<compile_context>
chip_gen: v7x
topology: tpu7x:2x2x1
jax: 0.10.0
libtpu: 0.0.40
codegen_flags: <defaults>
</compile_context>

<pallas_src>
import functools

import jax
import jax.numpy as jnp
from jax.experimental import pallas as pl
from jax.experimental.pallas import tpu as pltpu


# -----------------------------------------------------------------------------
# Single fused kernel for the whole implementable head.
#   img_out = image1_2d @ W1 + b1                      (g_W1, 512 -> 768)
#   sen_out = sentence_2d @ W2 + b2                    (g_W2, 768 -> 768)
#   eij     = tanh(sum_d u33 * w_att)                  (B, S)  — VPU + XLU
#   a       = exp(eij) / (sum_S exp(eij) + 1e-10)      exact reciprocal
#   u44     = sum_S a * u33                            (B, 768)
#   logits  = u44 @ Wc_pad + b_pad                     (B, 128) lane-dense
# Matmul operands bf16 (cast in-kernel / pre-cast weights), f32 accumulation;
# all tanh / exp / softmax math stays in f32 (v5e has no bf16 VPU/EUP).
# -----------------------------------------------------------------------------
def _fused_head_kernel(img_ref, w1_ref, b1_ref,
                       sen_ref, w2_ref, b2_ref,
                       u33_ref, watt_ref, wcls_ref, bcls_ref,
                       img_out_ref, sen_out_ref, logits_ref):
    # ---- g_W1: (B*P, 512) @ (512, 768) ----
    img_out_ref[...] = (
        jnp.dot(img_ref[...].astype(jnp.bfloat16), w1_ref[...],
                preferred_element_type=jnp.float32) + b1_ref[...]
    ).astype(img_out_ref.dtype)

    # ---- g_W2: (B*N, 768) @ (768, 768) ----
    sen_out_ref[...] = (
        jnp.dot(sen_ref[...].astype(jnp.bfloat16), w2_ref[...],
                preferred_element_type=jnp.float32) + b2_ref[...]
    ).astype(sen_out_ref.dtype)

    # ---- Attention(768, 5) pooling (f32), then classifier (bf16 MXU) ----
    x = u33_ref[...]                                            # (B, S, D) f32
    watt = watt_ref[...]                                        # (1, D)    f32
    eij = jnp.tanh(jnp.sum(x * watt, axis=-1, keepdims=True))   # (B, S, 1)
    a = jnp.exp(eij)                                            # tanh bounds eij
    a = a / (jnp.sum(a, axis=1, keepdims=True) + 1e-10)         # exact divide
    u44 = jnp.sum(a * x, axis=1)                                # (B, D) f32
    logits = jnp.dot(u44.astype(jnp.bfloat16), wcls_ref[...],
                     preferred_element_type=jnp.float32) + bcls_ref[...]
    logits_ref[...] = logits.astype(logits_ref.dtype)           # (B, LP)


def fused_head_pallas(kp, image1, sentence_pooled, u33):
    """One pallas_call computing g_W1, g_W2 and the attention+classifier head.

    image1:          (B, P, 512) f32
    sentence_pooled: (B, N, 768) f32
    u33:             (B, S, 768) f32
    Returns: logits_padded (B, 128), img_proj (B, P, 768), sent_feat (B, N, 768)
    """
    B, P, IMG = image1.shape
    Bs, Ns, H = sentence_pooled.shape
    _, S, _ = u33.shape
    LP = kp["cls_w_pad"].shape[1]

    img2d = image1.reshape(B * P, IMG)          # free inside jit (contiguous)
    sen2d = sentence_pooled.reshape(Bs * Ns, H)

    img_out, sen_out, logits = pl.pallas_call(
        _fused_head_kernel,
        out_shape=(
            jax.ShapeDtypeStruct((B * P, H), jnp.float32),
            jax.ShapeDtypeStruct((Bs * Ns, H), jnp.float32),
            jax.ShapeDtypeStruct((B, LP), jnp.float32),
        ),
        grid_spec=pltpu.PrefetchScalarGridSpec(
            num_scalar_prefetch=0,
            # One grid step: total work is tiny and launch-bound, so splitting
            # only adds pipeline boundaries (1 TC on v5e/v6e).  On v7x a 2-way
            # "parallel" split of the g_W2 rows could use both TensorCores,
            # but the fused single launch is the dominant win at these sizes.
            grid=(1,),
            in_specs=[
                pl.BlockSpec((B * P, IMG), lambda i: (0, 0)),
                pl.BlockSpec((IMG, H), lambda i: (0, 0)),
                pl.BlockSpec((1, H), lambda i: (0, 0)),
                pl.BlockSpec((Bs * Ns, H), lambda i: (0, 0)),
                pl.BlockSpec((H, H), lambda i: (0, 0)),
                pl.BlockSpec((1, H), lambda i: (0, 0)),
                pl.BlockSpec((B, S, H), lambda i: (0, 0, 0)),
                pl.BlockSpec((1, H), lambda i: (0, 0)),
                pl.BlockSpec((H, LP), lambda i: (0, 0)),
                pl.BlockSpec((1, LP), lambda i: (0, 0)),
            ],
            out_specs=[
                pl.BlockSpec((B * P, H), lambda i: (0, 0)),
                pl.BlockSpec((Bs * Ns, H), lambda i: (0, 0)),
                pl.BlockSpec((B, LP), lambda i: (0, 0)),
            ],
        ),
        # ~5 MiB of live tiles (x2 for buffering) — raise scoped VMEM above the
        # 16 MiB v5e default; still well under 32/64 MiB on v6e/v7x.
        compiler_params=pltpu.CompilerParams(
            dimension_semantics=("arbitrary",),
            vmem_limit_bytes=32 * 1024 * 1024),
    )(img2d, kp["g_w1"], kp["g_b1"],
      sen2d, kp["g_w2"], kp["g_b2"],
      u33, kp["att_w"], kp["cls_w_pad"], kp["cls_b_pad"])

    return logits, img_out.reshape(B, P, H), sen_out.reshape(Bs, Ns, H)


# -----------------------------------------------------------------------------
# Deterministic parameter construction (mirrors the __init__ shapes)
# -----------------------------------------------------------------------------
def init_params(key, num_labels, hidden=768, image_dim=512):
    ks = jax.random.split(key, 6)
    # Attention(768, 5).weight : (768, 1), kaiming-uniform-like init
    att_w = jax.random.uniform(ks[0], (hidden, 1), jnp.float32,
                               minval=-jnp.sqrt(6.0 / hidden),
                               maxval=jnp.sqrt(6.0 / hidden))
    # classifier Linear(768, num_labels): default PyTorch init ~ U(+-1/sqrt(in))
    bnd = 1.0 / jnp.sqrt(hidden)
    cls_w = jax.random.uniform(ks[1], (hidden, num_labels), jnp.float32,
                               minval=-bnd, maxval=bnd)   # stored (in, out)
    cls_b = jax.random.uniform(ks[2], (num_labels,), jnp.float32,
                               minval=-bnd, maxval=bnd)
    # g_W1 = Linear(512, 768): xavier-uniform weight, zero bias
    xav1 = jnp.sqrt(6.0 / (image_dim + hidden))
    g_w1 = jax.random.uniform(ks[3], (image_dim, hidden), jnp.float32,
                              minval=-xav1, maxval=xav1)
    g_b1 = jnp.zeros((hidden,), jnp.float32)
    # g_W2 = Linear(768, 768): xavier-uniform weight, zero bias
    xav2 = jnp.sqrt(6.0 / (hidden + hidden))
    g_w2 = jax.random.uniform(ks[4], (hidden, hidden), jnp.float32,
                              minval=-xav2, maxval=xav2)
    g_b2 = jnp.zeros((hidden,), jnp.float32)
    return dict(att_w=att_w, cls_w=cls_w, cls_b=cls_b,
                g_w1=g_w1, g_b1=g_b1, g_w2=g_w2, g_b2=g_b2)


def prepare_kernel_params(params, num_labels):
    """One-time, outside the hot path: pre-cast weights to bf16, lane-pad the
    classifier weight/bias to 128 lanes, reshape biases / w_att for the kernel."""
    H = params["g_w2"].shape[0]
    LP = 128 * max(1, -(-num_labels // 128))
    cls_w_pad = (jnp.zeros((H, LP), jnp.float32)
                 .at[:, :num_labels].set(params["cls_w"])
                 .astype(jnp.bfloat16))
    cls_b_pad = jnp.zeros((1, LP), jnp.float32).at[0, :num_labels].set(params["cls_b"])
    return dict(
        g_w1=params["g_w1"].astype(jnp.bfloat16),
        g_b1=params["g_b1"].reshape(1, -1).astype(jnp.float32),
        g_w2=params["g_w2"].astype(jnp.bfloat16),
        g_b2=params["g_b2"].reshape(1, -1).astype(jnp.float32),
        att_w=params["att_w"].reshape(1, -1).astype(jnp.float32),  # (1, 768)
        cls_w_pad=cls_w_pad,
        cls_b_pad=cls_b_pad,
    )


# -----------------------------------------------------------------------------
# Model head forward (the implementable part of ClassifyModel.forward)
# -----------------------------------------------------------------------------
@functools.partial(jax.jit, static_argnames=("num_labels",))
def classify_model_head(kparams, image1, sentence_pooled, u33, *, num_labels):
    """
    image1:          (4, P, 512)   raw image features  -> g_W1 projection
    sentence_pooled: (4, 100, 768) stand-in for the masked-max pooled sentence
                     features (the data-dependent pooling loop in
                     sentence_genaration is not translatable)  -> g_W2
    u33:             (4, 5, 768)   stand-in for the concatenated CLS slots of
                     the (missing) SectionOne/SentenceFour/Interaction outputs
    returns: logits (4, num_labels), img_proj, sent_feat
    """
    # TODO(synk): BertModel / Encoder2 / SectionOne / SentenceFour / Interaction
    # and the data-dependent sentence-mask pooling loop are external or
    # dynamically shaped and are not reproduced; their outputs are inputs here.
    logits_pad, img_proj, sent_feat = fused_head_pallas(
        kparams, image1, sentence_pooled, u33)
    return logits_pad[:, :num_labels], img_proj, sent_feat


if __name__ == "__main__":
    key = jax.random.PRNGKey(0)
    k_par, k_img, k_sen, k_u33 = jax.random.split(key, 4)

    NUM_LABELS = 54          # AAPD label count
    BATCH = 4                # matches the hard-coded batch of 4 in the module
    STEP = 5                 # Attention(768, 5)
    HIDDEN = 768
    IMG_DIM = 512
    IMG_PATCHES = 16
    N_SENT = 100

    params = init_params(k_par, NUM_LABELS, HIDDEN, IMG_DIM)
    kparams = prepare_kernel_params(params, NUM_LABELS)   # once, off hot path

    image1 = jax.random.normal(k_img, (BATCH, IMG_PATCHES, IMG_DIM), jnp.float32)
    sentence_pooled = jax.random.normal(k_sen, (BATCH, N_SENT, HIDDEN), jnp.float32)
    u33 = jax.random.normal(k_u33, (BATCH, STEP, HIDDEN), jnp.float32)

    logits, img_proj, sent_feat = classify_model_head(
        kparams, image1, sentence_pooled, u33, num_labels=NUM_LABELS)
    jax.block_until_ready((logits, img_proj, sent_feat))

    # --- correctness checks ---------------------------------------------------
    # Linear kernels vs. bf16-cast reference (same operand precision, f32 acc).
    ref_img = (jnp.dot(image1.reshape(-1, IMG_DIM).astype(jnp.bfloat16),
                       params["g_w1"].astype(jnp.bfloat16),
                       preferred_element_type=jnp.float32)
               + params["g_b1"]).reshape(BATCH, IMG_PATCHES, HIDDEN)
    ref_sen = (jnp.dot(sentence_pooled.reshape(-1, HIDDEN).astype(jnp.bfloat16),
                       params["g_w2"].astype(jnp.bfloat16),
                       preferred_element_type=jnp.float32)
               + params["g_b2"]).reshape(BATCH, N_SENT, HIDDEN)
    assert jnp.allclose(img_proj, ref_img, atol=1e-2, rtol=1e-2)
    assert jnp.allclose(sent_feat, ref_sen, atol=1e-2, rtol=1e-2)

    # Attention + classifier head vs. the unfused f32 reference.  Pooling is
    # exact f32 in-kernel; only the final classifier matmul uses bf16 operands,
    # so the tolerance is tightened to 2e-2 (was 5e-2 with approx reciprocal).
    eij = jnp.tanh(jnp.einsum("bsd,do->bso", u33, params["att_w"])[..., 0])
    a = jnp.exp(eij)
    a = a / (jnp.sum(a, axis=1, keepdims=True) + 1e-10)
    u44 = jnp.sum(u33 * a[..., None], axis=1)
    ref_logits = u44 @ params["cls_w"] + params["cls_b"]
    assert logits.shape == (BATCH, NUM_LABELS)
    assert jnp.allclose(logits, ref_logits, atol=2e-2, rtol=2e-2)

    print("KERNEL_OK")
</pallas_src>

<mosaic_0001>
module attributes {stable_mosaic.version = 11 : i64} {
  func.func @_fused_head_kernel(%arg0: i32, %arg1: memref<64x512xf32, #tpu.memory_space<vmem>>, %arg2: memref<512x768xbf16, #tpu.memory_space<vmem>>, %arg3: memref<1x768xf32, #tpu.memory_space<vmem>>, %arg4: memref<400x768xf32, #tpu.memory_space<vmem>>, %arg5: memref<768x768xbf16, #tpu.memory_space<vmem>>, %arg6: memref<1x768xf32, #tpu.memory_space<vmem>>, %arg7: memref<4x5x768xf32, #tpu.memory_space<vmem>>, %arg8: memref<1x768xf32, #tpu.memory_space<vmem>>, %arg9: memref<768x128xbf16, #tpu.memory_space<vmem>>, %arg10: memref<1x128xf32, #tpu.memory_space<vmem>>, %arg11: memref<64x768xf32, #tpu.memory_space<vmem>>, %arg12: memref<400x768xf32, #tpu.memory_space<vmem>>, %arg13: memref<4x128xf32, #tpu.memory_space<vmem>>) attributes {dimension_semantics = [#tpu.dimension_semantics<arbitrary>], iteration_bounds = array<i64: 1>, scalar_prefetch = 0 : i64, scratch_operands = 0 : i64, tpu.core_type = #tpu.core_type<tc>, window_params = [{pipeline_mode = #tpu.pipeline_mode<synchronous>, transform_indices = @transform_0, window_bounds = array<i64: 64, 512>}, {pipeline_mode = #tpu.pipeline_mode<synchronous>, transform_indices = @transform_1, window_bounds = array<i64: 512, 768>}, {pipeline_mode = #tpu.pipeline_mode<synchronous>, transform_indices = @transform_2, window_bounds = array<i64: 1, 768>}, {pipeline_mode = #tpu.pipeline_mode<synchronous>, transform_indices = @transform_3, window_bounds = array<i64: 400, 768>}, {pipeline_mode = #tpu.pipeline_mode<synchronous>, transform_indices = @transform_4, window_bounds = array<i64: 768, 768>}, {pipeline_mode = #tpu.pipeline_mode<synchronous>, transform_indices = @transform_5, window_bounds = array<i64: 1, 768>}, {pipeline_mode = #tpu.pipeline_mode<synchronous>, transform_indices = @transform_6, window_bounds = array<i64: 4, 5, 768>}, {pipeline_mode = #tpu.pipeline_mode<synchronous>, transform_indices = @transform_7, window_bounds = array<i64: 1, 768>}, {pipeline_mode = #tpu.pipeline_mode<synchronous>, transform_indices = @transform_8, window_bounds = array<i64: 768, 128>}, {pipeline_mode = #tpu.pipeline_mode<synchronous>, transform_indices = @transform_9, window_bounds = array<i64: 1, 128>}, {pipeline_mode = #tpu.pipeline_mode<synchronous>, transform_indices = @transform_10, window_bounds = array<i64: 64, 768>}, {pipeline_mode = #tpu.pipeline_mode<synchronous>, transform_indices = @transform_11, window_bounds = array<i64: 400, 768>}, {pipeline_mode = #tpu.pipeline_mode<synchronous>, transform_indices = @transform_12, window_bounds = array<i64: 4, 128>}]} {
    %c0 = arith.constant 0 : index
    %c0_0 = arith.constant 0 : index
    %0 = vector.load %arg1[%c0, %c0_0] : memref<64x512xf32, #tpu.memory_space<vmem>>, vector<64x512xf32>
    %1 = arith.truncf %0 : vector<64x512xf32> to vector<64x512xbf16>
    %c0_1 = arith.constant 0 : index
    %c0_2 = arith.constant 0 : index
    %2 = vector.load %arg2[%c0_1, %c0_2] : memref<512x768xbf16, #tpu.memory_space<vmem>>, vector<512x768xbf16>
    %cst = arith.constant dense<0.000000e+00> : vector<64x768xf32>
    %3 = tpu.matmul %1, %2, %cst {dimension_numbers = #tpu.dot_dimension_numbers<[1], [0], [0], [1], [0, 0, 1, 1], [], []>} : vector<64x512xbf16>, vector<512x768xbf16>, vector<64x768xf32> -> vector<64x768xf32>
    %c0_3 = arith.constant 0 : index
    %c0_4 = arith.constant 0 : index
    %4 = vector.load %arg3[%c0_3, %c0_4] : memref<1x768xf32, #tpu.memory_space<vmem>>, vector<1x768xf32>
    %5 = vector.broadcast %4 : vector<1x768xf32> to vector<64x768xf32>
    %6 = arith.addf %3, %5 : vector<64x768xf32>
    %c0_5 = arith.constant 0 : index
    %c0_6 = arith.constant 0 : index
    %7 = vector.load %arg11[%c0_5, %c0_6] : memref<64x768xf32, #tpu.memory_space<vmem>>, vector<64x768xf32>
    tpu.vector_store %arg11[%c0_5, %c0_6], %6 {strides = array<i32>} : memref<64x768xf32, #tpu.memory_space<vmem>>, vector<64x768xf32>,
    %c0_7 = arith.constant 0 : index
    %c0_8 = arith.constant 0 : index
    %8 = vector.load %arg4[%c0_7, %c0_8] : memref<400x768xf32, #tpu.memory_space<vmem>>, vector<400x768xf32>
    %9 = arith.truncf %8 : vector<400x768xf32> to vector<400x768xbf16>
    %c0_9 = arith.constant 0 : index
    %c0_10 = arith.constant 0 : index
    %10 = vector.load %arg5[%c0_9, %c0_10] : memref<768x768xbf16, #tpu.memory_space<vmem>>, vector<768x768xbf16>
    %cst_11 = arith.constant dense<0.000000e+00> : vector<400x768xf32>
    %11 = tpu.matmul %9, %10, %cst_11 {dimension_numbers = #tpu.dot_dimension_numbers<[1], [0], [0], [1], [0, 0, 1, 1], [], []>} : vector<400x768xbf16>, vector<768x768xbf16>, vector<400x768xf32> -> vector<400x768xf32>
    %c0_12 = arith.constant 0 : index
    %c0_13 = arith.constant 0 : index
    %12 = vector.load %arg6[%c0_12, %c0_13] : memref<1x768xf32, #tpu.memory_space<vmem>>, vector<1x768xf32>
    %13 = vector.broadcast %12 : vector<1x768xf32> to vector<400x768xf32>
    %14 = arith.addf %11, %13 : vector<400x768xf32>
    %c0_14 = arith.constant 0 : index
    %c0_15 = arith.constant 0 : index
    %15 = vector.load %arg12[%c0_14, %c0_15] : memref<400x768xf32, #tpu.memory_space<vmem>>, vector<400x768xf32>
    tpu.vector_store %arg12[%c0_14, %c0_15], %14 {strides = array<i32>} : memref<400x768xf32, #tpu.memory_space<vmem>>, vector<400x768xf32>,
    %c0_16 = arith.constant 0 : index
    %c0_17 = arith.constant 0 : index
    %c0_18 = arith.constant 0 : index
    %16 = vector.load %arg7[%c0_16, %c0_17, %c0_18] : memref<4x5x768xf32, #tpu.memory_space<vmem>>, vector<4x5x768xf32>
    %c0_19 = arith.constant 0 : index
    %c0_20 = arith.constant 0 : index
    %17 = vector.load %arg8[%c0_19, %c0_20] : memref<1x768xf32, #tpu.memory_space<vmem>>, vector<1x768xf32>
    %18 = vector.shape_cast %17 : vector<1x768xf32> to vector<1x1x768xf32>
    %19 = vector.broadcast %18 : vector<1x1x768xf32> to vector<4x5x768xf32>
    %20 = arith.mulf %16, %19 : vector<4x5x768xf32>
    %cst_21 = arith.constant dense<0.000000e+00> : vector<4x5xf32>
    %21 = vector.multi_reduction <add>, %20, %cst_21 [2] : vector<4x5x768xf32> to vector<4x5xf32>
    %22 = vector.shape_cast %21 : vector<4x5xf32> to vector<4x5x1xf32>
    %23 = math.tanh %22 : vector<4x5x1xf32>
    %24 = math.exp %23 : vector<4x5x1xf32>
    %cst_22 = arith.constant dense<0.000000e+00> : vector<4x1xf32>
    %25 = vector.multi_reduction <add>, %24, %cst_22 [1] : vector<4x5x1xf32> to vector<4x1xf32>
    %26 = vector.shape_cast %25 : vector<4x1xf32> to vector<4x1x1xf32>
    %cst_23 = arith.constant 1.000000e-10 : f32
    %27 = vector.broadcast %cst_23 : f32 to vector<4x1x1xf32>
    %28 = arith.addf %26, %27 : vector<4x1x1xf32>
    %29 = vector.broadcast %28 : vector<4x1x1xf32> to vector<4x5x1xf32>
    %30 = arith.divf %24, %29 : vector<4x5x1xf32>
    %31 = vector.broadcast %30 : vector<4x5x1xf32> to vector<4x5x768xf32>
    %32 = arith.mulf %31, %16 : vector<4x5x768xf32>
    %cst_24 = arith.constant dense<0.000000e+00> : vector<4x768xf32>
    %33 = vector.multi_reduction <add>, %32, %cst_24 [1] : vector<4x5x768xf32> to vector<4x768xf32>
    %34 = arith.truncf %33 : vector<4x768xf32> to vector<4x768xbf16>
    %c0_25 = arith.constant 0 : index
    %c0_26 = arith.constant 0 : index
    %35 = vector.load %arg9[%c0_25, %c0_26] : memref<768x128xbf16, #tpu.memory_space<vmem>>, vector<768x128xbf16>
    %cst_27 = arith.constant dense<0.000000e+00> : vector<4x128xf32>
    %36 = tpu.matmul %34, %35, %cst_27 {dimension_numbers = #tpu.dot_dimension_numbers<[1], [0], [0], [1], [0, 0, 1, 1], [], []>} : vector<4x768xbf16>, vector<768x128xbf16>, vector<4x128xf32> -> vector<4x128xf32>
    %c0_28 = arith.constant 0 : index
    %c0_29 = arith.constant 0 : index
    %37 = vector.load %arg10[%c0_28, %c0_29] : memref<1x128xf32, #tpu.memory_space<vmem>>, vector<1x128xf32>
    %38 = vector.broadcast %37 : vector<1x128xf32> to vector<4x128xf32>
    %39 = arith.addf %36, %38 : vector<4x128xf32>
    %c0_30 = arith.constant 0 : index
    %c0_31 = arith.constant 0 : index
    %40 = vector.load %arg13[%c0_30, %c0_31] : memref<4x128xf32, #tpu.memory_space<vmem>>, vector<4x128xf32>
    tpu.vector_store %arg13[%c0_30, %c0_31], %39 {strides = array<i32>} : memref<4x128xf32, #tpu.memory_space<vmem>>, vector<4x128xf32>,
    return
  }
  func.func @transform_0(%arg0: i32) -> (i32, i32) {
    %c0_i32 = arith.constant 0 : i32
    %c0_i32_0 = arith.constant 0 : i32
    %c0_i32_1 = arith.constant 0 : i32
    return %c0_i32, %c0_i32_0 : i32, i32
  }
  func.func @transform_1(%arg0: i32) -> (i32, i32) {
    %c0_i32 = arith.constant 0 : i32
    %c0_i32_0 = arith.constant 0 : i32
    %c0_i32_1 = arith.constant 0 : i32
    return %c0_i32, %c0_i32_0 : i32, i32
  }
  func.func @transform_2(%arg0: i32) -> (i32, i32) {
    %c0_i32 = arith.constant 0 : i32
    %c0_i32_0 = arith.constant 0 : i32
    %c0_i32_1 = arith.constant 0 : i32
    return %c0_i32, %c0_i32_0 : i32, i32
  }
  func.func @transform_3(%arg0: i32) -> (i32, i32) {
    %c0_i32 = arith.constant 0 : i32
    %c0_i32_0 = arith.constant 0 : i32
    %c0_i32_1 = arith.constant 0 : i32
    return %c0_i32, %c0_i32_0 : i32, i32
  }
  func.func @transform_4(%arg0: i32) -> (i32, i32) {
    %c0_i32 = arith.constant 0 : i32
    %c0_i32_0 = arith.constant 0 : i32
    %c0_i32_1 = arith.constant 0 : i32
    return %c0_i32, %c0_i32_0 : i32, i32
  }
  func.func @transform_5(%arg0: i32) -> (i32, i32) {
    %c0_i32 = arith.constant 0 : i32
    %c0_i32_0 = arith.constant 0 : i32
    %c0_i32_1 = arith.constant 0 : i32
    return %c0_i32, %c0_i32_0 : i32, i32
  }
  func.func @transform_6(%arg0: i32) -> (i32, i32, i32) {
    %c0_i32 = arith.constant 0 : i32
    %c0_i32_0 = arith.constant 0 : i32
    %c0_i32_1 = arith.constant 0 : i32
    %c0_i32_2 = arith.constant 0 : i32
    return %c0_i32, %c0_i32_0, %c0_i32_1 : i32, i32, i32
  }
  func.func @transform_7(%arg0: i32) -> (i32, i32) {
    %c0_i32 = arith.constant 0 : i32
    %c0_i32_0 = arith.constant 0 : i32
    %c0_i32_1 = arith.constant 0 : i32
    return %c0_i32, %c0_i32_0 : i32, i32
  }
  func.func @transform_8(%arg0: i32) -> (i32, i32) {
    %c0_i32 = arith.constant 0 : i32
    %c0_i32_0 = arith.constant 0 : i32
    %c0_i32_1 = arith.constant 0 : i32
    return %c0_i32, %c0_i32_0 : i32, i32
  }
  func.func @transform_9(%arg0: i32) -> (i32, i32) {
    %c0_i32 = arith.constant 0 : i32
    %c0_i32_0 = arith.constant 0 : i32
    %c0_i32_1 = arith.constant 0 : i32
    return %c0_i32, %c0_i32_0 : i32, i32
  }
  func.func @transform_10(%arg0: i32) -> (i32, i32) {
    %c0_i32 = arith.constant 0 : i32
    %c0_i32_0 = arith.constant 0 : i32
    %c0_i32_1 = arith.constant 0 : i32
    return %c0_i32, %c0_i32_0 : i32, i32
  }
  func.func @transform_11(%arg0: i32) -> (i32, i32) {
    %c0_i32 = arith.constant 0 : i32
    %c0_i32_0 = arith.constant 0 : i32
    %c0_i32_1 = arith.constant 0 : i32
    return %c0_i32, %c0_i32_0 : i32, i32
  }
  func.func @transform_12(%arg0: i32) -> (i32, i32) {
    %c0_i32 = arith.constant 0 : i32
    %c0_i32_0 = arith.constant 0 : i32
    %c0_i32_1 = arith.constant 0 : i32
    return %c0_i32, %c0_i32_0 : i32, i32
  }
}

</mosaic_0001>

<bundles_post_ra>
// kernel: classify_model_head.1
= control target key start
LH: loop header
LB: loop body
LE: loop exit
PB: predicated region body
PF: predicated region fallthrough
CT: control target
= control target key end

     0   :  { %18 = vsyncpa [#allocation3], 0  ;;  %s15773_s0 = inlined_call_operand.vmem [shape: f32[64,512], index: 0, kind: input, shape index: {}]   ;;  %s15774_s1 = inlined_call_operand.vmem [shape: bf16[512,768], index: 1, kind: input, shape index: {}]   ;;  %s15775_s2 = inlined_call_operand.vmem [shape: f32[1,768], index: 2, kind: input, shape index: {}]   ;;  %s15776_s3 = inlined_call_operand.vmem [shape: f32[400,768], index: 3, kind: input, shape index: {}]   ;;  %s15777_s4 = inlined_call_operand.vmem [shape: bf16[768,768], index: 4, kind: input, shape index: {}]   ;;  %s15778_s5 = inlined_call_operand.vmem [shape: f32[1,768], index: 5, kind: input, shape index: {}]   ;;  %s15779_s6 = inlined_call_operand.vmem [shape: f32[4,5,768], index: 6, kind: input, shape index: {}]   ;;  %s15780_s7 = inlined_call_operand.vmem [shape: f32[1,768], index: 7, kind: input, shape index: {}]   ;;  %s15781_s8 = inlined_call_operand.vmem [shape: bf16[768,128], index: 8, kind: input, shape index: {}]   ;;  %s15782_s9 = inlined_call_operand.vmem [shape: f32[1,128], index: 9, kind: input, shape index: {}]   ;;  %s15783_s10 = inlined_call_operand.hbm [shape: f32[64,768], index: 10, kind: output, shape index: {0}]   ;;  %s15784_s11 = inlined_call_operand.vmem [shape: f32[400,768], index: 11, kind: output, shape index: {1}]   ;;  %s15785_s12 = inlined_call_operand.hbm [shape: f32[4,128], index: 12, kind: output, shape index: {2}]  }
   0x1   :  { %v9439_v0 = vld [vmem:[%s15774_s1 + $0x4] ss:$24 sps:$4 sm:$0xff]   ;;  %v9443_v2 = vld [vmem:[%s15774_s1] ss:$24 sps:$4 sm:$0xff]   ;;  %v9445_v4 = vld [vmem:[%s15774_s1 + $0x34] ss:$24 sps:$4 sm:$0xff]  }
   0x2   :  { %v9441_v1 = vld [vmem:[%s15774_s1 + $0xc] ss:$24 sps:$4 sm:$0xff]   ;;  %1273 = vmatprep.subr.bf16.mxu0 %v9439_v0  ;;  %v9444_v3 = vld [vmem:[%s15774_s1 + $0x8] ss:$24 sps:$4 sm:$0xff]   ;;  %v9447_v5 = vld [vmem:[%s15774_s1 + $0x3c] ss:$24 sps:$4 sm:$0xff]  }
   0x3   :  { %1419 = vmatprep.subr.bf16.mxu1 %v9441_v1  ;;  %1274 = vmatpush1.bf16.msra.mxu0 %v9443_v2  ;;  %v9449_v6 = vld [vmem:[%s15774_s1 + $0x30] ss:$24 sps:$4 sm:$0xff]   ;;  %v9451_v8 = vld [vmem:[%s15774_s1 + $0x64] ss:$24 sps:$4 sm:$0xff]   ;;  %v9455_v10 = vld [vmem:[%s15774_s1 + $0x60] ss:$24 sps:$4 sm:$0xff]  }
   0x4   :  { %1420 = vmatpush1.bf16.msra.mxu1 %v9444_v3  ;;  %1275 = vmatprep.subr.bf16.mxu0 %v9445_v4  ;;  %v9450_v7 = vld [vmem:[%s15774_s1 + $0x38] ss:$24 sps:$4 sm:$0xff]   ;;  %v9453_v9 = vld [vmem:[%s15774_s1 + $0x6c] ss:$24 sps:$4 sm:$0xff]   ;;  %v9456_v11 = vld [vmem:[%s15774_s1 + $0x68] ss:$24 sps:$4 sm:$0xff]  }
   0x5   :  { %1421 = vmatprep.subr.bf16.mxu1 %v9447_v5  ;;  %v9457_v12 = vld [vmem:[%s15774_s1 + $0x94] ss:$24 sps:$4 sm:$0xff]   ;;  %v9461_v14 = vld [vmem:[%s15774_s1 + $0x90] ss:$24 sps:$4 sm:$0xff]   ;;  %v9463_v16 = vld [vmem:[%s15774_s1 + $0xc4] ss:$24 sps:$4 sm:$0xff]  }
   0x6   :  { %v9459_v13 = vld [vmem:[%s15774_s1 + $0x9c] ss:$24 sps:$4 sm:$0xff]   ;;  %v9462_v15 = vld [vmem:[%s15774_s1 + $0x98] ss:$24 sps:$4 sm:$0xff]   ;;  %v9465_v17 = vld [vmem:[%s15774_s1 + $0xcc] ss:$24 sps:$4 sm:$0xff]  }
   0x7   :  { %1276 = vmatpush1.bf16.msra.mxu0 %v9449_v6  ;;  %v9467_v18 = vld [vmem:[%s15774_s1 + $0xc0] ss:$24 sps:$4 sm:$0xff]   ;;  %v9469_v20 = vld [vmem:[%s15774_s1 + $0xf4] ss:$24 sps:$4 sm:$0xff]   ;;  %v9473_v22 = vld [vmem:[%s15774_s1 + $0xf0] ss:$24 sps:$4 sm:$0xff]  }
   0x8   :  { %1422 = vmatpush1.bf16.msra.mxu1 %v9450_v7  ;;  %1277 = vmatprep.subr.bf16.mxu0 %v9451_v8  ;;  %v9468_v19 = vld [vmem:[%s15774_s1 + $0xc8] ss:$24 sps:$4 sm:$0xff]   ;;  %v9471_v21 = vld [vmem:[%s15774_s1 + $0xfc] ss:$24 sps:$4 sm:$0xff]   ;;  %v9474_v23 = vld [vmem:[%s15774_s1 + $0xf8] ss:$24 sps:$4 sm:$0xff]  }
   0x9   :  { %1423 = vmatprep.subr.bf16.mxu1 %v9453_v9  ;;  %v9475_v24 = vld [vmem:[%s15774_s1 + $0x124] ss:$24 sps:$4 sm:$0xff]   ;;  %v9479_v26 = vld [vmem:[%s15774_s1 + $0x120] ss:$24 sps:$4 sm:$0xff]   ;;  %v9481_v28 = vld [vmem:[%s15774_s1 + $0x154] ss:$24 sps:$4 sm:$0xff]  }
   0xa   :  { %v9477_v25 = vld [vmem:[%s15774_s1 + $0x12c] ss:$24 sps:$4 sm:$0xff]   ;;  %v9480_v27 = vld [vmem:[%s15774_s1 + $0x128] ss:$24 sps:$4 sm:$0xff]   ;;  %v9483_v29 = vld [vmem:[%s15774_s1 + $0x15c] ss:$24 sps:$4 sm:$0xff]  }
   0xb   :  { %1278 = vmatpush1.bf16.msra.mxu0 %v9455_v10  ;;  %v9485_v30 = vld [vmem:[%s15774_s1 + $0x150] ss:$24 sps:$4 sm:$0xff]   ;;  %v9487_v32 = vld [vmem:[%s15774_s1 + $0x184] ss:$24 sps:$4 sm:$0xff]   ;;  %v9491_v34 = vld [vmem:[%s15774_s1 + $0x180] ss:$24 sps:$4 sm:$0xff]  }
   0xc   :  { %1424 = vmatpush1.bf16.msra.mxu1 %v9456_v11  ;;  %1279 = vmatprep.subr.bf16.mxu0 %v9457_v12  ;;  %v9486_v31 = vld [vmem:[%s15774_s1 + $0x158] ss:$24 sps:$4 sm:$0xff]   ;;  %v9489_v33 = vld [vmem:[%s15774_s1 + $0x18c] ss:$24 sps:$4 sm:$0xff]   ;;  %v9492_v35 = vld [vmem:[%s15774_s1 + $0x188] ss:$24 sps:$4 sm:$0xff]  }
   0xd   :  { %1425 = vmatprep.subr.bf16.mxu1 %v9459_v13  ;;  %v9493_v36 = vld [vmem:[%s15774_s1 + $0x1b4] ss:$24 sps:$4 sm:$0xff]   ;;  %v9497_v38 = vld [vmem:[%s15774_s1 + $0x1b0] ss:$24 sps:$4 sm:$0xff]   ;;  %v9499_v40 = vld [vmem:[%s15774_s1 + $0x1e4] ss:$24 sps:$4 sm:$0xff]  }
   0xe   :  { %v9495_v37 = vld [vmem:[%s15774_s1 + $0x1bc] ss:$24 sps:$4 sm:$0xff]   ;;  %v9498_v39 = vld [vmem:[%s15774_s1 + $0x1b8] ss:$24 sps:$4 sm:$0xff]   ;;  %v9501_v41 = vld [vmem:[%s15774_s1 + $0x1ec] ss:$24 sps:$4 sm:$0xff]  }
   0xf   :  { %1280 = vmatpush1.bf16.msra.mxu0 %v9461_v14  ;;  %v9503_v42 = vld [vmem:[%s15774_s1 + $0x1e0] ss:$24 sps:$4 sm:$0xff]   ;;  %v9505_v44 = vld [vmem:[%s15774_s1 + $0x214] ss:$24 sps:$4 sm:$0xff]   ;;  %v9509_v48 = vld [vmem:[%s15774_s1 + $0x210] ss:$24 sps:$4 sm:$0xff]  }
  0x10   :  { %1426 = vmatpush1.bf16.msra.mxu1 %v9462_v15  ;;  %1281 = vmatprep.subr.bf16.mxu0 %v9463_v16  ;;  %v9504_v43 = vld [vmem:[%s15774_s1 + $0x1e8] ss:$24 sps:$4 sm:$0xff]   ;;  %v9507_v45 = vld [vmem:[%s15774_s1 + $0x21c] ss:$24 sps:$4 sm:$0xff]   ;;  %v9510_v49 = vld [vmem:[%s15774_s1 + $0x218] ss:$24 sps:$4 sm:$0xff]  }
  0x11   :  { %1427 = vmatprep.subr.bf16.mxu1 %v9465_v17  ;;  %v42_v46 = vld [vmem:[%s15773_s0 + $0x8] sm:$0xff]  ;;  %v9511_v51 = vld [vmem:[%s15774_s1 + $0x244] ss:$24 sps:$4 sm:$0xff]   ;;  %v9515_v53 = vld [vmem:[%s15774_s1 + $0x240] ss:$24 sps:$4 sm:$0xff]  }
  0x12   :  { %v46_v47 = vld [vmem:[%s15773_s0 + $0x28] sm:$0xff]  ;;  %v9519_v56 = vld [vmem:[%s15774_s1 + $0x27c] ss:$24 sps:$4 sm:$0xff]   ;;  %v9522_v58 = vld [vmem:[%s15774_s1 + $0x278] ss:$24 sps:$4 sm:$0xff]  }
  0x13   :  { %1282 = vmatpush1.bf16.msra.mxu0 %v9467_v18  ;;  %v10523_v50 = vpack.c.bf16 %v46_v47, %v42_v46  ;;  %v9513_v52 = vld [vmem:[%s15774_s1 + $0x24c] ss:$24 sps:$4 sm:$0xff]   ;;  %v9516_v54 = vld [vmem:[%s15774_s1 + $0x248] ss:$24 sps:$4 sm:$0xff]   ;;  %v9531_v0 = vld [vmem:[%s15774_s1 + $0x2dc] ss:$24 sps:$4 sm:$0xff]  }
  0x14   :  { %1428 = vmatpush1.bf16.msra.mxu1 %v9468_v19  ;;  %1283 = vmatprep.subr.bf16.mxu0 %v9469_v20  ;;  %v9517_v55 = vld [vmem:[%s15774_s1 + $0x274] ss:$24 sps:$4 sm:$0xff]   ;;  %v9521_v57 = vld [vmem:[%s15774_s1 + $0x270] ss:$24 sps:$4 sm:$0xff]   ;;  %v9523_v59 = vld [vmem:[%s15774_s1 + $0x2a4] ss:$24 sps:$4 sm:$0xff]  }
  0x15   :  { %1429 = vmatprep.subr.bf16.mxu1 %v9471_v21  ;;  %1305 = vmatprep.mubr.bf16.mxu0 %v10523_v50  ;;  %v9525_v60 = vld [vmem:[%s15774_s1 + $0x2ac] ss:$24 sps:$4 sm:$0xff]   ;;  %v9527_v61 = vld [vmem:[%s15774_s1 + $0x2a0] ss:$24 sps:$4 sm:$0xff]   ;;  %v9533_v1 = vld [vmem:[%s15774_s1 + $0x2d0] ss:$24 sps:$4 sm:$0xff]  }
  0x16   :  { %1451 = vmatprep.mubr.bf16.mxu1 %v10523_v50  ;;  %v9528_v62 = vld [vmem:[%s15774_s1 + $0x2a8] ss:$24 sps:$4 sm:$0xff]   ;;  %v9529_v63 = vld [vmem:[%s15774_s1 + $0x2d4] ss:$24 sps:$4 sm:$0xff]   ;;  %v9534_v2 = vld [vmem:[%s15774_s1 + $0x2d8] ss:$24 sps:$4 sm:$0xff]  }
  0x17   :  { %1284 = vmatpush1.bf16.msra.mxu0 %v9473_v22  ;;  %v9537_v3 = vld [vmem:[%s15774_s1 + $0x304] ss:$24 sps:$4 sm:$0xff]   ;;  %v9535_v7 = vld [vmem:[%s15774_s1 + $0x300] ss:$24 sps:$4 sm:$0xff]   ;;  %v9543_v10 = vld [vmem:[%s15774_s1 + $0x334] ss:$24 sps:$4 sm:$0xff]  }
  0x18   :  { %1430 = vmatpush1.bf16.msra.mxu1 %v9474_v23  ;;  %1285 = vmatprep.subr.bf16.mxu0 %v9475_v24  ;;  %v41_v4 = vld [vmem:[%s15773_s0] sm:$0xff]  ;;  %v9546_v11 = vld [vmem:[%s15774_s1 + $0x33c] ss:$24 sps:$4 sm:$0xff]   ;;  %v9541_v12 = vld [vmem:[%s15774_s1 + $0x330] ss:$24 sps:$4 sm:$0xff]  }
  0x19   :  { %1431 = vmatprep.subr.bf16.mxu1 %v9477_v25  ;;  %v45_v5 = vld [vmem:[%s15773_s0 + $0x20] sm:$0xff]  ;;  %v9544_v13 = vld [vmem:[%s15774_s1 + $0x338] ss:$24 sps:$4 sm:$0xff]   ;;  %v50_v18 = vld [vmem:[%s15773_s0 + $0x48] sm:$0xff] }
  0x1a   :  { %v9540_v6 = vld [vmem:[%s15774_s1 + $0x30c] ss:$24 sps:$4 sm:$0xff]   ;;  %v9538_v8 = vld [vmem:[%s15774_s1 + $0x308] ss:$24 sps:$4 sm:$0xff]   ;;  %v10593_v9 = vpack.c.bf16 %v45_v5, %v41_v4  ;;  %v9558_v25 = vld [vmem:[%s15774_s1 + $0x39c] ss:$24 sps:$4 sm:$0xff]  }
  0x1b   :  { %1286 = vmatpush1.bf16.msra.mxu0 %v9479_v26  ;;  %v9549_v14 = vld [vmem:[%s15774_s1 + $0x364] ss:$24 sps:$4 sm:$0xff]   ;;  %v9547_v16 = vld [vmem:[%s15774_s1 + $0x360] ss:$24 sps:$4 sm:$0xff]   ;;  %v54_v19 = vld [vmem:[%s15773_s0 + $0x68] sm:$0xff] }
  0x1c   :  { %1432 = vmatpush1.bf16.msra.mxu1 %v9480_v27  ;;  %1287 = vmatprep.subr.bf16.mxu0 %v9481_v28  ;;  %v9552_v15 = vld [vmem:[%s15774_s1 + $0x36c] ss:$24 sps:$4 sm:$0xff]   ;;  %v9550_v17 = vld [vmem:[%s15774_s1 + $0x368] ss:$24 sps:$4 sm:$0xff]   ;;  %v10636_v23 = vpack.c.bf16 %v54_v19, %v50_v18  ;;  %v9556_v27 = vld [vmem:[%s15774_s1 + $0x398] ss:$24 sps:$4 sm:$0xff]  }
  0x1d   :  { %1433 = vmatprep.subr.bf16.mxu1 %v9483_v29  ;;  %v49_v20 = vld [vmem:[%s15773_s0 + $0x40] sm:$0xff]  ;;  %v9555_v22 = vld [vmem:[%s15774_s1 + $0x394] ss:$24 sps:$4 sm:$0xff]   ;;  %v9553_v26 = vld [vmem:[%s15774_s1 + $0x390] ss:$24 sps:$4 sm:$0xff]  }
  0x1e   :  { %v53_v21 = vld [vmem:[%s15773_s0 + $0x60] sm:$0xff]  ;;  %v9618_v18 = vld [vmem:[%s15774_s1 + $0x57c] ss:$24 sps:$4 sm:$0xff]   ;;  %v9613_v19 = vld [vmem:[%s15774_s1 + $0x570] ss:$24 sps:$4 sm:$0xff]  }
  0x1f   :  { %1288 = vmatpush1.bf16.msra.mxu0 %v9485_v30  ;;  %v10638_v24 = vpack.c.bf16 %v53_v21, %v49_v20  ;;  %v9561_v28 = vld [vmem:[%s15774_s1 + $0x3c4] ss:$24 sps:$4 sm:$0xff]   ;;  %v58_v30 = vld [vmem:[%s15773_s0 + $0x88] sm:$0xff]  ;;  %v9616_v20 = vld [vmem:[%s15774_s1 + $0x578] ss:$24 sps:$4 sm:$0xff]  }
  0x20   :  { %1434 = vmatpush1.bf16.msra.mxu1 %v9486_v31  ;;  %1289 = vmatprep.subr.bf16.mxu0 %v9487_v32  ;;  %v9564_v29 = vld [vmem:[%s15774_s1 + $0x3cc] ss:$24 sps:$4 sm:$0xff]  }
  0x21   :  { %1435 = vmatprep.subr.bf16.mxu1 %v9489_v33  ;;  %v62_v31 = vld [vmem:[%s15773_s0 + $0xa8] sm:$0xff]  ;;  %v57_v33 = vld [vmem:[%s15773_s0 + $0x80] sm:$0xff] }
  0x22   :  { %v10665_v32 = vpack.c.bf16 %v62_v31, %v58_v30  ;;  %v65_v46 = vld [vmem:[%s15773_s0 + $0xc0] sm:$0xff]  ;;  %v9628_v30 = vld [vmem:[%s15774_s1 + $0x5d8] ss:$24 sps:$4 sm:$0xff]  }
  0x23   :  { %1290 = vmatpush1.bf16.msra.mxu0 %v9491_v34  ;;  %v61_v34 = vld [vmem:[%s15773_s0 + $0xa0] sm:$0xff]  ;;  %v43_v31 = vld [vmem:[%s15773_s0 + $0x10] sm:$0xff] }
  0x24   :  { %1436 = vmatpush1.bf16.msra.mxu1 %v9492_v35  ;;  %1291 = vmatprep.subr.bf16.mxu0 %v9493_v36  ;;  %v9559_v35 = vld [vmem:[%s15774_s1 + $0x3c0] ss:$24 sps:$4 sm:$0xff]   ;;  %v9597_v4 = vld [vmem:[%s15774_s1 + $0x4e4] ss:$24 sps:$4 sm:$0xff]  }
  0x25   :  { %1437 = vmatprep.subr.bf16.mxu1 %v9495_v37  ;;  %v9562_v36 = vld [vmem:[%s15774_s1 + $0x3c8] ss:$24 sps:$4 sm:$0xff]   ;;  %v10679_v37 = vpack.c.bf16 %v61_v34, %v57_v33  ;;  %v9600_v5 = vld [vmem:[%s15774_s1 + $0x4ec] ss:$24 sps:$4 sm:$0xff]   ;;  %v47_v33 = vld [vmem:[%s15773_s0 + $0x30] sm:$0xff] }
  0x26   :  { %v9621_v21 = vld [vmem:[%s15774_s1 + $0x5a4] ss:$24 sps:$4 sm:$0xff]   ;;  %v9633_v34 = vld [vmem:[%s15774_s1 + $0x14] ss:$24 sps:$4 sm:$0xff]  }
  0x27   :  { %1292 = vmatpush1.bf16.msra.mxu0 %v9497_v38  ;;  %v9567_v38 = vld [vmem:[%s15774_s1 + $0x3f4] ss:$24 sps:$4 sm:$0xff]  }
  0x28   :  { %1438 = vmatpush1.bf16.msra.mxu1 %v9498_v39  ;;  %1293 = vmatprep.subr.bf16.mxu0 %v9499_v40  ;;  %v9570_v39 = vld [vmem:[%s15774_s1 + $0x3fc] ss:$24 sps:$4 sm:$0xff]   ;;  %v9565_v40 = vld [vmem:[%s15774_s1 + $0x3f0] ss:$24 sps:$4 sm:$0xff]  }
  0x29   :  { %1439 = vmatprep.subr.bf16.mxu1 %v9501_v41  ;;  %v9568_v41 = vld [vmem:[%s15774_s1 + $0x3f8] ss:$24 sps:$4 sm:$0xff]  }
  0x2b   :  { %1294 = vmatpush1.bf16.msra.mxu0 %v9503_v42  ;;  %v9573_v42 = vld [vmem:[%s15774_s1 + $0x424] ss:$24 sps:$4 sm:$0xff]  }
  0x2c   :  { %1440 = vmatpush1.bf16.msra.mxu1 %v9504_v43  ;;  %1295 = vmatprep.subr.bf16.mxu0 %v9505_v44  ;;  %v9576_v43 = vld [vmem:[%s15774_s1 + $0x42c] ss:$24 sps:$4 sm:$0xff]  }
  0x2d   :  { %1441 = vmatprep.subr.bf16.mxu1 %v9507_v45  ;;  %v66_v44 = vld [vmem:[%s15773_s0 + $0xc8] sm:$0xff] }
  0x2e   :  { %v70_v45 = vld [vmem:[%s15773_s0 + $0xe8] sm:$0xff] }
  0x2f   :  { %1296 = vmatpush1.bf16.msra.mxu0 %v9509_v48  ;;  %v10712_v47 = vpack.c.bf16 %v70_v45, %v66_v44  ;;  %v69_v48 = vld [vmem:[%s15773_s0 + $0xe0] sm:$0xff]  ;;  %v9640_v45 = vld [vmem:[%s15777_s4 + $0x330] ss:$24 sps:$4 sm:$0xff]  }
  0x30   :  { %1442 = vmatpush1.bf16.msra.mxu1 %v9510_v49  ;;  %1297 = vmatprep.subr.bf16.mxu0 %v9511_v51  ;;  %v9571_v49 = vld [vmem:[%s15774_s1 + $0x420] ss:$24 sps:$4 sm:$0xff]  }
  0x31   :  { %1443 = vmatprep.subr.bf16.mxu1 %v9513_v52  ;;  %v9574_v51 = vld [vmem:[%s15774_s1 + $0x428] ss:$24 sps:$4 sm:$0xff]   ;;  %v10725_v52 = vpack.c.bf16 %v69_v48, %v65_v46  ;;  %v51_v48 = vld [vmem:[%s15773_s0 + $0x50] sm:$0xff] }
  0x32   :  { %v9637_v44 = vld [vmem:[%s15774_s1 + $0x40] ss:$24 sps:$4 sm:$0xff]  }
  0x33   :  { %1298 = vmatpush1.bf16.msra.mxu0 %v9515_v53  ;;  %v9579_v53 = vld [vmem:[%s15774_s1 + $0x454] ss:$24 sps:$4 sm:$0xff]  }
  0x34   :  { %1444 = vmatpush1.bf16.msra.mxu1 %v9516_v54  ;;  %1299 = vmatprep.subr.bf16.mxu0 %v9517_v55  ;;  %v9582_v54 = vld [vmem:[%s15774_s1 + $0x45c] ss:$24 sps:$4 sm:$0xff]  }
  0x35   :  { %1445 = vmatprep.subr.bf16.mxu1 %v9519_v56  ;;  %v44_v55 = vld [vmem:[%s15773_s0 + $0x18] sm:$0xff]  ;;  %v9577_v56 = vld [vmem:[%s15774_s1 + $0x450] ss:$24 sps:$4 sm:$0xff]  }
  0x37   :  { %1300 = vmatpush1.bf16.msra.mxu0 %v9521_v57  ;;  %v9580_v57 = vld [vmem:[%s15774_s1 + $0x458] ss:$24 sps:$4 sm:$0xff]  }
  0x38   :  { %1446 = vmatpush1.bf16.msra.mxu1 %v9522_v58  ;;  %1301 = vmatprep.subr.bf16.mxu0 %v9523_v59  ;;  %v48_v58 = vld [vmem:[%s15773_s0 + $0x38] sm:$0xff] }
  0x39   :  { %1447 = vmatprep.subr.bf16.mxu1 %v9525_v60  ;;  %v9585_v59 = vld [vmem:[%s15774_s1 + $0x484] ss:$24 sps:$4 sm:$0xff]   ;;  %v10750_v60 = vpack.c.bf16 %v48_v58, %v44_v55  ;;  %v9646_v55 = vld [vmem:[%s15777_s4 + $0x360] ss:$24 sps:$4 sm:$0xff]  }
  0x3a   :  { %v64_v58 = vld [vmem:[%s15773_s0 + $0xb8] sm:$0xff] }
  0x3b   :  { %1302 = vmatpush1.bf16.msra.mxu0 %v9527_v61  ;;  %v9588_v61 = vld [vmem:[%s15774_s1 + $0x48c] ss:$24 sps:$4 sm:$0xff]  }
  0x3c   :  { %1448 = vmatpush1.bf16.msra.mxu1 %v9528_v62  ;;  %1303 = vmatprep.subr.bf16.mxu0 %v9529_v63  ;;  %v9583_v62 = vld [vmem:[%s15774_s1 + $0x480] ss:$24 sps:$4 sm:$0xff]  }
  0x3d   :  { %1449 = vmatprep.subr.bf16.mxu1 %v9531_v0  ;;  %v9586_v63 = vld [vmem:[%s15774_s1 + $0x488] ss:$24 sps:$4 sm:$0xff]   ;;  %v9591_v0 = vld [vmem:[%s15774_s1 + $0x4b4] ss:$24 sps:$4 sm:$0xff]  }
  0x3f   :  { %1304 = vmatpush1.bf16.msra.mxu0 %v9533_v1  ;;  %v9594_v1 = vld [vmem:[%s15774_s1 + $0x4bc] ss:$24 sps:$4 sm:$0xff]  }
  0x40   :  { %1450 = vmatpush1.bf16.msra.mxu1 %v9534_v2  ;;  %1346 = vmatprep.subr.bf16.mxu0 %v9537_v3  ;;  %v9589_v2 = vld [vmem:[%s15774_s1 + $0x4b0] ss:$24 sps:$4 sm:$0xff]  }
  0x41   :  { %1492 = vmatprep.subr.bf16.mxu1 %v9540_v6  ;;  %v9592_v3 = vld [vmem:[%s15774_s1 + $0x4b8] ss:$24 sps:$4 sm:$0xff]  }
  0x42   :  { %1306 = vmatmul.mubr.bf16.vlgmr.msra.gmra.mrb[0].mxu0 %v10593_v9  ;;  %v9595_v6 = vld [vmem:[%s15774_s1 + $0x4e0] ss:$24 sps:$4 sm:$0xff]  }
  0x43   :  { %1452 = vmatmul.mubr.bf16.vlgmr.msra.gmra.mrb[0].mxu1 %v10593_v9  ;;  %1347 = vmatpush1.bf16.msra.mxu0 %v9535_v7  ;;  %v9598_v7 = vld [vmem:[%s15774_s1 + $0x4e8] ss:$24 sps:$4 sm:$0xff]  }
  0x44   :  { %1493 = vmatpush1.bf16.msra.mxu1 %v9538_v8  ;;  %1348 = vmatprep.subr.bf16.mxu0 %v9543_v10  ;;  %v9603_v8 = vld [vmem:[%s15774_s1 + $0x514] ss:$24 sps:$4 sm:$0xff]  }
  0x45   :  { %1494 = vmatprep.subr.bf16.mxu1 %v9546_v11  ;;  %1315 = vmatprep.mubr.bf16.mxu0 %v10636_v23  ;;  %v9606_v10 = vld [vmem:[%s15774_s1 + $0x51c] ss:$24 sps:$4 sm:$0xff]   ;;  %v9601_v11 = vld [vmem:[%s15774_s1 + $0x510] ss:$24 sps:$4 sm:$0xff]  }
  0x46   :  { %1461 = vmatprep.mubr.bf16.mxu1 %v10636_v23 }
  0x47   :  { %1349 = vmatpush1.bf16.msra.mxu0 %v9541_v12  ;;  %v9604_v12 = vld [vmem:[%s15774_s1 + $0x518] ss:$24 sps:$4 sm:$0xff]  }
  0x48   :  { %1495 = vmatpush1.bf16.msra.mxu1 %v9544_v13  ;;  %1350 = vmatprep.subr.bf16.mxu0 %v9549_v14  ;;  %v9609_v13 = vld [vmem:[%s15774_s1 + $0x544] ss:$24 sps:$4 sm:$0xff]  }
  0x49   :  { %1496 = vmatprep.subr.bf16.mxu1 %v9552_v15  ;;  %v9612_v14 = vld [vmem:[%s15774_s1 + $0x54c] ss:$24 sps:$4 sm:$0xff]   ;;  %v9607_v15 = vld [vmem:[%s15774_s1 + $0x540] ss:$24 sps:$4 sm:$0xff]  }
  0x4a   :  { %1316 = vmatmul.mubr.bf16.gmra.mrb[4].mxu0 %v10638_v24 }
  0x4b   :  { %1462 = vmatmul.mubr.bf16.gmra.mrb[4].mxu1 %v10638_v24  ;;  %1351 = vmatpush1.bf16.msra.mxu0 %v9547_v16  ;;  %v9610_v16 = vld [vmem:[%s15774_s1 + $0x548] ss:$24 sps:$4 sm:$0xff]  }
  0x4c   :  { %1497 = vmatpush1.bf16.msra.mxu1 %v9550_v17  ;;  %1352 = vmatprep.subr.bf16.mxu0 %v9555_v22  ;;  %v9615_v17 = vld [vmem:[%s15774_s1 + $0x574] ss:$24 sps:$4 sm:$0xff]  }
  0x4d   :  { %1498 = vmatprep.subr.bf16.mxu1 %v9558_v25  ;;  %1325 = vmatprep.mubr.bf16.mxu0 %v10665_v32  ;;  %v9624_v22 = vld [vmem:[%s15774_s1 + $0x5ac] ss:$24 sps:$4 sm:$0xff]   ;;  %v9619_v25 = vld [vmem:[%s15774_s1 + $0x5a0] ss:$24 sps:$4 sm:$0xff]  }
  0x4e   :  { %1471 = vmatprep.mubr.bf16.mxu1 %v10665_v32 }
  0x4f   :  { %1353 = vmatpush1.bf16.msra.mxu0 %v9553_v26  ;;  %v9622_v26 = vld [vmem:[%s15774_s1 + $0x5a8] ss:$24 sps:$4 sm:$0xff]  }
  0x50   :  { %1499 = vmatpush1.bf16.msra.mxu1 %v9556_v27  ;;  %1354 = vmatprep.subr.bf16.mxu0 %v9561_v28  ;;  %v9627_v27 = vld [vmem:[%s15774_s1 + $0x5d4] ss:$24 sps:$4 sm:$0xff]  }
  0x51   :  { %1500 = vmatprep.subr.bf16.mxu1 %v9564_v29  ;;  %v9630_v28 = vld [vmem:[%s15774_s1 + $0x5dc] ss:$24 sps:$4 sm:$0xff]   ;;  %v9625_v29 = vld [vmem:[%s15774_s1 + $0x5d0] ss:$24 sps:$4 sm:$0xff]  }
  0x52   :  { %1326 = vmatmul.mubr.bf16.gmra.mrb[8].mxu0 %v10679_v37 }
  0x53   :  { %1472 = vmatmul.mubr.bf16.gmra.mrb[8].mxu1 %v10679_v37  ;;  %1355 = vmatpush1.bf16.msra.mxu0 %v9559_v35  ;;  %v9636_v35 = vld [vmem:[%s15777_s4 + $0x304] ss:$24 sps:$4 sm:$0xff]  }
  0x54   :  { %1501 = vmatpush1.bf16.msra.mxu1 %v9562_v36  ;;  %1356 = vmatprep.subr.bf16.mxu0 %v9567_v38  ;;  %v9631_v36 = vld [vmem:[%s15774_s1 + $0x10] ss:$24 sps:$4 sm:$0xff]   ;;  %v9634_v38 = vld [vmem:[%s15777_s4 + $0x300] ss:$24 sps:$4 sm:$0xff]  }
  0x55   :  { %1502 = vmatprep.subr.bf16.mxu1 %v9570_v39  ;;  %1335 = vmatprep.mubr.bf16.mxu0 %v10712_v47  ;;  %v10865_v39 = vpack.c.bf16 %v47_v33, %v43_v31  ;;  %v9676_v31 = vld [vmem:[%s15777_s4 + $0x450] ss:$24 sps:$4 sm:$0xff]   ;;  %v9681_v33 = vld [vmem:[%s15774_s1 + $0x194] ss:$24 sps:$4 sm:$0xff]  }
  0x56   :  { %1481 = vmatprep.mubr.bf16.mxu1 %v10712_v47 }
  0x57   :  { %1357 = vmatpush1.bf16.msra.mxu0 %v9565_v40  ;;  %v52_v40 = vld [vmem:[%s15773_s0 + $0x58] sm:$0xff] }
  0x58   :  { %1503 = vmatpush1.bf16.msra.mxu1 %v9568_v41  ;;  %1358 = vmatprep.subr.bf16.mxu0 %v9573_v42  ;;  %v56_v41 = vld [vmem:[%s15773_s0 + $0x78] sm:$0xff] }
  0x59   :  { %1504 = vmatprep.subr.bf16.mxu1 %v9576_v43  ;;  %v9639_v42 = vld [vmem:[%s15774_s1 + $0x44] ss:$24 sps:$4 sm:$0xff]   ;;  %v9642_v43 = vld [vmem:[%s15777_s4 + $0x334] ss:$24 sps:$4 sm:$0xff]   ;;  %v10885_v46 = vpack.c.bf16 %v56_v41, %v52_v40  ;;  %v9685_v40 = vld [vmem:[%s15774_s1 + $0x1c0] ss:$24 sps:$4 sm:$0xff]  }
  0x5a   :  { %1336 = vmatmul.mubr.bf16.gmra.mrb[12].mxu0 %v10725_v52  ;;  %v9688_v41 = vld [vmem:[%s15777_s4 + $0x4b0] ss:$24 sps:$4 sm:$0xff]  }
  0x5b   :  { %1482 = vmatmul.mubr.bf16.gmra.mrb[12].mxu1 %v10725_v52  ;;  %1359 = vmatpush1.bf16.msra.mxu0 %v9571_v49  ;;  %v55_v49 = vld [vmem:[%s15773_s0 + $0x70] sm:$0xff] }
  0x5c   :  { %1505 = vmatpush1.bf16.msra.mxu1 %v9574_v51  ;;  %1360 = vmatprep.subr.bf16.mxu0 %v9579_v53  ;;  %v9645_v51 = vld [vmem:[%s15774_s1 + $0x74] ss:$24 sps:$4 sm:$0xff]   ;;  %v9648_v53 = vld [vmem:[%s15777_s4 + $0x364] ss:$24 sps:$4 sm:$0xff]  }
  0x5d   :  { %1506 = vmatprep.subr.bf16.mxu1 %v9582_v54  ;;  %1378 = vmatprep.mubr.bf16.mxu0 %v10750_v60  ;;  %v9643_v54 = vld [vmem:[%s15774_s1 + $0x70] ss:$24 sps:$4 sm:$0xff]  }
  0x5e   :  { %1524 = vmatprep.mubr.bf16.mxu1 %v10750_v60 }
  0x5f   :  { %1361 = vmatpush1.bf16.msra.mxu0 %v9577_v56  ;;  %v10909_v56 = vpack.c.bf16 %v55_v49, %v51_v48  ;;  %v9699_v48 = vld [vmem:[%s15774_s1 + $0x224] ss:$24 sps:$4 sm:$0xff]   ;;  %v9702_v49 = vld [vmem:[%s15777_s4 + $0x514] ss:$24 sps:$4 sm:$0xff]  }
  0x60   :  { %1507 = vmatpush1.bf16.msra.mxu1 %v9580_v57  ;;  %1362 = vmatprep.subr.bf16.mxu0 %v9585_v59  ;;  %v60_v57 = vld [vmem:[%s15773_s0 + $0x98] sm:$0xff] }
  0x61   :  { %1508 = vmatprep.subr.bf16.mxu1 %v9588_v61  ;;  %v9651_v59 = vld [vmem:[%s15774_s1 + $0xa4] ss:$24 sps:$4 sm:$0xff]   ;;  %v9654_v61 = vld [vmem:[%s15777_s4 + $0x394] ss:$24 sps:$4 sm:$0xff]  }
  0x63   :  { %1363 = vmatpush1.bf16.msra.mxu0 %v9583_v62  ;;  %v9649_v62 = vld [vmem:[%s15774_s1 + $0xa0] ss:$24 sps:$4 sm:$0xff]  }
  0x64   :  { %1509 = vmatpush1.bf16.msra.mxu1 %v9586_v63  ;;  %1364 = vmatprep.subr.bf16.mxu0 %v9591_v0  ;;  %v10926_v63 = vpack.c.bf16 %v64_v58, %v60_v57  ;;  %v9652_v0 = vld [vmem:[%s15777_s4 + $0x390] ss:$24 sps:$4 sm:$0xff]   ;;  %v9706_v58 = vld [vmem:[%s15777_s4 + $0x540] ss:$24 sps:$4 sm:$0xff]  }
  0x65   :  { %1510 = vmatprep.subr.bf16.mxu1 %v9594_v1  ;;  %v59_v1 = vld [vmem:[%s15773_s0 + $0x90] sm:$0xff] }
  0x66   :  { %v9703_v57 = vld [vmem:[%s15774_s1 + $0x250] ss:$24 sps:$4 sm:$0xff]  }
  0x67   :  { %1365 = vmatpush1.bf16.msra.mxu0 %v9589_v2  ;;  %v63_v2 = vld [vmem:[%s15773_s0 + $0xb0] sm:$0xff] }
  0x68   :  { %1511 = vmatpush1.bf16.msra.mxu1 %v9592_v3  ;;  %1366 = vmatprep.subr.bf16.mxu0 %v9597_v4  ;;  %v9657_v3 = vld [vmem:[%s15774_s1 + $0xd4] ss:$24 sps:$4 sm:$0xff]   ;;  %v9660_v4 = vld [vmem:[%s15777_s4 + $0x3c4] ss:$24 sps:$4 sm:$0xff]  }
  0x69   :  { %1512 = vmatprep.subr.bf16.mxu1 %v9600_v5  ;;  %v10947_v5 = vpack.c.bf16 %v63_v2, %v59_v1  ;;  %v9717_v1 = vld [vmem:[%s15774_s1 + $0x2b4] ss:$24 sps:$4 sm:$0xff]   ;;  %v9720_v2 = vld [vmem:[%s15777_s4 + $0x5a4] ss:$24 sps:$4 sm:$0xff]  }
  0x6b   :  { %1367 = vmatpush1.bf16.msra.mxu0 %v9595_v6  ;;  %v68_v6 = vld [vmem:[%s15773_s0 + $0xd8] sm:$0xff] }
  0x6c   :  { %1513 = vmatpush1.bf16.msra.mxu1 %v9598_v7  ;;  %1368 = vmatprep.subr.bf16.mxu0 %v9603_v8  ;;  %v72_v7 = vld [vmem:[%s15773_s0 + $0xf8] sm:$0xff]  ;;  %v9655_v8 = vld [vmem:[%s15774_s1 + $0xd0] ss:$24 sps:$4 sm:$0xff]  }
  0x6d   :  { %1514 = vmatprep.subr.bf16.mxu1 %v9606_v10  ;;  %v9658_v10 = vld [vmem:[%s15777_s4 + $0x3c0] ss:$24 sps:$4 sm:$0xff]  }
  0x6f   :  { %1369 = vmatpush1.bf16.msra.mxu0 %v9601_v11  ;;  %v9663_v11 = vld [vmem:[%s15774_s1 + $0x104] ss:$24 sps:$4 sm:$0xff]  }
  0x70   :  { %1515 = vmatpush1.bf16.msra.mxu1 %v9604_v12  ;;  %1370 = vmatprep.subr.bf16.mxu0 %v9609_v13  ;;  %v9666_v12 = vld [vmem:[%s15777_s4 + $0x3f4] ss:$24 sps:$4 sm:$0xff]   ;;  %v9661_v13 = vld [vmem:[%s15774_s1 + $0x100] ss:$24 sps:$4 sm:$0xff]  }
  0x71   :  { %1516 = vmatprep.subr.bf16.mxu1 %v9612_v14  ;;  %v10970_v14 = vpack.c.bf16 %v72_v7, %v68_v6  ;;  %v9723_v6 = vld [vmem:[%s15774_s1 + $0x2e4] ss:$24 sps:$4 sm:$0xff]   ;;  %v9726_v7 = vld [vmem:[%s15777_s4 + $0x5d4] ss:$24 sps:$4 sm:$0xff]  }
  0x73   :  { %1371 = vmatpush1.bf16.msra.mxu0 %v9607_v15  ;;  %v9664_v15 = vld [vmem:[%s15777_s4 + $0x3f0] ss:$24 sps:$4 sm:$0xff]  }
  0x74   :  { %1517 = vmatpush1.bf16.msra.mxu1 %v9610_v16  ;;  %1372 = vmatprep.subr.bf16.mxu0 %v9615_v17  ;;  %v67_v16 = vld [vmem:[%s15773_s0 + $0xd0] sm:$0xff] }
  0x75   :  { %1518 = vmatprep.subr.bf16.mxu1 %v9618_v18  ;;  %v71_v17 = vld [vmem:[%s15773_s0 + $0xf0] sm:$0xff] }
  0x76   :  { %v9669_v18 = vld [vmem:[%s15774_s1 + $0x134] ss:$24 sps:$4 sm:$0xff]  }
  0x77   :  { %1373 = vmatpush1.bf16.msra.mxu0 %v9613_v19  ;;  %v9672_v19 = vld [vmem:[%s15777_s4 + $0x424] ss:$24 sps:$4 sm:$0xff]  }
  0x78   :  { %1519 = vmatpush1.bf16.msra.mxu1 %v9616_v20  ;;  %1374 = vmatprep.subr.bf16.mxu0 %v9621_v21  ;;  %v10991_v20 = vpack.c.bf16 %v71_v17, %v67_v16  ;;  %v9667_v21 = vld [vmem:[%s15774_s1 + $0x130] ss:$24 sps:$4 sm:$0xff]   ;;  %v1774_v16 = vld [vmem:[%s15776_s3 + $0x78] sm:$0xff] }
  0x79   :  { %1520 = vmatprep.subr.bf16.mxu1 %v9624_v22  ;;  %v1762_v22 = vld [vmem:[%s15776_s3 + $0x18] sm:$0xff]  ;;  %v1780_v17 = vld [vmem:[%s15776_s3 + $0xa8] sm:$0xff] }
  0x7b   :  { %1375 = vmatpush1.bf16.msra.mxu0 %v9619_v25  ;;  %v1768_v25 = vld [vmem:[%s15776_s3 + $0x48] sm:$0xff] }
  0x7c   :  { %1521 = vmatpush1.bf16.msra.mxu1 %v9622_v26  ;;  %1376 = vmatprep.subr.bf16.mxu0 %v9627_v27  ;;  %v9670_v26 = vld [vmem:[%s15777_s4 + $0x420] ss:$24 sps:$4 sm:$0xff]   ;;  %v9675_v27 = vld [vmem:[%s15774_s1 + $0x164] ss:$24 sps:$4 sm:$0xff]  }
  0x7d   :  { %1522 = vmatprep.subr.bf16.mxu1 %v9630_v28  ;;  %v9678_v28 = vld [vmem:[%s15777_s4 + $0x454] ss:$24 sps:$4 sm:$0xff]  }
  0x7f   :  { %1377 = vmatpush1.bf16.msra.mxu0 %v9625_v29  ;;  %v11011_v29 = vpack.c.bf16 %v1768_v25, %v1762_v22  ;;  %v9735_v22 = vld [vmem:[%s15774_s1 + $0x344] ss:$24 sps:$4 sm:$0xff]   ;;  %v11148_v25 = vpack.c.bf16 %v1780_v17, %v1774_v16  ;;  %v1828_v16 = vld [vmem:[%s15776_s3 + $0x228] sm:$0xff] }
  0x80   :  { %1523 = vmatpush1.bf16.msra.mxu1 %v9628_v30  ;;  %1565 = vmatprep.subr.bf16.mxu0 %v9633_v34  ;;  %v9673_v30 = vld [vmem:[%s15774_s1 + $0x160] ss:$24 sps:$4 sm:$0xff]   ;;  %v9684_v34 = vld [vmem:[%s15777_s4 + $0x484] ss:$24 sps:$4 sm:$0xff]   ;;  %v9817_v17 = vld [vmem:[%s15777_s4 + $0x750] ss:$24 sps:$4 sm:$0xff]  }
  0x81   :  { %4252 = vmatprep.subr.bf16.mxu1 %v9636_v35  ;;  %16040 = vst [vmem:[#allocation8_spill] sm:$0xff] %v11011_v29  ;;  %v9679_v35 = vld [vmem:[%s15774_s1 + $0x190] ss:$24 sps:$4 sm:$0xff]   ;;  %16042 = vst [vmem:[#allocation10_spill] sm:$0xff] %v11148_v25 }
  0x82   :  { %1379 = vmatmul.mubr.bf16.vlgmr.msra.gmra.mrb[0].mxu0 %v10865_v39 }
  0x83   :  { %1525 = vmatmul.mubr.bf16.vlgmr.msra.gmra.mrb[0].mxu1 %v10865_v39  ;;  %1566 = vmatpush1.bf16.msra.mxu0 %v9631_v36  ;;  %v9682_v36 = vld [vmem:[%s15777_s4 + $0x480] ss:$24 sps:$4 sm:$0xff]  }
  0x84   :  { %4253 = vmatpush1.bf16.msra.mxu1 %v9634_v38  ;;  %1567 = vmatprep.subr.bf16.mxu0 %v9639_v42  ;;  %v9687_v38 = vld [vmem:[%s15774_s1 + $0x1c4] ss:$24 sps:$4 sm:$0xff]   ;;  %v9693_v42 = vld [vmem:[%s15774_s1 + $0x1f4] ss:$24 sps:$4 sm:$0xff]  }
  0x85   :  { %4254 = vmatprep.subr.bf16.mxu1 %v9642_v43  ;;  %1388 = vmatprep.mubr.bf16.mxu0 %v10885_v46  ;;  %v9696_v43 = vld [vmem:[%s15777_s4 + $0x4e4] ss:$24 sps:$4 sm:$0xff]  }
  0x86   :  { %1534 = vmatprep.mubr.bf16.mxu1 %v10885_v46 }
  0x87   :  { %1568 = vmatpush1.bf16.msra.mxu0 %v9637_v44  ;;  %v9691_v44 = vld [vmem:[%s15774_s1 + $0x1f0] ss:$24 sps:$4 sm:$0xff]  }
  0x88   :  { %4255 = vmatpush1.bf16.msra.mxu1 %v9640_v45  ;;  %1569 = vmatprep.subr.bf16.mxu0 %v9645_v51  ;;  %v9694_v45 = vld [vmem:[%s15777_s4 + $0x4e0] ss:$24 sps:$4 sm:$0xff]  }
  0x89   :  { %4256 = vmatprep.subr.bf16.mxu1 %v9648_v53  ;;  %v9697_v51 = vld [vmem:[%s15774_s1 + $0x220] ss:$24 sps:$4 sm:$0xff]   ;;  %v9700_v53 = vld [vmem:[%s15777_s4 + $0x510] ss:$24 sps:$4 sm:$0xff]  }
  0x8a   :  { %1389 = vmatmul.mubr.bf16.gmra.mrb[4].mxu0 %v10909_v56 }
  0x8b   :  { %1535 = vmatmul.mubr.bf16.gmra.mrb[4].mxu1 %v10909_v56  ;;  %1570 = vmatpush1.bf16.msra.mxu0 %v9643_v54  ;;  %v9705_v54 = vld [vmem:[%s15774_s1 + $0x254] ss:$24 sps:$4 sm:$0xff]  }
  0x8c   :  { %4257 = vmatpush1.bf16.msra.mxu1 %v9646_v55  ;;  %1571 = vmatprep.subr.bf16.mxu0 %v9651_v59  ;;  %v9708_v55 = vld [vmem:[%s15777_s4 + $0x544] ss:$24 sps:$4 sm:$0xff]  }
  0x8d   :  { %4258 = vmatprep.subr.bf16.mxu1 %v9654_v61  ;;  %1398 = vmatprep.mubr.bf16.mxu0 %v10926_v63  ;;  %v9711_v59 = vld [vmem:[%s15774_s1 + $0x284] ss:$24 sps:$4 sm:$0xff]   ;;  %v9714_v61 = vld [vmem:[%s15777_s4 + $0x574] ss:$24 sps:$4 sm:$0xff]  }
  0x8e   :  { %1544 = vmatprep.mubr.bf16.mxu1 %v10926_v63 }
  0x8f   :  { %1572 = vmatpush1.bf16.msra.mxu0 %v9649_v62  ;;  %v9709_v62 = vld [vmem:[%s15774_s1 + $0x280] ss:$24 sps:$4 sm:$0xff]  }
  0x90   :  { %4259 = vmatpush1.bf16.msra.mxu1 %v9652_v0  ;;  %1573 = vmatprep.subr.bf16.mxu0 %v9657_v3  ;;  %v9712_v0 = vld [vmem:[%s15777_s4 + $0x570] ss:$24 sps:$4 sm:$0xff]  }
  0x91   :  { %4260 = vmatprep.subr.bf16.mxu1 %v9660_v4  ;;  %v9715_v3 = vld [vmem:[%s15774_s1 + $0x2b0] ss:$24 sps:$4 sm:$0xff]   ;;  %v9718_v4 = vld [vmem:[%s15777_s4 + $0x5a0] ss:$24 sps:$4 sm:$0xff]  }
  0x92   :  { %1399 = vmatmul.mubr.bf16.gmra.mrb[8].mxu0 %v10947_v5 }
  0x93   :  { %1545 = vmatmul.mubr.bf16.gmra.mrb[8].mxu1 %v10947_v5  ;;  %1574 = vmatpush1.bf16.msra.mxu0 %v9655_v8  ;;  %v9721_v8 = vld [vmem:[%s15774_s1 + $0x2e0] ss:$24 sps:$4 sm:$0xff]  }
  0x94   :  { %4261 = vmatpush1.bf16.msra.mxu1 %v9658_v10  ;;  %1575 = vmatprep.subr.bf16.mxu0 %v9663_v11  ;;  %v9724_v10 = vld [vmem:[%s15777_s4 + $0x5d0] ss:$24 sps:$4 sm:$0xff]  }
  0x95   :  { %4262 = vmatprep.subr.bf16.mxu1 %v9666_v12  ;;  %1408 = vmatprep.mubr.bf16.mxu0 %v10970_v14  ;;  %v1761_v11 = vld [vmem:[%s15776_s3 + $0x10] sm:$0xff]  ;;  %v1767_v12 = vld [vmem:[%s15776_s3 + $0x40] sm:$0xff] }
  0x96   :  { %1554 = vmatprep.mubr.bf16.mxu1 %v10970_v14 }
  0x97   :  { %1576 = vmatpush1.bf16.msra.mxu0 %v9661_v13  ;;  %v9729_v13 = vld [vmem:[%s15774_s1 + $0x314] ss:$24 sps:$4 sm:$0xff]  }
  0x98   :  { %4263 = vmatpush1.bf16.msra.mxu1 %v9664_v15  ;;  %1577 = vmatprep.subr.bf16.mxu0 %v9669_v18  ;;  %v9732_v15 = vld [vmem:[%s15777_s4 + $0x604] ss:$24 sps:$4 sm:$0xff]   ;;  %v11137_v18 = vpack.c.bf16 %v1767_v12, %v1761_v11  ;;  %v1809_v11 = vld [vmem:[%s15776_s3 + $0x190] sm:$0xff] }
  0x99   :  { %4264 = vmatprep.subr.bf16.mxu1 %v9672_v19  ;;  %v9727_v19 = vld [vmem:[%s15774_s1 + $0x310] ss:$24 sps:$4 sm:$0xff]   ;;  %v9819_v12 = vld [vmem:[%s15777_s4 + $0x754] ss:$24 sps:$4 sm:$0xff]  }
  0x9a   :  { %1409 = vmatmul.mubr.bf16.gmra.mrb[12].mxu0 %v10991_v20  ;;  %16041 = vst [vmem:[#allocation9_spill] sm:$0xff] %v11137_v18 }
  0x9b   :  { %1555 = vmatmul.mubr.bf16.gmra.mrb[12].mxu1 %v10991_v20  ;;  %1578 = vmatpush1.bf16.msra.mxu0 %v9667_v21  ;;  %v9730_v21 = vld [vmem:[%s15777_s4 + $0x600] ss:$24 sps:$4 sm:$0xff]  }
  0x9c   :  { %4265 = vmatpush1.bf16.msra.mxu1 %v9670_v26  ;;  %1579 = vmatprep.subr.bf16.mxu0 %v9675_v27  ;;  %v9733_v26 = vld [vmem:[%s15774_s1 + $0x340] ss:$24 sps:$4 sm:$0xff]   ;;  %v9744_v27 = vld [vmem:[%s15777_s4 + $0x634] ss:$24 sps:$4 sm:$0xff]  }
  0x9d   :  { %4266 = vmatprep.subr.bf16.mxu1 %v9678_v28  ;;  %4284 = vmatprep.mubr.bf16.mxu1 %v11011_v29  ;;  %v9738_v28 = vld [vmem:[%s15774_s1 + $0x374] ss:$24 sps:$4 sm:$0xff]  }
  0x9e   :  { %1597 = vmatprep.mubr.bf16.mxu0 %v10523_v50  ;;  %v9690_v50 = vld [vmem:[%s15777_s4 + $0x4b4] ss:$24 sps:$4 sm:$0xff]  }
  0x9f   :  { %1580 = vmatpush1.bf16.msra.mxu0 %v9673_v30  ;;  %v1773_v30 = vld [vmem:[%s15776_s3 + $0x70] sm:$0xff] }
  0xa0   :  { %4267 = vmatpush1.bf16.msra.mxu1 %v9676_v31  ;;  %1581 = vmatprep.subr.bf16.mxu0 %v9681_v33  ;;  %v1779_v31 = vld [vmem:[%s15776_s3 + $0xa0] sm:$0xff]  ;;  %v9742_v33 = vld [vmem:[%s15777_s4 + $0x630] ss:$24 sps:$4 sm:$0xff]  }
  0xa1   :  { %4268 = vmatprep.subr.bf16.mxu1 %v9684_v34  ;;  %v1792_v34 = vld [vmem:[%s15776_s3 + $0x108] sm:$0xff] }
  0xa3   :  { %1582 = vmatpush1.bf16.msra.mxu0 %v9679_v35  ;;  %v9756_v35 = vld [vmem:[%s15777_s4 + $0x664] ss:$24 sps:$4 sm:$0xff]  }
  0xa4   :  { %4269 = vmatpush1.bf16.msra.mxu1 %v9682_v36  ;;  %1583 = vmatprep.subr.bf16.mxu0 %v9687_v38  ;;  %v9736_v36 = vld [vmem:[%s15774_s1 + $0x370] ss:$24 sps:$4 sm:$0xff]   ;;  %v11184_v38 = vpack.c.bf16 %v1779_v31, %v1773_v30  ;;  %v9843_v30 = vld [vmem:[%s15777_s4 + $0x7b4] ss:$24 sps:$4 sm:$0xff]  }
  0xa5   :  { %4270 = vmatprep.subr.bf16.mxu1 %v9690_v50  ;;  %v9741_v50 = vld [vmem:[%s15774_s1 + $0x3a4] ss:$24 sps:$4 sm:$0xff]   ;;  %v9771_v31 = vld [vmem:[%s15774_s1 + $0x4f4] ss:$24 sps:$4 sm:$0xff]  }
  0xa6   :  { %16043 = vst [vmem:[#allocation11_spill] sm:$0xff] %v11184_v38 }
  0xa7   :  { %1584 = vmatpush1.bf16.msra.mxu0 %v9685_v40 }
  0xa8   :  { %4271 = vmatpush1.bf16.msra.mxu1 %v9688_v41  ;;  %1585 = vmatprep.subr.bf16.mxu0 %v9693_v42  ;;  %v9754_v41 = vld [vmem:[%s15777_s4 + $0x660] ss:$24 sps:$4 sm:$0xff]   ;;  %v9768_v42 = vld [vmem:[%s15777_s4 + $0x694] ss:$24 sps:$4 sm:$0xff]  }
  0xa9   :  { %4272 = vmatprep.subr.bf16.mxu1 %v9696_v43  ;;  %v9747_v43 = vld [vmem:[%s15774_s1 + $0x3d4] ss:$24 sps:$4 sm:$0xff]  }
  0xab   :  { %1586 = vmatpush1.bf16.msra.mxu0 %v9691_v44  ;;  %v1785_v44 = vld [vmem:[%s15776_s3 + $0xd0] sm:$0xff] }
  0xac   :  { %4273 = vmatpush1.bf16.msra.mxu1 %v9694_v45  ;;  %1587 = vmatprep.subr.bf16.mxu0 %v9699_v48  ;;  %v1791_v45 = vld [vmem:[%s15776_s3 + $0x100] sm:$0xff]  ;;  %v1798_v48 = vld [vmem:[%s15776_s3 + $0x138] sm:$0xff] }
  0xad   :  { %4274 = vmatprep.subr.bf16.mxu1 %v9702_v49  ;;  %v1804_v49 = vld [vmem:[%s15776_s3 + $0x168] sm:$0xff] }
  0xaf   :  { %1588 = vmatpush1.bf16.msra.mxu0 %v9697_v51  ;;  %v9780_v51 = vld [vmem:[%s15777_s4 + $0x6c4] ss:$24 sps:$4 sm:$0xff]  }
  0xb0   :  { %4275 = vmatpush1.bf16.msra.mxu1 %v9700_v53  ;;  %1589 = vmatprep.subr.bf16.mxu0 %v9705_v54  ;;  %v11225_v53 = vpack.c.bf16 %v1791_v45, %v1785_v44  ;;  %v9745_v54 = vld [vmem:[%s15774_s1 + $0x3d0] ss:$24 sps:$4 sm:$0xff]   ;;  %v9853_v44 = vld [vmem:[%s15777_s4 + $0x7e0] ss:$24 sps:$4 sm:$0xff]  }
  0xb1   :  { %4276 = vmatprep.subr.bf16.mxu1 %v9708_v55  ;;  %v9750_v55 = vld [vmem:[%s15774_s1 + $0x404] ss:$24 sps:$4 sm:$0xff]   ;;  %v9772_v45 = vld [vmem:[%s15774_s1 + $0x520] ss:$24 sps:$4 sm:$0xff]  }
  0xb2   :  { %16045 = vst [vmem:[#allocation13_spill] sm:$0xff] %v11225_v53 }
  0xb3   :  { %1590 = vmatpush1.bf16.msra.mxu0 %v9703_v57  ;;  %v11233_v57 = vpack.c.bf16 %v1804_v49, %v1798_v48  ;;  %v9861_v48 = vld [vmem:[%s15777_s4 + $0x814] ss:$24 sps:$4 sm:$0xff]  }
  0xb4   :  { %4277 = vmatpush1.bf16.msra.mxu1 %v9706_v58  ;;  %1591 = vmatprep.subr.bf16.mxu0 %v9711_v59  ;;  %v9748_v58 = vld [vmem:[%s15774_s1 + $0x400] ss:$24 sps:$4 sm:$0xff]   ;;  %v9792_v59 = vld [vmem:[%s15777_s4 + $0x6f4] ss:$24 sps:$4 sm:$0xff]  }
  0xb5   :  { %4278 = vmatprep.subr.bf16.mxu1 %v9714_v61  ;;  %16046 = vst [vmem:[#allocation14_spill] sm:$0xff] %v11233_v57  ;;  %v9753_v61 = vld [vmem:[%s15774_s1 + $0x434] ss:$24 sps:$4 sm:$0xff]  }
  0xb6   :  { %v9777_v49 = vld [vmem:[%s15774_s1 + $0x554] ss:$24 sps:$4 sm:$0xff]  }
  0xb7   :  { %1592 = vmatpush1.bf16.msra.mxu0 %v9709_v62  ;;  %v1797_v62 = vld [vmem:[%s15776_s3 + $0x130] sm:$0xff] }
  0xb8   :  { %4279 = vmatpush1.bf16.msra.mxu1 %v9712_v0  ;;  %1593 = vmatprep.subr.bf16.mxu0 %v9717_v1  ;;  %v1803_v0 = vld [vmem:[%s15776_s3 + $0x160] sm:$0xff]  ;;  %v1810_v1 = vld [vmem:[%s15776_s3 + $0x198] sm:$0xff] }
  0xb9   :  { %4280 = vmatprep.subr.bf16.mxu1 %v9720_v2  ;;  %v1816_v2 = vld [vmem:[%s15776_s3 + $0x1c8] sm:$0xff] }
  0xbb   :  { %1594 = vmatpush1.bf16.msra.mxu0 %v9715_v3  ;;  %v9804_v3 = vld [vmem:[%s15777_s4 + $0x724] ss:$24 sps:$4 sm:$0xff]  }
  0xbc   :  { %4281 = vmatpush1.bf16.msra.mxu1 %v9718_v4  ;;  %1595 = vmatprep.subr.bf16.mxu0 %v9723_v6  ;;  %v11269_v4 = vpack.c.bf16 %v1803_v0, %v1797_v62  ;;  %v9751_v6 = vld [vmem:[%s15774_s1 + $0x430] ss:$24 sps:$4 sm:$0xff]   ;;  %v9783_v0 = vld [vmem:[%s15774_s1 + $0x584] ss:$24 sps:$4 sm:$0xff]  }
  0xbd   :  { %4282 = vmatprep.subr.bf16.mxu1 %v9726_v7  ;;  %v11274_v7 = vpack.c.bf16 %v1816_v2, %v1810_v1  ;;  %v9865_v1 = vld [vmem:[%s15777_s4 + $0x840] ss:$24 sps:$4 sm:$0xff]  }
  0xbe   :  { %16047 = vst [vmem:[#allocation15_spill] sm:$0xff] %v11269_v4  ;;  %v9781_v2 = vld [vmem:[%s15774_s1 + $0x580] ss:$24 sps:$4 sm:$0xff]  }
  0xbf   :  { %1596 = vmatpush1.bf16.msra.mxu0 %v9721_v8  ;;  %16048 = vst [vmem:[#allocation16_spill] sm:$0xff] %v11274_v7  ;;  %v9759_v8 = vld [vmem:[%s15774_s1 + $0x464] ss:$24 sps:$4 sm:$0xff]  }
  0xc0   :  { %4283 = vmatpush1.bf16.msra.mxu1 %v9724_v10  ;;  %1638 = vmatprep.subr.bf16.mxu0 %v9729_v13  ;;  %v9757_v10 = vld [vmem:[%s15774_s1 + $0x460] ss:$24 sps:$4 sm:$0xff]  }
  0xc1   :  { %4535 = vmatprep.subr.bf16.mxu1 %v9732_v15  ;;  %v1815_v13 = vld [vmem:[%s15776_s3 + $0x1c0] sm:$0xff]  ;;  %v9762_v15 = vld [vmem:[%s15774_s1 + $0x494] ss:$24 sps:$4 sm:$0xff]  }
  0xc2   :  { %1598 = vmatmul.mubr.bf16.vlgmr.msra.gmra.mrb[16].mxu0 %v10593_v9  ;;  %v1786_v9 = vld [vmem:[%s15776_s3 + $0xd8] sm:$0xff] }
  0xc3   :  { %4285 = vmatmul.mubr.bf16.vlgmr.msra.gmra.mrb[16].mxu1 %v11137_v18  ;;  %1639 = vmatpush1.bf16.msra.mxu0 %v9727_v19  ;;  %v11189_v40 = vpack.c.bf16 %v1792_v34, %v1786_v9  ;;  %v11310_v19 = vpack.c.bf16 %v1815_v13, %v1809_v11  ;;  %v1827_v9 = vld [vmem:[%s15776_s3 + $0x220] sm:$0xff]  ;;  %v1834_v34 = vld [vmem:[%s15776_s3 + $0x258] sm:$0xff]  ;;  %v9871_v11 = vld [vmem:[%s15777_s4 + $0x870] ss:$24 sps:$4 sm:$0xff]  }
  0xc4   :  { %4536 = vmatpush1.bf16.msra.mxu1 %v9730_v21  ;;  %1640 = vmatprep.subr.bf16.mxu0 %v9735_v22  ;;  %v9831_v21 = vld [vmem:[%s15777_s4 + $0x784] ss:$24 sps:$4 sm:$0xff]   ;;  %v9760_v22 = vld [vmem:[%s15774_s1 + $0x490] ss:$24 sps:$4 sm:$0xff]  }
  0xc5   :  { %4294 = vmatprep.mubr.bf16.mxu1 %v11148_v25  ;;  %4537 = vmatprep.subr.bf16.mxu1 %v9744_v27  ;;  %16044 = vst [vmem:[#allocation12_spill] sm:$0xff] %v11189_v40  ;;  %16049 = vst [vmem:[#allocation17_spill] sm:$0xff] %v11310_v19  ;;  %v9829_v27 = vld [vmem:[%s15777_s4 + $0x780] ss:$24 sps:$4 sm:$0xff]   ;;  %v9879_v13 = vld [vmem:[%s15777_s4 + $0x8a4] ss:$24 sps:$4 sm:$0xff]  }
  0xc6   :  { %1607 = vmatprep.mubr.bf16.mxu0 %v10636_v23  ;;  %v9739_v23 = vld [vmem:[%s15774_s1 + $0x3a0] ss:$24 sps:$4 sm:$0xff]  }
  0xc7   :  { %1641 = vmatpush1.bf16.msra.mxu0 %v9733_v26 }
  0xc8   :  { %4538 = vmatpush1.bf16.msra.mxu1 %v9742_v33  ;;  %1642 = vmatprep.subr.bf16.mxu0 %v9738_v28  ;;  %v9763_v28 = vld [vmem:[%s15774_s1 + $0x4c0] ss:$24 sps:$4 sm:$0xff]   ;;  %v1821_v33 = vld [vmem:[%s15776_s3 + $0x1f0] sm:$0xff] }
  0xc9   :  { %4539 = vmatprep.subr.bf16.mxu1 %v9756_v35  ;;  %v1840_v35 = vld [vmem:[%s15776_s3 + $0x288] sm:$0xff] }
  0xca   :  { %1608 = vmatmul.mubr.bf16.gmra.mrb[20].mxu0 %v10638_v24  ;;  %v9766_v24 = vld [vmem:[%s15777_s4 + $0x690] ss:$24 sps:$4 sm:$0xff]  }
  0xcb   :  { %4295 = vmatmul.mubr.bf16.gmra.mrb[20].mxu1 %v11184_v38  ;;  %1643 = vmatpush1.bf16.msra.mxu0 %v9736_v36  ;;  %v9841_v36 = vld [vmem:[%s15777_s4 + $0x7b0] ss:$24 sps:$4 sm:$0xff]  }
  0xcc   :  { %4304 = vmatprep.mubr.bf16.mxu1 %v11189_v40  ;;  %1644 = vmatprep.subr.bf16.mxu0 %v9741_v50  ;;  %v11352_v50 = vpack.c.bf16 %v1827_v9, %v1821_v33  ;;  %v9883_v33 = vld [vmem:[%s15777_s4 + $0x8d0] ss:$24 sps:$4 sm:$0xff]  }
  0xcd   :  { %4540 = vmatpush1.bf16.msra.mxu1 %v9754_v41  ;;  %1617 = vmatprep.mubr.bf16.mxu0 %v10665_v32  ;;  %v9778_v32 = vld [vmem:[%s15777_s4 + $0x6c0] ss:$24 sps:$4 sm:$0xff]   ;;  %v9855_v41 = vld [vmem:[%s15777_s4 + $0x7e4] ss:$24 sps:$4 sm:$0xff]  }
  0xce   :  { %4541 = vmatprep.subr.bf16.mxu1 %v9768_v42  ;;  %16051 = vst [vmem:[#allocation19_spill] sm:$0xff] %v11352_v50  ;;  %v11360_v42 = vpack.c.bf16 %v1840_v35, %v1834_v34  ;;  %v9793_v34 = vld [vmem:[%s15777_s4] ss:$24 sps:$4 sm:$0xff]   ;;  %v9798_v35 = vld [vmem:[%s15777_s4 + $0x34] ss:$24 sps:$4 sm:$0xff]  }
  0xcf   :  { %1645 = vmatpush1.bf16.msra.mxu0 %v9739_v23  ;;  %v9769_v23 = vld [vmem:[%s15774_s1 + $0x4f0] ss:$24 sps:$4 sm:$0xff]  }
  0xd0   :  { %1646 = vmatprep.subr.bf16.mxu0 %v9747_v43  ;;  %16052 = vst [vmem:[#allocation20_spill] sm:$0xff] %v11360_v42  ;;  %v9774_v43 = vld [vmem:[%s15774_s1 + $0x524] ss:$24 sps:$4 sm:$0xff]  }
  0xd1   :  { %4542 = vmatpush1.bf16.msra.mxu1 %v9766_v24  ;;  %v1833_v24 = vld [vmem:[%s15776_s3 + $0x250] sm:$0xff] }
  0xd2   :  { %4543 = vmatprep.subr.bf16.mxu1 %v9780_v51  ;;  %1618 = vmatmul.mubr.bf16.gmra.mrb[24].mxu0 %v10679_v37  ;;  %v9790_v37 = vld [vmem:[%s15777_s4 + $0x6f0] ss:$24 sps:$4 sm:$0xff]   ;;  %v1839_v51 = vld [vmem:[%s15776_s3 + $0x280] sm:$0xff] }
  0xd3   :  { %4305 = vmatmul.mubr.bf16.gmra.mrb[24].mxu1 %v11225_v53  ;;  %1647 = vmatpush1.bf16.msra.mxu0 %v9745_v54  ;;  %v1846_v54 = vld [vmem:[%s15776_s3 + $0x2b8] sm:$0xff] }
  0xd4   :  { %4314 = vmatprep.mubr.bf16.mxu1 %v11233_v57  ;;  %1648 = vmatprep.subr.bf16.mxu0 %v9750_v55  ;;  %v1852_v55 = vld [vmem:[%s15776_s3 + $0x2e8] sm:$0xff] }
  0xd5   :  { %4544 = vmatpush1.bf16.msra.mxu1 %v9778_v32  ;;  %1627 = vmatprep.mubr.bf16.mxu0 %v10712_v47  ;;  %v9802_v47 = vld [vmem:[%s15777_s4 + $0x720] ss:$24 sps:$4 sm:$0xff]   ;;  %v9859_v32 = vld [vmem:[%s15777_s4 + $0x810] ss:$24 sps:$4 sm:$0xff]   ;;  %v11402_v62 = vpack.c.bf16 %v1852_v55, %v1846_v54 }
  0xd6   :  { %4545 = vmatprep.subr.bf16.mxu1 %v9792_v59  ;;  %v9867_v59 = vld [vmem:[%s15777_s4 + $0x844] ss:$24 sps:$4 sm:$0xff]   ;;  %v9805_v54 = vld [vmem:[%s15777_s4 + $0x90] ss:$24 sps:$4 sm:$0xff]  }
  0xd7   :  { %1649 = vmatpush1.bf16.msra.mxu0 %v9748_v58  ;;  %v11394_v58 = vpack.c.bf16 %v1839_v51, %v1833_v24  ;;  %16054 = vst [vmem:[#allocation22_spill] sm:$0xff] %v11402_v62  ;;  %v9891_v51 = vld [vmem:[%s15777_s4 + $0x14] ss:$24 sps:$4 sm:$0xff]  }
  0xd8   :  { %1650 = vmatprep.subr.bf16.mxu0 %v9753_v61  ;;  %v9775_v61 = vld [vmem:[%s15774_s1 + $0x550] ss:$24 sps:$4 sm:$0xff]  }
  0xd9   :  { %4546 = vmatpush1.bf16.msra.mxu1 %v9790_v37  ;;  %16053 = vst [vmem:[#allocation21_spill] sm:$0xff] %v11394_v58  ;;  %v1845_v37 = vld [vmem:[%s15776_s3 + $0x2b0] sm:$0xff] }
  0xda   :  { %4547 = vmatprep.subr.bf16.mxu1 %v9804_v3  ;;  %1628 = vmatmul.mubr.bf16.gmra.mrb[28].mxu0 %v10725_v52  ;;  %v1822_v52 = vld [vmem:[%s15776_s3 + $0x1f8] sm:$0xff]  ;;  %v9873_v3 = vld [vmem:[%s15777_s4 + $0x874] ss:$24 sps:$4 sm:$0xff]  }
  0xdb   :  { %4315 = vmatmul.mubr.bf16.gmra.mrb[28].mxu1 %v11269_v4  ;;  %1651 = vmatpush1.bf16.msra.mxu0 %v9751_v6  ;;  %v11318_v26 = vpack.c.bf16 %v1828_v16, %v1822_v52  ;;  %v1851_v6 = vld [vmem:[%s15776_s3 + $0x2e0] sm:$0xff]  ;;  %v1881_v55 = vld [vmem:[%s15776_s3 + $0x3d0] sm:$0xff] }
  0xdc   :  { %4324 = vmatprep.mubr.bf16.mxu1 %v11274_v7  ;;  %1652 = vmatprep.subr.bf16.mxu0 %v9759_v8  ;;  %v9786_v8 = vld [vmem:[%s15774_s1 + $0x5b4] ss:$24 sps:$4 sm:$0xff]   ;;  %v9789_v16 = vld [vmem:[%s15774_s1 + $0x5e4] ss:$24 sps:$4 sm:$0xff]  }
  0xdd   :  { %1670 = vmatprep.mubr.bf16.mxu0 %v10750_v60  ;;  %4548 = vmatpush1.bf16.msra.mxu1 %v9802_v47  ;;  %16050 = vst [vmem:[#allocation18_spill] sm:$0xff] %v11318_v26  ;;  %v9765_v60 = vld [vmem:[%s15774_s1 + $0x4c4] ss:$24 sps:$4 sm:$0xff]  }
  0xde   :  { %4549 = vmatprep.subr.bf16.mxu1 %v9819_v12  ;;  %v1858_v47 = vld [vmem:[%s15776_s3 + $0x318] sm:$0xff]  ;;  %v11436_v12 = vpack.c.bf16 %v1851_v6, %v1845_v37  ;;  %v9811_v37 = vld [vmem:[%s15777_s4 + $0xf0] ss:$24 sps:$4 sm:$0xff]  }
  0xdf   :  { %1653 = vmatpush1.bf16.msra.mxu0 %v9757_v10  ;;  %v1864_v10 = vld [vmem:[%s15776_s3 + $0x348] sm:$0xff]  ;;  %v1893_v6 = vld [vmem:[%s15776_s3 + $0x430] sm:$0xff] }
  0xe0   :  { %1654 = vmatprep.subr.bf16.mxu0 %v9762_v15  ;;  %16055 = vst [vmem:[#allocation23_spill] sm:$0xff] %v11436_v12  ;;  %v9784_v15 = vld [vmem:[%s15774_s1 + $0x5b0] ss:$24 sps:$4 sm:$0xff]   ;;  %v11444_v52 = vpack.c.bf16 %v1864_v10, %v1858_v47 }
  0xe1   :  { %4550 = vmatpush1.bf16.msra.mxu1 %v9817_v17  ;;  %v9877_v17 = vld [vmem:[%s15777_s4 + $0x8a0] ss:$24 sps:$4 sm:$0xff]   ;;  %v1912_v47 = vld [vmem:[%s15776_s3 + $0x4c8] sm:$0xff] }
  0xe2   :  { %4551 = vmatprep.subr.bf16.mxu1 %v9831_v21  ;;  %16056 = vst [vmem:[#allocation24_spill] sm:$0xff] %v11444_v52  ;;  %v9787_v21 = vld [vmem:[%s15774_s1 + $0x5e0] ss:$24 sps:$4 sm:$0xff]   ;;  %v1760_v10 = vld [vmem:[%s15776_s3 + $0x8] sm:$0xff] }
  0xe3   :  { %4325 = vmatmul.mubr.bf16.gmra.mrb[32].mxu1 %v11310_v19  ;;  %1655 = vmatpush1.bf16.msra.mxu0 %v9760_v22  ;;  %v1857_v22 = vld [vmem:[%s15776_s3 + $0x310] sm:$0xff] }
  0xe4   :  { %4334 = vmatprep.mubr.bf16.mxu1 %v11318_v26  ;;  %1656 = vmatprep.subr.bf16.mxu0 %v9765_v60  ;;  %v1863_v60 = vld [vmem:[%s15776_s3 + $0x340] sm:$0xff] }
  0xe5   :  { %4552 = vmatpush1.bf16.msra.mxu1 %v9829_v27  ;;  %v9885_v27 = vld [vmem:[%s15777_s4 + $0x8d4] ss:$24 sps:$4 sm:$0xff]   ;;  %v11478_v9 = vpack.c.bf16 %v1863_v60, %v1857_v22  ;;  %v9825_v22 = vld [vmem:[%s15777_s4 + $0x184] ss:$24 sps:$4 sm:$0xff]  }
  0xe6   :  { %4553 = vmatprep.subr.bf16.mxu1 %v9843_v30  ;;  %v1870_v30 = vld [vmem:[%s15776_s3 + $0x378] sm:$0xff]  ;;  %v1905_v60 = vld [vmem:[%s15776_s3 + $0x490] sm:$0xff] }
  0xe7   :  { %1657 = vmatpush1.bf16.msra.mxu0 %v9763_v28  ;;  %v9795_v28 = vld [vmem:[%s15777_s4 + $0x4] ss:$24 sps:$4 sm:$0xff]   ;;  %16057 = vst [vmem:[#allocation25_spill] sm:$0xff] %v11478_v9 }
  0xe8   :  { %1658 = vmatprep.subr.bf16.mxu0 %v9771_v31  ;;  %v1876_v31 = vld [vmem:[%s15776_s3 + $0x3a8] sm:$0xff] }
  0xe9   :  { %4554 = vmatpush1.bf16.msra.mxu1 %v9841_v36  ;;  %v11486_v36 = vpack.c.bf16 %v1876_v31, %v1870_v30  ;;  %v9823_v31 = vld [vmem:[%s15777_s4 + $0x180] ss:$24 sps:$4 sm:$0xff]  }
  0xea   :  { %4555 = vmatprep.subr.bf16.mxu1 %v9855_v41  ;;  %v9796_v41 = vld [vmem:[%s15777_s4 + $0x30] ss:$24 sps:$4 sm:$0xff]  }
  0xeb   :  { %4335 = vmatmul.mubr.bf16.gmra.mrb[36].mxu1 %v11352_v50  ;;  %1659 = vmatpush1.bf16.msra.mxu0 %v9769_v23  ;;  %16058 = vst [vmem:[#allocation26_spill] sm:$0xff] %v11486_v36  ;;  %v9801_v23 = vld [vmem:[%s15777_s4 + $0x64] ss:$24 sps:$4 sm:$0xff]  }
  0xec   :  { %4344 = vmatprep.mubr.bf16.mxu1 %v11360_v42  ;;  %1660 = vmatprep.subr.bf16.mxu0 %v9774_v43  ;;  %v1869_v43 = vld [vmem:[%s15776_s3 + $0x370] sm:$0xff] }
  0xed   :  { %4556 = vmatpush1.bf16.msra.mxu1 %v9853_v44  ;;  %v1882_v44 = vld [vmem:[%s15776_s3 + $0x3d8] sm:$0xff] }
  0xee   :  { %4557 = vmatprep.subr.bf16.mxu1 %v9861_v48  ;;  %v9799_v48 = vld [vmem:[%s15777_s4 + $0x60] ss:$24 sps:$4 sm:$0xff]  }
  0xef   :  { %1661 = vmatpush1.bf16.msra.mxu0 %v9772_v45  ;;  %v1888_v45 = vld [vmem:[%s15776_s3 + $0x408] sm:$0xff] }
  0xf0   :  { %1662 = vmatprep.subr.bf16.mxu0 %v9777_v49  ;;  %v9807_v49 = vld [vmem:[%s15777_s4 + $0x94] ss:$24 sps:$4 sm:$0xff]   ;;  %v11518_v24 = vpack.c.bf16 %v1888_v45, %v1882_v44 }
  0xf1   :  { %4558 = vmatpush1.bf16.msra.mxu1 %v9859_v32  ;;  %v9810_v32 = vld [vmem:[%s15777_s4 + $0xc4] ss:$24 sps:$4 sm:$0xff]   ;;  %v1936_v44 = vld [vmem:[%s15776_s3 + $0x588] sm:$0xff] }
  0xf2   :  { %4559 = vmatprep.subr.bf16.mxu1 %v9867_v59  ;;  %16060 = vst [vmem:[#allocation28_spill] sm:$0xff] %v11518_v24  ;;  %v1894_v59 = vld [vmem:[%s15776_s3 + $0x438] sm:$0xff] }
  0xf3   :  { %4345 = vmatmul.mubr.bf16.gmra.mrb[40].mxu1 %v11394_v58  ;;  %1663 = vmatpush1.bf16.msra.mxu0 %v9775_v61 }
  0xf4   :  { %4354 = vmatprep.mubr.bf16.mxu1 %v11402_v62  ;;  %1664 = vmatprep.subr.bf16.mxu0 %v9783_v0  ;;  %v9808_v0 = vld [vmem:[%s15777_s4 + $0xc0] ss:$24 sps:$4 sm:$0xff]  }
  0xf5   :  { %4560 = vmatpush1.bf16.msra.mxu1 %v9865_v1  ;;  %v9813_v1 = vld [vmem:[%s15777_s4 + $0xf4] ss:$24 sps:$4 sm:$0xff]  }
  0xf6   :  { %4561 = vmatprep.subr.bf16.mxu1 %v9873_v3  ;;  %v9816_v3 = vld [vmem:[%s15777_s4 + $0x124] ss:$24 sps:$4 sm:$0xff]  }
  0xf7   :  { %1665 = vmatpush1.bf16.msra.mxu0 %v9781_v2 }
  0xf8   :  { %1666 = vmatprep.subr.bf16.mxu0 %v9786_v8  ;;  %v1906_v8 = vld [vmem:[%s15776_s3 + $0x498] sm:$0xff] }
  0xf9   :  { %4562 = vmatpush1.bf16.msra.mxu1 %v9871_v11 }
  0xfa   :  { %4563 = vmatprep.subr.bf16.mxu1 %v9879_v13  ;;  %v9814_v13 = vld [vmem:[%s15777_s4 + $0x120] ss:$24 sps:$4 sm:$0xff]  }
  0xfb   :  { %4355 = vmatmul.mubr.bf16.gmra.mrb[44].mxu1 %v11436_v12  ;;  %1667 = vmatpush1.bf16.msra.mxu0 %v9784_v15  ;;  %v9822_v15 = vld [vmem:[%s15777_s4 + $0x154] ss:$24 sps:$4 sm:$0xff]  }
  0xfc   :  { %4364 = vmatprep.mubr.bf16.mxu1 %v11444_v52  ;;  %1668 = vmatprep.subr.bf16.mxu0 %v9789_v16  ;;  %v11591_v16 = vpack.c.bf16 %v1912_v47, %v1906_v8  ;;  %v1941_v8 = vld [vmem:[%s15776_s3 + $0x5b0] sm:$0xff]  ;;  %v1947_v47 = vld [vmem:[%s15776_s3 + $0x5e0] sm:$0xff] }
  0xfd   :  { %4564 = vmatpush1.bf16.msra.mxu1 %v9877_v17 }
  0xfe   :  { %4565 = vmatprep.subr.bf16.mxu1 %v9885_v27  ;;  %16064 = vst [vmem:[#allocation32_spill] sm:$0xff] %v11591_v16  ;;  %v1918_v27 = vld [vmem:[%s15776_s3 + $0x4f8] sm:$0xff] }
  0xff   :  { %1669 = vmatpush1.bf16.msra.mxu0 %v9787_v21  ;;  %v9820_v21 = vld [vmem:[%s15777_s4 + $0x150] ss:$24 sps:$4 sm:$0xff]  }
 0x100   :  { %3969 = vmatprep.subr.bf16.mxu0 %v9795_v28  ;;  %v1924_v28 = vld [vmem:[%s15776_s3 + $0x528] sm:$0xff] }
 0x101   :  { %4566 = vmatpush1.bf16.msra.mxu1 %v9883_v33  ;;  %v9828_v33 = vld [vmem:[%s15777_s4 + $0x1b4] ss:$24 sps:$4 sm:$0xff]  }
 0x102   :  { %1671 = vmatmul.mubr.bf16.vlgmr.msra.gmra.mrb[16].mxu0 %v10865_v39  ;;  %v1875_v39 = vld [vmem:[%s15776_s3 + $0x3a0] sm:$0xff]  ;;  %5667 = vmatprep.subr.bf16.mxu1 %v9891_v51 }
 0x103   :  { %4365 = vmatmul.mubr.bf16.gmra.mrb[48].mxu1 %v11478_v9  ;;  %3970 = vmatpush1.bf16.msra.mxu0 %v9793_v34  ;;  %v11625_v34 = vpack.c.bf16 %v1924_v28, %v1918_v27  ;;  %v1765_v27 = vld [vmem:[%s15776_s3 + $0x30] sm:$0xff] }
 0x104   :  { %1680 = vmatprep.mubr.bf16.mxu0 %v10885_v46  ;;  %3971 = vmatprep.subr.bf16.mxu0 %v9798_v35  ;;  %v11510_v46 = vpack.c.bf16 %v1875_v39, %v1869_v43  ;;  %v9826_v35 = vld [vmem:[%s15777_s4 + $0x1b0] ss:$24 sps:$4 sm:$0xff]   ;;  %v9834_v43 = vld [vmem:[%s15777_s4 + $0x1e4] ss:$24 sps:$4 sm:$0xff]  }
 0x105   :  { %4374 = vmatprep.mubr.bf16.mxu1 %v11486_v36  ;;  %16066 = vst [vmem:[#allocation34_spill] sm:$0xff] %v11625_v34  ;;  %v1930_v39 = vld [vmem:[%s15776_s3 + $0x558] sm:$0xff]  ;;  %v1953_v28 = vld [vmem:[%s15776_s3 + $0x610] sm:$0xff] }
 0x106   :  { %16059 = vst [vmem:[#allocation27_spill] sm:$0xff] %v11510_v46  ;;  %v11655_v51 = vpack.c.bf16 %v1936_v44, %v1930_v39 }
 0x107   :  { %3972 = vmatpush1.bf16.msra.mxu0 %v9796_v41  ;;  %v1917_v41 = vld [vmem:[%s15776_s3 + $0x4f0] sm:$0xff] }
 0x108   :  { %3973 = vmatprep.subr.bf16.mxu0 %v9801_v23  ;;  %v1923_v23 = vld [vmem:[%s15776_s3 + $0x520] sm:$0xff]  ;;  %16068 = vst [vmem:[#allocation36_spill] sm:$0xff] %v11655_v51 }
 0x109   :  { %v11647_v45 = vpack.c.bf16 %v1923_v23, %v1917_v41  ;;  %v1778_v41 = vld [vmem:[%s15776_s3 + $0x98] sm:$0xff] }
 0x10a   :  { %1681 = vmatmul.mubr.bf16.gmra.mrb[20].mxu0 %v10909_v56  ;;  %v1887_v56 = vld [vmem:[%s15776_s3 + $0x400] sm:$0xff]  ;;  %v1966_v23 = vld [vmem:[%s15776_s3 + $0x678] sm:$0xff] }
 0x10b   :  { %4375 = vmatmul.mubr.bf16.gmra.mrb[52].mxu1 %v11510_v46  ;;  %3974 = vmatpush1.bf16.msra.mxu0 %v9799_v48  ;;  %v11545_v61 = vpack.c.bf16 %v1887_v56, %v1881_v55  ;;  %16067 = vst [vmem:[#allocation35_spill] sm:$0xff] %v11647_v45  ;;  %v9832_v48 = vld [vmem:[%s15777_s4 + $0x1e0] ss:$24 sps:$4 sm:$0xff]   ;;  %v9840_v55 = vld [vmem:[%s15777_s4 + $0x244] ss:$24 sps:$4 sm:$0xff]   ;;  %v1929_v56 = vld [vmem:[%s15776_s3 + $0x550] sm:$0xff] }
 0x10c   :  { %1690 = vmatprep.mubr.bf16.mxu0 %v10926_v63  ;;  %3975 = vmatprep.subr.bf16.mxu0 %v9807_v49  ;;  %v1900_v63 = vld [vmem:[%s15776_s3 + $0x468] sm:$0xff] }
 0x10d   :  { %4384 = vmatprep.mubr.bf16.mxu1 %v11518_v24  ;;  %16061 = vst [vmem:[#allocation29_spill] sm:$0xff] %v11545_v61  ;;  %v11553_v2 = vpack.c.bf16 %v1900_v63, %v1894_v59  ;;  %v9837_v49 = vld [vmem:[%s15777_s4 + $0x214] ss:$24 sps:$4 sm:$0xff]   ;;  %v1942_v59 = vld [vmem:[%s15776_s3 + $0x5b8] sm:$0xff] }
 0x10e   :  { %v1948_v63 = vld [vmem:[%s15776_s3 + $0x5e8] sm:$0xff] }
 0x10f   :  { %3976 = vmatpush1.bf16.msra.mxu0 %v9805_v54  ;;  %16062 = vst [vmem:[#allocation30_spill] sm:$0xff] %v11553_v2  ;;  %v9835_v54 = vld [vmem:[%s15777_s4 + $0x210] ss:$24 sps:$4 sm:$0xff]  }
 0x110   :  { %3977 = vmatprep.subr.bf16.mxu0 %v9810_v32  ;;  %v1935_v32 = vld [vmem:[%s15776_s3 + $0x580] sm:$0xff] }
 0x112   :  { %1691 = vmatmul.mubr.bf16.gmra.mrb[24].mxu0 %v10947_v5  ;;  %v1899_v5 = vld [vmem:[%s15776_s3 + $0x460] sm:$0xff] }
 0x113   :  { %4385 = vmatmul.mubr.bf16.gmra.mrb[56].mxu1 %v11545_v61  ;;  %3978 = vmatpush1.bf16.msra.mxu0 %v9808_v0  ;;  %v11583_v11 = vpack.c.bf16 %v1899_v5, %v1893_v6  ;;  %v11677_v0 = vpack.c.bf16 %v1935_v32, %v1929_v56  ;;  %v9844_v6 = vld [vmem:[%s15777_s4 + $0x270] ss:$24 sps:$4 sm:$0xff]   ;;  %v9849_v5 = vld [vmem:[%s15777_s4 + $0x2a4] ss:$24 sps:$4 sm:$0xff]  }
 0x114   :  { %1700 = vmatprep.mubr.bf16.mxu0 %v10970_v14  ;;  %3979 = vmatprep.subr.bf16.mxu0 %v9813_v1  ;;  %v1766_v14 = vld [vmem:[%s15776_s3 + $0x38] sm:$0xff]  ;;  %v1771_v56 = vld [vmem:[%s15776_s3 + $0x60] sm:$0xff]  ;;  %v1777_v32 = vld [vmem:[%s15776_s3 + $0x90] sm:$0xff] }
 0x115   :  { %4394 = vmatprep.mubr.bf16.mxu1 %v11553_v2  ;;  %16063 = vst [vmem:[#allocation31_spill] sm:$0xff] %v11583_v11  ;;  %v11593_v17 = vpack.c.bf16 %v1766_v14, %v1760_v10  ;;  %16069 = vst [vmem:[#allocation37_spill] sm:$0xff] %v11677_v0  ;;  %v9838_v1 = vld [vmem:[%s15777_s4 + $0x240] ss:$24 sps:$4 sm:$0xff]   ;;  %v1960_v14 = vld [vmem:[%s15776_s3 + $0x648] sm:$0xff] }
 0x116   :  { %v1954_v10 = vld [vmem:[%s15776_s3 + $0x618] sm:$0xff] }
 0x117   :  { %3980 = vmatpush1.bf16.msra.mxu0 %v9811_v37  ;;  %v9846_v37 = vld [vmem:[%s15777_s4 + $0x274] ss:$24 sps:$4 sm:$0xff]  }
 0x118   :  { %3981 = vmatprep.subr.bf16.mxu0 %v9816_v3  ;;  %v11685_v3 = vpack.c.bf16 %v1948_v63, %v1942_v59  ;;  %v1965_v59 = vld [vmem:[%s15776_s3 + $0x670] sm:$0xff]  ;;  %v1971_v63 = vld [vmem:[%s15776_s3 + $0x6a0] sm:$0xff] }
 0x11a   :  { %1701 = vmatmul.mubr.bf16.gmra.mrb[28].mxu0 %v10991_v20  ;;  %v1911_v20 = vld [vmem:[%s15776_s3 + $0x4c0] sm:$0xff]  ;;  %16070 = vst [vmem:[#allocation38_spill] sm:$0xff] %v11685_v3 }
 0x11b   :  { %4395 = vmatmul.mubr.bf16.gmra.mrb[60].mxu1 %v11583_v11  ;;  %3982 = vmatpush1.bf16.msra.mxu0 %v9814_v13  ;;  %v11617_v30 = vpack.c.bf16 %v1911_v20, %v1905_v60  ;;  %v11707_v13 = vpack.c.bf16 %v1947_v47, %v1941_v8  ;;  %v9850_v60 = vld [vmem:[%s15777_s4 + $0x2d0] ss:$24 sps:$4 sm:$0xff]   ;;  %v1759_v20 = vld [vmem:[%s15776_s3] sm:$0xff] }
 0x11c   :  { %4404 = vmatprep.mubr.bf16.mxu1 %v11591_v16  ;;  %3983 = vmatprep.subr.bf16.mxu0 %v9822_v15  ;;  %v9847_v15 = vld [vmem:[%s15777_s4 + $0x2a0] ss:$24 sps:$4 sm:$0xff]   ;;  %v11749_v39 = vpack.c.bf16 %v1765_v27, %v1759_v20  ;;  %v1984_v8 = vld [vmem:[%s15776_s3 + $0x708] sm:$0xff]  ;;  %v9876_v27 = vld [vmem:[%s15777_s4 + $0x9c] ss:$24 sps:$4 sm:$0xff]  }
 0x11d   :  { %4001 = vmatprep.mubr.bf16.mxu0 %v11593_v17  ;;  %16065 = vst [vmem:[#allocation33_spill] sm:$0xff] %v11617_v30  ;;  %16071 = vst [vmem:[#allocation39_spill] sm:$0xff] %v11707_v13  ;;  %v9870_v47 = vld [vmem:[%s15777_s4 + $0x6c] ss:$24 sps:$4 sm:$0xff]   ;;  %v9868_v20 = vld [vmem:[%s15777_s4 + $0x68] ss:$24 sps:$4 sm:$0xff]  }
 0x11f   :  { %3984 = vmatpush1.bf16.msra.mxu0 %v9820_v21  ;;  %v9852_v21 = vld [vmem:[%s15777_s4 + $0x2d4] ss:$24 sps:$4 sm:$0xff]  }
 0x120   :  { %3985 = vmatprep.subr.bf16.mxu0 %v9825_v22  ;;  %v11715_v22 = vpack.c.bf16 %v1960_v14, %v1954_v10  ;;  %v283_v10 = vlaneseq  ;;  %v11797_v14 = vpack.c.bf16 %v1777_v32, %v1771_v56  ;;  %v9874_v56 = vld [vmem:[%s15777_s4 + $0x98] ss:$24 sps:$4 sm:$0xff]   ;;  %v9882_v32 = vld [vmem:[%s15777_s4 + $0xcc] ss:$24 sps:$4 sm:$0xff]  }
 0x122   :  { %16072 = vst [vmem:[#allocation40_spill] sm:$0xff] %v11715_v22 }
 0x123   :  { %4405 = vmatmul.mubr.bf16.gmra.mrb[64].mxu1 %v11617_v30  ;;  %3986 = vmatpush1.bf16.msra.mxu0 %v9823_v31  ;;  %v1959_v31 = vld [vmem:[%s15776_s3 + $0x640] sm:$0xff] }
 0x124   :  { %4414 = vmatprep.mubr.bf16.mxu1 %v11625_v34  ;;  %3987 = vmatprep.subr.bf16.mxu0 %v9828_v33  ;;  %v9858_v33 = vld [vmem:[%s15777_s4 + $0xc] ss:$24 sps:$4 sm:$0xff]   ;;  %v11751_v44 = vpack.c.bf16 %v1959_v31, %v1953_v28  ;;  %v1789_v31 = vld [vmem:[%s15776_s3 + $0xf0] sm:$0xff] }
 0x125   :  { %v1783_v28 = vld [vmem:[%s15776_s3 + $0xc0] sm:$0xff] }
 0x126   :  { %16073 = vst [vmem:[#allocation41_spill] sm:$0xff] %v11751_v44 }
 0x127   :  { %3988 = vmatpush1.bf16.msra.mxu0 %v9826_v35  ;;  %v1772_v35 = vld [vmem:[%s15776_s3 + $0x68] sm:$0xff] }
 0x128   :  { %3989 = vmatprep.subr.bf16.mxu0 %v9834_v43  ;;  %v1972_v43 = vld [vmem:[%s15776_s3 + $0x6a8] sm:$0xff] }
 0x12b   :  { %4415 = vmatmul.mubr.bf16.gmra.mrb[68].mxu1 %v11647_v45  ;;  %3990 = vmatpush1.bf16.msra.mxu0 %v9832_v48  ;;  %v9856_v48 = vld [vmem:[%s15777_s4 + $0x8] ss:$24 sps:$4 sm:$0xff]  }
 0x12c   :  { %4424 = vmatprep.mubr.bf16.mxu1 %v11655_v51  ;;  %3991 = vmatprep.subr.bf16.mxu0 %v9837_v49  ;;  %v11756_v49 = vpack.c.bf16 %v1778_v41, %v1772_v35  ;;  %v1977_v35 = vld [vmem:[%s15776_s3 + $0x6d0] sm:$0xff]  ;;  %v1983_v41 = vld [vmem:[%s15776_s3 + $0x700] sm:$0xff] }
 0x12f   :  { %3992 = vmatpush1.bf16.msra.mxu0 %v9835_v54  ;;  %v9864_v54 = vld [vmem:[%s15777_s4 + $0x3c] ss:$24 sps:$4 sm:$0xff]  }
 0x130   :  { %3993 = vmatprep.subr.bf16.mxu0 %v9840_v55  ;;  %v11761_v55 = vpack.c.bf16 %v1972_v43, %v1966_v23  ;;  %v1796_v23 = vld [vmem:[%s15776_s3 + $0x128] sm:$0xff]  ;;  %v1802_v43 = vld [vmem:[%s15776_s3 + $0x158] sm:$0xff] }
 0x132   :  { %16074 = vst [vmem:[#allocation42_spill] sm:$0xff] %v11761_v55 }
 0x133   :  { %4425 = vmatmul.mubr.bf16.gmra.mrb[72].mxu1 %v11677_v0  ;;  %3994 = vmatpush1.bf16.msra.mxu0 %v9838_v1  ;;  %v9862_v1 = vld [vmem:[%s15777_s4 + $0x38] ss:$24 sps:$4 sm:$0xff]  }
 0x134   :  { %4434 = vmatprep.mubr.bf16.mxu1 %v11685_v3  ;;  %3995 = vmatprep.subr.bf16.mxu0 %v9846_v37  ;;  %v1784_v37 = vld [vmem:[%s15776_s3 + $0xc8] sm:$0xff] }
 0x137   :  { %3996 = vmatpush1.bf16.msra.mxu0 %v9844_v6  ;;  %v1790_v6 = vld [vmem:[%s15776_s3 + $0xf8] sm:$0xff] }
 0x138   :  { %3997 = vmatprep.subr.bf16.mxu0 %v9849_v5  ;;  %v1978_v5 = vld [vmem:[%s15776_s3 + $0x6d8] sm:$0xff] }
 0x13b   :  { %4435 = vmatmul.mubr.bf16.gmra.mrb[76].mxu1 %v11707_v13  ;;  %3998 = vmatpush1.bf16.msra.mxu0 %v9847_v15  ;;  %v11799_v15 = vpack.c.bf16 %v1971_v63, %v1965_v59  ;;  %v281_v59 = vld [vmem:[%s15775_s2] sm:$0x3f] }
 0x13c   :  { %4444 = vmatprep.mubr.bf16.mxu1 %v11715_v22  ;;  %3999 = vmatprep.subr.bf16.mxu0 %v9852_v21  ;;  %v11801_v21 = vpack.c.bf16 %v1790_v6, %v1784_v37  ;;  %v11855_v37 = vpack.c.bf16 %v1983_v41, %v1977_v35  ;;  %v1989_v35 = vld [vmem:[%s15776_s3 + $0x730] sm:$0xff]  ;;  %v1995_v41 = vld [vmem:[%s15776_s3 + $0x760] sm:$0xff] }
 0x13d   :  { %16075 = vst [vmem:[#allocation43_spill] sm:$0xff] %v11799_v15  ;;  %v11926_v45 = vpack.c.bf16 %v1995_v41, %v1989_v35  ;;  %v2020_v35 = vld [vmem:[%s15776_s3 + $0x828] sm:$0xff]  ;;  %v9898_v41 = vld [vmem:[%s15777_s4 + $0x158] ss:$24 sps:$4 sm:$0xff]  }
 0x13e   :  { %16078 = vst [vmem:[#allocation46_spill] sm:$0xff] %v11855_v37 }
 0x13f   :  { %4000 = vmatpush1.bf16.msra.mxu0 %v9850_v60  ;;  %v11803_v60 = vpack.c.bf16 %v1984_v8, %v1978_v5  ;;  %16083 = vst [vmem:[#allocation51_spill] sm:$0xff] %v11926_v45 }
 0x140   :  { %4818 = vmatprep.subr.bf16.mxu0 %v9858_v33  ;;  %v11817_v33 = vshrl.u32 %v283_v10, 7 }
 0x141   :  { %16076 = vst [vmem:[#allocation44_spill] sm:$0xff] %v11803_v60 }
 0x142   :  { %4002 = vmatmul.mubr.bf16.vlgmr.msra.gmra.mrb[32].mxu0 %v11749_v39  ;;  %v11851_v63 = vsub.s32 0, %v11817_v33  ;;  %v11858_v6 = vsub.s32 2, %v11817_v33  ;;  %v11861_v5 = vsub.s32 1, %v11817_v33  ;;  %v11864_v8 = vsub.s32 3, %v11817_v33 }
 0x143   :  { %4445 = vmatmul.mubr.bf16.gmra.mrb[80].mxu1 %v11751_v44  ;;  %4819 = vmatpush1.bf16.msra.mxu0 %v9856_v48  ;;  %v1990_v48 = vld [vmem:[%s15776_s3 + $0x738] sm:$0xff] }
 0x144   :  { %4011 = vmatprep.mubr.bf16.mxu0 %v11756_v49  ;;  %4454 = vmatprep.mubr.bf16.mxu1 %v11761_v55  ;;  %16077 = vst [vmem:[#allocation45_spill] sm:$0xff] %v11851_v63  ;;  %16079 = vst [vmem:[#allocation47_spill] sm:$0xff] %v11858_v6  ;;  %v9894_v55 = vld [vmem:[%s15777_s4 + $0x12c] ss:$24 sps:$4 sm:$0xff]  }
 0x145   :  { %4820 = vmatprep.subr.bf16.mxu0 %v9864_v54  ;;  %v1996_v54 = vld [vmem:[%s15776_s3 + $0x768] sm:$0xff]  ;;  %16080 = vst [vmem:[#allocation48_spill] sm:$0xff] %v11861_v5  ;;  %16081 = vst [vmem:[#allocation49_spill] sm:$0xff] %v11864_v8 }
 0x146   :  { %v11868_v10 = vpack.c.bf16 %v1996_v54, %v1990_v48  ;;  %v1808_v48 = vld [vmem:[%s15776_s3 + $0x188] sm:$0xff]  ;;  %v1814_v54 = vld [vmem:[%s15776_s3 + $0x1b8] sm:$0xff] }
 0x147   :  { %4821 = vmatpush1.bf16.msra.mxu0 %v9862_v1  ;;  %v11853_v1 = vpack.c.bf16 %v1789_v31, %v1783_v28  ;;  %v1795_v28 = vld [vmem:[%s15776_s3 + $0x120] sm:$0xff]  ;;  %v1801_v31 = vld [vmem:[%s15776_s3 + $0x150] sm:$0xff] }
 0x148   :  { %4822 = vmatprep.subr.bf16.mxu0 %v9870_v47  ;;  %v11866_v47 = vpack.c.bf16 %v1802_v43, %v1796_v23  ;;  %16082 = vst [vmem:[#allocation50_spill] sm:$0xff] %v11868_v10  ;;  %v11891_v23 = vrot.slane %v281_v59, %v11851_v63  ;;  %v11894_v43 = vrot.slane %v281_v59, %v11858_v6 }
 0x14a   :  { %4012 = vmatmul.mubr.bf16.gmra.mrb[36].mxu0 %v11797_v14 }
 0x14b   :  { %4455 = vmatmul.mubr.bf16.gmra.mrb[84].mxu1 %v11799_v15  ;;  %4021 = vmatprep.mubr.bf16.mxu0 %v11801_v21  ;;  %v11915_v15 = vrot.slane %v281_v59, %v11864_v8 }
 0x14c   :  { %4464 = vmatprep.mubr.bf16.mxu1 %v11803_v60  ;;  %4823 = vmatpush1.bf16.msra.mxu0 %v9868_v20  ;;  %v9880_v20 = vld [vmem:[%s15777_s4 + $0xc8] ss:$24 sps:$4 sm:$0xff]   ;;  %v11912_v60 = vrot.slane %v281_v59, %v11861_v5  ;;  %v11924_v59 = vpack.c.bf16 %v1801_v31, %v1795_v28 }
 0x14d   :  { %4824 = vmatprep.subr.bf16.mxu0 %v9876_v27  ;;  %v9888_v27 = vld [vmem:[%s15777_s4 + $0xfc] ss:$24 sps:$4 sm:$0xff]  }
 0x150   :  { %4825 = vmatpush1.bf16.msra.mxu0 %v9874_v56  ;;  %v2002_v56 = vld [vmem:[%s15776_s3 + $0x798] sm:$0xff] }
 0x151   :  { %4826 = vmatprep.subr.bf16.mxu0 %v9882_v32  ;;  %v2008_v32 = vld [vmem:[%s15776_s3 + $0x7c8] sm:$0xff] }
 0x152   :  { %4022 = vmatmul.mubr.bf16.gmra.mrb[40].mxu0 %v11853_v1  ;;  %v11932_v11 = vpack.c.bf16 %v2008_v32, %v2002_v56 }
 0x153   :  { %4465 = vmatmul.mubr.bf16.gmra.mrb[88].mxu1 %v11855_v37  ;;  %v9886_v37 = vld [vmem:[%s15777_s4 + $0xf8] ss:$24 sps:$4 sm:$0xff]   ;;  %4031 = vmatprep.mubr.bf16.mxu0 %v11866_v47 }
 0x154   :  { %4474 = vmatprep.mubr.bf16.mxu1 %v11868_v10  ;;  %4827 = vmatpush1.bf16.msra.mxu0 %v9880_v20  ;;  %v11930_v20 = vpack.c.bf16 %v1814_v54, %v1808_v48  ;;  %16084 = vst [vmem:[#allocation52_spill] sm:$0xff] %v11932_v11  ;;  %v9906_v48 = vld [vmem:[%s15777_s4 + $0x18c] ss:$24 sps:$4 sm:$0xff]  }
 0x155   :  { %v1380_v44 = vpop.f32.mrb[0].mxu0  ;;  %4828 = vmatprep.subr.bf16.mxu0 %v9888_v27 }
 0x156   :  { %v1526_v22 = vpop.f32.mrb[0].mxu1  ;;  %v8439_v13 = vadd.f32 %v1380_v44, %v11891_v23  ;;  %v1382_v0 = vpop.f32.mrb[1].mxu0 }
 0x157   :  { %v8455_v3 = vadd.f32 %v1526_v22, %v11894_v43  ;;  %v1528_v51 = vpop.f32.mrb[1].mxu1  ;;  %v8440_v10 = vadd.f32 %v1382_v0, %v11912_v60  ;;  %v1384_v30 = vpop.f32.mrb[2].mxu0  ;;  %v9892_v0 = vld [vmem:[%s15777_s4 + $0x128] ss:$24 sps:$4 sm:$0xff]  }
 0x158   :  { %v8456_v34 = vadd.f32 %v1528_v51, %v11915_v15  ;;  %v1530_v16 = vpop.f32.mrb[2].mxu1  ;;  %1711 = vst [vmem:[#allocation2] sm:$0xff] %v8439_v13  ;;  %v8441_v22 = vadd.f32 %v1384_v30, %v11891_v23  ;;  %v1386_v27 = vpop.f32.mrb[3].mxu0  ;;  %4829 = vmatpush1.bf16.msra.mxu0 %v9886_v37  ;;  %v2001_v30 = vld [vmem:[%s15776_s3 + $0x790] sm:$0xff]  ;;  %v1820_v37 = vld [vmem:[%s15776_s3 + $0x1e8] sm:$0xff] }
 0x159   :  { %1713 = vst [vmem:[#allocation2 + $0x10] sm:$0xff] %v8455_v3  ;;  %v8457_v44 = vadd.f32 %v1530_v16, %v11894_v43  ;;  %v1532_v28 = vpop.f32.mrb[3].mxu1  ;;  %1712 = vst [vmem:[#allocation2 + $0x8] sm:$0xff] %v8440_v10  ;;  %v8442_v51 = vadd.f32 %v1386_v27, %v11912_v60  ;;  %v1807_v3 = vld [vmem:[%s15776_s3 + $0x180] sm:$0xff]  ;;  %v1813_v16 = vld [vmem:[%s15776_s3 + $0x1b0] sm:$0xff]  ;;  %4830 = vmatprep.subr.bf16.mxu0 %v9894_v55 }
 0x15a   :  { %1714 = vst [vmem:[#allocation2 + $0x18] sm:$0xff] %v8456_v34  ;;  %v8458_v31 = vadd.f32 %v1532_v28, %v11915_v15  ;;  %v2007_v34 = vld [vmem:[%s15776_s3 + $0x7c0] sm:$0xff]  ;;  %v9900_v13 = vld [vmem:[%s15777_s4 + $0x15c] ss:$24 sps:$4 sm:$0xff]   ;;  %1717 = vst [vmem:[#allocation2 + $0x30] sm:$0xff] %v8441_v22  ;;  %4032 = vmatmul.mubr.bf16.gmra.mrb[44].mxu0 %v11924_v59  ;;  %v11980_v28 = vpack.c.bf16 %v1813_v16, %v1807_v3 }
 0x15b   :  { %1719 = vst [vmem:[#allocation2 + $0x40] sm:$0xff] %v8457_v44  ;;  %4475 = vmatmul.mubr.bf16.gmra.mrb[92].mxu1 %v11926_v45  ;;  %v1826_v10 = vld [vmem:[%s15776_s3 + $0x218] sm:$0xff]  ;;  %1718 = vst [vmem:[#allocation2 + $0x38] sm:$0xff] %v8442_v51  ;;  %4041 = vmatprep.mubr.bf16.mxu0 %v11930_v20  ;;  %v11982_v51 = vpack.c.bf16 %v2007_v34, %v2001_v30 }
 0x15c   :  { %v2014_v55 = vld [vmem:[%s15776_s3 + $0x7f8] sm:$0xff]  ;;  %1720 = vst [vmem:[#allocation2 + $0x48] sm:$0xff] %v8458_v31  ;;  %4484 = vmatprep.mubr.bf16.mxu1 %v11932_v11  ;;  %4831 = vmatpush1.bf16.msra.mxu0 %v9892_v0  ;;  %v11986_v0 = vpack.c.bf16 %v1826_v10, %v1820_v37 }
 0x15d   :  { %v1390_v54 = vpop.f32.mrb[4].mxu0  ;;  %4832 = vmatprep.subr.bf16.mxu0 %v9900_v13  ;;  %16085 = vst [vmem:[#allocation53_spill] sm:$0xff] %v11982_v51  ;;  %v11988_v61 = vpack.c.bf16 %v2020_v35, %v2014_v55  ;;  %v9904_v13 = vld [vmem:[%s15777_s4 + $0x188] ss:$24 sps:$4 sm:$0xff]   ;;  %v9912_v37 = vld [vmem:[%s15777_s4 + $0x1bc] ss:$24 sps:$4 sm:$0xff]  }
 0x15e   :  { %v1536_v56 = vpop.f32.mrb[4].mxu1  ;;  %v8443_v32 = vadd.f32 %v1390_v54, %v11891_v23  ;;  %v1392_v44 = vpop.f32.mrb[5].mxu0  ;;  %v1819_v35 = vld [vmem:[%s15776_s3 + $0x1e0] sm:$0xff]  ;;  %v1838_v54 = vld [vmem:[%s15776_s3 + $0x278] sm:$0xff] }
 0x15f   :  { %v8459_v22 = vadd.f32 %v1536_v56, %v11894_v43  ;;  %v1538_v27 = vpop.f32.mrb[5].mxu1  ;;  %v8444_v31 = vadd.f32 %v1392_v44, %v11912_v60  ;;  %v1394_v45 = vpop.f32.mrb[6].mxu0  ;;  %16086 = vst [vmem:[#allocation54_spill] sm:$0xff] %v11988_v61  ;;  %v2026_v56 = vld [vmem:[%s15776_s3 + $0x858] sm:$0xff] }
 0x160   :  { %v8460_v11 = vadd.f32 %v1538_v27, %v11915_v15  ;;  %v1540_v2 = vpop.f32.mrb[6].mxu1  ;;  %1723 = vst [vmem:[#allocation2 + $0x60] sm:$0xff] %v8443_v32  ;;  %v8445_v3 = vadd.f32 %v1394_v45, %v11891_v23  ;;  %v1396_v30 = vpop.f32.mrb[7].mxu0  ;;  %4833 = vmatpush1.bf16.msra.mxu0 %v9898_v41  ;;  %v2013_v45 = vld [vmem:[%s15776_s3 + $0x7f0] sm:$0xff]  ;;  %v1832_v41 = vld [vmem:[%s15776_s3 + $0x248] sm:$0xff] }
 0x161   :  { %1725 = vst [vmem:[#allocation2 + $0x70] sm:$0xff] %v8459_v22  ;;  %v8461_v16 = vadd.f32 %v1540_v2, %v11894_v43  ;;  %v1542_v34 = vpop.f32.mrb[7].mxu1  ;;  %1724 = vst [vmem:[#allocation2 + $0x68] sm:$0xff] %v8444_v31  ;;  %v8446_v10 = vadd.f32 %v1396_v30, %v11912_v60  ;;  %v1825_v2 = vld [vmem:[%s15776_s3 + $0x210] sm:$0xff]  ;;  %4834 = vmatprep.subr.bf16.mxu0 %v9906_v48  ;;  %v2032_v48 = vld [vmem:[%s15776_s3 + $0x888] sm:$0xff] }
 0x162   :  { %1726 = vst [vmem:[#allocation2 + $0x78] sm:$0xff] %v8460_v11  ;;  %v8462_v55 = vadd.f32 %v1542_v34, %v11915_v15  ;;  %v2019_v11 = vld [vmem:[%s15776_s3 + $0x820] sm:$0xff]  ;;  %1729 = vst [vmem:[#allocation2 + $0x90] sm:$0xff] %v8445_v3  ;;  %4042 = vmatmul.mubr.bf16.gmra.mrb[48].mxu0 %v11980_v28  ;;  %v9910_v32 = vld [vmem:[%s15777_s4 + $0x1b8] ss:$24 sps:$4 sm:$0xff]   ;;  %v12036_v34 = vpack.c.bf16 %v1825_v2, %v1819_v35  ;;  %v12044_v46 = vpack.c.bf16 %v2032_v48, %v2026_v56 }
 0x163   :  { %1731 = vst [vmem:[#allocation2 + $0xa0] sm:$0xff] %v8461_v16  ;;  %4485 = vmatmul.mubr.bf16.gmra.mrb[96].mxu1 %v11982_v51  ;;  %1730 = vst [vmem:[#allocation2 + $0x98] sm:$0xff] %v8446_v10  ;;  %4051 = vmatprep.mubr.bf16.mxu0 %v11986_v0  ;;  %v9918_v22 = vld [vmem:[%s15777_s4 + $0x1ec] ss:$24 sps:$4 sm:$0xff]   ;;  %v12038_v10 = vpack.c.bf16 %v2019_v11, %v2013_v45  ;;  %v9916_v45 = vld [vmem:[%s15777_s4 + $0x1e8] ss:$24 sps:$4 sm:$0xff]  }
 0x164   :  { %1732 = vst [vmem:[#allocation2 + $0xa8] sm:$0xff] %v8462_v55  ;;  %4494 = vmatprep.mubr.bf16.mxu1 %v11988_v61  ;;  %4835 = vmatpush1.bf16.msra.mxu0 %v9904_v13  ;;  %v12042_v13 = vpack.c.bf16 %v1838_v54, %v1832_v41  ;;  %16088 = vst [vmem:[#allocation56_spill] sm:$0xff] %v12044_v46  ;;  %v1831_v54 = vld [vmem:[%s15776_s3 + $0x240] sm:$0xff]  ;;  %v9924_v56 = vld [vmem:[%s15777_s4 + $0x21c] ss:$24 sps:$4 sm:$0xff]  }
 0x165   :  { %v1400_v44 = vpop.f32.mrb[8].mxu0  ;;  %4836 = vmatprep.subr.bf16.mxu0 %v9912_v37  ;;  %16087 = vst [vmem:[#allocation55_spill] sm:$0xff] %v12038_v10  ;;  %v1844_v48 = vld [vmem:[%s15776_s3 + $0x2a8] sm:$0xff] }
 0x166   :  { %v1546_v27 = vpop.f32.mrb[8].mxu1  ;;  %v8447_v31 = vadd.f32 %v1400_v44, %v11891_v23  ;;  %v1402_v16 = vpop.f32.mrb[9].mxu0 }
 0x167   :  { %v8463_v3 = vadd.f32 %v1546_v27, %v11894_v43  ;;  %v1548_v30 = vpop.f32.mrb[9].mxu1  ;;  %v8448_v55 = vadd.f32 %v1402_v16, %v11912_v60  ;;  %v1404_v51 = vpop.f32.mrb[10].mxu0  ;;  %v2044_v27 = vld [vmem:[%s15776_s3 + $0x8e8] sm:$0xff] }
 0x168   :  { %v8464_v61 = vadd.f32 %v1548_v30, %v11915_v15  ;;  %v1550_v24 = vpop.f32.mrb[10].mxu1  ;;  %1735 = vst [vmem:[#allocation2 + $0xc0] sm:$0xff] %v8447_v31  ;;  %v8449_v37 = vadd.f32 %v1404_v51, %v11891_v23  ;;  %v1406_v35 = vpop.f32.mrb[11].mxu0  ;;  %4837 = vmatpush1.bf16.msra.mxu0 %v9910_v32  ;;  %v2025_v51 = vld [vmem:[%s15776_s3 + $0x850] sm:$0xff]  ;;  %v1850_v32 = vld [vmem:[%s15776_s3 + $0x2d8] sm:$0xff] }
 0x169   :  { %1737 = vst [vmem:[#allocation2 + $0xd0] sm:$0xff] %v8463_v3  ;;  %v8465_v44 = vadd.f32 %v1550_v24, %v11894_v43  ;;  %v1552_v2 = vpop.f32.mrb[11].mxu1  ;;  %1736 = vst [vmem:[#allocation2 + $0xc8] sm:$0xff] %v8448_v55  ;;  %v8450_v11 = vadd.f32 %v1406_v35, %v11912_v60  ;;  %v1837_v24 = vld [vmem:[%s15776_s3 + $0x270] sm:$0xff]  ;;  %4838 = vmatprep.subr.bf16.mxu0 %v9918_v22  ;;  %v2038_v22 = vld [vmem:[%s15776_s3 + $0x8b8] sm:$0xff] }
 0x16a   :  { %1738 = vst [vmem:[#allocation2 + $0xd8] sm:$0xff] %v8464_v61  ;;  %v8466_v41 = vadd.f32 %v1552_v2, %v11915_v15  ;;  %v2031_v61 = vld [vmem:[%s15776_s3 + $0x880] sm:$0xff]  ;;  %1741 = vst [vmem:[#allocation2 + $0xf0] sm:$0xff] %v8449_v37  ;;  %4052 = vmatmul.mubr.bf16.gmra.mrb[52].mxu0 %v12036_v34  ;;  %v9922_v31 = vld [vmem:[%s15777_s4 + $0x218] ss:$24 sps:$4 sm:$0xff]   ;;  %v12092_v2 = vpack.c.bf16 %v1837_v24, %v1831_v54  ;;  %v12100_v9 = vpack.c.bf16 %v2044_v27, %v2038_v22 }
 0x16b   :  { %1743 = vst [vmem:[#allocation2 + $0x100] sm:$0xff] %v8465_v44  ;;  %4495 = vmatmul.mubr.bf16.gmra.mrb[100].mxu1 %v12038_v10  ;;  %1742 = vst [vmem:[#allocation2 + $0xf8] sm:$0xff] %v8450_v11  ;;  %4061 = vmatprep.mubr.bf16.mxu0 %v12042_v13  ;;  %v9930_v3 = vld [vmem:[%s15777_s4 + $0x24c] ss:$24 sps:$4 sm:$0xff]   ;;  %v12094_v11 = vpack.c.bf16 %v2031_v61, %v2025_v51  ;;  %v9928_v51 = vld [vmem:[%s15777_s4 + $0x248] ss:$24 sps:$4 sm:$0xff]  }
 0x16c   :  { %1744 = vst [vmem:[#allocation2 + $0x108] sm:$0xff] %v8466_v41  ;;  %4504 = vmatprep.mubr.bf16.mxu1 %v12044_v46  ;;  %4839 = vmatpush1.bf16.msra.mxu0 %v9916_v45  ;;  %16089 = vst [vmem:[#allocation57_spill] sm:$0xff] %v12092_v2  ;;  %v12098_v45 = vpack.c.bf16 %v1850_v32, %v1844_v48  ;;  %v1843_v32 = vld [vmem:[%s15776_s3 + $0x2a0] sm:$0xff]  ;;  %v2056_v22 = vld [vmem:[%s15776_s3 + $0x948] sm:$0xff] }
 0x16d   :  { %v1410_v16 = vpop.f32.mrb[12].mxu0  ;;  %4840 = vmatprep.subr.bf16.mxu0 %v9924_v56  ;;  %16090 = vst [vmem:[#allocation58_spill] sm:$0xff] %v12094_v11  ;;  %16092 = vst [vmem:[#allocation60_spill] sm:$0xff] %v12100_v9  ;;  %v9934_v27 = vld [vmem:[%s15777_s4 + $0x278] ss:$24 sps:$4 sm:$0xff]  }
 0x16e   :  { %v1556_v30 = vpop.f32.mrb[12].mxu1  ;;  %v8451_v55 = vadd.f32 %v1410_v16, %v11891_v23  ;;  %v1412_v44 = vpop.f32.mrb[13].mxu0  ;;  %16091 = vst [vmem:[#allocation59_spill] sm:$0xff] %v12098_v45 }
 0x16f   :  { %v8467_v37 = vadd.f32 %v1556_v30, %v11894_v43  ;;  %v1558_v35 = vpop.f32.mrb[13].mxu1  ;;  %v8452_v41 = vadd.f32 %v1412_v44, %v11912_v60  ;;  %v1414_v10 = vpop.f32.mrb[14].mxu0  ;;  %v9940_v44 = vld [vmem:[%s15777_s4 + $0x2a8] ss:$24 sps:$4 sm:$0xff]  }
 0x170   :  { %v8468_v46 = vadd.f32 %v1558_v35, %v11915_v15  ;;  %v1560_v36 = vpop.f32.mrb[14].mxu1  ;;  %1747 = vst [vmem:[#allocation2 + $0x120] sm:$0xff] %v8451_v55  ;;  %v8453_v56 = vadd.f32 %v1414_v10, %v11891_v23  ;;  %v1416_v54 = vpop.f32.mrb[15].mxu0  ;;  %4841 = vmatpush1.bf16.msra.mxu0 %v9922_v31  ;;  %v2037_v23 = vld [vmem:[%s15776_s3 + $0x8b0] sm:$0xff]  ;;  %v2050_v10 = vld [vmem:[%s15776_s3 + $0x918] sm:$0xff]  ;;  %v1855_v35 = vld [vmem:[%s15776_s3 + $0x300] sm:$0xff] }
 0x171   :  { %1749 = vst [vmem:[#allocation2 + $0x130] sm:$0xff] %v8467_v37  ;;  %v8469_v16 = vadd.f32 %v1560_v36, %v11894_v43  ;;  %v1562_v24 = vpop.f32.mrb[15].mxu1  ;;  %1748 = vst [vmem:[#allocation2 + $0x128] sm:$0xff] %v8452_v41  ;;  %v8454_v61 = vadd.f32 %v1416_v54, %v11912_v60  ;;  %v1849_v36 = vld [vmem:[%s15776_s3 + $0x2d0] sm:$0xff]  ;;  %4842 = vmatprep.subr.bf16.mxu0 %v9930_v3  ;;  %v1856_v60 = vld [vmem:[%s15776_s3 + $0x308] sm:$0xff]  ;;  %v12152_v37 = vpack.c.bf16 %v2056_v22, %v2050_v10 }
 0x172   :  { %1750 = vst [vmem:[#allocation2 + $0x138] sm:$0xff] %v8468_v46  ;;  %v8470_v48 = vadd.f32 %v1562_v24, %v11915_v15  ;;  %v9936_v46 = vld [vmem:[%s15777_s4 + $0x27c] ss:$24 sps:$4 sm:$0xff]   ;;  %1753 = vst [vmem:[#allocation2 + $0x150] sm:$0xff] %v8453_v56  ;;  %4062 = vmatmul.mubr.bf16.gmra.mrb[56].mxu0 %v12092_v2  ;;  %v2043_v15 = vld [vmem:[%s15776_s3 + $0x8e0] sm:$0xff]  ;;  %v12146_v3 = vpack.c.bf16 %v1849_v36, %v1843_v32 }
 0x173   :  { %1755 = vst [vmem:[#allocation2 + $0x160] sm:$0xff] %v8469_v16  ;;  %4505 = vmatmul.mubr.bf16.gmra.mrb[104].mxu1 %v12094_v11  ;;  %1754 = vst [vmem:[#allocation2 + $0x158] sm:$0xff] %v8454_v61  ;;  %4071 = vmatprep.mubr.bf16.mxu0 %v12098_v45  ;;  %v1862_v43 = vld [vmem:[%s15776_s3 + $0x338] sm:$0xff]  ;;  %v9942_v31 = vld [vmem:[%s15777_s4 + $0x2ac] ss:$24 sps:$4 sm:$0xff]   ;;  %v12148_v30 = vpack.c.bf16 %v2043_v15, %v2037_v23 }
 0x174   :  { %1756 = vst [vmem:[#allocation2 + $0x168] sm:$0xff] %v8470_v48  ;;  %4514 = vmatprep.mubr.bf16.mxu1 %v12100_v9  ;;  %4843 = vmatpush1.bf16.msra.mxu0 %v9928_v51  ;;  %v12150_v55 = vpack.c.bf16 %v1862_v43, %v1856_v60  ;;  %16094 = vst [vmem:[#allocation62_spill] sm:$0xff] %v12152_v37  ;;  %v1861_v41 = vld [vmem:[%s15776_s3 + $0x330] sm:$0xff]  ;;  %v2055_v16 = vld [vmem:[%s15776_s3 + $0x940] sm:$0xff] }
 0x175   :  { %4844 = vmatprep.subr.bf16.mxu0 %v9936_v46  ;;  %16093 = vst [vmem:[#allocation61_spill] sm:$0xff] %v12148_v30  ;;  %v2049_v56 = vld [vmem:[%s15776_s3 + $0x910] sm:$0xff]  ;;  %v1868_v54 = vld [vmem:[%s15776_s3 + $0x368] sm:$0xff]  ;;  %v1874_v24 = vld [vmem:[%s15776_s3 + $0x398] sm:$0xff]  ;;  %v12191_v36 = vpack.c.bf16 %v1861_v41, %v1855_v35 }
 0x176   :  { %v9948_v51 = vld [vmem:[%s15777_s4 + $0x2dc] ss:$24 sps:$4 sm:$0xff]   ;;  %v1764_v61 = vld [vmem:[%s15776_s3 + $0x28] sm:$0xff]  ;;  %v9946_v32 = vld [vmem:[%s15777_s4 + $0x2d8] ss:$24 sps:$4 sm:$0xff]   ;;  %v12193_v23 = vpack.c.bf16 %v2055_v16, %v2049_v56  ;;  %v12195_v46 = vpack.c.bf16 %v1874_v24, %v1868_v54 }
 0x177   :  { %v1770_v48 = vld [vmem:[%s15776_s3 + $0x58] sm:$0xff]  ;;  %v1867_v60 = vld [vmem:[%s15776_s3 + $0x360] sm:$0xff]  ;;  %v1873_v43 = vld [vmem:[%s15776_s3 + $0x390] sm:$0xff] }
 0x178   :  { %4845 = vmatpush1.bf16.msra.mxu0 %v9934_v27  ;;  %16095 = vst [vmem:[#allocation63_spill] sm:$0xff] %v12193_v23  ;;  %v12197_v15 = vpack.c.bf16 %v1770_v48, %v1764_v61  ;;  %v1763_v10 = vld [vmem:[%s15776_s3 + $0x20] sm:$0xff]  ;;  %v1769_v22 = vld [vmem:[%s15776_s3 + $0x50] sm:$0xff]  ;;  %v1880_v27 = vld [vmem:[%s15776_s3 + $0x3c8] sm:$0xff]  ;;  %v12230_v56 = vpack.c.bf16 %v1873_v43, %v1867_v60 }
 0x179   :  { %4846 = vmatprep.subr.bf16.mxu0 %v9942_v31  ;;  %v1886_v31 = vld [vmem:[%s15776_s3 + $0x3f8] sm:$0xff]  ;;  %v9889_v41 = vld [vmem:[%s15777_s4 + $0x10] ss:$24 sps:$4 sm:$0xff]   ;;  %v12232_v16 = vpack.c.bf16 %v1769_v22, %v1763_v10  ;;  %v1879_v61 = vld [vmem:[%s15776_s3 + $0x3c0] sm:$0xff] }
 0x17a   :  { %4072 = vmatmul.mubr.bf16.gmra.mrb[60].mxu0 %v12146_v3  ;;  %16096 = vst [vmem:[#allocation64_spill] sm:$0xff] %v12197_v15  ;;  %v1782_v35 = vld [vmem:[%s15776_s3 + $0xb8] sm:$0xff]  ;;  %16097 = vst [vmem:[#allocation65_spill] sm:$0xff] %v12230_v56  ;;  %v12237_v24 = vpack.c.bf16 %v1886_v31, %v1880_v27  ;;  %v1885_v48 = vld [vmem:[%s15776_s3 + $0x3f0] sm:$0xff] }
 0x17b   :  { %4515 = vmatmul.mubr.bf16.gmra.mrb[108].mxu1 %v12148_v30  ;;  %4081 = vmatprep.mubr.bf16.mxu0 %v12150_v55  ;;  %16098 = vst [vmem:[#allocation66_spill] sm:$0xff] %v12232_v16  ;;  %v9897_v54 = vld [vmem:[%s15777_s4 + $0x44] ss:$24 sps:$4 sm:$0xff]   ;;  %v1781_v60 = vld [vmem:[%s15776_s3 + $0xb0] sm:$0xff]  ;;  %v9895_v43 = vld [vmem:[%s15777_s4 + $0x40] ss:$24 sps:$4 sm:$0xff]  }
 0x17c   :  { %4524 = vmatprep.mubr.bf16.mxu1 %v12152_v37  ;;  %4847 = vmatpush1.bf16.msra.mxu0 %v9940_v44  ;;  %v1776_v44 = vld [vmem:[%s15776_s3 + $0x88] sm:$0xff]  ;;  %16099 = vst [vmem:[#allocation67_spill] sm:$0xff] %v12237_v24  ;;  %v1898_v27 = vld [vmem:[%s15776_s3 + $0x458] sm:$0xff] }
 0x17d   :  { %4848 = vmatprep.subr.bf16.mxu0 %v9948_v51  ;;  %v12239_v51 = vpack.c.bf16 %v1782_v35, %v1776_v44  ;;  %v1892_v10 = vld [vmem:[%s15776_s3 + $0x428] sm:$0xff]  ;;  %v1794_v44 = vld [vmem:[%s15776_s3 + $0x118] sm:$0xff] }
 0x17e   :  { %v9954_v22 = vld [vmem:[%s15777_s4 + $0x30c] ss:$24 sps:$4 sm:$0xff]   ;;  %v9913_v9 = vld [vmem:[%s15777_s4 + $0xd0] ss:$24 sps:$4 sm:$0xff]  }
 0x17f   :  { %16100 = vst [vmem:[#allocation68_spill] sm:$0xff] %v12239_v51  ;;  %v1788_v31 = vld [vmem:[%s15776_s3 + $0xe8] sm:$0xff] }
 0x180   :  { %4849 = vmatpush1.bf16.msra.mxu0 %v9946_v32  ;;  %v1775_v32 = vld [vmem:[%s15776_s3 + $0x80] sm:$0xff]  ;;  %v9903_v35 = vld [vmem:[%s15777_s4 + $0x74] ss:$24 sps:$4 sm:$0xff]  }
 0x181   :  { %5101 = vmatprep.subr.bf16.mxu0 %v9954_v22  ;;  %v1800_v22 = vld [vmem:[%s15776_s3 + $0x148] sm:$0xff] }
 0x182   :  { %4082 = vmatmul.mubr.bf16.gmra.mrb[64].mxu0 %v12191_v36 }
 0x183   :  { %4525 = vmatmul.mubr.bf16.gmra.mrb[112].mxu1 %v12193_v23  ;;  %4091 = vmatprep.mubr.bf16.mxu0 %v12195_v46  ;;  %v9909_v23 = vld [vmem:[%s15777_s4 + $0xa4] ss:$24 sps:$4 sm:$0xff]  }
 0x184   :  { %4567 = vmatprep.mubr.bf16.mxu1 %v12197_v15  ;;  %v9901_v15 = vld [vmem:[%s15777_s4 + $0x70] ss:$24 sps:$4 sm:$0xff]  }
 0x18a   :  { %4092 = vmatmul.mubr.bf16.gmra.mrb[68].mxu0 %v12230_v56 }
 0x18b   :  { %4568 = vmatmul.mubr.bf16.vlgmr.msra.gmra.mrb[16].mxu1 %v12232_v16  ;;  %4101 = vmatprep.mubr.bf16.mxu0 %v12237_v24  ;;  %v12280_v16 = vpack.c.bf16 %v1781_v60, %v1775_v32  ;;  %v1787_v32 = vld [vmem:[%s15776_s3 + $0xe0] sm:$0xff]  ;;  %v1793_v60 = vld [vmem:[%s15776_s3 + $0x110] sm:$0xff] }
 0x18c   :  { %5668 = vmatpush1.bf16.msra.mxu1 %v9889_v41  ;;  %4577 = vmatprep.mubr.bf16.mxu1 %v12239_v51  ;;  %v12278_v41 = vpack.c.bf16 %v1885_v48, %v1879_v61  ;;  %v12285_v51 = vpack.c.bf16 %v1898_v27, %v1892_v10  ;;  %v1891_v61 = vld [vmem:[%s15776_s3 + $0x420] sm:$0xff]  ;;  %v1897_v48 = vld [vmem:[%s15776_s3 + $0x450] sm:$0xff]  ;;  %v1910_v10 = vld [vmem:[%s15776_s3 + $0x4b8] sm:$0xff] }
 0x18d   :  { %5669 = vmatprep.subr.bf16.mxu1 %v9897_v54  ;;  %16102 = vst [vmem:[#allocation70_spill] sm:$0xff] %v12280_v16  ;;  %v12287_v54 = vpack.c.bf16 %v1794_v44, %v1788_v31  ;;  %v1806_v27 = vld [vmem:[%s15776_s3 + $0x178] sm:$0xff]  ;;  %v9915_v44 = vld [vmem:[%s15777_s4 + $0xd4] ss:$24 sps:$4 sm:$0xff]  }
 0x18e   :  { %16101 = vst [vmem:[#allocation69_spill] sm:$0xff] %v12278_v41  ;;  %16103 = vst [vmem:[#allocation71_spill] sm:$0xff] %v12285_v51  ;;  %v9907_v31 = vld [vmem:[%s15777_s4 + $0xa0] ss:$24 sps:$4 sm:$0xff]   ;;  %v12332_v30 = vpack.c.bf16 %v1806_v27, %v1800_v22 }
 0x18f   :  { %16104 = vst [vmem:[#allocation72_spill] sm:$0xff] %v12287_v54 }
 0x190   :  { %5670 = vmatpush1.bf16.msra.mxu1 %v9895_v43  ;;  %v1904_v43 = vld [vmem:[%s15776_s3 + $0x488] sm:$0xff]  ;;  %16106 = vst [vmem:[#allocation74_spill] sm:$0xff] %v12332_v30 }
 0x191   :  { %5671 = vmatprep.subr.bf16.mxu1 %v9903_v35  ;;  %v12326_v35 = vpack.c.bf16 %v1897_v48, %v1891_v61  ;;  %v12330_v37 = vpack.c.bf16 %v1910_v10, %v1904_v43  ;;  %v1799_v61 = vld [vmem:[%s15776_s3 + $0x140] sm:$0xff]  ;;  %v1805_v48 = vld [vmem:[%s15776_s3 + $0x170] sm:$0xff] }
 0x192   :  { %4102 = vmatmul.mubr.bf16.gmra.mrb[72].mxu0 %v12278_v41 }
 0x193   :  { %4578 = vmatmul.mubr.bf16.gmra.mrb[20].mxu1 %v12280_v16  ;;  %4111 = vmatprep.mubr.bf16.mxu0 %v12285_v51  ;;  %v12328_v16 = vpack.c.bf16 %v1793_v60, %v1787_v32  ;;  %v1916_v32 = vld [vmem:[%s15776_s3 + $0x4e8] sm:$0xff]  ;;  %v1922_v60 = vld [vmem:[%s15776_s3 + $0x518] sm:$0xff] }
 0x194   :  { %4587 = vmatprep.mubr.bf16.mxu1 %v12287_v54  ;;  %5672 = vmatpush1.bf16.msra.mxu1 %v9901_v15  ;;  %v9921_v54 = vld [vmem:[%s15777_s4 + $0x104] ss:$24 sps:$4 sm:$0xff]   ;;  %v1909_v15 = vld [vmem:[%s15776_s3 + $0x4b0] sm:$0xff] }
 0x195   :  { %5673 = vmatprep.subr.bf16.mxu1 %v9909_v23  ;;  %16105 = vst [vmem:[#allocation73_spill] sm:$0xff] %v12328_v16  ;;  %v1903_v23 = vld [vmem:[%s15776_s3 + $0x480] sm:$0xff] }
 0x198   :  { %5674 = vmatpush1.bf16.msra.mxu1 %v9907_v31 }
 0x199   :  { %5675 = vmatprep.subr.bf16.mxu1 %v9915_v44 }
 0x19a   :  { %4112 = vmatmul.mubr.bf16.gmra.mrb[76].mxu0 %v12326_v35 }
 0x19b   :  { %4588 = vmatmul.mubr.bf16.gmra.mrb[24].mxu1 %v12328_v16  ;;  %4121 = vmatprep.mubr.bf16.mxu0 %v12330_v37 }
 0x19c   :  { %4597 = vmatprep.mubr.bf16.mxu1 %v12332_v30 }
 0x19d   :  { %19 = vsyncpa [#allocation5], 0  ;;  %v1812_v43 = vld [vmem:[%s15776_s3 + $0x1a8] sm:$0xff]  ;;  %v1818_v10 = vld [vmem:[%s15776_s3 + $0x1d8] sm:$0xff]  ;;  %5676 = vmatpush1.bf16.msra.mxu1 %v9913_v9  ;;  %v12374_v31 = vpack.c.bf16 %v1909_v15, %v1903_v23  ;;  %v12376_v44 = vpack.c.bf16 %v1805_v48, %v1799_v61  ;;  %v12378_v30 = vpack.c.bf16 %v1922_v60, %v1916_v32  ;;  %vm6896_vm0 = vcmask 1044480  }
 0x19e   :  { %v9919_v22 = vld [vmem:[%s15777_s4 + $0x100] ss:$24 sps:$4 sm:$0xff]   ;;  %5677 = vmatprep.subr.bf16.mxu1 %v9921_v54  ;;  %v9927_v27 = vld [vmem:[%s15777_s4 + $0x134] ss:$24 sps:$4 sm:$0xff]   ;;  %v12380_v16 = vpack.c.bf16 %v1818_v10, %v1812_v43  ;;  %v9925_v9 = vld [vmem:[%s15777_s4 + $0x130] ss:$24 sps:$4 sm:$0xff]  }
 0x19f   :  { %16107 = vst [vmem:[#allocation75_spill] sm:$0xff] %v12376_v44  ;;  %v9933_v54 = vld [vmem:[%s15777_s4 + $0x164] ss:$24 sps:$4 sm:$0xff]   ;;  %v1921_v15 = vld [vmem:[%s15776_s3 + $0x510] sm:$0xff]  ;;  %v1928_v32 = vld [vmem:[%s15776_s3 + $0x548] sm:$0xff]  ;;  %vm7368_vm1 = vcmask 1041409  }
 0x1a0   :  { %16108 = vst [vmem:[#allocation76_spill] sm:$0xff] %v12380_v16  ;;  %v1915_v23 = vld [vmem:[%s15776_s3 + $0x4e0] sm:$0xff]  ;;  %v1817_v48 = vld [vmem:[%s15776_s3 + $0x1d0] sm:$0xff]  ;;  %v1934_v60 = vld [vmem:[%s15776_s3 + $0x578] sm:$0xff]  ;;  %vm7370_vm2 = vcmask 1042434   ;;  %vm7372_vm3 = vcmask 1043459  }
 0x1a1   :  { %5678 = vmatpush1.bf16.msra.mxu1 %v9919_v22  ;;  %v1811_v61 = vld [vmem:[%s15776_s3 + $0x1a0] sm:$0xff]  ;;  %v1824_v43 = vld [vmem:[%s15776_s3 + $0x208] sm:$0xff]  ;;  %v1830_v10 = vld [vmem:[%s15776_s3 + $0x238] sm:$0xff]  ;;  %v12426_v11 = vpack.c.bf16 %v1934_v60, %v1928_v32 }
 0x1a2   :  { %5679 = vmatprep.subr.bf16.mxu1 %v9927_v27  ;;  %4122 = vmatmul.mubr.bf16.gmra.mrb[80].mxu0 %v12374_v31  ;;  %v9931_v22 = vld [vmem:[%s15777_s4 + $0x160] ss:$24 sps:$4 sm:$0xff]   ;;  %v9939_v27 = vld [vmem:[%s15777_s4 + $0x194] ss:$24 sps:$4 sm:$0xff]   ;;  %v12428_v52 = vpack.c.bf16 %v1830_v10, %v1824_v43 }
 0x1a3   :  { %4598 = vmatmul.mubr.bf16.gmra.mrb[28].mxu1 %v12376_v44  ;;  %4131 = vmatprep.mubr.bf16.mxu0 %v12378_v30  ;;  %v12424_v44 = vpack.c.bf16 %v1817_v48, %v1811_v61  ;;  %v1823_v61 = vld [vmem:[%s15776_s3 + $0x200] sm:$0xff]  ;;  %v1829_v48 = vld [vmem:[%s15776_s3 + $0x230] sm:$0xff]  ;;  %v1940_v32 = vld [vmem:[%s15776_s3 + $0x5a8] sm:$0xff] }
 0x1a4   :  { %4607 = vmatprep.mubr.bf16.mxu1 %v12380_v16  ;;  %v12422_v16 = vpack.c.bf16 %v1921_v15, %v1915_v23  ;;  %16110 = vst [vmem:[#allocation78_spill] sm:$0xff] %v12428_v52  ;;  %v1927_v23 = vld [vmem:[%s15776_s3 + $0x540] sm:$0xff]  ;;  %v1933_v15 = vld [vmem:[%s15776_s3 + $0x570] sm:$0xff]  ;;  %v1946_v60 = vld [vmem:[%s15776_s3 + $0x5d8] sm:$0xff] }
 0x1a5   :  { %5680 = vmatpush1.bf16.msra.mxu1 %v9925_v9  ;;  %16109 = vst [vmem:[#allocation77_spill] sm:$0xff] %v12424_v44  ;;  %v9937_v9 = vld [vmem:[%s15777_s4 + $0x190] ss:$24 sps:$4 sm:$0xff]   ;;  %v1842_v10 = vld [vmem:[%s15776_s3 + $0x298] sm:$0xff]  ;;  %v12474_v12 = vpack.c.bf16 %v1946_v60, %v1940_v32 }
 0x1a6   :  { %5681 = vmatprep.subr.bf16.mxu1 %v9933_v54  ;;  %v9945_v54 = vld [vmem:[%s15777_s4 + $0x1c4] ss:$24 sps:$4 sm:$0xff]   ;;  %v1836_v43 = vld [vmem:[%s15776_s3 + $0x268] sm:$0xff]  ;;  %v9979_v19 = vld [vmem:[%s15777_s4 + $0x2e0] ss:$24 sps:$4 sm:$0xff]  }
 0x1a7   :  { %v12476_v62 = vpack.c.bf16 %v1842_v10, %v1836_v43  ;;  %v1952_v32 = vld [vmem:[%s15776_s3 + $0x608] sm:$0xff]  ;;  %v1958_v60 = vld [vmem:[%s15776_s3 + $0x638] sm:$0xff] }
 0x1a8   :  { %v1848_v43 = vld [vmem:[%s15776_s3 + $0x2c8] sm:$0xff]  ;;  %v1854_v10 = vld [vmem:[%s15776_s3 + $0x2f8] sm:$0xff]  ;;  %v12522_v58 = vpack.c.bf16 %v1958_v60, %v1952_v32 }
 0x1a9   :  { %5682 = vmatpush1.bf16.msra.mxu1 %v9931_v22  ;;  %v9943_v22 = vld [vmem:[%s15777_s4 + $0x1c0] ss:$24 sps:$4 sm:$0xff]   ;;  %16112 = vst [vmem:[#allocation80_spill] sm:$0xff] %v12476_v62  ;;  %v12524_v42 = vpack.c.bf16 %v1854_v10, %v1848_v43  ;;  %v1964_v32 = vld [vmem:[%s15776_s3 + $0x668] sm:$0xff] }
 0x1aa   :  { %5683 = vmatprep.subr.bf16.mxu1 %v9939_v27  ;;  %4132 = vmatmul.mubr.bf16.gmra.mrb[84].mxu0 %v12422_v16  ;;  %v9951_v27 = vld [vmem:[%s15777_s4 + $0x1f4] ss:$24 sps:$4 sm:$0xff]   ;;  %16115 = vst [vmem:[#allocation83_spill] sm:$0xff] %v12522_v58  ;;  %v1970_v60 = vld [vmem:[%s15776_s3 + $0x698] sm:$0xff] }
 0x1ab   :  { %4608 = vmatmul.mubr.bf16.gmra.mrb[32].mxu1 %v12424_v44  ;;  %4141 = vmatprep.mubr.bf16.mxu0 %v12426_v11  ;;  %v12472_v44 = vpack.c.bf16 %v1829_v48, %v1823_v61  ;;  %v1835_v61 = vld [vmem:[%s15776_s3 + $0x260] sm:$0xff]  ;;  %v1841_v48 = vld [vmem:[%s15776_s3 + $0x290] sm:$0xff]  ;;  %16116 = vst [vmem:[#allocation84_spill] sm:$0xff] %v12524_v42  ;;  %v1860_v43 = vld [vmem:[%s15776_s3 + $0x328] sm:$0xff]  ;;  %v12570_v50 = vpack.c.bf16 %v1970_v60, %v1964_v32 }
 0x1ac   :  { %4617 = vmatprep.mubr.bf16.mxu1 %v12428_v52  ;;  %v12470_v52 = vpack.c.bf16 %v1933_v15, %v1927_v23  ;;  %v1939_v23 = vld [vmem:[%s15776_s3 + $0x5a0] sm:$0xff]  ;;  %v1945_v15 = vld [vmem:[%s15776_s3 + $0x5d0] sm:$0xff]  ;;  %v1866_v10 = vld [vmem:[%s15776_s3 + $0x358] sm:$0xff] }
 0x1ad   :  { %5684 = vmatpush1.bf16.msra.mxu1 %v9937_v9  ;;  %16111 = vst [vmem:[#allocation79_spill] sm:$0xff] %v12472_v44  ;;  %v9949_v9 = vld [vmem:[%s15777_s4 + $0x1f0] ss:$24 sps:$4 sm:$0xff]   ;;  %16119 = vst [vmem:[#allocation87_spill] sm:$0xff] %v12570_v50  ;;  %v12572_v26 = vpack.c.bf16 %v1866_v10, %v1860_v43  ;;  %v1982_v32 = vld [vmem:[%s15776_s3 + $0x6f8] sm:$0xff] }
 0x1ae   :  { %5685 = vmatprep.subr.bf16.mxu1 %v9945_v54  ;;  %v9957_v54 = vld [vmem:[%s15777_s4 + $0x224] ss:$24 sps:$4 sm:$0xff]   ;;  %v1872_v60 = vld [vmem:[%s15776_s3 + $0x388] sm:$0xff] }
 0x1af   :  { %16120 = vst [vmem:[#allocation88_spill] sm:$0xff] %v12572_v26  ;;  %v1878_v43 = vld [vmem:[%s15776_s3 + $0x3b8] sm:$0xff] }
 0x1b1   :  { %5686 = vmatpush1.bf16.msra.mxu1 %v9943_v22  ;;  %v9955_v22 = vld [vmem:[%s15777_s4 + $0x220] ss:$24 sps:$4 sm:$0xff]  }
 0x1b2   :  { %5687 = vmatprep.subr.bf16.mxu1 %v9951_v27  ;;  %4142 = vmatmul.mubr.bf16.gmra.mrb[88].mxu0 %v12470_v52  ;;  %v9963_v27 = vld [vmem:[%s15777_s4 + $0x254] ss:$24 sps:$4 sm:$0xff]  }
 0x1b3   :  { %4618 = vmatmul.mubr.bf16.gmra.mrb[36].mxu1 %v12472_v44  ;;  %4151 = vmatprep.mubr.bf16.mxu0 %v12474_v12  ;;  %v12520_v44 = vpack.c.bf16 %v1841_v48, %v1835_v61  ;;  %v1847_v61 = vld [vmem:[%s15776_s3 + $0x2c0] sm:$0xff]  ;;  %v1853_v48 = vld [vmem:[%s15776_s3 + $0x2f0] sm:$0xff] }
 0x1b4   :  { %4627 = vmatprep.mubr.bf16.mxu1 %v12476_v62  ;;  %v12518_v62 = vpack.c.bf16 %v1945_v15, %v1939_v23  ;;  %v1951_v23 = vld [vmem:[%s15776_s3 + $0x600] sm:$0xff]  ;;  %v1957_v15 = vld [vmem:[%s15776_s3 + $0x630] sm:$0xff] }
 0x1b5   :  { %5688 = vmatpush1.bf16.msra.mxu1 %v9949_v9  ;;  %16114 = vst [vmem:[#allocation82_spill] sm:$0xff] %v12520_v44  ;;  %v9961_v9 = vld [vmem:[%s15777_s4 + $0x250] ss:$24 sps:$4 sm:$0xff]  }
 0x1b6   :  { %5689 = vmatprep.subr.bf16.mxu1 %v9957_v54  ;;  %16113 = vst [vmem:[#allocation81_spill] sm:$0xff] %v12518_v62  ;;  %v9969_v54 = vld [vmem:[%s15777_s4 + $0x284] ss:$24 sps:$4 sm:$0xff]  }
 0x1b9   :  { %5690 = vmatpush1.bf16.msra.mxu1 %v9955_v22  ;;  %v9967_v22 = vld [vmem:[%s15777_s4 + $0x280] ss:$24 sps:$4 sm:$0xff]  }
 0x1ba   :  { %5691 = vmatprep.subr.bf16.mxu1 %v9963_v27  ;;  %4152 = vmatmul.mubr.bf16.gmra.mrb[92].mxu0 %v12518_v62  ;;  %v9975_v27 = vld [vmem:[%s15777_s4 + $0x2b4] ss:$24 sps:$4 sm:$0xff]  }
 0x1bb   :  { %4628 = vmatmul.mubr.bf16.gmra.mrb[40].mxu1 %v12520_v44  ;;  %4161 = vmatprep.mubr.bf16.mxu0 %v12522_v58  ;;  %v12568_v44 = vpack.c.bf16 %v1853_v48, %v1847_v61  ;;  %v1865_v61 = vld [vmem:[%s15776_s3 + $0x350] sm:$0xff]  ;;  %v1976_v48 = vld [vmem:[%s15776_s3 + $0x6c8] sm:$0xff] }
 0x1bc   :  { %4637 = vmatprep.mubr.bf16.mxu1 %v12524_v42  ;;  %v12566_v42 = vpack.c.bf16 %v1957_v15, %v1951_v23  ;;  %v1969_v23 = vld [vmem:[%s15776_s3 + $0x690] sm:$0xff]  ;;  %v1859_v15 = vld [vmem:[%s15776_s3 + $0x320] sm:$0xff] }
 0x1bd   :  { %5692 = vmatpush1.bf16.msra.mxu1 %v9961_v9  ;;  %16118 = vst [vmem:[#allocation86_spill] sm:$0xff] %v12568_v44  ;;  %v9973_v9 = vld [vmem:[%s15777_s4 + $0x2b0] ss:$24 sps:$4 sm:$0xff]  }
 0x1be   :  { %5693 = vmatprep.subr.bf16.mxu1 %v9969_v54  ;;  %16117 = vst [vmem:[#allocation85_spill] sm:$0xff] %v12566_v42  ;;  %v1963_v54 = vld [vmem:[%s15776_s3 + $0x660] sm:$0xff] }
 0x1bf   :  { %v12605_v10 = vpack.c.bf16 %v1969_v23, %v1963_v54  ;;  %v1981_v54 = vld [vmem:[%s15776_s3 + $0x6f0] sm:$0xff]  ;;  %v10024_v58 = vld [vmem:[%s15777_s4 + $0x548] ss:$24 sps:$4 sm:$0xff]  }
 0x1c0   :  { %v1877_v23 = vld [vmem:[%s15776_s3 + $0x3b0] sm:$0xff] }
 0x1c1   :  { %5694 = vmatpush1.bf16.msra.mxu1 %v9967_v22  ;;  %16121 = vst [vmem:[#allocation89_spill] sm:$0xff] %v12605_v10  ;;  %v12607_v22 = vpack.c.bf16 %v1865_v61, %v1859_v15  ;;  %v1988_v15 = vld [vmem:[%s15776_s3 + $0x728] sm:$0xff]  ;;  %v1994_v61 = vld [vmem:[%s15776_s3 + $0x758] sm:$0xff] }
 0x1c2   :  { %5695 = vmatprep.subr.bf16.mxu1 %v9975_v27  ;;  %4162 = vmatmul.mubr.bf16.gmra.mrb[96].mxu0 %v12566_v42  ;;  %v12609_v27 = vpack.c.bf16 %v1982_v32, %v1976_v48  ;;  %v1884_v48 = vld [vmem:[%s15776_s3 + $0x3e8] sm:$0xff]  ;;  %v1890_v32 = vld [vmem:[%s15776_s3 + $0x418] sm:$0xff]  ;;  %v12657_v7 = vpack.c.bf16 %v1994_v61, %v1988_v15  ;;  %v1883_v15 = vld [vmem:[%s15776_s3 + $0x3e0] sm:$0xff] }
 0x1c3   :  { %4638 = vmatmul.mubr.bf16.gmra.mrb[44].mxu1 %v12568_v44  ;;  %4171 = vmatprep.mubr.bf16.mxu0 %v12570_v50  ;;  %16122 = vst [vmem:[#allocation90_spill] sm:$0xff] %v12607_v22  ;;  %v9981_v44 = vld [vmem:[%s15777_s4 + $0x2e4] ss:$24 sps:$4 sm:$0xff]   ;;  %v12659_v4 = vpack.c.bf16 %v1890_v32, %v1884_v48  ;;  %v1889_v61 = vld [vmem:[%s15776_s3 + $0x410] sm:$0xff]  ;;  %v2000_v48 = vld [vmem:[%s15776_s3 + $0x788] sm:$0xff] }
 0x1c4   :  { %4647 = vmatprep.mubr.bf16.mxu1 %v12572_v26  ;;  %16123 = vst [vmem:[#allocation91_spill] sm:$0xff] %v12609_v27  ;;  %v12611_v26 = vpack.c.bf16 %v1878_v43, %v1872_v60  ;;  %16129 = vst [vmem:[#allocation97_spill] sm:$0xff] %v12657_v7  ;;  %v2006_v32 = vld [vmem:[%s15776_s3 + $0x7b8] sm:$0xff]  ;;  %v12704_v38 = vpack.c.bf16 %v1889_v61, %v1883_v15 }
 0x1c5   :  { %5696 = vmatpush1.bf16.msra.mxu1 %v9973_v9  ;;  %v1975_v9 = vld [vmem:[%s15776_s3 + $0x6c0] sm:$0xff]  ;;  %16130 = vst [vmem:[#allocation98_spill] sm:$0xff] %v12659_v4  ;;  %v12707_v8 = vpack.c.bf16 %v2006_v32, %v2000_v48 }
 0x1c6   :  { %16124 = vst [vmem:[#allocation92_spill] sm:$0xff] %v12611_v26  ;;  %5697 = vmatprep.subr.bf16.mxu1 %v9981_v44  ;;  %v1871_v44 = vld [vmem:[%s15776_s3 + $0x380] sm:$0xff]  ;;  %v12647_v60 = vpack.c.bf16 %v1981_v54, %v1975_v9  ;;  %v1993_v54 = vld [vmem:[%s15776_s3 + $0x750] sm:$0xff]  ;;  %16132 = vst [vmem:[#allocation100_spill] sm:$0xff] %v12704_v38 }
 0x1c7   :  { %v12649_v43 = vpack.c.bf16 %v1877_v23, %v1871_v44  ;;  %v9987_v44 = vld [vmem:[%s15777_s4 + $0x314] ss:$24 sps:$4 sm:$0xff]   ;;  %16133 = vst [vmem:[#allocation101_spill] sm:$0xff] %v12707_v8 }
 0x1c8   :  { %16125 = vst [vmem:[#allocation93_spill] sm:$0xff] %v12647_v60 }
 0x1c9   :  { %5698 = vmatpush1.bf16.msra.mxu1 %v9979_v19  ;;  %16126 = vst [vmem:[#allocation94_spill] sm:$0xff] %v12649_v43  ;;  %v10231_v19 = vld [vmem:[%s15775_s2] sm:$0x3f] }
 0x1ca   :  { %4172 = vmatmul.mubr.bf16.gmra.mrb[100].mxu0 %v12605_v10  ;;  %5950 = vmatprep.subr.bf16.mxu1 %v9987_v44 }
 0x1cb   :  { %4648 = vmatmul.mubr.bf16.gmra.mrb[48].mxu1 %v12607_v22  ;;  %4181 = vmatprep.mubr.bf16.mxu0 %v12609_v27  ;;  %v12655_v22 = vsub.s32 5, %v11817_v33  ;;  %v10012_v27 = vld [vmem:[%s15777_s4 + $0x4e8] ss:$24 sps:$4 sm:$0xff]  }
 0x1cc   :  { %4657 = vmatprep.mubr.bf16.mxu1 %v12611_v26  ;;  %v12652_v26 = vsub.s32 4, %v11817_v33  ;;  %v1987_v33 = vld [vmem:[%s15776_s3 + $0x720] sm:$0xff] }
 0x1cd   :  { %16128 = vst [vmem:[#allocation96_spill] sm:$0xff] %v12655_v22  ;;  %v12679_v23 = vrot.slane %v10231_v19, %v12655_v22  ;;  %v12702_v40 = vpack.c.bf16 %v1993_v54, %v1987_v33 }
 0x1ce   :  { %16127 = vst [vmem:[#allocation95_spill] sm:$0xff] %v12652_v26  ;;  %v12667_v9 = vrot.slane %v10231_v19, %v12652_v26  ;;  %v1896_v19 = vld [vmem:[%s15776_s3 + $0x448] sm:$0xff] }
 0x1cf   :  { %16131 = vst [vmem:[#allocation99_spill] sm:$0xff] %v12702_v40 }
 0x1d2   :  { %4182 = vmatmul.mubr.bf16.gmra.mrb[104].mxu0 %v12647_v60 }
 0x1d3   :  { %4658 = vmatmul.mubr.bf16.gmra.mrb[52].mxu1 %v12649_v43  ;;  %4191 = vmatprep.mubr.bf16.mxu0 %v12657_v7 }
 0x1d4   :  { %4667 = vmatprep.mubr.bf16.mxu1 %v12659_v4  ;;  %v1902_v4 = vld [vmem:[%s15776_s3 + $0x478] sm:$0xff] }
 0x1d5   :  { %v1672_v43 = vpop.f32.mrb[16].mxu0  ;;  %v12709_v25 = vpack.c.bf16 %v1902_v4, %v1896_v19  ;;  %v2005_v4 = vld [vmem:[%s15776_s3 + $0x7b0] sm:$0xff] }
 0x1d6   :  { %v8471_v57 = vadd.f32 %v1672_v43, %v12667_v9  ;;  %v1674_v53 = vpop.f32.mrb[17].mxu0  ;;  %v1914_v43 = vld [vmem:[%s15776_s3 + $0x4d8] sm:$0xff] }
 0x1d7   :  { %v8472_v22 = vadd.f32 %v1674_v53, %v12679_v23  ;;  %v1676_v26 = vpop.f32.mrb[18].mxu0  ;;  %16134 = vst [vmem:[#allocation102_spill] sm:$0xff] %v12709_v25  ;;  %v1999_v53 = vld [vmem:[%s15776_s3 + $0x780] sm:$0xff] }
 0x1d8   :  { %1715 = vst [vmem:[#allocation2 + $0x20] sm:$0xff] %v8471_v57  ;;  %v8473_v6 = vadd.f32 %v1676_v26, %v12667_v9  ;;  %v1678_v18 = vpop.f32.mrb[19].mxu0  ;;  %v1901_v57 = vld [vmem:[%s15776_s3 + $0x470] sm:$0xff]  ;;  %v2012_v26 = vld [vmem:[%s15776_s3 + $0x7e8] sm:$0xff]  ;;  %v12742_v61 = vpack.c.bf16 %v2005_v4, %v1999_v53  ;;  %v2011_v53 = vld [vmem:[%s15776_s3 + $0x7e0] sm:$0xff] }
 0x1d9   :  { %1716 = vst [vmem:[#allocation2 + $0x28] sm:$0xff] %v8472_v22  ;;  %v8474_v44 = vadd.f32 %v1678_v18, %v12679_v23  ;;  %v1895_v18 = vld [vmem:[%s15776_s3 + $0x440] sm:$0xff]  ;;  %v1908_v22 = vld [vmem:[%s15776_s3 + $0x4a8] sm:$0xff]  ;;  %v2017_v4 = vld [vmem:[%s15776_s3 + $0x810] sm:$0xff] }
 0x1da   :  { %1721 = vst [vmem:[#allocation2 + $0x50] sm:$0xff] %v8473_v6  ;;  %4192 = vmatmul.mubr.bf16.gmra.mrb[108].mxu0 %v12702_v40  ;;  %v2018_v6 = vld [vmem:[%s15776_s3 + $0x818] sm:$0xff]  ;;  %16135 = vst [vmem:[#allocation103_spill] sm:$0xff] %v12742_v61  ;;  %v12744_v48 = vpack.c.bf16 %v1901_v57, %v1895_v18  ;;  %v2024_v18 = vld [vmem:[%s15776_s3 + $0x848] sm:$0xff] }
 0x1db   :  { %4668 = vmatmul.mubr.bf16.gmra.mrb[56].mxu1 %v12704_v38  ;;  %1722 = vst [vmem:[#allocation2 + $0x58] sm:$0xff] %v8474_v44  ;;  %4201 = vmatprep.mubr.bf16.mxu0 %v12707_v8  ;;  %v12747_v44 = vpack.c.bf16 %v2018_v6, %v2012_v26  ;;  %v1920_v57 = vld [vmem:[%s15776_s3 + $0x508] sm:$0xff]  ;;  %v1926_v26 = vld [vmem:[%s15776_s3 + $0x538] sm:$0xff] }
 0x1dc   :  { %4677 = vmatprep.mubr.bf16.mxu1 %v12709_v25  ;;  %16136 = vst [vmem:[#allocation104_spill] sm:$0xff] %v12744_v48  ;;  %v12749_v25 = vpack.c.bf16 %v1914_v43, %v1908_v22 }
 0x1dd   :  { %v1682_v33 = vpop.f32.mrb[20].mxu0  ;;  %16137 = vst [vmem:[#allocation105_spill] sm:$0xff] %v12747_v44 }
 0x1de   :  { %v8475_v54 = vadd.f32 %v1682_v33, %v12667_v9  ;;  %v1684_v15 = vpop.f32.mrb[21].mxu0  ;;  %16138 = vst [vmem:[#allocation106_spill] sm:$0xff] %v12749_v25  ;;  %v12782_v33 = vpack.c.bf16 %v2017_v4, %v2011_v53  ;;  %v2023_v53 = vld [vmem:[%s15776_s3 + $0x840] sm:$0xff]  ;;  %v2029_v4 = vld [vmem:[%s15776_s3 + $0x870] sm:$0xff] }
 0x1df   :  { %v8476_v32 = vadd.f32 %v1684_v15, %v12679_v23  ;;  %v1686_v19 = vpop.f32.mrb[22].mxu0 }
 0x1e0   :  { %1727 = vst [vmem:[#allocation2 + $0x80] sm:$0xff] %v8475_v54  ;;  %v8477_v38 = vadd.f32 %v1686_v19, %v12667_v9  ;;  %v1688_v29 = vpop.f32.mrb[23].mxu0  ;;  %16139 = vst [vmem:[#allocation107_spill] sm:$0xff] %v12782_v33 }
 0x1e1   :  { %1728 = vst [vmem:[#allocation2 + $0x88] sm:$0xff] %v8476_v32  ;;  %v8478_v8 = vadd.f32 %v1688_v29, %v12679_v23  ;;  %v1907_v29 = vld [vmem:[%s15776_s3 + $0x4a0] sm:$0xff] }
 0x1e2   :  { %1733 = vst [vmem:[#allocation2 + $0xb0] sm:$0xff] %v8477_v38  ;;  %4202 = vmatmul.mubr.bf16.gmra.mrb[112].mxu0 %v12742_v61  ;;  %v1913_v38 = vld [vmem:[%s15776_s3 + $0x4d0] sm:$0xff] }
 0x1e3   :  { %4678 = vmatmul.mubr.bf16.gmra.mrb[60].mxu1 %v12744_v48  ;;  %1734 = vst [vmem:[#allocation2 + $0xb8] sm:$0xff] %v8478_v8  ;;  %4211 = vmatprep.mubr.bf16.mxu0 %v12747_v44  ;;  %v2030_v8 = vld [vmem:[%s15776_s3 + $0x878] sm:$0xff]  ;;  %v12784_v54 = vpack.c.bf16 %v1913_v38, %v1907_v29  ;;  %v2036_v29 = vld [vmem:[%s15776_s3 + $0x8a8] sm:$0xff] }
 0x1e4   :  { %4687 = vmatprep.mubr.bf16.mxu1 %v12749_v25  ;;  %v12787_v19 = vpack.c.bf16 %v2030_v8, %v2024_v18  ;;  %v12789_v25 = vpack.c.bf16 %v1926_v26, %v1920_v57  ;;  %v1932_v38 = vld [vmem:[%s15776_s3 + $0x568] sm:$0xff]  ;;  %v1938_v18 = vld [vmem:[%s15776_s3 + $0x598] sm:$0xff] }
 0x1e5   :  { %v1692_v6 = vpop.f32.mrb[24].mxu0  ;;  %16140 = vst [vmem:[#allocation108_spill] sm:$0xff] %v12784_v54 }
 0x1e6   :  { %v8479_v22 = vadd.f32 %v1692_v6, %v12667_v9  ;;  %v1694_v43 = vpop.f32.mrb[25].mxu0  ;;  %16141 = vst [vmem:[#allocation109_spill] sm:$0xff] %v12787_v19  ;;  %16142 = vst [vmem:[#allocation110_spill] sm:$0xff] %v12789_v25  ;;  %v12822_v6 = vpack.c.bf16 %v2029_v4, %v2023_v53  ;;  %v2035_v53 = vld [vmem:[%s15776_s3 + $0x8a0] sm:$0xff]  ;;  %v2041_v4 = vld [vmem:[%s15776_s3 + $0x8d0] sm:$0xff] }
 0x1e7   :  { %v8480_v15 = vadd.f32 %v1694_v43, %v12679_v23  ;;  %v1696_v32 = vpop.f32.mrb[26].mxu0 }
 0x1e8   :  { %1739 = vst [vmem:[#allocation2 + $0xe0] sm:$0xff] %v8479_v22  ;;  %v8481_v48 = vadd.f32 %v1696_v32, %v12667_v9  ;;  %v1698_v44 = vpop.f32.mrb[27].mxu0  ;;  %16143 = vst [vmem:[#allocation111_spill] sm:$0xff] %v12822_v6 }
 0x1e9   :  { %1740 = vst [vmem:[#allocation2 + $0xe8] sm:$0xff] %v8480_v15  ;;  %v8482_v61 = vadd.f32 %v1698_v44, %v12679_v23  ;;  %v1925_v44 = vld [vmem:[%s15776_s3 + $0x530] sm:$0xff] }
 0x1ea   :  { %1745 = vst [vmem:[#allocation2 + $0x110] sm:$0xff] %v8481_v48  ;;  %4212 = vmatmul.mubr.bf16.gmra.mrb[116].mxu0 %v12782_v33  ;;  %v1919_v48 = vld [vmem:[%s15776_s3 + $0x500] sm:$0xff] }
 0x1eb   :  { %4688 = vmatmul.mubr.bf16.gmra.mrb[64].mxu1 %v12784_v54  ;;  %1746 = vst [vmem:[#allocation2 + $0x118] sm:$0xff] %v8482_v61  ;;  %4221 = vmatprep.mubr.bf16.mxu0 %v12787_v19  ;;  %v2042_v61 = vld [vmem:[%s15776_s3 + $0x8d8] sm:$0xff]  ;;  %v12824_v22 = vpack.c.bf16 %v1925_v44, %v1919_v48  ;;  %v12861_v44 = vpack.c.bf16 %v2041_v4, %v2035_v53 }
 0x1ec   :  { %4697 = vmatprep.mubr.bf16.mxu1 %v12789_v25  ;;  %v12827_v32 = vpack.c.bf16 %v2042_v61, %v2036_v29  ;;  %v12829_v25 = vpack.c.bf16 %v1938_v18, %v1932_v38  ;;  %v1950_v48 = vld [vmem:[%s15776_s3 + $0x5f8] sm:$0xff]  ;;  %v2047_v18 = vld [vmem:[%s15776_s3 + $0x900] sm:$0xff] }
 0x1ed   :  { %v1702_v8 = vpop.f32.mrb[28].mxu0  ;;  %16144 = vst [vmem:[#allocation112_spill] sm:$0xff] %v12824_v22  ;;  %16147 = vst [vmem:[#allocation115_spill] sm:$0xff] %v12861_v44 }
 0x1ee   :  { %v8483_v57 = vadd.f32 %v1702_v8, %v12667_v9  ;;  %v1704_v26 = vpop.f32.mrb[29].mxu0  ;;  %16145 = vst [vmem:[#allocation113_spill] sm:$0xff] %v12827_v32  ;;  %16146 = vst [vmem:[#allocation114_spill] sm:$0xff] %v12829_v25  ;;  %v2053_v8 = vld [vmem:[%s15776_s3 + $0x930] sm:$0xff] }
 0x1ef   :  { %v8484_v43 = vadd.f32 %v1704_v26, %v12679_v23  ;;  %v1706_v15 = vpop.f32.mrb[30].mxu0  ;;  %v1949_v26 = vld [vmem:[%s15776_s3 + $0x5f0] sm:$0xff]  ;;  %v12891_v53 = vpack.c.bf16 %v2053_v8, %v2047_v18  ;;  %v9952_v18 = vld [vmem:[%s15777_s4 + $0x308] ss:$24 sps:$4 sm:$0xff]  }
 0x1f0   :  { %1751 = vst [vmem:[#allocation2 + $0x140] sm:$0xff] %v8483_v57  ;;  %v8485_v54 = vadd.f32 %v1706_v15, %v12667_v9  ;;  %v1708_v19 = vpop.f32.mrb[31].mxu0  ;;  %v1931_v9 = vld [vmem:[%s15776_s3 + $0x560] sm:$0xff]  ;;  %v1962_v15 = vld [vmem:[%s15776_s3 + $0x658] sm:$0xff] }
 0x1f1   :  { %1752 = vst [vmem:[#allocation2 + $0x148] sm:$0xff] %v8484_v43  ;;  %v8486_v33 = vadd.f32 %v1708_v19, %v12679_v23  ;;  %v1937_v23 = vld [vmem:[%s15776_s3 + $0x590] sm:$0xff]  ;;  %v1944_v19 = vld [vmem:[%s15776_s3 + $0x5c8] sm:$0xff]  ;;  %v1943_v57 = vld [vmem:[%s15776_s3 + $0x5c0] sm:$0xff] }
 0x1f2   :  { %1757 = vst [vmem:[#allocation2 + $0x170] sm:$0xff] %v8485_v54  ;;  %4222 = vmatmul.mubr.bf16.gmra.mrb[120].mxu0 %v12822_v6  ;;  %v2048_v54 = vld [vmem:[%s15776_s3 + $0x908] sm:$0xff]  ;;  %v12863_v29 = vpack.c.bf16 %v1937_v23, %v1931_v9  ;;  %v12867_v38 = vpack.c.bf16 %v1950_v48, %v1944_v19  ;;  %16151 = vst [vmem:[#allocation119_spill] sm:$0xff] %v12891_v53  ;;  %v12893_v4 = vpack.c.bf16 %v1949_v26, %v1943_v57  ;;  %v1955_v23 = vld [vmem:[%s15776_s3 + $0x620] sm:$0xff] }
 0x1f3   :  { %4698 = vmatmul.mubr.bf16.gmra.mrb[68].mxu1 %v12824_v22  ;;  %1758 = vst [vmem:[#allocation2 + $0x178] sm:$0xff] %v8486_v33  ;;  %4231 = vmatprep.mubr.bf16.mxu0 %v12827_v32  ;;  %v2054_v33 = vld [vmem:[%s15776_s3 + $0x938] sm:$0xff]  ;;  %v1956_v43 = vld [vmem:[%s15776_s3 + $0x628] sm:$0xff]  ;;  %v1967_v26 = vld [vmem:[%s15776_s3 + $0x680] sm:$0xff] }
 0x1f4   :  { %4707 = vmatprep.mubr.bf16.mxu1 %v12829_v25  ;;  %16148 = vst [vmem:[#allocation116_spill] sm:$0xff] %v12863_v29  ;;  %v12865_v61 = vpack.c.bf16 %v2054_v33, %v2048_v54  ;;  %16150 = vst [vmem:[#allocation118_spill] sm:$0xff] %v12867_v38  ;;  %v12895_v9 = vpack.c.bf16 %v1962_v15, %v1956_v43  ;;  %v1961_v54 = vld [vmem:[%s15776_s3 + $0x650] sm:$0xff]  ;;  %v1968_v33 = vld [vmem:[%s15776_s3 + $0x688] sm:$0xff] }
 0x1f5   :  { %16152 = vst [vmem:[#allocation120_spill] sm:$0xff] %v12893_v4  ;;  %v1974_v19 = vld [vmem:[%s15776_s3 + $0x6b8] sm:$0xff]  ;;  %v12913_v48 = vpack.c.bf16 %v1961_v54, %v1955_v23  ;;  %v1973_v43 = vld [vmem:[%s15776_s3 + $0x6b0] sm:$0xff]  ;;  %v1980_v23 = vld [vmem:[%s15776_s3 + $0x6e8] sm:$0xff] }
 0x1f6   :  { %16149 = vst [vmem:[#allocation117_spill] sm:$0xff] %v12865_v61  ;;  %16153 = vst [vmem:[#allocation121_spill] sm:$0xff] %v12895_v9  ;;  %v12918_v8 = vpack.c.bf16 %v1974_v19, %v1968_v33  ;;  %v9960_v57 = vld [vmem:[%s15777_s4 + $0x33c] ss:$24 sps:$4 sm:$0xff]   ;;  %v9958_v15 = vld [vmem:[%s15777_s4 + $0x338] ss:$24 sps:$4 sm:$0xff]   ;;  %v12945_v19 = vpack.c.bf16 %v1973_v43, %v1967_v26 }
 0x1f7   :  { %16154 = vst [vmem:[#allocation122_spill] sm:$0xff] %v12913_v48  ;;  %v1986_v54 = vld [vmem:[%s15776_s3 + $0x718] sm:$0xff]  ;;  %v9966_v33 = vld [vmem:[%s15777_s4 + $0x36c] ss:$24 sps:$4 sm:$0xff]   ;;  %v1985_v43 = vld [vmem:[%s15776_s3 + $0x710] sm:$0xff] }
 0x1f8   :  { %16155 = vst [vmem:[#allocation123_spill] sm:$0xff] %v12918_v8  ;;  %16156 = vst [vmem:[#allocation124_spill] sm:$0xff] %v12945_v19  ;;  %v1979_v26 = vld [vmem:[%s15776_s3 + $0x6e0] sm:$0xff] }
 0x1f9   :  { %v10000_v6 = vld [vmem:[%s15777_s4 + $0x488] ss:$24 sps:$4 sm:$0xff]  }
 0x1fa   :  { %4232 = vmatmul.mubr.bf16.gmra.mrb[124].mxu0 %v12861_v44 }
 0x1fb   :  { %4708 = vmatmul.mubr.bf16.gmra.mrb[72].mxu1 %v12863_v29  ;;  %4241 = vmatprep.mubr.bf16.mxu0 %v12865_v61 }
 0x1fc   :  { %4717 = vmatprep.mubr.bf16.mxu1 %v12867_v38  ;;  %v9976_v38 = vld [vmem:[%s15777_s4 + $0x3c8] ss:$24 sps:$4 sm:$0xff]  }
 0x202   :  { %4242 = vmatmul.mubr.bf16.gmra.mrb[128].mxu0 %v12891_v53  ;;  %v9988_v53 = vld [vmem:[%s15777_s4 + $0x428] ss:$24 sps:$4 sm:$0xff]  }
 0x203   :  { %4718 = vmatmul.mubr.bf16.gmra.mrb[76].mxu1 %v12893_v4  ;;  %4850 = vmatprep.mubr.bf16.mxu0 %v11593_v17 }
 0x204   :  { %4727 = vmatprep.mubr.bf16.mxu1 %v12895_v9 }
 0x20a   :  { %4851 = vmatmul.mubr.bf16.vlgmr.msra.gmra.mrb[132].mxu0 %v11749_v39 }
 0x20b   :  { %4728 = vmatmul.mubr.bf16.gmra.mrb[80].mxu1 %v12913_v48  ;;  %5102 = vmatpush1.bf16.msra.mxu0 %v9952_v18  ;;  %v12947_v18 = vpack.c.bf16 %v1986_v54, %v1980_v23  ;;  %v1998_v23 = vld [vmem:[%s15776_s3 + $0x778] sm:$0xff]  ;;  %v12981_v48 = vpack.c.bf16 %v1985_v43, %v1979_v26  ;;  %v1991_v26 = vld [vmem:[%s15776_s3 + $0x740] sm:$0xff]  ;;  %v2004_v43 = vld [vmem:[%s15776_s3 + $0x7a8] sm:$0xff] }
 0x20c   :  { %4737 = vmatprep.mubr.bf16.mxu1 %v12918_v8  ;;  %4860 = vmatprep.mubr.bf16.mxu0 %v11756_v49  ;;  %v9972_v8 = vld [vmem:[%s15777_s4 + $0x39c] ss:$24 sps:$4 sm:$0xff]   ;;  %v9970_v54 = vld [vmem:[%s15777_s4 + $0x398] ss:$24 sps:$4 sm:$0xff]  }
 0x20d   :  { %5103 = vmatprep.subr.bf16.mxu0 %v9960_v57  ;;  %16157 = vst [vmem:[#allocation125_spill] sm:$0xff] %v12947_v18  ;;  %v9964_v57 = vld [vmem:[%s15777_s4 + $0x368] ss:$24 sps:$4 sm:$0xff]   ;;  %16158 = vst [vmem:[#allocation126_spill] sm:$0xff] %v12981_v48 }
 0x20f   :  { %5104 = vmatpush1.bf16.msra.mxu0 %v9958_v15  ;;  %v1992_v15 = vld [vmem:[%s15776_s3 + $0x748] sm:$0xff] }
 0x210   :  { %5105 = vmatprep.subr.bf16.mxu0 %v9966_v33  ;;  %v12985_v4 = vpack.c.bf16 %v1998_v23, %v1992_v15  ;;  %v2010_v15 = vld [vmem:[%s15776_s3 + $0x7d8] sm:$0xff] }
 0x211   :  { %v9982_v23 = vld [vmem:[%s15777_s4 + $0x3f8] ss:$24 sps:$4 sm:$0xff]   ;;  %v13025_v22 = vpack.c.bf16 %v2010_v15, %v2004_v43 }
 0x212   :  { %4861 = vmatmul.mubr.bf16.gmra.mrb[136].mxu0 %v11797_v14  ;;  %16159 = vst [vmem:[#allocation127_spill] sm:$0xff] %v12985_v4  ;;  %v2022_v43 = vld [vmem:[%s15776_s3 + $0x838] sm:$0xff] }
 0x213   :  { %4738 = vmatmul.mubr.bf16.gmra.mrb[84].mxu1 %v12945_v19  ;;  %4870 = vmatprep.mubr.bf16.mxu0 %v11801_v21  ;;  %16161 = vst [vmem:[#allocation129_spill] sm:$0xff] %v13025_v22  ;;  %v9994_v15 = vld [vmem:[%s15777_s4 + $0x458] ss:$24 sps:$4 sm:$0xff]  }
 0x214   :  { %4747 = vmatprep.mubr.bf16.mxu1 %v12947_v18  ;;  %5106 = vmatpush1.bf16.msra.mxu0 %v9964_v57  ;;  %v9978_v18 = vld [vmem:[%s15777_s4 + $0x3cc] ss:$24 sps:$4 sm:$0xff]  }
 0x215   :  { %v12974_v33 = vpop.f32.mrb[32].mxu0  ;;  %5107 = vmatprep.subr.bf16.mxu0 %v9972_v8  ;;  %v9984_v8 = vld [vmem:[%s15777_s4 + $0x3fc] ss:$24 sps:$4 sm:$0xff]  }
 0x216   :  { %v12979_v19 = vpop.f32.mrb[33].mxu0 }
 0x217   :  { %v12983_v9 = vpop.f32.mrb[34].mxu0 }
 0x218   :  { %v12987_v57 = vpop.f32.mrb[35].mxu0  ;;  %5108 = vmatpush1.bf16.msra.mxu0 %v9970_v54 }
 0x219   :  { %5109 = vmatprep.subr.bf16.mxu0 %v9978_v18  ;;  %v1997_v18 = vld [vmem:[%s15776_s3 + $0x770] sm:$0xff] }
 0x21a   :  { %4871 = vmatmul.mubr.bf16.gmra.mrb[140].mxu0 %v11853_v1  ;;  %v13021_v29 = vpack.c.bf16 %v1997_v18, %v1991_v26  ;;  %v2003_v26 = vld [vmem:[%s15776_s3 + $0x7a0] sm:$0xff]  ;;  %v2016_v18 = vld [vmem:[%s15776_s3 + $0x808] sm:$0xff] }
 0x21b   :  { %4748 = vmatmul.mubr.bf16.gmra.mrb[88].mxu1 %v12981_v48  ;;  %4880 = vmatprep.mubr.bf16.mxu0 %v11866_v47  ;;  %v13065_v32 = vpack.c.bf16 %v2022_v43, %v2016_v18  ;;  %v2034_v18 = vld [vmem:[%s15776_s3 + $0x898] sm:$0xff] }
 0x21c   :  { %4757 = vmatprep.mubr.bf16.mxu1 %v12985_v4  ;;  %5110 = vmatpush1.bf16.msra.mxu0 %v9976_v38  ;;  %v9990_v4 = vld [vmem:[%s15777_s4 + $0x42c] ss:$24 sps:$4 sm:$0xff]   ;;  %16160 = vst [vmem:[#allocation128_spill] sm:$0xff] %v13021_v29  ;;  %v10006_v43 = vld [vmem:[%s15777_s4 + $0x4b8] ss:$24 sps:$4 sm:$0xff]  }
 0x21d   :  { %v13014_v54 = vpop.f32.mrb[36].mxu0  ;;  %5111 = vmatprep.subr.bf16.mxu0 %v9984_v8  ;;  %v9996_v8 = vld [vmem:[%s15777_s4 + $0x45c] ss:$24 sps:$4 sm:$0xff]   ;;  %16163 = vst [vmem:[#allocation131_spill] sm:$0xff] %v13065_v32 }
 0x21e   :  { %v13019_v48 = vpop.f32.mrb[37].mxu0 }
 0x21f   :  { %v13023_v25 = vpop.f32.mrb[38].mxu0 }
 0x220   :  { %v13027_v38 = vpop.f32.mrb[39].mxu0  ;;  %5112 = vmatpush1.bf16.msra.mxu0 %v9982_v23 }
 0x221   :  { %5113 = vmatprep.subr.bf16.mxu0 %v9990_v4  ;;  %v2009_v4 = vld [vmem:[%s15776_s3 + $0x7d0] sm:$0xff] }
 0x222   :  { %4881 = vmatmul.mubr.bf16.gmra.mrb[144].mxu0 %v11924_v59  ;;  %v13061_v61 = vpack.c.bf16 %v2009_v4, %v2003_v26  ;;  %v2015_v26 = vld [vmem:[%s15776_s3 + $0x800] sm:$0xff]  ;;  %v2028_v4 = vld [vmem:[%s15776_s3 + $0x868] sm:$0xff] }
 0x223   :  { %4758 = vmatmul.mubr.bf16.gmra.mrb[92].mxu1 %v13021_v29  ;;  %4890 = vmatprep.mubr.bf16.mxu0 %v11930_v20  ;;  %v13105_v60 = vpack.c.bf16 %v2034_v18, %v2028_v4  ;;  %v2046_v4 = vld [vmem:[%s15776_s3 + $0x8f8] sm:$0xff] }
 0x224   :  { %4767 = vmatprep.mubr.bf16.mxu1 %v13025_v22  ;;  %5114 = vmatpush1.bf16.msra.mxu0 %v9988_v53  ;;  %v10002_v22 = vld [vmem:[%s15777_s4 + $0x48c] ss:$24 sps:$4 sm:$0xff]   ;;  %16162 = vst [vmem:[#allocation130_spill] sm:$0xff] %v13061_v61  ;;  %v10018_v18 = vld [vmem:[%s15777_s4 + $0x518] ss:$24 sps:$4 sm:$0xff]  }
 0x225   :  { %v13054_v23 = vpop.f32.mrb[40].mxu0  ;;  %5115 = vmatprep.subr.bf16.mxu0 %v9996_v8  ;;  %v10008_v8 = vld [vmem:[%s15777_s4 + $0x4bc] ss:$24 sps:$4 sm:$0xff]   ;;  %16165 = vst [vmem:[#allocation133_spill] sm:$0xff] %v13105_v60 }
 0x226   :  { %v13059_v29 = vpop.f32.mrb[41].mxu0 }
 0x227   :  { %v13063_v44 = vpop.f32.mrb[42].mxu0 }
 0x228   :  { %v13067_v53 = vpop.f32.mrb[43].mxu0  ;;  %5116 = vmatpush1.bf16.msra.mxu0 %v9994_v15 }
 0x229   :  { %5117 = vmatprep.subr.bf16.mxu0 %v10002_v22  ;;  %v2021_v22 = vld [vmem:[%s15776_s3 + $0x830] sm:$0xff] }
 0x22a   :  { %4891 = vmatmul.mubr.bf16.gmra.mrb[148].mxu0 %v11980_v28  ;;  %v13101_v40 = vpack.c.bf16 %v2021_v22, %v2015_v26  ;;  %v2027_v26 = vld [vmem:[%s15776_s3 + $0x860] sm:$0xff]  ;;  %v2040_v22 = vld [vmem:[%s15776_s3 + $0x8c8] sm:$0xff] }
 0x22b   :  { %4768 = vmatmul.mubr.bf16.gmra.mrb[96].mxu1 %v13061_v61  ;;  %4900 = vmatprep.mubr.bf16.mxu0 %v11986_v0  ;;  %v13145_v42 = vpack.c.bf16 %v2046_v4, %v2040_v22  ;;  %v2058_v22 = vld [vmem:[%s15776_s3 + $0x958] sm:$0xff] }
 0x22c   :  { %4777 = vmatprep.mubr.bf16.mxu1 %v13065_v32  ;;  %5118 = vmatpush1.bf16.msra.mxu0 %v10000_v6  ;;  %v10014_v32 = vld [vmem:[%s15777_s4 + $0x4ec] ss:$24 sps:$4 sm:$0xff]   ;;  %16164 = vst [vmem:[#allocation132_spill] sm:$0xff] %v13101_v40  ;;  %v10030_v4 = vld [vmem:[%s15777_s4 + $0x578] ss:$24 sps:$4 sm:$0xff]  }
 0x22d   :  { %v13094_v15 = vpop.f32.mrb[44].mxu0  ;;  %5119 = vmatprep.subr.bf16.mxu0 %v10008_v8  ;;  %v10020_v8 = vld [vmem:[%s15777_s4 + $0x51c] ss:$24 sps:$4 sm:$0xff]   ;;  %16167 = vst [vmem:[#allocation135_spill] sm:$0xff] %v13145_v42 }
 0x22e   :  { %v13099_v61 = vpop.f32.mrb[45].mxu0 }
 0x22f   :  { %v13103_v7 = vpop.f32.mrb[46].mxu0 }
 0x230   :  { %v13107_v6 = vpop.f32.mrb[47].mxu0  ;;  %5120 = vmatpush1.bf16.msra.mxu0 %v10006_v43 }
 0x231   :  { %5121 = vmatprep.subr.bf16.mxu0 %v10014_v32  ;;  %v2033_v32 = vld [vmem:[%s15776_s3 + $0x890] sm:$0xff] }
 0x232   :  { %4901 = vmatmul.mubr.bf16.gmra.mrb[152].mxu0 %v12036_v34  ;;  %v13141_v10 = vpack.c.bf16 %v2033_v32, %v2027_v26  ;;  %v2039_v26 = vld [vmem:[%s15776_s3 + $0x8c0] sm:$0xff]  ;;  %v2052_v32 = vld [vmem:[%s15776_s3 + $0x928] sm:$0xff] }
 0x233   :  { %4778 = vmatmul.mubr.bf16.gmra.mrb[100].mxu1 %v13101_v40  ;;  %4910 = vmatprep.mubr.bf16.mxu0 %v12042_v13  ;;  %v13185_v62 = vpack.c.bf16 %v2058_v22, %v2052_v32 }
 0x234   :  { %4787 = vmatprep.mubr.bf16.mxu1 %v13105_v60  ;;  %5122 = vmatpush1.bf16.msra.mxu0 %v10012_v27  ;;  %v10026_v60 = vld [vmem:[%s15777_s4 + $0x54c] ss:$24 sps:$4 sm:$0xff]   ;;  %16166 = vst [vmem:[#allocation134_spill] sm:$0xff] %v13141_v10 }
 0x235   :  { %v13134_v43 = vpop.f32.mrb[48].mxu0  ;;  %5123 = vmatprep.subr.bf16.mxu0 %v10020_v8  ;;  %v10032_v8 = vld [vmem:[%s15777_s4 + $0x57c] ss:$24 sps:$4 sm:$0xff]   ;;  %16170 = vst [vmem:[#allocation138_spill] sm:$0xff] %v13185_v62 }
 0x236   :  { %v13139_v40 = vpop.f32.mrb[49].mxu0 }
 0x237   :  { %v13143_v50 = vpop.f32.mrb[50].mxu0 }
 0x238   :  { %v13147_v27 = vpop.f32.mrb[51].mxu0  ;;  %5124 = vmatpush1.bf16.msra.mxu0 %v10018_v18 }
 0x239   :  { %5125 = vmatprep.subr.bf16.mxu0 %v10026_v60  ;;  %v2045_v60 = vld [vmem:[%s15776_s3 + $0x8f0] sm:$0xff] }
 0x23a   :  { %4911 = vmatmul.mubr.bf16.gmra.mrb[156].mxu0 %v12092_v2 }
 0x23b   :  { %4788 = vmatmul.mubr.bf16.gmra.mrb[104].mxu1 %v13141_v10  ;;  %4920 = vmatprep.mubr.bf16.mxu0 %v12098_v45  ;;  %v13181_v45 = vpack.c.bf16 %v2045_v60, %v2039_v26  ;;  %v2057_v26 = vld [vmem:[%s15776_s3 + $0x950] sm:$0xff] }
 0x23c   :  { %4797 = vmatprep.mubr.bf16.mxu1 %v13145_v42  ;;  %5126 = vmatpush1.bf16.msra.mxu0 %v10024_v58  ;;  %v10038_v42 = vld [vmem:[%s15777_s4 + $0x5ac] ss:$24 sps:$4 sm:$0xff]  }
 0x23d   :  { %v13174_v18 = vpop.f32.mrb[52].mxu0  ;;  %5127 = vmatprep.subr.bf16.mxu0 %v10032_v8  ;;  %16169 = vst [vmem:[#allocation137_spill] sm:$0xff] %v13181_v45  ;;  %v2051_v8 = vld [vmem:[%s15776_s3 + $0x920] sm:$0xff] }
 0x23e   :  { %16168 = vst [vmem:[#allocation136_spill] sm:$0xff] %v13174_v18  ;;  %v13179_v10 = vpop.f32.mrb[53].mxu0  ;;  %v10036_v18 = vld [vmem:[%s15777_s4 + $0x5a8] ss:$24 sps:$4 sm:$0xff]   ;;  %v13206_v32 = vpack.c.bf16 %v2057_v26, %v2051_v8 }
 0x23f   :  { %v13183_v2 = vpop.f32.mrb[54].mxu0 }
 0x240   :  { %v13187_v58 = vpop.f32.mrb[55].mxu0  ;;  %5128 = vmatpush1.bf16.msra.mxu0 %v10030_v4  ;;  %16171 = vst [vmem:[#allocation139_spill] sm:$0xff] %v13206_v32 }
 0x241   :  { %5129 = vmatprep.subr.bf16.mxu0 %v10038_v42 }
 0x242   :  { %4921 = vmatmul.mubr.bf16.gmra.mrb[160].mxu0 %v12146_v3 }
 0x243   :  { %4798 = vmatmul.mubr.bf16.gmra.mrb[108].mxu1 %v13181_v45  ;;  %4930 = vmatprep.mubr.bf16.mxu0 %v12150_v55  ;;  %v10044_v45 = vld [vmem:[%s15777_s4 + $0x5dc] ss:$24 sps:$4 sm:$0xff]  }
 0x244   :  { %4807 = vmatprep.mubr.bf16.mxu1 %v13185_v62  ;;  %5130 = vmatpush1.bf16.msra.mxu0 %v10036_v18  ;;  %v10042_v62 = vld [vmem:[%s15777_s4 + $0x5d8] ss:$24 sps:$4 sm:$0xff]  }
 0x245   :  { %v13202_v60 = vpop.f32.mrb[56].mxu0  ;;  %5131 = vmatprep.subr.bf16.mxu0 %v10044_v45  ;;  %v9999_v45 = vld [vmem:[%s15777_s4 + $0x374] ss:$24 sps:$4 sm:$0xff]  }
 0x246   :  { %v13204_v42 = vpop.f32.mrb[57].mxu0 }
 0x247   :  { %v13208_v22 = vpop.f32.mrb[58].mxu0 }
 0x248   :  { %16172 = vst [vmem:[#allocation140_spill] sm:$0xff] %v13208_v22  ;;  %v13210_v4 = vpop.f32.mrb[59].mxu0  ;;  %5132 = vmatpush1.bf16.msra.mxu0 %v10042_v62  ;;  %v9991_v62 = vld [vmem:[%s15777_s4 + $0x340] ss:$24 sps:$4 sm:$0xff]  }
 0x249   :  { %16173 = vst [vmem:[#allocation141_spill] sm:$0xff] %v13210_v4  ;;  %v9985_v4 = vld [vmem:[%s15777_s4 + $0x310] ss:$24 sps:$4 sm:$0xff]  }
 0x24a   :  { %4931 = vmatmul.mubr.bf16.gmra.mrb[164].mxu0 %v12191_v36 }
 0x24b   :  { %4808 = vmatmul.mubr.bf16.gmra.mrb[112].mxu1 %v13206_v32  ;;  %4940 = vmatprep.mubr.bf16.mxu0 %v12195_v46  ;;  %v9993_v32 = vld [vmem:[%s15777_s4 + $0x344] ss:$24 sps:$4 sm:$0xff]  }
 0x24c   :  { %5699 = vmatprep.mubr.bf16.mxu1 %v11593_v17  ;;  %v10050_v17 = vld [vmem:[%s15777_s4 + $0x60c] ss:$24 sps:$4 sm:$0xff]  }
 0x24d   :  { %v13222_v18 = vpop.f32.mrb[60].mxu0  ;;  %5384 = vmatprep.subr.bf16.mxu0 %v10050_v17  ;;  %v10005_v17 = vld [vmem:[%s15777_s4 + $0x3a4] ss:$24 sps:$4 sm:$0xff]  }
 0x24e   :  { %v13224_v8 = vpop.f32.mrb[61].mxu0 }
 0x24f   :  { %v13226_v26 = vpop.f32.mrb[62].mxu0 }
 0x250   :  { %16174 = vst [vmem:[#allocation142_spill] sm:$0xff] %v13226_v26  ;;  %v13231_v22 = vpop.f32.mrb[63].mxu0 }
 0x251   :  { %16175 = vst [vmem:[#allocation143_spill] sm:$0xff] %v13231_v22 }
 0x252   :  { %4941 = vmatmul.mubr.bf16.gmra.mrb[168].mxu0 %v12230_v56 }
 0x253   :  { %5700 = vmatmul.mubr.bf16.vlgmr.msra.gmra.mrb[116].mxu1 %v11749_v39  ;;  %4950 = vmatprep.mubr.bf16.mxu0 %v12237_v24  ;;  %v2497_v39 = vld [vmem:[%s15778_s5] sm:$0x3f] }
 0x254   :  { %5951 = vmatpush1.bf16.msra.mxu1 %v9985_v4  ;;  %5709 = vmatprep.mubr.bf16.mxu1 %v11756_v49  ;;  %v13259_v22 = vrot.slane %v2497_v39, %v11851_v63  ;;  %v13267_v26 = vrot.slane %v2497_v39, %v11861_v5 }
 0x255   :  { %5952 = vmatprep.subr.bf16.mxu1 %v9993_v32  ;;  %v13252_v4 = vpop.f32.mrb[64].mxu0  ;;  %v9997_v32 = vld [vmem:[%s15777_s4 + $0x370] ss:$24 sps:$4 sm:$0xff]  }
 0x256   :  { %v13254_v24 = vpop.f32.mrb[65].mxu0  ;;  %v4006_v39 = vadd.f32 %v12979_v19, %v13267_v26 }
 0x257   :  { %16176 = vst [vmem:[#allocation144_spill] sm:$0xff] %v13254_v24  ;;  %v13256_v56 = vpop.f32.mrb[66].mxu0 }
 0x258   :  { %16177 = vst [vmem:[#allocation145_spill] sm:$0xff] %v13256_v56  ;;  %5953 = vmatpush1.bf16.msra.mxu1 %v9991_v62  ;;  %v13261_v49 = vpop.f32.mrb[67].mxu0  ;;  %v4004_v62 = vadd.f32 %v12974_v33, %v13259_v22 }
 0x259   :  { %16178 = vst [vmem:[#allocation146_spill] sm:$0xff] %v13261_v49  ;;  %5954 = vmatprep.subr.bf16.mxu1 %v9999_v45  ;;  %v10003_v45 = vld [vmem:[%s15777_s4 + $0x3a0] ss:$24 sps:$4 sm:$0xff]  }
 0x25a   :  { %4951 = vmatmul.mubr.bf16.gmra.mrb[172].mxu0 %v12278_v41  ;;  %v4010_v41 = vadd.f32 %v12987_v57, %v13267_v26 }
 0x25b   :  { %5710 = vmatmul.mubr.bf16.gmra.mrb[120].mxu1 %v11797_v14  ;;  %4960 = vmatprep.mubr.bf16.mxu0 %v12285_v51  ;;  %v10011_v14 = vld [vmem:[%s15777_s4 + $0x3d4] ss:$24 sps:$4 sm:$0xff]  }
 0x25c   :  { %5719 = vmatprep.mubr.bf16.mxu1 %v11801_v21  ;;  %5955 = vmatpush1.bf16.msra.mxu1 %v9997_v32  ;;  %v4008_v21 = vadd.f32 %v12983_v9, %v13259_v22  ;;  %v10017_v9 = vld [vmem:[%s15777_s4 + $0x404] ss:$24 sps:$4 sm:$0xff]  }
 0x25d   :  { %v13283_v5 = vpop.f32.mrb[68].mxu0  ;;  %5956 = vmatprep.subr.bf16.mxu1 %v10005_v17 }
 0x25e   :  { %16179 = vst [vmem:[#allocation147_spill] sm:$0xff] %v13283_v5  ;;  %v4569_v63 = vpop.f32.mrb[16].mxu1  ;;  %v13290_v32 = vpop.f32.mrb[69].mxu0 }
 0x25f   :  { %v8488_v33 = vadd.f32 %v4569_v63, %v4004_v62  ;;  %v4571_v51 = vpop.f32.mrb[17].mxu1  ;;  %v13294_v19 = vpop.f32.mrb[70].mxu0  ;;  %v10009_v63 = vld [vmem:[%s15777_s4 + $0x3d0] ss:$24 sps:$4 sm:$0xff]  }
 0x260   :  { %v8490_v49 = vadd.f32 %v4571_v51, %v4006_v39  ;;  %v4573_v5 = vpop.f32.mrb[18].mxu1  ;;  %v13299_v56 = vpop.f32.mrb[71].mxu0  ;;  %5957 = vmatpush1.bf16.msra.mxu1 %v10003_v45  ;;  %v4020_v39 = vadd.f32 %v13027_v38, %v13267_v26 }
 0x261   :  { %6516 = vst [vmem:[%s15784_s11] sm:$0xff] %v8488_v33  ;;  %v8492_v17 = vadd.f32 %v4573_v5, %v4008_v21  ;;  %v4575_v24 = vpop.f32.mrb[19].mxu1  ;;  %5958 = vmatprep.subr.bf16.mxu1 %v10011_v14  ;;  %v4014_v5 = vadd.f32 %v13014_v54, %v13259_v22 }
 0x262   :  { %6517 = vst [vmem:[%s15784_s11 + $0x8] sm:$0xff] %v8490_v49  ;;  %v8494_v51 = vadd.f32 %v4575_v24, %v4010_v41  ;;  %4961 = vmatmul.mubr.bf16.gmra.mrb[176].mxu0 %v12326_v35  ;;  %v10015_v24 = vld [vmem:[%s15777_s4 + $0x400] ss:$24 sps:$4 sm:$0xff]   ;;  %v4016_v41 = vadd.f32 %v13019_v48, %v13267_v26  ;;  %v10023_v49 = vld [vmem:[%s15777_s4 + $0x434] ss:$24 sps:$4 sm:$0xff]  }
 0x263   :  { %6522 = vst [vmem:[%s15784_s11 + $0x30] sm:$0xff] %v8492_v17  ;;  %5720 = vmatmul.mubr.bf16.gmra.mrb[124].mxu1 %v11853_v1  ;;  %4970 = vmatprep.mubr.bf16.mxu0 %v12330_v37 }
 0x264   :  { %6523 = vst [vmem:[%s15784_s11 + $0x38] sm:$0xff] %v8494_v51  ;;  %5729 = vmatprep.mubr.bf16.mxu1 %v11866_v47  ;;  %5959 = vmatpush1.bf16.msra.mxu1 %v10009_v63  ;;  %v4018_v47 = vadd.f32 %v13023_v25, %v13259_v22  ;;  %v10021_v25 = vld [vmem:[%s15777_s4 + $0x430] ss:$24 sps:$4 sm:$0xff]   ;;  %v10029_v51 = vld [vmem:[%s15777_s4 + $0x464] ss:$24 sps:$4 sm:$0xff]  }
 0x265   :  { %v13327_v1 = vpop.f32.mrb[72].mxu0  ;;  %5960 = vmatprep.subr.bf16.mxu1 %v10017_v9  ;;  %v4024_v9 = vadd.f32 %v13054_v23, %v13259_v22 }
 0x266   :  { %v4579_v57 = vpop.f32.mrb[20].mxu1  ;;  %v13334_v62 = vpop.f32.mrb[73].mxu0 }
 0x267   :  { %v8496_v54 = vadd.f32 %v4579_v57, %v4014_v5  ;;  %v4581_v45 = vpop.f32.mrb[21].mxu1  ;;  %v13338_v48 = vpop.f32.mrb[74].mxu0  ;;  %v10027_v5 = vld [vmem:[%s15777_s4 + $0x460] ss:$24 sps:$4 sm:$0xff]   ;;  %v10035_v57 = vld [vmem:[%s15777_s4 + $0x494] ss:$24 sps:$4 sm:$0xff]  }
 0x268   :  { %v8498_v14 = vadd.f32 %v4581_v45, %v4016_v41  ;;  %v4583_v21 = vpop.f32.mrb[22].mxu1  ;;  %v13343_v17 = vpop.f32.mrb[75].mxu0  ;;  %5961 = vmatpush1.bf16.msra.mxu1 %v10015_v24  ;;  %v4026_v24 = vadd.f32 %v13059_v29, %v13267_v26 }
 0x269   :  { %6528 = vst [vmem:[%s15784_s11 + $0x60] sm:$0xff] %v8496_v54  ;;  %v8500_v33 = vadd.f32 %v4583_v21, %v4018_v47  ;;  %v4585_v63 = vpop.f32.mrb[23].mxu1  ;;  %5962 = vmatprep.subr.bf16.mxu1 %v10023_v49  ;;  %v4030_v54 = vadd.f32 %v13067_v53, %v13267_v26 }
 0x26a   :  { %6529 = vst [vmem:[%s15784_s11 + $0x68] sm:$0xff] %v8498_v14  ;;  %v8502_v38 = vadd.f32 %v4585_v63, %v4020_v39  ;;  %4971 = vmatmul.mubr.bf16.gmra.mrb[180].mxu0 %v12374_v31  ;;  %v10041_v63 = vld [vmem:[%s15777_s4 + $0x4c4] ss:$24 sps:$4 sm:$0xff]  }
 0x26b   :  { %6534 = vst [vmem:[%s15784_s11 + $0x90] sm:$0xff] %v8500_v33  ;;  %5730 = vmatmul.mubr.bf16.gmra.mrb[128].mxu1 %v11924_v59  ;;  %4980 = vmatprep.mubr.bf16.mxu0 %v12378_v30 }
 0x26c   :  { %6535 = vst [vmem:[%s15784_s11 + $0x98] sm:$0xff] %v8502_v38  ;;  %5739 = vmatprep.mubr.bf16.mxu1 %v11930_v20  ;;  %5963 = vmatpush1.bf16.msra.mxu1 %v10021_v25  ;;  %v4028_v20 = vadd.f32 %v13063_v44, %v13259_v22  ;;  %v10033_v44 = vld [vmem:[%s15777_s4 + $0x490] ss:$24 sps:$4 sm:$0xff]   ;;  %v4034_v25 = vadd.f32 %v13094_v15, %v13259_v22  ;;  %v10039_v38 = vld [vmem:[%s15777_s4 + $0x4c0] ss:$24 sps:$4 sm:$0xff]  }
 0x26d   :  { %v13371_v59 = vpop.f32.mrb[76].mxu0  ;;  %5964 = vmatprep.subr.bf16.mxu1 %v10029_v51  ;;  %v4036_v51 = vadd.f32 %v13099_v61, %v13267_v26 }
 0x26e   :  { %v4589_v41 = vpop.f32.mrb[24].mxu1  ;;  %v13378_v49 = vpop.f32.mrb[77].mxu0 }
 0x26f   :  { %v8504_v23 = vadd.f32 %v4589_v41, %v4024_v9  ;;  %v4591_v47 = vpop.f32.mrb[25].mxu1  ;;  %v13382_v29 = vpop.f32.mrb[78].mxu0 }
 0x270   :  { %v8506_v45 = vadd.f32 %v4591_v47, %v4026_v24  ;;  %v4593_v39 = vpop.f32.mrb[26].mxu1  ;;  %v13387_v21 = vpop.f32.mrb[79].mxu0  ;;  %5965 = vmatpush1.bf16.msra.mxu1 %v10027_v5  ;;  %v10047_v5 = vld [vmem:[%s15777_s4 + $0x4f4] ss:$24 sps:$4 sm:$0xff]  }
 0x271   :  { %6540 = vst [vmem:[%s15784_s11 + $0xc0] sm:$0xff] %v8504_v23  ;;  %v8508_v14 = vadd.f32 %v4593_v39, %v4028_v20  ;;  %v4595_v33 = vpop.f32.mrb[27].mxu1  ;;  %5966 = vmatprep.subr.bf16.mxu1 %v10035_v57  ;;  %v4040_v57 = vadd.f32 %v13107_v6, %v13267_v26  ;;  %v10053_v39 = vld [vmem:[%s15777_s4 + $0x524] ss:$24 sps:$4 sm:$0xff]  }
 0x272   :  { %6541 = vst [vmem:[%s15784_s11 + $0xc8] sm:$0xff] %v8506_v45  ;;  %v8510_v53 = vadd.f32 %v4595_v33, %v4030_v54  ;;  %4981 = vmatmul.mubr.bf16.gmra.mrb[184].mxu0 %v12422_v16  ;;  %v10051_v33 = vld [vmem:[%s15777_s4 + $0x520] ss:$24 sps:$4 sm:$0xff]  }
 0x273   :  { %6546 = vst [vmem:[%s15784_s11 + $0xf0] sm:$0xff] %v8508_v14  ;;  %5740 = vmatmul.mubr.bf16.gmra.mrb[132].mxu1 %v11980_v28  ;;  %4990 = vmatprep.mubr.bf16.mxu0 %v12426_v11  ;;  %v4044_v14 = vadd.f32 %v13134_v43, %v13259_v22 }
 0x274   :  { %6547 = vst [vmem:[%s15784_s11 + $0xf8] sm:$0xff] %v8510_v53  ;;  %5749 = vmatprep.mubr.bf16.mxu1 %v11986_v0  ;;  %5967 = vmatpush1.bf16.msra.mxu1 %v10033_v44  ;;  %v4038_v0 = vadd.f32 %v13103_v7, %v13259_v22  ;;  %v10045_v7 = vld [vmem:[%s15777_s4 + $0x4f0] ss:$24 sps:$4 sm:$0xff]   ;;  %v4046_v44 = vadd.f32 %v13139_v40, %v13267_v26 }
 0x275   :  { %v13415_v28 = vpop.f32.mrb[80].mxu0  ;;  %5968 = vmatprep.subr.bf16.mxu1 %v10041_v63  ;;  %v10059_v63 = vld [vmem:[%s15777_s4 + $0x554] ss:$24 sps:$4 sm:$0xff]  }
 0x276   :  { %v4599_v9 = vpop.f32.mrb[28].mxu1  ;;  %v13422_v24 = vpop.f32.mrb[81].mxu0 }
 0x277   :  { %v8512_v15 = vadd.f32 %v4599_v9, %v4034_v25  ;;  %v4601_v41 = vpop.f32.mrb[29].mxu1  ;;  %v13426_v61 = vpop.f32.mrb[82].mxu0 }
 0x278   :  { %v8514_v20 = vadd.f32 %v4601_v41, %v4036_v51  ;;  %v4603_v23 = vpop.f32.mrb[30].mxu1  ;;  %v13431_v54 = vpop.f32.mrb[83].mxu0  ;;  %5969 = vmatpush1.bf16.msra.mxu1 %v10039_v38  ;;  %v4050_v51 = vadd.f32 %v13147_v27, %v13267_v26 }
 0x279   :  { %6552 = vst [vmem:[%s15784_s11 + $0x120] sm:$0xff] %v8512_v15  ;;  %v8516_v47 = vadd.f32 %v4603_v23, %v4038_v0  ;;  %v4605_v45 = vpop.f32.mrb[31].mxu1  ;;  %5970 = vmatprep.subr.bf16.mxu1 %v10047_v5  ;;  %v16181_v23 = vld [vmem:[#allocation57_spill] sm:$0xff] }
 0x27a   :  { %6553 = vst [vmem:[%s15784_s11 + $0x128] sm:$0xff] %v8514_v20  ;;  %v8518_v6 = vadd.f32 %v4605_v45, %v4040_v57  ;;  %4991 = vmatmul.mubr.bf16.gmra.mrb[188].mxu0 %v12470_v52  ;;  %v10065_v57 = vld [vmem:[%s15777_s4 + $0x584] ss:$24 sps:$4 sm:$0xff]   ;;  %v16180_v20 = vld [vmem:[#allocation81_spill] sm:$0xff] }
 0x27b   :  { %6558 = vst [vmem:[%s15784_s11 + $0x150] sm:$0xff] %v8516_v47  ;;  %5750 = vmatmul.mubr.bf16.gmra.mrb[136].mxu1 %v12036_v34  ;;  %5000 = vmatprep.mubr.bf16.mxu0 %v12474_v12  ;;  %v16182_v47 = vld [vmem:[#allocation83_spill] sm:$0xff] }
 0x27c   :  { %6559 = vst [vmem:[%s15784_s11 + $0x158] sm:$0xff] %v8518_v6  ;;  %5759 = vmatprep.mubr.bf16.mxu1 %v12042_v13  ;;  %5971 = vmatpush1.bf16.msra.mxu1 %v10045_v7  ;;  %v4048_v13 = vadd.f32 %v13143_v50, %v13259_v22  ;;  %v10057_v50 = vld [vmem:[%s15777_s4 + $0x550] ss:$24 sps:$4 sm:$0xff]   ;;  %v16183_v45 = vld [vmem:[#allocation59_spill] sm:$0xff] }
 0x27d   :  { %v13459_v34 = vpop.f32.mrb[84].mxu0  ;;  %5972 = vmatprep.subr.bf16.mxu1 %v10053_v39  ;;  %v16184_v7 = vld [vmem:[#allocation136_spill] sm:$0xff]  ;;  %v10063_v39 = vld [vmem:[%s15777_s4 + $0x580] ss:$24 sps:$4 sm:$0xff]  }
 0x27e   :  { %v4609_v53 = vpop.f32.mrb[32].mxu1  ;;  %v13466_v25 = vpop.f32.mrb[85].mxu0  ;;  %v4054_v6 = vadd.f32 %v16184_v7, %v13259_v22 }
 0x27f   :  { %v8520_v43 = vadd.f32 %v4609_v53, %v4044_v14  ;;  %v4611_v38 = vpop.f32.mrb[33].mxu1  ;;  %v13470_v40 = vpop.f32.mrb[86].mxu0  ;;  %v4056_v14 = vadd.f32 %v13179_v10, %v13267_v26  ;;  %v10071_v53 = vld [vmem:[%s15777_s4 + $0x5b4] ss:$24 sps:$4 sm:$0xff]  }
 0x280   :  { %v8522_v9 = vadd.f32 %v4611_v38, %v4046_v44  ;;  %v4613_v5 = vpop.f32.mrb[34].mxu1  ;;  %v13475_v15 = vpop.f32.mrb[87].mxu0  ;;  %5973 = vmatpush1.bf16.msra.mxu1 %v10051_v33 }
 0x281   :  { %6564 = vst [vmem:[%s15784_s11 + $0x180] sm:$0xff] %v8520_v43  ;;  %v8524_v0 = vadd.f32 %v4613_v5, %v4048_v13  ;;  %v4615_v41 = vpop.f32.mrb[35].mxu1  ;;  %5974 = vmatprep.subr.bf16.mxu1 %v10059_v63  ;;  %v4058_v63 = vadd.f32 %v13183_v2, %v13259_v22  ;;  %v10069_v2 = vld [vmem:[%s15777_s4 + $0x5b0] ss:$24 sps:$4 sm:$0xff]  }
 0x282   :  { %6565 = vst [vmem:[%s15784_s11 + $0x188] sm:$0xff] %v8522_v9  ;;  %v8526_v27 = vadd.f32 %v4615_v41, %v4050_v51  ;;  %5001 = vmatmul.mubr.bf16.gmra.mrb[192].mxu0 %v16180_v20  ;;  %v4060_v51 = vadd.f32 %v13187_v58, %v13267_v26 }
 0x283   :  { %6570 = vst [vmem:[%s15784_s11 + $0x1b0] sm:$0xff] %v8524_v0  ;;  %5760 = vmatmul.mubr.bf16.gmra.mrb[140].mxu1 %v16181_v23  ;;  %5010 = vmatprep.mubr.bf16.mxu0 %v16182_v47  ;;  %v4064_v23 = vadd.f32 %v13202_v60, %v13259_v22 }
 0x284   :  { %6571 = vst [vmem:[%s15784_s11 + $0x1b8] sm:$0xff] %v8526_v27  ;;  %5769 = vmatprep.mubr.bf16.mxu1 %v16183_v45  ;;  %5975 = vmatpush1.bf16.msra.mxu1 %v10057_v50  ;;  %v16185_v27 = vld [vmem:[#allocation85_spill] sm:$0xff]  ;;  %v4066_v45 = vadd.f32 %v13204_v42, %v13267_v26 }
 0x285   :  { %v13503_v33 = vpop.f32.mrb[88].mxu0  ;;  %5976 = vmatprep.subr.bf16.mxu1 %v10065_v57  ;;  %v16186_v57 = vld [vmem:[#allocation87_spill] sm:$0xff] }
 0x286   :  { %v4619_v44 = vpop.f32.mrb[36].mxu1  ;;  %v13510_v43 = vpop.f32.mrb[89].mxu0 }
 0x287   :  { %v8528_v13 = vadd.f32 %v4619_v44, %v4054_v6  ;;  %v4621_v38 = vpop.f32.mrb[37].mxu1  ;;  %v13514_v10 = vpop.f32.mrb[90].mxu0 }
 0x288   :  { %v8530_v9 = vadd.f32 %v4621_v38, %v4056_v14  ;;  %v4623_v5 = vpop.f32.mrb[38].mxu1  ;;  %v13519_v41 = vpop.f32.mrb[91].mxu0  ;;  %5977 = vmatpush1.bf16.msra.mxu1 %v10063_v39 }
 0x289   :  { %6576 = vst [vmem:[%s15784_s11 + $0x1e0] sm:$0xff] %v8528_v13  ;;  %v8532_v0 = vadd.f32 %v4623_v5, %v4058_v63  ;;  %v4625_v50 = vpop.f32.mrb[39].mxu1  ;;  %5978 = vmatprep.subr.bf16.mxu1 %v10071_v53  ;;  %v16188_v63 = vld [vmem:[#allocation141_spill] sm:$0xff] }
 0x28a   :  { %6577 = vst [vmem:[%s15784_s11 + $0x1e8] sm:$0xff] %v8530_v9  ;;  %v8534_v58 = vadd.f32 %v4625_v50, %v4060_v51  ;;  %5011 = vmatmul.mubr.bf16.gmra.mrb[196].mxu0 %v16185_v27  ;;  %v10077_v50 = vld [vmem:[%s15777_s4 + $0x5e4] ss:$24 sps:$4 sm:$0xff]  }
 0x28b   :  { %6582 = vst [vmem:[%s15784_s11 + $0x210] sm:$0xff] %v8532_v0  ;;  %5770 = vmatmul.mubr.bf16.gmra.mrb[144].mxu1 %v12146_v3  ;;  %5020 = vmatprep.mubr.bf16.mxu0 %v16186_v57  ;;  %v16187_v3 = vld [vmem:[#allocation140_spill] sm:$0xff]  ;;  %v10075_v0 = vld [vmem:[%s15777_s4 + $0x5e0] ss:$24 sps:$4 sm:$0xff]  }
 0x28c   :  { %6583 = vst [vmem:[%s15784_s11 + $0x218] sm:$0xff] %v8534_v58  ;;  %5779 = vmatprep.mubr.bf16.mxu1 %v12150_v55  ;;  %5979 = vmatpush1.bf16.msra.mxu1 %v10069_v2  ;;  %v4068_v39 = vadd.f32 %v16187_v3, %v13259_v22  ;;  %v4070_v55 = vadd.f32 %v16188_v63, %v13267_v26  ;;  %v16189_v2 = vld [vmem:[#allocation89_spill] sm:$0xff]  ;;  %v16190_v58 = vld [vmem:[#allocation91_spill] sm:$0xff] }
 0x28d   :  { %v13541_v7 = vpop.f32.mrb[92].mxu0  ;;  %5980 = vmatprep.subr.bf16.mxu1 %v10077_v50  ;;  %v16194_v50 = vld [vmem:[#allocation65_spill] sm:$0xff] }
 0x28e   :  { %v4629_v6 = vpop.f32.mrb[40].mxu1  ;;  %v13545_v44 = vpop.f32.mrb[93].mxu0 }
 0x28f   :  { %v8536_v14 = vadd.f32 %v4629_v6, %v4064_v23  ;;  %v4631_v53 = vpop.f32.mrb[41].mxu1  ;;  %v13549_v38 = vpop.f32.mrb[94].mxu0  ;;  %v4074_v23 = vadd.f32 %v13222_v18, %v13259_v22 }
 0x290   :  { %v8538_v13 = vadd.f32 %v4631_v53, %v4066_v45  ;;  %v4633_v60 = vpop.f32.mrb[42].mxu1  ;;  %v13554_v51 = vpop.f32.mrb[95].mxu0  ;;  %v4076_v45 = vadd.f32 %v13224_v8, %v13267_v26  ;;  %5981 = vmatpush1.bf16.msra.mxu1 %v10075_v0  ;;  %v16193_v0 = vld [vmem:[#allocation93_spill] sm:$0xff] }
 0x291   :  { %6588 = vst [vmem:[%s15784_s11 + $0x240] sm:$0xff] %v8536_v14  ;;  %v8540_v42 = vadd.f32 %v4633_v60, %v4068_v39  ;;  %v4635_v9 = vpop.f32.mrb[43].mxu1 }
 0x292   :  { %6589 = vst [vmem:[%s15784_s11 + $0x248] sm:$0xff] %v8538_v13  ;;  %v8542_v5 = vadd.f32 %v4635_v9, %v4070_v55  ;;  %5021 = vmatmul.mubr.bf16.gmra.mrb[200].mxu0 %v16189_v2 }
 0x293   :  { %6594 = vst [vmem:[%s15784_s11 + $0x270] sm:$0xff] %v8540_v42  ;;  %5780 = vmatmul.mubr.bf16.gmra.mrb[148].mxu1 %v12191_v36  ;;  %5030 = vmatprep.mubr.bf16.mxu0 %v16190_v58  ;;  %v16191_v36 = vld [vmem:[#allocation142_spill] sm:$0xff] }
 0x294   :  { %6595 = vst [vmem:[%s15784_s11 + $0x278] sm:$0xff] %v8542_v5  ;;  %5789 = vmatprep.mubr.bf16.mxu1 %v12195_v46  ;;  %v4078_v39 = vadd.f32 %v16191_v36, %v13259_v22  ;;  %v16192_v46 = vld [vmem:[#allocation143_spill] sm:$0xff]  ;;  %v4084_v36 = vadd.f32 %v13252_v4, %v13259_v22 }
 0x295   :  { %v13579_v6 = vpop.f32.mrb[96].mxu0  ;;  %v4080_v55 = vadd.f32 %v16192_v46, %v13267_v26 }
 0x296   :  { %v4639_v3 = vpop.f32.mrb[44].mxu1  ;;  %v13583_v53 = vpop.f32.mrb[97].mxu0 }
 0x297   :  { %v8544_v14 = vadd.f32 %v4639_v3, %v4074_v23  ;;  %v4641_v63 = vpop.f32.mrb[45].mxu1  ;;  %v13587_v18 = vpop.f32.mrb[98].mxu0  ;;  %v16195_v23 = vld [vmem:[#allocation97_spill] sm:$0xff] }
 0x298   :  { %v8546_v13 = vadd.f32 %v4641_v63, %v4076_v45  ;;  %v4643_v60 = vpop.f32.mrb[46].mxu1  ;;  %v13592_v42 = vpop.f32.mrb[99].mxu0  ;;  %v16196_v45 = vld [vmem:[#allocation67_spill] sm:$0xff]  ;;  %v10083_v3 = vld [vmem:[%s15777_s4 + $0x614] ss:$24 sps:$4 sm:$0xff]  }
 0x299   :  { %6600 = vst [vmem:[%s15784_s11 + $0x2a0] sm:$0xff] %v8544_v14  ;;  %v8548_v8 = vadd.f32 %v4643_v60, %v4078_v39  ;;  %v4645_v9 = vpop.f32.mrb[47].mxu1  ;;  %v16197_v39 = vld [vmem:[#allocation144_spill] sm:$0xff]  ;;  %6233 = vmatprep.subr.bf16.mxu1 %v10083_v3 }
 0x29a   :  { %6601 = vst [vmem:[%s15784_s11 + $0x2a8] sm:$0xff] %v8546_v13  ;;  %v8550_v5 = vadd.f32 %v4645_v9, %v4080_v55  ;;  %5031 = vmatmul.mubr.bf16.gmra.mrb[204].mxu0 %v16193_v0  ;;  %v4086_v14 = vadd.f32 %v16197_v39, %v13267_v26  ;;  %v16198_v55 = vld [vmem:[#allocation145_spill] sm:$0xff] }
 0x29b   :  { %6606 = vst [vmem:[%s15784_s11 + $0x2d0] sm:$0xff] %v8548_v8  ;;  %5790 = vmatmul.mubr.bf16.gmra.mrb[152].mxu1 %v16194_v50  ;;  %5040 = vmatprep.mubr.bf16.mxu0 %v16195_v23  ;;  %v4088_v13 = vadd.f32 %v16198_v55, %v13259_v22  ;;  %v16202_v55 = vld [vmem:[#allocation101_spill] sm:$0xff] }
 0x29c   :  { %6607 = vst [vmem:[%s15784_s11 + $0x2d8] sm:$0xff] %v8550_v5  ;;  %5799 = vmatprep.mubr.bf16.mxu1 %v16196_v45  ;;  %v16199_v5 = vld [vmem:[#allocation146_spill] sm:$0xff] }
 0x29d   :  { %v13614_v63 = vpop.f32.mrb[100].mxu0  ;;  %v4090_v50 = vadd.f32 %v16199_v5, %v13267_v26 }
 0x29e   :  { %v4649_v46 = vpop.f32.mrb[48].mxu1  ;;  %v13618_v8 = vpop.f32.mrb[101].mxu0 }
 0x29f   :  { %v8552_v60 = vadd.f32 %v4649_v46, %v4084_v36  ;;  %v4651_v9 = vpop.f32.mrb[49].mxu1  ;;  %v13622_v23 = vpop.f32.mrb[102].mxu0  ;;  %v16201_v46 = vld [vmem:[#allocation69_spill] sm:$0xff] }
 0x2a0   :  { %v8554_v45 = vadd.f32 %v4651_v9, %v4086_v14  ;;  %v4653_v4 = vpop.f32.mrb[50].mxu1  ;;  %v13627_v3 = vpop.f32.mrb[103].mxu0  ;;  %v16200_v14 = vld [vmem:[#allocation99_spill] sm:$0xff] }
 0x2a1   :  { %6612 = vst [vmem:[%s15784_s11 + $0x300] sm:$0xff] %v8552_v60  ;;  %v8556_v39 = vadd.f32 %v4653_v4, %v4088_v13  ;;  %v4655_v0 = vpop.f32.mrb[51].mxu1  ;;  %v16203_v13 = vld [vmem:[#allocation71_spill] sm:$0xff] }
 0x2a2   :  { %6613 = vst [vmem:[%s15784_s11 + $0x308] sm:$0xff] %v8554_v45  ;;  %v8558_v36 = vadd.f32 %v4655_v0, %v4090_v50  ;;  %5041 = vmatmul.mubr.bf16.gmra.mrb[208].mxu0 %v16200_v14  ;;  %v16204_v60 = vld [vmem:[#allocation147_spill] sm:$0xff]  ;;  %v4096_v0 = vadd.f32 %v13290_v32, %v13267_v26  ;;  %v4098_v45 = vadd.f32 %v13294_v19, %v13259_v22 }
 0x2a3   :  { %6618 = vst [vmem:[%s15784_s11 + $0x330] sm:$0xff] %v8556_v39  ;;  %5800 = vmatmul.mubr.bf16.gmra.mrb[156].mxu1 %v16201_v46  ;;  %5050 = vmatprep.mubr.bf16.mxu0 %v16202_v55  ;;  %v4094_v9 = vadd.f32 %v16204_v60, %v13259_v22  ;;  %v4100_v46 = vadd.f32 %v13299_v56, %v13267_v26  ;;  %v16206_v56 = vld [vmem:[#allocation103_spill] sm:$0xff] }
 0x2a4   :  { %6619 = vst [vmem:[%s15784_s11 + $0x338] sm:$0xff] %v8558_v36  ;;  %5809 = vmatprep.mubr.bf16.mxu1 %v16203_v13 }
 0x2a5   :  { %v13646_v5 = vpop.f32.mrb[104].mxu0 }
 0x2a6   :  { %16205 = vst [vmem:[#allocation81_spill] sm:$0xff] %v13646_v5  ;;  %v4659_v50 = vpop.f32.mrb[52].mxu1  ;;  %v13650_v39 = vpop.f32.mrb[105].mxu0 }
 0x2a7   :  { %v8560_v4 = vadd.f32 %v4659_v50, %v4094_v9  ;;  %v4661_v36 = vpop.f32.mrb[53].mxu1  ;;  %v13654_v55 = vpop.f32.mrb[106].mxu0  ;;  %v16207_v9 = vld [vmem:[#allocation105_spill] sm:$0xff] }
 0x2a8   :  { %v8562_v13 = vadd.f32 %v4661_v36, %v4096_v0  ;;  %v4663_v60 = vpop.f32.mrb[54].mxu1  ;;  %v13659_v5 = vpop.f32.mrb[107].mxu0  ;;  %v4104_v0 = vadd.f32 %v13327_v1, %v13259_v22 }
 0x2a9   :  { %6624 = vst [vmem:[%s15784_s11 + $0x360] sm:$0xff] %v8560_v4  ;;  %v8564_v32 = vadd.f32 %v4663_v60, %v4098_v45  ;;  %v4665_v14 = vpop.f32.mrb[55].mxu1 }
 0x2aa   :  { %6625 = vst [vmem:[%s15784_s11 + $0x368] sm:$0xff] %v8562_v13  ;;  %v8566_v19 = vadd.f32 %v4665_v14, %v4100_v46  ;;  %5051 = vmatmul.mubr.bf16.gmra.mrb[212].mxu0 %v16206_v56  ;;  %v4106_v14 = vadd.f32 %v13334_v62, %v13267_v26  ;;  %v4110_v13 = vadd.f32 %v13343_v17, %v13267_v26  ;;  %v16208_v17 = vld [vmem:[#allocation107_spill] sm:$0xff] }
 0x2ab   :  { %6630 = vst [vmem:[%s15784_s11 + $0x390] sm:$0xff] %v8564_v32  ;;  %5810 = vmatmul.mubr.bf16.gmra.mrb[160].mxu1 %v12326_v35  ;;  %5060 = vmatprep.mubr.bf16.mxu0 %v16207_v9  ;;  %v4108_v35 = vadd.f32 %v13338_v48, %v13259_v22 }
 0x2ac   :  { %6631 = vst [vmem:[%s15784_s11 + $0x398] sm:$0xff] %v8566_v19  ;;  %5819 = vmatprep.mubr.bf16.mxu1 %v12330_v37 }
 0x2ad   :  { %v13678_v50 = vpop.f32.mrb[108].mxu0 }
 0x2ae   :  { %v4669_v45 = vpop.f32.mrb[56].mxu1  ;;  %v13682_v36 = vpop.f32.mrb[109].mxu0 }
 0x2af   :  { %v8568_v4 = vadd.f32 %v4669_v45, %v4104_v0  ;;  %v4671_v46 = vpop.f32.mrb[57].mxu1  ;;  %v13686_v60 = vpop.f32.mrb[110].mxu0  ;;  %v16209_v0 = vld [vmem:[#allocation109_spill] sm:$0xff]  ;;  %v4116_v45 = vadd.f32 %v13378_v49, %v13267_v26 }
 0x2b0   :  { %v8570_v37 = vadd.f32 %v4671_v46, %v4106_v14  ;;  %v4673_v1 = vpop.f32.mrb[58].mxu1  ;;  %v13691_v32 = vpop.f32.mrb[111].mxu0  ;;  %v4114_v14 = vadd.f32 %v13371_v59, %v13259_v22 }
 0x2b1   :  { %6636 = vst [vmem:[%s15784_s11 + $0x3c0] sm:$0xff] %v8568_v4  ;;  %v8572_v62 = vadd.f32 %v4673_v1, %v4108_v35  ;;  %v4675_v19 = vpop.f32.mrb[59].mxu1  ;;  %v4120_v1 = vadd.f32 %v13387_v21, %v13267_v26  ;;  %v16210_v21 = vld [vmem:[#allocation111_spill] sm:$0xff] }
 0x2b2   :  { %6637 = vst [vmem:[%s15784_s11 + $0x3c8] sm:$0xff] %v8570_v37  ;;  %v8574_v48 = vadd.f32 %v4675_v19, %v4110_v13  ;;  %5061 = vmatmul.mubr.bf16.gmra.mrb[216].mxu0 %v16208_v17 }
 0x2b3   :  { %6642 = vst [vmem:[%s15784_s11 + $0x3f0] sm:$0xff] %v8572_v62  ;;  %5820 = vmatmul.mubr.bf16.gmra.mrb[164].mxu1 %v12374_v31  ;;  %5070 = vmatprep.mubr.bf16.mxu0 %v16209_v0  ;;  %v4118_v31 = vadd.f32 %v13382_v29, %v13259_v22 }
 0x2b4   :  { %6643 = vst [vmem:[%s15784_s11 + $0x3f8] sm:$0xff] %v8574_v48  ;;  %5829 = vmatprep.mubr.bf16.mxu1 %v12378_v30 }
 0x2b5   :  { %v13710_v35 = vpop.f32.mrb[112].mxu0 }
 0x2b6   :  { %v4679_v4 = vpop.f32.mrb[60].mxu1  ;;  %v13714_v13 = vpop.f32.mrb[113].mxu0 }
 0x2b7   :  { %v8576_v46 = vadd.f32 %v4679_v4, %v4114_v14  ;;  %v4681_v37 = vpop.f32.mrb[61].mxu1  ;;  %v13718_v62 = vpop.f32.mrb[114].mxu0  ;;  %v16211_v14 = vld [vmem:[#allocation113_spill] sm:$0xff]  ;;  %v4126_v4 = vadd.f32 %v13422_v24, %v13267_v26 }
 0x2b8   :  { %v8578_v30 = vadd.f32 %v4681_v37, %v4116_v45  ;;  %v4683_v59 = vpop.f32.mrb[62].mxu1  ;;  %v13723_v19 = vpop.f32.mrb[115].mxu0  ;;  %v4124_v45 = vadd.f32 %v13415_v28, %v13259_v22 }
 0x2b9   :  { %6648 = vst [vmem:[%s15784_s11 + $0x420] sm:$0xff] %v8576_v46  ;;  %v8580_v49 = vadd.f32 %v4683_v59, %v4118_v31  ;;  %v4685_v48 = vpop.f32.mrb[63].mxu1  ;;  %v4130_v59 = vadd.f32 %v13431_v54, %v13267_v26  ;;  %v16212_v54 = vld [vmem:[#allocation115_spill] sm:$0xff] }
 0x2ba   :  { %6649 = vst [vmem:[%s15784_s11 + $0x428] sm:$0xff] %v8578_v30  ;;  %v8582_v29 = vadd.f32 %v4685_v48, %v4120_v1  ;;  %5071 = vmatmul.mubr.bf16.gmra.mrb[220].mxu0 %v16210_v21 }
 0x2bb   :  { %6654 = vst [vmem:[%s15784_s11 + $0x450] sm:$0xff] %v8580_v49  ;;  %5830 = vmatmul.mubr.bf16.gmra.mrb[168].mxu1 %v12422_v16  ;;  %5080 = vmatprep.mubr.bf16.mxu0 %v16211_v14  ;;  %v4128_v16 = vadd.f32 %v13426_v61, %v13259_v22 }
 0x2bc   :  { %6655 = vst [vmem:[%s15784_s11 + $0x458] sm:$0xff] %v8582_v29  ;;  %5839 = vmatprep.mubr.bf16.mxu1 %v12426_v11 }
 0x2bd   :  { %v13742_v31 = vpop.f32.mrb[116].mxu0 }
 0x2be   :  { %v4689_v46 = vpop.f32.mrb[64].mxu1  ;;  %v13746_v1 = vpop.f32.mrb[117].mxu0 }
 0x2bf   :  { %v8584_v37 = vadd.f32 %v4689_v46, %v4124_v45  ;;  %v4691_v30 = vpop.f32.mrb[65].mxu1  ;;  %v13750_v49 = vpop.f32.mrb[118].mxu0  ;;  %v16213_v45 = vld [vmem:[#allocation117_spill] sm:$0xff]  ;;  %v4136_v46 = vadd.f32 %v13466_v25, %v13267_v26 }
 0x2c0   :  { %v8586_v11 = vadd.f32 %v4691_v30, %v4126_v4  ;;  %v4693_v28 = vpop.f32.mrb[66].mxu1  ;;  %v13755_v48 = vpop.f32.mrb[119].mxu0  ;;  %v4134_v4 = vadd.f32 %v13459_v34, %v13259_v22 }
 0x2c1   :  { %6660 = vst [vmem:[%s15784_s11 + $0x480] sm:$0xff] %v8584_v37  ;;  %v8588_v24 = vadd.f32 %v4693_v28, %v4128_v16  ;;  %v4695_v29 = vpop.f32.mrb[67].mxu1  ;;  %v4140_v28 = vadd.f32 %v13475_v15, %v13267_v26  ;;  %v16218_v15 = vld [vmem:[#allocation119_spill] sm:$0xff] }
 0x2c2   :  { %6661 = vst [vmem:[%s15784_s11 + $0x488] sm:$0xff] %v8586_v11  ;;  %v8590_v61 = vadd.f32 %v4695_v29, %v4130_v59  ;;  %5081 = vmatmul.mubr.bf16.gmra.mrb[224].mxu0 %v16212_v54 }
 0x2c3   :  { %6666 = vst [vmem:[%s15784_s11 + $0x4b0] sm:$0xff] %v8588_v24  ;;  %5840 = vmatmul.mubr.bf16.gmra.mrb[172].mxu1 %v12470_v52  ;;  %5090 = vmatprep.mubr.bf16.mxu0 %v16213_v45  ;;  %v4138_v52 = vadd.f32 %v13470_v40, %v13259_v22  ;;  %v13939_v45 = vadd.f32 %v13614_v63, %v13259_v22 }
 0x2c4   :  { %6667 = vst [vmem:[%s15784_s11 + $0x4b8] sm:$0xff] %v8590_v61  ;;  %5849 = vmatprep.mubr.bf16.mxu1 %v12474_v12 }
 0x2c5   :  { %v13774_v16 = vpop.f32.mrb[120].mxu0 }
 0x2c6   :  { %16214 = vst [vmem:[#allocation57_spill] sm:$0xff] %v13774_v16  ;;  %v4699_v37 = vpop.f32.mrb[68].mxu1  ;;  %v13778_v59 = vpop.f32.mrb[121].mxu0 }
 0x2c7   :  { %v8592_v30 = vadd.f32 %v4699_v37, %v4134_v4  ;;  %16215 = vst [vmem:[#allocation83_spill] sm:$0xff] %v13778_v59  ;;  %v4701_v11 = vpop.f32.mrb[69].mxu1  ;;  %v13782_v24 = vpop.f32.mrb[122].mxu0  ;;  %v16219_v4 = vld [vmem:[#allocation8_spill] sm:$0xff]  ;;  %v4146_v37 = vadd.f32 %v13510_v43, %v13267_v26 }
 0x2c8   :  { %v8594_v12 = vadd.f32 %v4701_v11, %v4136_v46  ;;  %16216 = vst [vmem:[#allocation59_spill] sm:$0xff] %v13782_v24  ;;  %v4703_v34 = vpop.f32.mrb[70].mxu1  ;;  %v13787_v29 = vpop.f32.mrb[123].mxu0  ;;  %v4144_v46 = vadd.f32 %v13503_v33, %v13259_v22  ;;  %v10048_v43 = vld [vmem:[%s15777_s4 + $0x608] ss:$24 sps:$4 sm:$0xff]  }
 0x2c9   :  { %6672 = vst [vmem:[%s15784_s11 + $0x4e0] sm:$0xff] %v8592_v30  ;;  %v8596_v25 = vadd.f32 %v4703_v34, %v4138_v52  ;;  %16217 = vst [vmem:[#allocation136_spill] sm:$0xff] %v13787_v29  ;;  %v4705_v61 = vpop.f32.mrb[71].mxu1  ;;  %v4150_v34 = vadd.f32 %v13519_v41, %v13267_v26  ;;  %v16232_v29 = vld [vmem:[#allocation95_spill] sm:$0xff] }
 0x2ca   :  { %6673 = vst [vmem:[%s15784_s11 + $0x4e8] sm:$0xff] %v8594_v12  ;;  %v8598_v40 = vadd.f32 %v4705_v61, %v4140_v28  ;;  %5091 = vmatmul.mubr.bf16.gmra.mrb[228].mxu0 %v16218_v15  ;;  %v13822_v61 = vld [vmem:[%s15780_s7] sm:$0x3f] }
 0x2cb   :  { %6678 = vst [vmem:[%s15784_s11 + $0x510] sm:$0xff] %v8596_v25  ;;  %5850 = vmatmul.mubr.bf16.gmra.mrb[176].mxu1 %v16180_v20  ;;  %5133 = vmatprep.mubr.bf16.mxu0 %v16219_v4  ;;  %v4148_v20 = vadd.f32 %v13514_v10, %v13259_v22  ;;  %v6820_v59 = vld [vmem:[%s15779_s6 + $0x20] sm:$0x1f] }
 0x2cc   :  { %6679 = vst [vmem:[%s15784_s11 + $0x518] sm:$0xff] %v8598_v40  ;;  %5859 = vmatprep.mubr.bf16.mxu1 %v16182_v47 }
 0x2cd   :  { %v13806_v52 = vpop.f32.mrb[124].mxu0 }
 0x2ce   :  { %16220 = vst [vmem:[#allocation85_spill] sm:$0xff] %v13806_v52  ;;  %v4709_v30 = vpop.f32.mrb[72].mxu1  ;;  %v13810_v28 = vpop.f32.mrb[125].mxu0 }
 0x2cf   :  { %v8600_v11 = vadd.f32 %v4709_v30, %v4144_v46  ;;  %16221 = vst [vmem:[#allocation87_spill] sm:$0xff] %v13810_v28  ;;  %v4711_v12 = vpop.f32.mrb[73].mxu1  ;;  %v13814_v25 = vpop.f32.mrb[126].mxu0  ;;  %v10056_v46 = vld [vmem:[%s15777_s4 + $0x63c] ss:$24 sps:$4 sm:$0xff]   ;;  %v4154_v28 = vadd.f32 %v13541_v7, %v13259_v22  ;;  %v16226_v7 = vld [vmem:[#allocation9_spill] sm:$0xff] }
 0x2d0   :  { %v8602_v47 = vadd.f32 %v4711_v12, %v4146_v37  ;;  %16222 = vst [vmem:[#allocation140_spill] sm:$0xff] %v13814_v25  ;;  %v4713_v33 = vpop.f32.mrb[74].mxu1  ;;  %v13827_v40 = vpop.f32.mrb[127].mxu0  ;;  %v16224_v37 = vld [vmem:[#allocation45_spill] sm:$0xff]  ;;  %v16225_v12 = vld [vmem:[#allocation48_spill] sm:$0xff] }
 0x2d1   :  { %6684 = vst [vmem:[%s15784_s11 + $0x540] sm:$0xff] %v8600_v11  ;;  %v8604_v10 = vadd.f32 %v4713_v33, %v4148_v20  ;;  %16223 = vst [vmem:[#allocation141_spill] sm:$0xff] %v13827_v40  ;;  %v4715_v41 = vpop.f32.mrb[75].mxu1  ;;  %v13834_v30 = vrot.slane %v13822_v61, %v16224_v37  ;;  %v13838_v25 = vrot.slane %v13822_v61, %v16225_v12  ;;  %v6816_v33 = vld [vmem:[%s15779_s6] sm:$0x1f] }
 0x2d2   :  { %v4156_v20 = vadd.f32 %v13545_v44, %v13267_v26  ;;  %6685 = vst [vmem:[%s15784_s11 + $0x548] sm:$0xff] %v8602_v47  ;;  %v8606_v11 = vadd.f32 %v4715_v41, %v4150_v34  ;;  %v6817_v37 = vld [vmem:[%s15779_s6 + $0x8] sm:$0x1f]  ;;  %5134 = vmatmul.mubr.bf16.vlgmr.msra.gmra.mrb[132].mxu0 %v16226_v7  ;;  %v16227_v44 = vld [vmem:[#allocation47_spill] sm:$0xff]  ;;  %v4158_v12 = vadd.f32 %v13549_v38, %v13259_v22 }
 0x2d3   :  { %6690 = vst [vmem:[%s15784_s11 + $0x570] sm:$0xff] %v8604_v10  ;;  %5860 = vmatmul.mubr.bf16.gmra.mrb[180].mxu1 %v16185_v27  ;;  %v13860_v47 = vrot.slane %v13822_v61, %v16227_v44  ;;  %v6872_v34 = vmul.f32 %v13834_v30, %v6816_v33  ;;  %v6873_v41 = vmul.f32 %v13838_v25, %v6817_v37  ;;  %v16228_v27 = vld [vmem:[#allocation10_spill] sm:$0xff]  ;;  %v10062_v38 = vld [vmem:[%s15777_s4 + $0x66c] ss:$24 sps:$4 sm:$0xff]  }
 0x2d4   :  { %v4160_v40 = vadd.f32 %v13554_v51, %v13267_v26  ;;  %v13870_v10 = vadd.f32 %v13579_v6, %v13259_v22  ;;  %6691 = vst [vmem:[%s15784_s11 + $0x578] sm:$0xff] %v8606_v11  ;;  %5385 = vmatpush1.bf16.msra.mxu0 %v10048_v43  ;;  %5143 = vmatprep.mubr.bf16.mxu0 %v16228_v27  ;;  %v10054_v33 = vld [vmem:[%s15777_s4 + $0x638] ss:$24 sps:$4 sm:$0xff]   ;;  %v6828_v44 = vld [vmem:[%s15779_s6 + $0x60] sm:$0x1f] }
 0x2d5   :  { %v6818_v51 = vld [vmem:[%s15779_s6 + $0x10] sm:$0x1f]  ;;  %v13887_v6 = vadd.f32 %v13583_v53, %v13267_v26  ;;  %5869 = vmatprep.mubr.bf16.mxu1 %v16186_v57  ;;  %5386 = vmatprep.subr.bf16.mxu0 %v10056_v46  ;;  %v6829_v27 = vld [vmem:[%s15779_s6 + $0x68] sm:$0x1f]  ;;  %v13903_v53 = vadd.f32 %v13587_v18, %v13259_v22  ;;  %v13907_v57 = vadd.f32 %v13592_v42, %v13267_v26  ;;  %v13909_v46 = vpop.f32.mrb[128].mxu0  ;;  %v6897_v7 = vsel %vm6896_vm0, %v6872_v34, 0.0 }
 0x2d6   :  { %v16229_v43 = vld [vmem:[#allocation49_spill] sm:$0xff]  ;;  %v6874_v37 = vmul.f32 %v13860_v47, %v6818_v51  ;;  %16230 = vst [vmem:[#allocation89_spill] sm:$0xff] %v13909_v46  ;;  %v4719_v51 = vpop.f32.mrb[76].mxu1  ;;  %v6898_v52 = vsel %vm6896_vm0, %v6873_v41, 0.0  ;;  %v13916_v15 = vpop.f32.mrb[129].mxu0  ;;  %v13923_v46 = vrot.slane %v13822_v61, %v16232_v29  ;;  %v6884_v41 = vmul.f32 %v13834_v30, %v6828_v44 }
 0x2d7   :  { %v13892_v11 = vrot.slane %v13822_v61, %v16229_v43  ;;  %v6819_v43 = vld [vmem:[%s15779_s6 + $0x18] sm:$0x1f]  ;;  %v8608_v4 = vadd.f32 %v4719_v51, %v4154_v28  ;;  %16231 = vst [vmem:[#allocation91_spill] sm:$0xff] %v13916_v15  ;;  %v4721_v18 = vpop.f32.mrb[77].mxu1  ;;  %v10060_v42 = vld [vmem:[%s15777_s4 + $0x668] ss:$24 sps:$4 sm:$0xff]   ;;  %v6899_v16 = vadd.f32 %v6898_v52, %v6897_v7 }
 0x2d8   :  { %v6830_v34 = vld [vmem:[%s15779_s6 + $0x70] sm:$0x1f]  ;;  %v8610_v28 = vadd.f32 %v4721_v18, %v4156_v20  ;;  %v13930_v51 = vpop.f32.mrb[130].mxu0  ;;  %v4723_v15 = vpop.f32.mrb[78].mxu1  ;;  %5387 = vmatpush1.bf16.msra.mxu0 %v10054_v33  ;;  %v6900_v29 = vsel %vm6896_vm0, %v6874_v37, 0.0  ;;  %v16234_v7 = vld [vmem:[#allocation96_spill] sm:$0xff]  ;;  %v6876_v63 = vmul.f32 %v13923_v46, %v6820_v59 }
 0x2d9   :  { %v6875_v24 = vmul.f32 %v13892_v11, %v6819_v43  ;;  %v6885_v43 = vmul.f32 %v13838_v25, %v6829_v27  ;;  %6696 = vst [vmem:[%s15784_s11 + $0x5a0] sm:$0xff] %v8608_v4  ;;  %v8612_v20 = vadd.f32 %v4723_v15, %v4158_v12  ;;  %v13944_v44 = vpop.f32.mrb[131].mxu0  ;;  %v4725_v33 = vpop.f32.mrb[79].mxu1  ;;  %5388 = vmatprep.subr.bf16.mxu0 %v10062_v38  ;;  %v10068_v52 = vld [vmem:[%s15777_s4 + $0x69c] ss:$24 sps:$4 sm:$0xff]  }
 0x2da   :  { %16233 = vst [vmem:[#allocation142_spill] sm:$0xff] %v13944_v44  ;;  %v13951_v27 = vrot.slane %v13822_v61, %v16234_v7  ;;  %v6831_v37 = vld [vmem:[%s15779_s6 + $0x78] sm:$0x1f]  ;;  %v13959_v15 = vadd.f32 %v13618_v8, %v13267_v26  ;;  %6697 = vst [vmem:[%s15784_s11 + $0x5a8] sm:$0xff] %v8610_v28  ;;  %v8614_v4 = vadd.f32 %v4725_v33, %v4160_v40  ;;  %v6821_v61 = vld [vmem:[%s15779_s6 + $0x28] sm:$0x1f] }
 0x2db   :  { %v6901_v12 = vadd.f32 %v6900_v29, %v6899_v16  ;;  %v6902_v59 = vsel %vm6896_vm0, %v6875_v24, 0.0  ;;  %v6832_v38 = vld [vmem:[%s15779_s6 + $0x80] sm:$0x1f]  ;;  %6702 = vst [vmem:[%s15784_s11 + $0x5d0] sm:$0xff] %v8612_v20  ;;  %5870 = vmatmul.mubr.bf16.gmra.mrb[184].mxu1 %v16189_v2  ;;  %v10066_v40 = vld [vmem:[%s15777_s4 + $0x698] ss:$24 sps:$4 sm:$0xff]   ;;  %v6886_v29 = vmul.f32 %v13860_v47, %v6830_v34  ;;  %v6887_v18 = vmul.f32 %v13892_v11, %v6831_v37 }
 0x2dc   :  { %v16235_v8 = vld [vmem:[#allocation11_spill] sm:$0xff]  ;;  %v6877_v16 = vmul.f32 %v13951_v27, %v6821_v61  ;;  %v6904_v24 = vsel %vm6896_vm0, %v6876_v63, 0.0  ;;  %v6822_v28 = vld [vmem:[%s15779_s6 + $0x30] sm:$0x1f]  ;;  %6703 = vst [vmem:[%s15784_s11 + $0x5d8] sm:$0xff] %v8614_v4  ;;  %v16236_v2 = vld [vmem:[#allocation12_spill] sm:$0xff]  ;;  %5879 = vmatprep.mubr.bf16.mxu1 %v16190_v58  ;;  %v6888_v34 = vmul.f32 %v13923_v46, %v6832_v38  ;;  %5389 = vmatpush1.bf16.msra.mxu0 %v10060_v42 }
 0x2dd   :  { %5144 = vmatmul.mubr.bf16.gmra.mrb[136].mxu0 %v16235_v8  ;;  %v6903_v20 = vadd.f32 %v6902_v59, %v6901_v12  ;;  %v6833_v33 = vld [vmem:[%s15779_s6 + $0x88] sm:$0x1f]  ;;  %v6923_v63 = vsel %vm6896_vm0, %v6884_v41, 0.0  ;;  %v6924_v37 = vsel %vm6896_vm0, %v6885_v43, 0.0  ;;  %v6823_v61 = vld [vmem:[%s15779_s6 + $0x38] sm:$0x1f]  ;;  %v14011_v43 = vadd.f32 %v13622_v23, %v13259_v22  ;;  %5390 = vmatprep.subr.bf16.mxu0 %v10068_v52 }
 0x2de   :  { %5153 = vmatprep.mubr.bf16.mxu0 %v16236_v2  ;;  %v6906_v4 = vsel %vm6896_vm0, %v6877_v16, 0.0  ;;  %v6889_v58 = vmul.f32 %v13951_v27, %v6833_v33  ;;  %v6925_v12 = vadd.f32 %v6924_v37, %v6923_v63  ;;  %v6926_v59 = vsel %vm6896_vm0, %v6886_v29, 0.0  ;;  %v6824_v38 = vld [vmem:[%s15779_s6 + $0x40] sm:$0x1f]  ;;  %v6825_v41 = vld [vmem:[%s15779_s6 + $0x48] sm:$0x1f] }
 0x2df   :  { %v4729_v42 = vpop.f32.mrb[80].mxu1  ;;  %v10074_v16 = vld [vmem:[%s15777_s4 + $0x6cc] ss:$24 sps:$4 sm:$0xff]   ;;  %v6905_v33 = vadd.f32 %v6904_v24, %v6903_v20  ;;  %v6928_v29 = vsel %vm6896_vm0, %v6887_v18, 0.0  ;;  %v6826_v63 = vld [vmem:[%s15779_s6 + $0x50] sm:$0x1f]  ;;  %v6878_v37 = vmul.f32 %v13834_v30, %v6822_v28  ;;  %v6879_v24 = vmul.f32 %v13838_v25, %v6823_v61 }
 0x2e0   :  { %v8616_v7 = vadd.f32 %v4729_v42, %v13870_v10  ;;  %v4731_v2 = vpop.f32.mrb[81].mxu1  ;;  %v10072_v23 = vld [vmem:[%s15777_s4 + $0x6c8] ss:$24 sps:$4 sm:$0xff]   ;;  %v6927_v52 = vadd.f32 %v6926_v59, %v6925_v12  ;;  %v6930_v8 = vsel %vm6896_vm0, %v6888_v34, 0.0  ;;  %v10080_v44 = vld [vmem:[%s15777_s4 + $0x6fc] ss:$24 sps:$4 sm:$0xff]   ;;  %v6880_v42 = vmul.f32 %v13860_v47, %v6824_v38  ;;  %5391 = vmatpush1.bf16.msra.mxu0 %v10066_v40 }
 0x2e1   :  { %v8618_v18 = vadd.f32 %v4731_v2, %v13887_v6  ;;  %v4733_v20 = vpop.f32.mrb[82].mxu1  ;;  %v6907_v28 = vadd.f32 %v6906_v4, %v6905_v33  ;;  %v6827_v10 = vld [vmem:[%s15779_s6 + $0x58] sm:$0x1f]  ;;  %v6881_v12 = vmul.f32 %v13892_v11, %v6825_v41  ;;  %v6834_v34 = vld [vmem:[%s15779_s6 + $0x90] sm:$0x1f]  ;;  %v6932_v4 = vsel %vm6896_vm0, %v6889_v58, 0.0  ;;  %5392 = vmatprep.subr.bf16.mxu0 %v10074_v16 }
 0x2e2   :  { %6708 = vst [vmem:[%s15784_s11 + $0x600] sm:$0xff] %v8616_v7  ;;  %v8620_v6 = vadd.f32 %v4733_v20, %v13903_v53  ;;  %v4735_v2 = vpop.f32.mrb[83].mxu1  ;;  %v6929_v61 = vadd.f32 %v6928_v29, %v6927_v52  ;;  %v6882_v59 = vmul.f32 %v13923_v46, %v6826_v63  ;;  %v6835_v38 = vld [vmem:[%s15779_s6 + $0x98] sm:$0x1f]  ;;  %v6836_v41 = vld [vmem:[%s15779_s6 + $0xa0] sm:$0x1f]  ;;  %v6883_v16 = vmul.f32 %v13951_v27, %v6827_v10 }
 0x2e3   :  { %6709 = vst [vmem:[%s15784_s11 + $0x608] sm:$0xff] %v8618_v18  ;;  %v8622_v53 = vadd.f32 %v4735_v2, %v13907_v57  ;;  %6908 = vadd.xlane.f32.xlu0 %v6907_v28  ;;  %v6910_v7 = vsel %vm6896_vm0, %v6878_v37, 0.0  ;;  %v6911_v40 = vsel %vm6896_vm0, %v6879_v24, 0.0  ;;  %v6913_v58 = vsel %vm6896_vm0, %v6880_v42, 0.0  ;;  %v6837_v33 = vld [vmem:[%s15779_s6 + $0xa8] sm:$0x1f] }
 0x2e4   :  { %6714 = vst [vmem:[%s15784_s11 + $0x630] sm:$0xff] %v8620_v6  ;;  %v16237_v29 = vld [vmem:[#allocation13_spill] sm:$0xff]  ;;  %v6931_v57 = vadd.f32 %v6930_v8, %v6929_v61  ;;  %v6912_v37 = vadd.f32 %v6911_v40, %v6910_v7  ;;  %v16239_v24 = vld [vmem:[#allocation14_spill] sm:$0xff]  ;;  %v6915_v20 = vsel %vm6896_vm0, %v6881_v12, 0.0  ;;  %v6890_v8 = vmul.f32 %v13834_v30, %v6834_v34  ;;  %5393 = vmatpush1.bf16.msra.mxu0 %v10072_v23 }
 0x2e5   :  { %5154 = vmatmul.mubr.bf16.gmra.mrb[140].mxu0 %v16237_v29  ;;  %v16238_v63 = vld [vmem:[#allocation93_spill] sm:$0xff]  ;;  %6715 = vst [vmem:[%s15784_s11 + $0x638] sm:$0xff] %v8622_v53  ;;  %v6891_v28 = vmul.f32 %v13838_v25, %v6835_v38  ;;  %v6892_v10 = vmul.f32 %v13860_v47, %v6836_v41  ;;  %v6917_v61 = vsel %vm6896_vm0, %v6882_v59, 0.0  ;;  %v6839_v53 = vld [vmem:[%s15779_s6 + $0xb8] sm:$0x1f]  ;;  %v6893_v12 = vmul.f32 %v13892_v11, %v6837_v33 }
 0x2e6   :  { %5880 = vmatmul.mubr.bf16.gmra.mrb[188].mxu1 %v16238_v63  ;;  %v14070_v52 = vld [vmem:[%s15779_s6 + $0xb0] sm:$0x1f]  ;;  %5163 = vmatprep.mubr.bf16.mxu0 %v16239_v24  ;;  %v6933_v6 = vadd.f32 %v6932_v4, %v6931_v57  ;;  %v6914_v2 = vadd.f32 %v6913_v58, %v6912_v37  ;;  %v4739_v30 = vpop.f32.mrb[84].mxu1  ;;  %v10086_v25 = vld [vmem:[%s15777_s4 + $0x72c] ss:$24 sps:$4 sm:$0xff]   ;;  %v6936_v23 = vsel %vm6896_vm0, %v6890_v8, 0.0  ;;  %v4180_v59 = vadd.f32 %v13627_v3, %v13267_v26 }
 0x2e7   :  { %v16240_v18 = vld [vmem:[#allocation97_spill] sm:$0xff]  ;;  %5394 = vmatprep.subr.bf16.mxu0 %v10080_v44  ;;  %v6894_v47 = vmul.f32 %v13923_v46, %v14070_v52  ;;  %v6937_v34 = vsel %vm6896_vm0, %v6891_v28, 0.0  ;;  %v6939_v4 = vsel %vm6896_vm0, %v6892_v10, 0.0  ;;  %v8624_v11 = vadd.f32 %v4739_v30, %v13939_v45  ;;  %v4741_v38 = vpop.f32.mrb[85].mxu1  ;;  %v10084_v63 = vld [vmem:[%s15777_s4 + $0x728] ss:$24 sps:$4 sm:$0xff]  }
 0x2e8   :  { %5889 = vmatprep.mubr.bf16.mxu1 %v16240_v18  ;;  %v10078_v42 = vld [vmem:[%s15777_s4 + $0x6f8] ss:$24 sps:$4 sm:$0xff]   ;;  %6934 = vadd.xlane.f32.xlu1 %v6933_v6  ;;  %v6916_v44 = vadd.f32 %v6915_v20, %v6914_v2  ;;  %v6938_v41 = vadd.f32 %v6937_v34, %v6936_v23  ;;  %v8626_v7 = vadd.f32 %v4741_v38, %v13959_v15  ;;  %v4743_v40 = vpop.f32.mrb[86].mxu1  ;;  %v6919_v46 = vsel %vm6896_vm0, %v6883_v16, 0.0  ;;  %v10092_v16 = vld [vmem:[%s15777_s4 + $0x75c] ss:$24 sps:$4 sm:$0xff]  }
 0x2e9   :  { %v6895_v58 = vmul.f32 %v13951_v27, %v6839_v53  ;;  %v6941_v33 = vsel %vm6896_vm0, %v6893_v12, 0.0  ;;  %6720 = vst [vmem:[%s15784_s11 + $0x660] sm:$0xff] %v8624_v11  ;;  %v8628_v3 = vadd.f32 %v4743_v40, %v14011_v43  ;;  %v4745_v45 = vpop.f32.mrb[87].mxu1  ;;  %5395 = vmatpush1.bf16.msra.mxu0 %v10078_v42  ;;  %v6943_v43 = vsel %vm6896_vm0, %v6894_v47, 0.0  ;;  %v16241_v37 = vld [vmem:[#allocation15_spill] sm:$0xff]  ;;  %v16243_v28 = vld [vmem:[#allocation16_spill] sm:$0xff] }
 0x2ea   :  { %v6918_v15 = vadd.f32 %v6917_v61, %v6916_v44  ;;  %v6940_v57 = vadd.f32 %v6939_v4, %v6938_v41  ;;  %6721 = vst [vmem:[%s15784_s11 + $0x668] sm:$0xff] %v8626_v7  ;;  %v8630_v27 = vadd.f32 %v4745_v45, %v4180_v59  ;;  %5396 = vmatprep.subr.bf16.mxu0 %v10086_v25  ;;  %v16242_v18 = vld [vmem:[#allocation99_spill] sm:$0xff]  ;;  %v16244_v10 = vld [vmem:[#allocation101_spill] sm:$0xff]  ;;  %v16247_v40 = vld [vmem:[#allocation18_spill] sm:$0xff] }
 0x2eb   :  { %6726 = vst [vmem:[%s15784_s11 + $0x690] sm:$0xff] %v8628_v3  ;;  %v6945_v42 = vsel %vm6896_vm0, %v6895_v58, 0.0  ;;  %v16245_v6 = vld [vmem:[#allocation81_spill] sm:$0xff]  ;;  %v4186_v12 = vadd.f32 %v13650_v39, %v13267_v26  ;;  %v4188_v47 = vadd.f32 %v13654_v55, %v13259_v22  ;;  %v4190_v59 = vadd.f32 %v13659_v5, %v13267_v26  ;;  %v10096_v41 = vld [vmem:[%s15777_s4 + $0x788] ss:$24 sps:$4 sm:$0xff]  }
 0x2ec   :  { %v6920_v20 = vadd.f32 %v6919_v46, %v6918_v15  ;;  %v6942_v8 = vadd.f32 %v6941_v33, %v6940_v57  ;;  %6727 = vst [vmem:[%s15784_s11 + $0x698] sm:$0xff] %v8630_v27  ;;  %v4184_v2 = vadd.f32 %v16245_v6, %v13259_v22  ;;  %v10090_v61 = vld [vmem:[%s15777_s4 + $0x758] ss:$24 sps:$4 sm:$0xff]   ;;  %v10098_v25 = vld [vmem:[%s15777_s4 + $0x78c] ss:$24 sps:$4 sm:$0xff]   ;;  %v4194_v46 = vadd.f32 %v13678_v50, %v13259_v22 }
 0x2ed   :  { %5164 = vmatmul.mubr.bf16.gmra.mrb[144].mxu0 %v16241_v37  ;;  %v10104_v5 = vld [vmem:[%s15777_s4 + $0x7bc] ss:$24 sps:$4 sm:$0xff]   ;;  %v16246_v7 = vld [vmem:[#allocation17_spill] sm:$0xff]  ;;  %v4196_v33 = vadd.f32 %v13682_v36, %v13267_v26  ;;  %v4200_v50 = vadd.f32 %v13691_v32, %v13267_v26 }
 0x2ee   :  { %5890 = vmatmul.mubr.bf16.gmra.mrb[192].mxu1 %v16242_v18  ;;  %5173 = vmatprep.mubr.bf16.mxu0 %v16243_v28  ;;  %v6944_v53 = vadd.f32 %v6943_v43, %v6942_v8  ;;  %v4749_v30 = vpop.f32.mrb[88].mxu1  ;;  %v10102_v58 = vld [vmem:[%s15777_s4 + $0x7b8] ss:$24 sps:$4 sm:$0xff]   ;;  %v10110_v3 = vld [vmem:[%s15777_s4 + $0x7ec] ss:$24 sps:$4 sm:$0xff]   ;;  %v16248_v43 = vld [vmem:[#allocation19_spill] sm:$0xff] }
 0x2ef   :  { %5899 = vmatprep.mubr.bf16.mxu1 %v16244_v10  ;;  %5397 = vmatpush1.bf16.msra.mxu0 %v10084_v63  ;;  %v8632_v23 = vadd.f32 %v4749_v30, %v4184_v2  ;;  %v4751_v34 = vpop.f32.mrb[89].mxu1  ;;  %v10116_v32 = vld [vmem:[%s15777_s4 + $0x81c] ss:$24 sps:$4 sm:$0xff]   ;;  %v16249_v18 = vld [vmem:[#allocation20_spill] sm:$0xff]  ;;  %v10114_v8 = vld [vmem:[%s15777_s4 + $0x818] ss:$24 sps:$4 sm:$0xff]   ;;  %v4206_v10 = vadd.f32 %v13714_v13, %v13267_v26 }
 0x2f0   :  { %6921 = vadd.xlane.f32.xlu0 %v6920_v20  ;;  %5398 = vmatprep.subr.bf16.mxu0 %v10092_v16  ;;  %v6946_v4 = vadd.f32 %v6945_v42, %v6944_v53  ;;  %v8634_v11 = vadd.f32 %v4751_v34, %v4186_v12  ;;  %v4753_v38 = vpop.f32.mrb[90].mxu1  ;;  %v10108_v16 = vld [vmem:[%s15777_s4 + $0x7e8] ss:$24 sps:$4 sm:$0xff]   ;;  %v4204_v20 = vadd.f32 %v13710_v35, %v13259_v22  ;;  %v10122_v42 = vld [vmem:[%s15777_s4 + $0x84c] ss:$24 sps:$4 sm:$0xff]  }
 0x2f1   :  { %6732 = vst [vmem:[%s15784_s11 + $0x6c0] sm:$0xff] %v8632_v23  ;;  %v8636_v39 = vadd.f32 %v4753_v38, %v4188_v47  ;;  %v4755_v44 = vpop.f32.mrb[91].mxu1  ;;  %v4210_v35 = vadd.f32 %v13723_v19, %v13267_v26  ;;  %v10120_v30 = vld [vmem:[%s15777_s4 + $0x848] ss:$24 sps:$4 sm:$0xff]   ;;  %v10128_v19 = vld [vmem:[%s15777_s4 + $0x87c] ss:$24 sps:$4 sm:$0xff]   ;;  %v4214_v23 = vadd.f32 %v13742_v31, %v13259_v22  ;;  %v4220_v31 = vadd.f32 %v13755_v48, %v13267_v26 }
 0x2f2   :  { %6947 = vadd.xlane.f32.xlu1 %v6946_v4  ;;  %6733 = vst [vmem:[%s15784_s11 + $0x6c8] sm:$0xff] %v8634_v11  ;;  %v8638_v55 = vadd.f32 %v4755_v44, %v4190_v59  ;;  %v16251_v47 = vld [vmem:[#allocation22_spill] sm:$0xff]  ;;  %v4216_v4 = vadd.f32 %v13746_v1, %v13267_v26  ;;  %v10134_v59 = vld [vmem:[%s15777_s4 + $0x8ac] ss:$24 sps:$4 sm:$0xff]   ;;  %v16252_v48 = vld [vmem:[#allocation23_spill] sm:$0xff] }
 0x2f3   :  { %5399 = vmatpush1.bf16.msra.mxu0 %v10090_v61  ;;  %6738 = vst [vmem:[%s15784_s11 + $0x6f0] sm:$0xff] %v8636_v39  ;;  %v10126_v34 = vld [vmem:[%s15777_s4 + $0x878] ss:$24 sps:$4 sm:$0xff]  }
 0x2f4   :  { %5400 = vmatprep.subr.bf16.mxu0 %v10098_v25  ;;  %6739 = vst [vmem:[%s15784_s11 + $0x6f8] sm:$0xff] %v8638_v55  ;;  %v16250_v25 = vld [vmem:[#allocation21_spill] sm:$0xff]  ;;  %v10132_v55 = vld [vmem:[%s15777_s4 + $0x8a8] ss:$24 sps:$4 sm:$0xff]  }
 0x2f5   :  { %5174 = vmatmul.mubr.bf16.gmra.mrb[148].mxu0 %v16246_v7 }
 0x2f6   :  { %5900 = vmatmul.mubr.bf16.gmra.mrb[196].mxu1 %v16206_v56  ;;  %5183 = vmatprep.mubr.bf16.mxu0 %v16247_v40  ;;  %v4759_v56 = vpop.f32.mrb[92].mxu1 }
 0x2f7   :  { %5909 = vmatprep.mubr.bf16.mxu1 %v16207_v9  ;;  %5401 = vmatpush1.bf16.msra.mxu0 %v10096_v41  ;;  %v4198_v9 = vadd.f32 %v13686_v60, %v13259_v22  ;;  %v8640_v45 = vadd.f32 %v4759_v56, %v4194_v46  ;;  %v4761_v63 = vpop.f32.mrb[93].mxu1  ;;  %v16254_v46 = vld [vmem:[#allocation117_spill] sm:$0xff] }
 0x2f8   :  { %5402 = vmatprep.subr.bf16.mxu0 %v10104_v5  ;;  %v8642_v15 = vadd.f32 %v4761_v63, %v4196_v33  ;;  %v4763_v57 = vpop.f32.mrb[94].mxu1  ;;  %v16253_v5 = vld [vmem:[#allocation24_spill] sm:$0xff]  ;;  %v16255_v33 = vld [vmem:[#allocation57_spill] sm:$0xff]  ;;  %v16257_v63 = vld [vmem:[#allocation59_spill] sm:$0xff] }
 0x2f9   :  { %6744 = vst [vmem:[%s15784_s11 + $0x720] sm:$0xff] %v8640_v45  ;;  %v8644_v36 = vadd.f32 %v4763_v57, %v4198_v9  ;;  %v4765_v27 = vpop.f32.mrb[95].mxu1  ;;  %v4224_v56 = vadd.f32 %v16255_v33, %v13259_v22  ;;  %v16272_v33 = vld [vmem:[#allocation91_spill] sm:$0xff] }
 0x2fa   :  { %6745 = vst [vmem:[%s15784_s11 + $0x728] sm:$0xff] %v8642_v15  ;;  %v8646_v60 = vadd.f32 %v4765_v27, %v4200_v50  ;;  %v4228_v50 = vadd.f32 %v16257_v63, %v13259_v22  ;;  %v16273_v63 = vld [vmem:[#allocation142_spill] sm:$0xff] }
 0x2fb   :  { %5403 = vmatpush1.bf16.msra.mxu0 %v10102_v58  ;;  %6750 = vst [vmem:[%s15784_s11 + $0x750] sm:$0xff] %v8644_v36  ;;  %v10140_v58 = vld [vmem:[%s15777_s4 + $0x8dc] ss:$24 sps:$4 sm:$0xff]   ;;  %v16258_v36 = vld [vmem:[#allocation136_spill] sm:$0xff] }
 0x2fc   :  { %5404 = vmatprep.subr.bf16.mxu0 %v10110_v3  ;;  %6751 = vst [vmem:[%s15784_s11 + $0x758] sm:$0xff] %v8646_v60  ;;  %v16256_v3 = vld [vmem:[#allocation83_spill] sm:$0xff]  ;;  %v4230_v27 = vadd.f32 %v16258_v36, %v13267_v26 }
 0x2fd   :  { %5184 = vmatmul.mubr.bf16.gmra.mrb[152].mxu0 %v16248_v43  ;;  %v4226_v9 = vadd.f32 %v16256_v3, %v13267_v26  ;;  %v4248_v3 = vadd.f32 %v13930_v51, %v13259_v22  ;;  %v16274_v51 = vld [vmem:[#allocation29_spill] sm:$0xff] }
 0x2fe   :  { %5910 = vmatmul.mubr.bf16.gmra.mrb[200].mxu1 %v16208_v17  ;;  %5193 = vmatprep.mubr.bf16.mxu0 %v16249_v18  ;;  %v4769_v17 = vpop.f32.mrb[96].mxu1 }
 0x2ff   :  { %5919 = vmatprep.mubr.bf16.mxu1 %v16209_v0  ;;  %5405 = vmatpush1.bf16.msra.mxu0 %v10108_v16  ;;  %v4208_v0 = vadd.f32 %v13718_v62, %v13259_v22  ;;  %v8648_v6 = vadd.f32 %v4769_v17, %v4204_v20  ;;  %v4771_v2 = vpop.f32.mrb[97].mxu1  ;;  %v16260_v17 = vld [vmem:[#allocation119_spill] sm:$0xff] }
 0x300   :  { %5406 = vmatprep.subr.bf16.mxu0 %v10116_v32  ;;  %v8650_v61 = vadd.f32 %v4771_v2, %v4206_v10  ;;  %v4773_v53 = vpop.f32.mrb[98].mxu1  ;;  %v16259_v10 = vld [vmem:[#allocation25_spill] sm:$0xff] }
 0x301   :  { %6756 = vst [vmem:[%s15784_s11 + $0x780] sm:$0xff] %v8648_v6  ;;  %v8652_v13 = vadd.f32 %v4773_v53, %v4208_v0  ;;  %v4775_v12 = vpop.f32.mrb[99].mxu1  ;;  %v16262_v0 = vld [vmem:[#allocation8_spill] sm:$0xff]  ;;  %v16263_v6 = vld [vmem:[#allocation85_spill] sm:$0xff] }
 0x302   :  { %6757 = vst [vmem:[%s15784_s11 + $0x788] sm:$0xff] %v8650_v61  ;;  %v8654_v62 = vadd.f32 %v4775_v12, %v4210_v35  ;;  %v4234_v2 = vadd.f32 %v16263_v6, %v13259_v22  ;;  %v16264_v35 = vld [vmem:[#allocation87_spill] sm:$0xff] }
 0x303   :  { %5407 = vmatpush1.bf16.msra.mxu0 %v10114_v8  ;;  %6762 = vst [vmem:[%s15784_s11 + $0x7b0] sm:$0xff] %v8652_v13  ;;  %v4236_v61 = vadd.f32 %v16264_v35, %v13267_v26  ;;  %v16265_v13 = vld [vmem:[#allocation140_spill] sm:$0xff] }
 0x304   :  { %5408 = vmatprep.subr.bf16.mxu0 %v10122_v42  ;;  %6763 = vst [vmem:[%s15784_s11 + $0x7b8] sm:$0xff] %v8654_v62  ;;  %v16261_v42 = vld [vmem:[#allocation26_spill] sm:$0xff]  ;;  %v4238_v12 = vadd.f32 %v16265_v13, %v13259_v22  ;;  %v10113_v6 = vld [vmem:[%s15777_s4 + $0x704] ss:$24 sps:$4 sm:$0xff]   ;;  %v10117_v13 = vld [vmem:[%s15777_s4 + $0x730] ss:$24 sps:$4 sm:$0xff]  }
 0x305   :  { %5194 = vmatmul.mubr.bf16.gmra.mrb[156].mxu0 %v16250_v25  ;;  %v16279_v35 = vld [vmem:[#allocation32_spill] sm:$0xff] }
 0x306   :  { %5920 = vmatmul.mubr.bf16.gmra.mrb[204].mxu1 %v16210_v21  ;;  %5203 = vmatprep.mubr.bf16.mxu0 %v16251_v47  ;;  %v4779_v21 = vpop.f32.mrb[100].mxu1 }
 0x307   :  { %5929 = vmatprep.mubr.bf16.mxu1 %v16211_v14  ;;  %5409 = vmatpush1.bf16.msra.mxu0 %v10120_v30  ;;  %v4218_v14 = vadd.f32 %v13750_v49, %v13259_v22  ;;  %v8656_v11 = vadd.f32 %v4779_v21, %v4214_v23  ;;  %v4781_v38 = vpop.f32.mrb[101].mxu1  ;;  %v10081_v21 = vld [vmem:[%s15777_s4 + $0x610] ss:$24 sps:$4 sm:$0xff]  }
 0x308   :  { %5410 = vmatprep.subr.bf16.mxu0 %v10128_v19  ;;  %v8658_v39 = vadd.f32 %v4781_v38, %v4216_v4  ;;  %v4783_v44 = vpop.f32.mrb[102].mxu1  ;;  %v16266_v19 = vld [vmem:[#allocation141_spill] sm:$0xff] }
 0x309   :  { %6768 = vst [vmem:[%s15784_s11 + $0x7e0] sm:$0xff] %v8656_v11  ;;  %v8660_v1 = vadd.f32 %v4783_v44, %v4218_v14  ;;  %v4785_v41 = vpop.f32.mrb[103].mxu1  ;;  %v4240_v23 = vadd.f32 %v16266_v19, %v13267_v26  ;;  %v10089_v11 = vld [vmem:[%s15777_s4 + $0x644] ss:$24 sps:$4 sm:$0xff]   ;;  %v10129_v19 = vld [vmem:[%s15777_s4 + $0x790] ss:$24 sps:$4 sm:$0xff]  }
 0x30a   :  { %6769 = vst [vmem:[%s15784_s11 + $0x7e8] sm:$0xff] %v8658_v39  ;;  %v8662_v49 = vadd.f32 %v4785_v41, %v4220_v31  ;;  %v16267_v31 = vld [vmem:[#allocation27_spill] sm:$0xff]  ;;  %v16268_v39 = vld [vmem:[#allocation9_spill] sm:$0xff] }
 0x30b   :  { %5411 = vmatpush1.bf16.msra.mxu0 %v10126_v34  ;;  %6774 = vst [vmem:[%s15784_s11 + $0x810] sm:$0xff] %v8660_v1  ;;  %v10144_v44 = vld [vmem:[%s15781_s8 + $0x40] sm:$0xff]  }
 0x30c   :  { %5412 = vmatprep.subr.bf16.mxu0 %v10134_v59  ;;  %6775 = vst [vmem:[%s15784_s11 + $0x818] sm:$0xff] %v8662_v49  ;;  %v16269_v1 = vld [vmem:[#allocation28_spill] sm:$0xff]  ;;  %v10087_v41 = vld [vmem:[%s15777_s4 + $0x640] ss:$24 sps:$4 sm:$0xff]  }
 0x30d   :  { %5204 = vmatmul.mubr.bf16.gmra.mrb[160].mxu0 %v16252_v48 }
 0x30e   :  { %5930 = vmatmul.mubr.bf16.gmra.mrb[208].mxu1 %v16212_v54  ;;  %5213 = vmatprep.mubr.bf16.mxu0 %v16253_v5  ;;  %v10138_v54 = vld [vmem:[%s15777_s4 + $0x8d8] ss:$24 sps:$4 sm:$0xff]   ;;  %v4789_v45 = vpop.f32.mrb[104].mxu1 }
 0x30f   :  { %5939 = vmatprep.mubr.bf16.mxu1 %v16254_v46  ;;  %5413 = vmatpush1.bf16.msra.mxu0 %v10132_v55  ;;  %v8664_v15 = vadd.f32 %v4789_v45, %v4224_v56  ;;  %v4791_v57 = vpop.f32.mrb[105].mxu1  ;;  %v16270_v55 = vld [vmem:[#allocation89_spill] sm:$0xff]  ;;  %v16271_v46 = vld [vmem:[#allocation10_spill] sm:$0xff]  ;;  %v4246_v56 = vadd.f32 %v16272_v33, %v13267_v26 }
 0x310   :  { %5414 = vmatprep.subr.bf16.mxu0 %v10140_v58  ;;  %v8666_v16 = vadd.f32 %v4791_v57, %v4226_v9  ;;  %v4793_v60 = vpop.f32.mrb[106].mxu1  ;;  %v4244_v49 = vadd.f32 %v16270_v55, %v13259_v22  ;;  %v10095_v58 = vld [vmem:[%s15777_s4 + $0x674] ss:$24 sps:$4 sm:$0xff]   ;;  %v10157_v55 = vld [vmem:[%s15777_s4 + $0x8b0] ss:$24 sps:$4 sm:$0xff]  }
 0x311   :  { %6780 = vst [vmem:[%s15784_s11 + $0x840] sm:$0xff] %v8664_v15  ;;  %v8668_v32 = vadd.f32 %v4793_v60, %v4228_v50  ;;  %v4795_v20 = vpop.f32.mrb[107].mxu1  ;;  %v4250_v50 = vadd.f32 %v16273_v63, %v13267_v26  ;;  %v10101_v26 = vld [vmem:[%s15777_s4 + $0x6a4] ss:$24 sps:$4 sm:$0xff]   ;;  %v16292_v33 = vld [vmem:[#allocation46_spill] sm:$0xff] }
 0x312   :  { %6781 = vst [vmem:[%s15784_s11 + $0x848] sm:$0xff] %v8666_v16  ;;  %v8670_v8 = vadd.f32 %v4795_v20, %v4230_v27  ;;  %v10093_v16 = vld [vmem:[%s15777_s4 + $0x670] ss:$24 sps:$4 sm:$0xff]   ;;  %v16275_v60 = vld [vmem:[#allocation11_spill] sm:$0xff] }
 0x313   :  { %5415 = vmatpush1.bf16.msra.mxu0 %v10138_v54  ;;  %6786 = vst [vmem:[%s15784_s11 + $0x870] sm:$0xff] %v8668_v32  ;;  %v16276_v32 = vld [vmem:[#allocation30_spill] sm:$0xff]  ;;  %v16277_v20 = vld [vmem:[#allocation12_spill] sm:$0xff] }
 0x314   :  { %6787 = vst [vmem:[%s15784_s11 + $0x878] sm:$0xff] %v8670_v8  ;;  %8373 = vmatprep.subr.bf16.mxu0 %v10144_v44  ;;  %v10099_v8 = vld [vmem:[%s15777_s4 + $0x6a0] ss:$24 sps:$4 sm:$0xff]  }
 0x315   :  { %5214 = vmatmul.mubr.bf16.gmra.mrb[164].mxu0 %v16259_v10  ;;  %v10154_v44 = vld [vmem:[%s15777_s4 + $0x880] ss:$24 sps:$4 sm:$0xff]  }
 0x316   :  { %5940 = vmatmul.mubr.bf16.gmra.mrb[212].mxu1 %v16260_v17  ;;  %5223 = vmatprep.mubr.bf16.mxu0 %v16261_v42  ;;  %v4799_v53 = vpop.f32.mrb[108].mxu1  ;;  %v10107_v17 = vld [vmem:[%s15777_s4 + $0x6d4] ss:$24 sps:$4 sm:$0xff]  }
 0x317   :  { %5982 = vmatprep.mubr.bf16.mxu1 %v16262_v0  ;;  %v8672_v30 = vadd.f32 %v4799_v53, %v4234_v2  ;;  %v4801_v62 = vpop.f32.mrb[109].mxu1  ;;  %v10105_v0 = vld [vmem:[%s15777_s4 + $0x6d0] ss:$24 sps:$4 sm:$0xff]   ;;  %v16278_v2 = vld [vmem:[#allocation31_spill] sm:$0xff]  ;;  %v10119_v53 = vld [vmem:[%s15777_s4 + $0x734] ss:$24 sps:$4 sm:$0xff]  }
 0x318   :  { %v8674_v34 = vadd.f32 %v4801_v62, %v4236_v61  ;;  %v4803_v4 = vpop.f32.mrb[110].mxu1  ;;  %v10111_v61 = vld [vmem:[%s15777_s4 + $0x700] ss:$24 sps:$4 sm:$0xff]   ;;  %v10131_v62 = vld [vmem:[%s15777_s4 + $0x794] ss:$24 sps:$4 sm:$0xff]  }
 0x319   :  { %6792 = vst [vmem:[%s15784_s11 + $0x8a0] sm:$0xff] %v8672_v30  ;;  %v8676_v59 = vadd.f32 %v4803_v4, %v4238_v12  ;;  %v4805_v14 = vpop.f32.mrb[111].mxu1  ;;  %v16281_v12 = vld [vmem:[#allocation34_spill] sm:$0xff] }
 0x31a   :  { %6793 = vst [vmem:[%s15784_s11 + $0x8a8] sm:$0xff] %v8674_v34  ;;  %v8678_v38 = vadd.f32 %v4805_v14, %v4240_v23  ;;  %v10123_v30 = vld [vmem:[%s15777_s4 + $0x760] ss:$24 sps:$4 sm:$0xff]   ;;  %v16283_v23 = vld [vmem:[#allocation36_spill] sm:$0xff]  ;;  %v10143_v4 = vld [vmem:[%s15777_s4 + $0x7f4] ss:$24 sps:$4 sm:$0xff]  }
 0x31b   :  { %6798 = vst [vmem:[%s15784_s11 + $0x8d0] sm:$0xff] %v8676_v59  ;;  %v10135_v34 = vld [vmem:[%s15777_s4 + $0x7c0] ss:$24 sps:$4 sm:$0xff]  }
 0x31c   :  { %6799 = vst [vmem:[%s15784_s11 + $0x8d8] sm:$0xff] %v8678_v38  ;;  %v16285_v59 = vld [vmem:[#allocation38_spill] sm:$0xff]  ;;  %v10149_v38 = vld [vmem:[%s15777_s4 + $0x850] ss:$24 sps:$4 sm:$0xff]  }
 0x31d   :  { %5224 = vmatmul.mubr.bf16.gmra.mrb[168].mxu0 %v16267_v31  ;;  %v10146_v14 = vld [vmem:[%s15777_s4 + $0x820] ss:$24 sps:$4 sm:$0xff]  }
 0x31e   :  { %5983 = vmatmul.mubr.bf16.vlgmr.msra.gmra.mrb[116].mxu1 %v16268_v39  ;;  %5233 = vmatprep.mubr.bf16.mxu0 %v16269_v1  ;;  %v4809_v54 = vpop.f32.mrb[112].mxu1  ;;  %v16287_v39 = vld [vmem:[#allocation40_spill] sm:$0xff] }
 0x31f   :  { %6234 = vmatpush1.bf16.msra.mxu1 %v10081_v21  ;;  %5992 = vmatprep.mubr.bf16.mxu1 %v16271_v46  ;;  %v8680_v9 = vadd.f32 %v4809_v54, %v4244_v49  ;;  %v4811_v45 = vpop.f32.mrb[113].mxu1  ;;  %v10141_v21 = vld [vmem:[%s15777_s4 + $0x7f0] ss:$24 sps:$4 sm:$0xff]   ;;  %v16289_v49 = vld [vmem:[#allocation42_spill] sm:$0xff] }
 0x320   :  { %6235 = vmatprep.subr.bf16.mxu1 %v10089_v11  ;;  %v8682_v15 = vadd.f32 %v4811_v45, %v4246_v56  ;;  %v4813_v57 = vpop.f32.mrb[114].mxu1  ;;  %v10151_v11 = vld [vmem:[%s15777_s4 + $0x854] ss:$24 sps:$4 sm:$0xff]   ;;  %v10162_v46 = vld [vmem:[%s15777_s4 + $0x8e0] ss:$24 sps:$4 sm:$0xff]   ;;  %v16295_v54 = vld [vmem:[#allocation52_spill] sm:$0xff] }
 0x321   :  { %6804 = vst [vmem:[%s15784_s11 + $0x900] sm:$0xff] %v8680_v9  ;;  %v8684_v36 = vadd.f32 %v4813_v57, %v4248_v3  ;;  %v4815_v27 = vpop.f32.mrb[115].mxu1  ;;  %v16294_v56 = vld [vmem:[#allocation51_spill] sm:$0xff]  ;;  %v16300_v9 = vld [vmem:[#allocation58_spill] sm:$0xff]  ;;  %v16301_v45 = vld [vmem:[#allocation60_spill] sm:$0xff] }
 0x322   :  { %6805 = vst [vmem:[%s15784_s11 + $0x908] sm:$0xff] %v8682_v15  ;;  %v8686_v22 = vadd.f32 %v4815_v27, %v4250_v50  ;;  %v16302_v15 = vld [vmem:[#allocation61_spill] sm:$0xff] }
 0x323   :  { %6236 = vmatpush1.bf16.msra.mxu1 %v10087_v41  ;;  %6810 = vst [vmem:[%s15784_s11 + $0x930] sm:$0xff] %v8684_v36  ;;  %v10159_v41 = vld [vmem:[%s15777_s4 + $0x8b4] ss:$24 sps:$4 sm:$0xff]  }
 0x324   :  { %6237 = vmatprep.subr.bf16.mxu1 %v10095_v58  ;;  %6811 = vst [vmem:[%s15784_s11 + $0x938] sm:$0xff] %v8686_v22  ;;  %v16290_v58 = vld [vmem:[#allocation43_spill] sm:$0xff]  ;;  %v16303_v36 = vld [vmem:[#allocation62_spill] sm:$0xff] }
 0x325   :  { %5234 = vmatmul.mubr.bf16.gmra.mrb[172].mxu0 %v16274_v51  ;;  %v16304_v22 = vld [vmem:[#allocation63_spill] sm:$0xff] }
 0x326   :  { %5993 = vmatmul.mubr.bf16.gmra.mrb[120].mxu1 %v16275_v60  ;;  %5243 = vmatprep.mubr.bf16.mxu0 %v16276_v32 }
 0x327   :  { %6002 = vmatprep.mubr.bf16.mxu1 %v16277_v20  ;;  %6238 = vmatpush1.bf16.msra.mxu1 %v10093_v16 }
 0x328   :  { %6239 = vmatprep.subr.bf16.mxu1 %v10101_v26  ;;  %v16305_v26 = vld [vmem:[#allocation64_spill] sm:$0xff] }
 0x32b   :  { %6240 = vmatpush1.bf16.msra.mxu1 %v10099_v8  ;;  %v10145_v8 = vld [vmem:[%s15781_s8] sm:$0xff]  }
 0x32c   :  { %6241 = vmatprep.subr.bf16.mxu1 %v10107_v17  ;;  %v10152_v17 = vld [vmem:[%s15781_s8 + $0x48] sm:$0xff]  }
 0x32d   :  { %5244 = vmatmul.mubr.bf16.gmra.mrb[176].mxu0 %v16278_v2 }
 0x32e   :  { %6003 = vmatmul.mubr.bf16.gmra.mrb[124].mxu1 %v16237_v29  ;;  %5253 = vmatprep.mubr.bf16.mxu0 %v16279_v35  ;;  %v10125_v29 = vld [vmem:[%s15777_s4 + $0x764] ss:$24 sps:$4 sm:$0xff]  }
 0x32f   :  { %6012 = vmatprep.mubr.bf16.mxu1 %v16239_v24  ;;  %6242 = vmatpush1.bf16.msra.mxu1 %v10105_v0  ;;  %v16280_v24 = vld [vmem:[#allocation33_spill] sm:$0xff] }
 0x330   :  { %6243 = vmatprep.subr.bf16.mxu1 %v10113_v6  ;;  %v16306_v6 = vld [vmem:[#allocation66_spill] sm:$0xff] }
 0x333   :  { %6244 = vmatpush1.bf16.msra.mxu1 %v10111_v61  ;;  %v10153_v61 = vld [vmem:[%s15781_s8 + $0x8] sm:$0xff]  }
 0x334   :  { %6245 = vmatprep.subr.bf16.mxu1 %v10119_v53  ;;  %v10160_v53 = vld [vmem:[%s15781_s8 + $0x50] sm:$0xff]  }
 0x335   :  { %5254 = vmatmul.mubr.bf16.gmra.mrb[180].mxu0 %v16280_v24 }
 0x336   :  { %6013 = vmatmul.mubr.bf16.gmra.mrb[128].mxu1 %v16241_v37  ;;  %5263 = vmatprep.mubr.bf16.mxu0 %v16281_v12  ;;  %v10137_v37 = vld [vmem:[%s15777_s4 + $0x7c4] ss:$24 sps:$4 sm:$0xff]  }
 0x337   :  { %6022 = vmatprep.mubr.bf16.mxu1 %v16243_v28  ;;  %6246 = vmatpush1.bf16.msra.mxu1 %v10117_v13  ;;  %v16282_v28 = vld [vmem:[#allocation35_spill] sm:$0xff]  ;;  %v10161_v13 = vld [vmem:[%s15781_s8 + $0x10] sm:$0xff]  }
 0x338   :  { %6247 = vmatprep.subr.bf16.mxu1 %v10125_v29  ;;  %v10165_v29 = vld [vmem:[%s15781_s8 + $0x58] sm:$0xff]  }
 0x33b   :  { %6248 = vmatpush1.bf16.msra.mxu1 %v10123_v30 }
 0x33c   :  { %6249 = vmatprep.subr.bf16.mxu1 %v10131_v62  ;;  %v16309_v62 = vld [vmem:[#allocation72_spill] sm:$0xff] }
 0x33d   :  { %5264 = vmatmul.mubr.bf16.gmra.mrb[184].mxu0 %v16282_v28 }
 0x33e   :  { %6023 = vmatmul.mubr.bf16.gmra.mrb[132].mxu1 %v16246_v7  ;;  %5273 = vmatprep.mubr.bf16.mxu0 %v16283_v23  ;;  %v10148_v7 = vld [vmem:[%s15777_s4 + $0x824] ss:$24 sps:$4 sm:$0xff]  }
 0x33f   :  { %6032 = vmatprep.mubr.bf16.mxu1 %v16247_v40  ;;  %6250 = vmatpush1.bf16.msra.mxu1 %v10129_v19  ;;  %v16284_v40 = vld [vmem:[#allocation37_spill] sm:$0xff]  ;;  %v10166_v19 = vld [vmem:[%s15781_s8 + $0x18] sm:$0xff]  }
 0x340   :  { %6251 = vmatprep.subr.bf16.mxu1 %v10137_v37 }
 0x343   :  { %6252 = vmatpush1.bf16.msra.mxu1 %v10135_v34 }
 0x344   :  { %6253 = vmatprep.subr.bf16.mxu1 %v10143_v4 }
 0x345   :  { %5274 = vmatmul.mubr.bf16.gmra.mrb[188].mxu0 %v16284_v40 }
 0x346   :  { %6033 = vmatmul.mubr.bf16.gmra.mrb[136].mxu1 %v16248_v43  ;;  %5283 = vmatprep.mubr.bf16.mxu0 %v16285_v59  ;;  %v10156_v43 = vld [vmem:[%s15777_s4 + $0x884] ss:$24 sps:$4 sm:$0xff]  }
 0x347   :  { %6042 = vmatprep.mubr.bf16.mxu1 %v16249_v18  ;;  %6254 = vmatpush1.bf16.msra.mxu1 %v10141_v21  ;;  %v16286_v18 = vld [vmem:[#allocation39_spill] sm:$0xff] }
 0x348   :  { %6255 = vmatprep.subr.bf16.mxu1 %v10148_v7  ;;  %v10168_v7 = vld [vmem:[%s15781_s8 + $0x20] sm:$0xff]  }
 0x34b   :  { %6256 = vmatpush1.bf16.msra.mxu1 %v10146_v14  ;;  %v10169_v14 = vld [vmem:[%s15781_s8 + $0x68] sm:$0xff]  }
 0x34c   :  { %6257 = vmatprep.subr.bf16.mxu1 %v10151_v11  ;;  %v16310_v11 = vld [vmem:[#allocation73_spill] sm:$0xff] }
 0x34d   :  { %5284 = vmatmul.mubr.bf16.gmra.mrb[192].mxu0 %v16286_v18 }
 0x34e   :  { %6043 = vmatmul.mubr.bf16.gmra.mrb[140].mxu1 %v16250_v25  ;;  %5293 = vmatprep.mubr.bf16.mxu0 %v16287_v39  ;;  %v16288_v25 = vld [vmem:[#allocation41_spill] sm:$0xff] }
 0x34f   :  { %6052 = vmatprep.mubr.bf16.mxu1 %v16251_v47  ;;  %6258 = vmatpush1.bf16.msra.mxu1 %v10149_v38  ;;  %v10164_v47 = vld [vmem:[%s15777_s4 + $0x8e4] ss:$24 sps:$4 sm:$0xff]   ;;  %v16311_v38 = vld [vmem:[#allocation74_spill] sm:$0xff] }
 0x350   :  { %6259 = vmatprep.subr.bf16.mxu1 %v10156_v43 }
 0x353   :  { %6260 = vmatpush1.bf16.msra.mxu1 %v10154_v44  ;;  %v10170_v44 = vld [vmem:[%s15781_s8 + $0x28] sm:$0xff]  }
 0x354   :  { %6261 = vmatprep.subr.bf16.mxu1 %v10159_v41 }
 0x355   :  { %5294 = vmatmul.mubr.bf16.gmra.mrb[196].mxu0 %v16288_v25 }
 0x356   :  { %6053 = vmatmul.mubr.bf16.gmra.mrb[144].mxu1 %v16252_v48  ;;  %5303 = vmatprep.mubr.bf16.mxu0 %v16289_v49  ;;  %v16291_v48 = vld [vmem:[#allocation44_spill] sm:$0xff] }
 0x357   :  { %6062 = vmatprep.mubr.bf16.mxu1 %v16253_v5  ;;  %6262 = vmatpush1.bf16.msra.mxu1 %v10157_v55  ;;  %v16293_v5 = vld [vmem:[#allocation50_spill] sm:$0xff] }
 0x358   :  { %6263 = vmatprep.subr.bf16.mxu1 %v10164_v47  ;;  %v10171_v55 = vld [vmem:[%s15781_s8 + $0x70] sm:$0xff]  }
 0x35b   :  { %6264 = vmatpush1.bf16.msra.mxu1 %v10162_v46  ;;  %v10172_v46 = vld [vmem:[%s15781_s8 + $0x30] sm:$0xff]  }
 0x35d   :  { %5304 = vmatmul.mubr.bf16.gmra.mrb[200].mxu0 %v16290_v58 }
 0x35e   :  { %6063 = vmatmul.mubr.bf16.gmra.mrb[148].mxu1 %v16259_v10  ;;  %5313 = vmatprep.mubr.bf16.mxu0 %v16291_v48  ;;  %v16296_v10 = vld [vmem:[#allocation53_spill] sm:$0xff] }
 0x35f   :  { %6072 = vmatprep.mubr.bf16.mxu1 %v16261_v42  ;;  %v16297_v42 = vld [vmem:[#allocation54_spill] sm:$0xff] }
 0x365   :  { %5314 = vmatmul.mubr.bf16.gmra.mrb[204].mxu0 %v16292_v33 }
 0x366   :  { %6073 = vmatmul.mubr.bf16.gmra.mrb[152].mxu1 %v16267_v31  ;;  %5323 = vmatprep.mubr.bf16.mxu0 %v16293_v5  ;;  %v16298_v31 = vld [vmem:[#allocation55_spill] sm:$0xff] }
 0x367   :  { %6082 = vmatprep.mubr.bf16.mxu1 %v16269_v1  ;;  %v16299_v1 = vld [vmem:[#allocation56_spill] sm:$0xff] }
 0x36d   :  { %5324 = vmatmul.mubr.bf16.gmra.mrb[208].mxu0 %v16294_v56 }
 0x36e   :  { %6083 = vmatmul.mubr.bf16.gmra.mrb[156].mxu1 %v16274_v51  ;;  %5333 = vmatprep.mubr.bf16.mxu0 %v16295_v54 }
 0x36f   :  { %6092 = vmatprep.mubr.bf16.mxu1 %v16276_v32 }
 0x370   :  { %v6909_v3 = vpop.xlane.xlu0 %6908 }
 0x371   :  { %10207 = vtanh.f32 %v6909_v3 }
 0x375   :  { %5334 = vmatmul.mubr.bf16.gmra.mrb[212].mxu0 %v16296_v10  ;;  %v6935_v63 = vpop.xlane.xlu1 %6934 }
 0x376   :  { %6093 = vmatmul.mubr.bf16.gmra.mrb[160].mxu1 %v16278_v2  ;;  %5343 = vmatprep.mubr.bf16.mxu0 %v16297_v42 }
 0x377   :  { %6102 = vmatprep.mubr.bf16.mxu1 %v16279_v35  ;;  %v16307_v35 = vld [vmem:[#allocation68_spill] sm:$0xff] }
 0x37b   :  { %v10208_v27 = vpop.eup %10207 }
 0x37c   :  { %v6953_v51 = vmul.f32 1.442695, %v10208_v27 }
 0x37d   :  { %5344 = vmatmul.mubr.bf16.gmra.mrb[216].mxu0 %v16298_v31  ;;  %v6922_v50 = vpop.xlane.xlu0 %6921 }
 0x37e   :  { %6103 = vmatmul.mubr.bf16.gmra.mrb[164].mxu1 %v16280_v24  ;;  %5353 = vmatprep.mubr.bf16.mxu0 %v16299_v1  ;;  %10209 = vtanh.f32 %v6922_v50 }
 0x37f   :  { %6112 = vmatprep.mubr.bf16.mxu1 %v16281_v12  ;;  %v6948_v57 = vpop.xlane.xlu1 %6947  ;;  %10211 = vtanh.f32 %v6935_v63  ;;  %v16308_v12 = vld [vmem:[#allocation70_spill] sm:$0xff] }
 0x380   :  { %10213 = vtanh.f32 %v6948_v57 }
 0x381   :  { %10215 = vpow2.f32 %v6953_v51 }
 0x385   :  { %5354 = vmatmul.mubr.bf16.gmra.mrb[220].mxu0 %v16300_v9 }
 0x386   :  { %6113 = vmatmul.mubr.bf16.gmra.mrb[168].mxu1 %v16282_v28  ;;  %5363 = vmatprep.mubr.bf16.mxu0 %v16301_v45  ;;  %v10167_v28 = vld [vmem:[%s15781_s8 + $0x60] sm:$0xff]  }
 0x387   :  { %6122 = vmatprep.mubr.bf16.mxu1 %v16283_v23 }
 0x388   :  { %v10210_v16 = vpop.eup %10209 }
 0x389   :  { %v10212_v60 = vpop.eup %10211  ;;  %v6955_v32 = vmul.f32 1.442695, %v10210_v16 }
 0x38a   :  { %v10214_v20 = vpop.eup %10213  ;;  %v6957_v0 = vmul.f32 1.442695, %v10212_v60  ;;  %v16314_v60 = vld [vmem:[#allocation77_spill] sm:$0xff] }
 0x38b   :  { %10217 = vpow2.f32 %v6955_v32  ;;  %v6959_v2 = vmul.f32 1.442695, %v10214_v20  ;;  %v14522_v24 = vpop.eup %10215  ;;  %v16315_v20 = vld [vmem:[#allocation78_spill] sm:$0xff] }
 0x38c   :  { %10219 = vpow2.f32 %v6957_v0  ;;  %v6961_v37 = vsel %vm6896_vm0, %v14522_v24, 0.0 }
 0x38d   :  { %5364 = vmatmul.mubr.bf16.gmra.mrb[224].mxu0 %v16302_v15  ;;  %10221 = vpow2.f32 %v6959_v2  ;;  %v6962_v21 = vrot.slane %v6961_v37, 4 }
 0x38e   :  { %6123 = vmatmul.mubr.bf16.gmra.mrb[172].mxu1 %v16284_v40  ;;  %5373 = vmatprep.mubr.bf16.mxu0 %v16303_v36 }
 0x38f   :  { %6132 = vmatprep.mubr.bf16.mxu1 %v16285_v59 }
 0x395   :  { %5374 = vmatmul.mubr.bf16.gmra.mrb[228].mxu0 %v16304_v22  ;;  %v14526_v30 = vpop.eup %10217 }
 0x396   :  { %6133 = vmatmul.mubr.bf16.gmra.mrb[176].mxu1 %v16286_v18  ;;  %5416 = vmatprep.mubr.bf16.mxu0 %v16305_v26  ;;  %v14538_v23 = vpop.eup %10219  ;;  %v6968_v34 = vsel %vm6896_vm0, %v14526_v30, 0.0  ;;  %v6963_v18 = vadd.f32 %v6962_v21, %v6961_v37  ;;  %v16318_v37 = vld [vmem:[#allocation82_spill] sm:$0xff] }
 0x397   :  { %6142 = vmatprep.mubr.bf16.mxu1 %v16287_v39  ;;  %v14542_v4 = vpop.eup %10221  ;;  %v6975_v40 = vsel %vm6896_vm0, %v14538_v23, 0.0  ;;  %v6969_v59 = vrot.slane %v6968_v34, 4 }
 0x398   :  { %v6982_v43 = vsel %vm6896_vm0, %v14542_v4, 0.0  ;;  %v6976_v39 = vrot.slane %v6975_v40, 4  ;;  %v6964_v47 = vrot.slane %v6963_v18, 2 }
 0x399   :  { %v6970_v41 = vadd.f32 %v6969_v59, %v6968_v34  ;;  %v16321_v59 = vld [vmem:[#allocation88_spill] sm:$0xff] }
 0x39a   :  { %v6965_v3 = vadd.f32 %v6964_v47, %v6963_v18 }
 0x39c   :  { %v6966_v27 = vrot.slane %v6965_v3, 1 }
 0x39d   :  { %5417 = vmatmul.mubr.bf16.vlgmr.msra.gmra.mrb[132].mxu0 %v16306_v6 }
 0x39e   :  { %6143 = vmatmul.mubr.bf16.gmra.mrb[180].mxu1 %v16288_v25  ;;  %8374 = vmatpush3.bf16.msra.mxu0 %v10145_v8  ;;  %v6983_v25 = vrot.slane %v6982_v43, 4 }
 0x39f   :  { %5426 = vmatprep.mubr.bf16.mxu0 %v16307_v35  ;;  %6152 = vmatprep.mubr.bf16.mxu1 %v16289_v49  ;;  %v6977_v49 = vadd.f32 %v6976_v39, %v6975_v40  ;;  %v16322_v39 = vld [vmem:[#allocation90_spill] sm:$0xff] }
 0x3a0   :  { %8375 = vmatprep.subr.bf16.mxu0 %v10152_v17 }
 0x3a1   :  { %v6978_v63 = vrot.slane %v6977_v49, 2 }
 0x3a2   :  { %8376 = vmatpush3.bf16.msra.mxu0 %v10153_v61 }
 0x3a3   :  { %8377 = vmatprep.subr.bf16.mxu0 %v10160_v53  ;;  %v6979_v16 = vadd.f32 %v6978_v63, %v6977_v49  ;;  %v16316_v53 = vld [vmem:[#allocation79_spill] sm:$0xff] }
 0x3a5   :  { %5427 = vmatmul.mubr.bf16.gmra.mrb[136].mxu0 %v16308_v12  ;;  %v6980_v8 = vrot.slane %v6979_v16, 1 }
 0x3a6   :  { %6153 = vmatmul.mubr.bf16.gmra.mrb[184].mxu1 %v16290_v58  ;;  %5436 = vmatprep.mubr.bf16.mxu0 %v16309_v62  ;;  %v6971_v58 = vrot.slane %v6970_v41, 2 }
 0x3a7   :  { %6162 = vmatprep.mubr.bf16.mxu1 %v16291_v48  ;;  %8378 = vmatpush3.bf16.msra.mxu0 %v10161_v13  ;;  %v16312_v48 = vld [vmem:[#allocation75_spill] sm:$0xff]  ;;  %v6981_v2 = vadd.f32 %v6980_v8, %v6979_v16 }
 0x3a8   :  { %8379 = vmatprep.subr.bf16.mxu0 %v10165_v29  ;;  %v6972_v50 = vadd.f32 %v6971_v58, %v6970_v41  ;;  %v16317_v29 = vld [vmem:[#allocation80_spill] sm:$0xff] }
 0x3aa   :  { %v6973_v51 = vrot.slane %v6972_v50, 1 }
 0x3ab   :  { %8380 = vmatpush3.bf16.msra.mxu0 %v10166_v19 }
 0x3ac   :  { %8381 = vmatprep.subr.bf16.mxu0 %v10167_v28 }
 0x3ad   :  { %5437 = vmatmul.mubr.bf16.gmra.mrb[140].mxu0 %v16310_v11 }
 0x3ae   :  { %6163 = vmatmul.mubr.bf16.gmra.mrb[188].mxu1 %v16292_v33  ;;  %5446 = vmatprep.mubr.bf16.mxu0 %v16311_v38  ;;  %v6984_v33 = vadd.f32 %v6983_v25, %v6982_v43  ;;  %v10232_v43 = vld [vmem:[%s15779_s6 + $0x20] sm:$0x1f] }
 0x3af   :  { %6172 = vmatprep.mubr.bf16.mxu1 %v16293_v5  ;;  %8382 = vmatpush3.bf16.msra.mxu0 %v10168_v7  ;;  %v16313_v5 = vld [vmem:[#allocation76_spill] sm:$0xff]  ;;  %v16320_v7 = vld [vmem:[#allocation86_spill] sm:$0xff] }
 0x3b0   :  { %8383 = vmatprep.subr.bf16.mxu0 %v10169_v14  ;;  %v6985_v57 = vrot.slane %v6984_v33, 2 }
 0x3b2   :  { %v6986_v32 = vadd.f32 %v6985_v57, %v6984_v33 }
 0x3b3   :  { %8384 = vmatpush3.bf16.msra.mxu0 %v10170_v44 }
 0x3b4   :  { %8385 = vmatprep.subr.bf16.mxu0 %v10171_v55  ;;  %v6987_v17 = vrot.slane %v6986_v32, 1  ;;  %v16323_v55 = vld [vmem:[#allocation92_spill] sm:$0xff] }
 0x3b5   :  { %5447 = vmatmul.mubr.bf16.gmra.mrb[144].mxu0 %v16312_v48 }
 0x3b6   :  { %6173 = vmatmul.mubr.bf16.gmra.mrb[192].mxu1 %v16294_v56  ;;  %5456 = vmatprep.mubr.bf16.mxu0 %v16313_v5  ;;  %v6967_v56 = vadd.f32 %v6966_v27, %v6965_v3  ;;  %v6988_v13 = vadd.f32 %v6987_v17, %v6986_v32  ;;  %v16324_v27 = vld [vmem:[#allocation94_spill] sm:$0xff] }
 0x3b7   :  { %6182 = vmatprep.mubr.bf16.mxu1 %v16295_v54  ;;  %8386 = vmatpush3.bf16.msra.mxu0 %v10172_v46  ;;  %v6974_v54 = vadd.f32 %v6973_v51, %v6972_v50  ;;  %v16325_v32 = vld [vmem:[#allocation98_spill] sm:$0xff] }
 0x3b8   :  { %v6989_v0 = vadd.f32 1e-10, %v6967_v56  ;;  %v6992_v19 = vadd.f32 1e-10, %v6988_v13 }
 0x3b9   :  { %v6990_v61 = vadd.f32 1e-10, %v6974_v54 }
 0x3ba   :  { %10223 = vrcp.f32 %v6989_v0 }
 0x3bb   :  { %10225 = vrcp.f32 %v6990_v61 }
 0x3bd   :  { %5457 = vmatmul.mubr.bf16.gmra.mrb[148].mxu0 %v16314_v60 }
 0x3be   :  { %6183 = vmatmul.mubr.bf16.gmra.mrb[196].mxu1 %v16296_v10  ;;  %5466 = vmatprep.mubr.bf16.mxu0 %v16315_v20  ;;  %v10173_v10 = vld [vmem:[%s15781_s8 + $0x78] sm:$0xff]  }
 0x3bf   :  { %6192 = vmatprep.mubr.bf16.mxu1 %v16297_v42  ;;  %v6991_v42 = vadd.f32 1e-10, %v6981_v2  ;;  %8387 = vmatprep.subr.bf16.mxu0 %v10173_v10 }
 0x3c1   :  { %10227 = vrcp.f32 %v6991_v42 }
 0x3c2   :  { %10229 = vrcp.f32 %v6992_v19 }
 0x3c4   :  { %v10224_v28 = vpop.eup %10223 }
 0x3c5   :  { %5467 = vmatmul.mubr.bf16.gmra.mrb[152].mxu0 %v16316_v53  ;;  %v10226_v34 = vpop.eup %10225  ;;  %v14592_v40 = vmul.f32 %v10224_v28, %v14522_v24  ;;  %v10233_v24 = vld [vmem:[%s15779_s6 + $0x50] sm:$0x1f]  ;;  %v16326_v28 = vld [vmem:[#allocation100_spill] sm:$0xff] }
 0x3c6   :  { %6193 = vmatmul.mubr.bf16.gmra.mrb[200].mxu1 %v16298_v31  ;;  %5476 = vmatprep.mubr.bf16.mxu0 %v16317_v29  ;;  %v10174_v31 = vld [vmem:[%s15781_s8 + $0x38] sm:$0xff]  }
 0x3c7   :  { %6202 = vmatprep.mubr.bf16.mxu1 %v16299_v1  ;;  %v16319_v1 = vld [vmem:[#allocation84_spill] sm:$0xff]  ;;  %8388 = vmatpush3.bf16.msra.mxu0 %v10174_v31 }
 0x3cb   :  { %v10228_v21 = vpop.eup %10227 }
 0x3cc   :  { %v10230_v14 = vpop.eup %10229 }
 0x3cd   :  { %5477 = vmatmul.mubr.bf16.gmra.mrb[156].mxu0 %v16318_v37  ;;  %v14611_v18 = vmul.f32 %v10230_v14, %v14542_v4  ;;  %v10175_v4 = vld [vmem:[%s15781_s8 + $0xc0] sm:$0xff]   ;;  %v16327_v14 = vld [vmem:[#allocation102_spill] sm:$0xff] }
 0x3ce   :  { %6203 = vmatmul.mubr.bf16.gmra.mrb[204].mxu1 %v16300_v9  ;;  %5486 = vmatprep.mubr.bf16.mxu0 %v16319_v1  ;;  %v14595_v9 = vmul.f32 %v10226_v34, %v14526_v30 }
 0x3cf   :  { %6212 = vmatprep.mubr.bf16.mxu1 %v16301_v45  ;;  %v14600_v45 = vmul.f32 %v10228_v21, %v14538_v23  ;;  %v7023_v25 = vmul.f32 %v14611_v18, %v14070_v52  ;;  %8395 = vmatprep.subr.bf16.mxu0 %v10175_v4  ;;  %v16331_v4 = vld [vmem:[#allocation110_spill] sm:$0xff] }
 0x3d0   :  { %v7011_v30 = vmul.f32 %v10233_v24, %v14595_v9 }
 0x3d1   :  { %v7179_v3 = vsel %vm6896_vm0, %v7023_v25, 0.0  ;;  %v16332_v25 = vld [vmem:[#allocation112_spill] sm:$0xff] }
 0x3d2   :  { %v7095_v41 = vsel %vm6896_vm0, %v7011_v30, 0.0  ;;  %v7180_v57 = vrot.slane %v7179_v3, 4 }
 0x3d3   :  { %v7096_v49 = vrot.slane %v7095_v41, 4 }
 0x3d4   :  { %v7181_v56 = vadd.f32 %v7180_v57, %v7179_v3 }
 0x3d5   :  { %5487 = vmatmul.mubr.bf16.gmra.mrb[160].mxu0 %v16320_v7  ;;  %v7097_v58 = vadd.f32 %v7096_v49, %v7095_v41  ;;  %v16329_v41 = vld [vmem:[#allocation106_spill] sm:$0xff] }
 0x3d6   :  { %6213 = vmatmul.mubr.bf16.gmra.mrb[208].mxu1 %v16302_v15  ;;  %5496 = vmatprep.mubr.bf16.mxu0 %v16321_v59  ;;  %v7005_v15 = vmul.f32 %v10232_v43, %v14592_v40  ;;  %v7182_v0 = vrot.slane %v7181_v56, 2  ;;  %v16342_v49 = vld [vmem:[#allocation126_spill] sm:$0xff] }
 0x3d7   :  { %6222 = vmatprep.mubr.bf16.mxu1 %v16303_v36  ;;  %v10234_v36 = vld [vmem:[%s15779_s6 + $0x80] sm:$0x1f]  ;;  %v7098_v50 = vrot.slane %v7097_v58, 2 }
 0x3d8   :  { %v7017_v23 = vmul.f32 %v10234_v36, %v14600_v45  ;;  %v7053_v44 = vsel %vm6896_vm0, %v7005_v15, 0.0  ;;  %v7183_v10 = vadd.f32 %v7182_v0, %v7181_v56  ;;  %v10242_v56 = vld [vmem:[%s15779_s6 + $0x48] sm:$0x1f] }
 0x3d9   :  { %v7054_v47 = vrot.slane %v7053_v44, 4  ;;  %v7099_v52 = vadd.f32 %v7098_v50, %v7097_v58 }
 0x3db   :  { %v7055_v46 = vadd.f32 %v7054_v47, %v7053_v44  ;;  %v7100_v54 = vrot.slane %v7099_v52, 1  ;;  %v16333_v47 = vld [vmem:[#allocation114_spill] sm:$0xff] }
 0x3dd   :  { %5497 = vmatmul.mubr.bf16.gmra.mrb[164].mxu0 %v16322_v39  ;;  %v7056_v63 = vrot.slane %v7055_v46, 2  ;;  %v7101_v61 = vadd.f32 %v7100_v54, %v7099_v52  ;;  %v16344_v54 = vld [vmem:[#allocation128_spill] sm:$0xff] }
 0x3de   :  { %6223 = vmatmul.mubr.bf16.gmra.mrb[212].mxu1 %v16304_v22  ;;  %5506 = vmatprep.mubr.bf16.mxu0 %v16323_v55  ;;  %v7137_v22 = vsel %vm6896_vm0, %v7017_v23, 0.0 }
 0x3df   :  { %6265 = vmatprep.mubr.bf16.mxu1 %v16305_v26  ;;  %v7138_v33 = vrot.slane %v7137_v22, 4  ;;  %v7057_v16 = vadd.f32 %v7056_v63, %v7055_v46  ;;  %v7203_v31 = vpack.c.bf16 %v7101_v61, %v7101_v61  ;;  %v10239_v63 = vld [vmem:[%s15779_s6 + $0x98] sm:$0x1f]  ;;  %v16345_v61 = vld [vmem:[#allocation129_spill] sm:$0xff] }
 0x3e0   :  { %v7020_v50 = vmul.f32 %v10239_v63, %v14611_v18 }
 0x3e1   :  { %v7139_v26 = vadd.f32 %v7138_v33, %v7137_v22  ;;  %v7058_v8 = vrot.slane %v7057_v16, 1  ;;  %v7354_v21 = vunpack.c.l.b16 %v7203_v31  ;;  %v10238_v33 = vld [vmem:[%s15779_s6] sm:$0x1f] }
 0x3e2   :  { %v7001_v3 = vmul.f32 %v10238_v33, %v14592_v40  ;;  %v16346_v33 = vld [vmem:[#allocation130_spill] sm:$0xff] }
 0x3e3   :  { %v7140_v51 = vrot.slane %v7139_v26, 2  ;;  %v7059_v2 = vadd.f32 %v7058_v8, %v7057_v16  ;;  %v7010_v8 = vmul.f32 %v10242_v56, %v14595_v9 }
 0x3e5   :  { %5507 = vmatmul.mubr.bf16.gmra.mrb[168].mxu0 %v16324_v27  ;;  %v7141_v17 = vadd.f32 %v7140_v51, %v7139_v26  ;;  %v7197_v19 = vpack.c.bf16 %v7059_v2, %v7059_v2  ;;  %v10240_v26 = vld [vmem:[%s15779_s6 + $0x30] sm:$0x1f]  ;;  %v10241_v51 = vld [vmem:[%s15779_s6 + $0x18] sm:$0x1f]  ;;  %v7025_v2 = vsel %vm6896_vm0, %v7001_v3, 0.0 }
 0x3e6   :  { %6266 = vmatmul.mubr.bf16.vlgmr.msra.gmra.mrb[116].mxu1 %v16306_v6  ;;  %5516 = vmatprep.mubr.bf16.mxu0 %v16325_v32  ;;  %v7184_v6 = vrot.slane %v7183_v10, 1  ;;  %v7007_v57 = vmul.f32 %v10240_v26, %v14595_v9  ;;  %v16347_v26 = vld [vmem:[#allocation131_spill] sm:$0xff] }
 0x3e7   :  { %6275 = vmatprep.mubr.bf16.mxu1 %v16307_v35  ;;  %v7142_v13 = vrot.slane %v7141_v17, 1  ;;  %v7348_v35 = vunpack.c.l.b16 %v7197_v19 }
 0x3e8   :  { %v7185_v43 = vadd.f32 %v7184_v6, %v7183_v10  ;;  %v7158_v10 = vsel %vm6896_vm0, %v7020_v50, 0.0  ;;  %v10244_v6 = vld [vmem:[%s15779_s6 + $0x78] sm:$0x1f] }
 0x3e9   :  { %v7143_v42 = vadd.f32 %v7142_v13, %v7141_v17  ;;  %v7383_v24 = vsel %vm7368_vm1, %v7354_v21, %v7348_v35  ;;  %v10243_v17 = vld [vmem:[%s15779_s6 + $0x60] sm:$0x1f]  ;;  %v7026_v35 = vrot.slane %v7025_v2, 4  ;;  %v7088_v21 = vsel %vm6896_vm0, %v7010_v8, 0.0 }
 0x3ea   :  { %v7215_v30 = vpack.c.bf16 %v7185_v43, %v7185_v43  ;;  %v7013_v0 = vmul.f32 %v10243_v17, %v14600_v45  ;;  %v7159_v43 = vrot.slane %v7158_v10, 4 }
 0x3eb   :  { %v7209_v34 = vpack.c.bf16 %v7143_v42, %v7143_v42  ;;  %v7067_v42 = vsel %vm6896_vm0, %v7007_v57, 0.0 }
 0x3ec   :  { %v7366_v23 = vunpack.c.l.b16 %v7215_v30  ;;  %v7109_v30 = vsel %vm6896_vm0, %v7013_v0, 0.0  ;;  %v7160_v3 = vadd.f32 %v7159_v43, %v7158_v10 }
 0x3ed   :  { %5517 = vmatmul.mubr.bf16.gmra.mrb[172].mxu0 %v16326_v28  ;;  %v7360_v15 = vunpack.c.l.b16 %v7209_v34 }
 0x3ee   :  { %6276 = vmatmul.mubr.bf16.gmra.mrb[120].mxu1 %v16308_v12  ;;  %5526 = vmatprep.mubr.bf16.mxu0 %v16327_v14  ;;  %v16328_v12 = vld [vmem:[#allocation104_spill] sm:$0xff] }
 0x3ef   :  { %6285 = vmatprep.mubr.bf16.mxu1 %v16309_v62  ;;  %v7384_v36 = vsel %vm7370_vm2, %v7360_v15, %v7383_v24  ;;  %v16330_v62 = vld [vmem:[#allocation108_spill] sm:$0xff]  ;;  %v7068_v24 = vrot.slane %v7067_v42, 4 }
 0x3f0   :  { %v14641_v44 = vsel %vm7372_vm3, %v7366_v23, %v7384_v36  ;;  %v10246_v23 = vld [vmem:[%s15779_s6 + $0xa8] sm:$0x1f] }
 0x3f1   :  { %v7069_v63 = vadd.f32 %v7068_v24, %v7067_v42  ;;  %v16348_v24 = vld [vmem:[#allocation132_spill] sm:$0xff] }
 0x3f5   :  { %5527 = vmatmul.mubr.bf16.gmra.mrb[176].mxu0 %v16328_v12 }
 0x3f6   :  { %6286 = vmatmul.mubr.bf16.gmra.mrb[124].mxu1 %v16310_v11  ;;  %5536 = vmatprep.mubr.bf16.mxu0 %v16329_v41  ;;  %v16334_v11 = vld [vmem:[#allocation116_spill] sm:$0xff] }
 0x3f7   :  { %6295 = vmatprep.mubr.bf16.mxu1 %v16311_v38  ;;  %v16335_v38 = vld [vmem:[#allocation118_spill] sm:$0xff] }
 0x3fd   :  { %5537 = vmatmul.mubr.bf16.gmra.mrb[180].mxu0 %v16330_v62 }
 0x3fe   :  { %6296 = vmatmul.mubr.bf16.gmra.mrb[128].mxu1 %v16312_v48  ;;  %5546 = vmatprep.mubr.bf16.mxu0 %v16331_v4  ;;  %v16336_v48 = vld [vmem:[#allocation120_spill] sm:$0xff] }
 0x3ff   :  { %6305 = vmatprep.mubr.bf16.mxu1 %v16313_v5  ;;  %v16337_v5 = vld [vmem:[#allocation121_spill] sm:$0xff] }
 0x405   :  { %5547 = vmatmul.mubr.bf16.gmra.mrb[184].mxu0 %v16332_v25 }
 0x406   :  { %6306 = vmatmul.mubr.bf16.gmra.mrb[132].mxu1 %v16314_v60  ;;  %5556 = vmatprep.mubr.bf16.mxu0 %v16333_v47  ;;  %v16338_v60 = vld [vmem:[#allocation122_spill] sm:$0xff] }
 0x407   :  { %6315 = vmatprep.mubr.bf16.mxu1 %v16315_v20  ;;  %v16339_v20 = vld [vmem:[#allocation123_spill] sm:$0xff] }
 0x40d   :  { %5557 = vmatmul.mubr.bf16.gmra.mrb[188].mxu0 %v16334_v11 }
 0x40e   :  { %6316 = vmatmul.mubr.bf16.gmra.mrb[136].mxu1 %v16316_v53  ;;  %5566 = vmatprep.mubr.bf16.mxu0 %v16335_v38  ;;  %v16340_v53 = vld [vmem:[#allocation124_spill] sm:$0xff] }
 0x40f   :  { %6325 = vmatprep.mubr.bf16.mxu1 %v16317_v29  ;;  %v16341_v29 = vld [vmem:[#allocation125_spill] sm:$0xff] }
 0x415   :  { %5567 = vmatmul.mubr.bf16.gmra.mrb[192].mxu0 %v16336_v48 }
 0x416   :  { %6326 = vmatmul.mubr.bf16.gmra.mrb[140].mxu1 %v16318_v37  ;;  %5576 = vmatprep.mubr.bf16.mxu0 %v16337_v5  ;;  %v10235_v37 = vld [vmem:[%s15779_s6 + $0x8] sm:$0x1f] }
 0x417   :  { %6335 = vmatprep.mubr.bf16.mxu1 %v16319_v1  ;;  %v7002_v1 = vmul.f32 %v10235_v37, %v14592_v40  ;;  %v7022_v37 = vmul.f32 %v10246_v23, %v14611_v18 }
 0x419   :  { %v7032_v46 = vsel %vm6896_vm0, %v7002_v1, 0.0 }
 0x41d   :  { %5577 = vmatmul.mubr.bf16.gmra.mrb[196].mxu0 %v16338_v60 }
 0x41e   :  { %6336 = vmatmul.mubr.bf16.gmra.mrb[144].mxu1 %v16320_v7  ;;  %5586 = vmatprep.mubr.bf16.mxu0 %v16339_v20  ;;  %v10236_v7 = vld [vmem:[%s15779_s6 + $0x38] sm:$0x1f] }
 0x41f   :  { %6345 = vmatprep.mubr.bf16.mxu1 %v16321_v59  ;;  %v7008_v59 = vmul.f32 %v10236_v7, %v14595_v9 }
 0x421   :  { %v7074_v58 = vsel %vm6896_vm0, %v7008_v59, 0.0 }
 0x422   :  { %v7075_v16 = vrot.slane %v7074_v58, 4 }
 0x424   :  { %v7076_v31 = vadd.f32 %v7075_v16, %v7074_v58  ;;  %v7110_v58 = vrot.slane %v7109_v30, 4  ;;  %v7172_v16 = vsel %vm6896_vm0, %v7022_v37, 0.0 }
 0x425   :  { %5587 = vmatmul.mubr.bf16.gmra.mrb[200].mxu0 %v16340_v53 }
 0x426   :  { %6346 = vmatmul.mubr.bf16.gmra.mrb[148].mxu1 %v16322_v39  ;;  %5596 = vmatprep.mubr.bf16.mxu0 %v16341_v29  ;;  %v16343_v39 = vld [vmem:[#allocation127_spill] sm:$0xff]  ;;  %v7077_v59 = vrot.slane %v7076_v31, 2  ;;  %v7111_v17 = vadd.f32 %v7110_v58, %v7109_v30 }
 0x427   :  { %6355 = vmatprep.mubr.bf16.mxu1 %v16323_v55  ;;  %v10237_v55 = vld [vmem:[%s15779_s6 + $0x68] sm:$0x1f] }
 0x428   :  { %v7014_v22 = vmul.f32 %v10237_v55, %v14600_v45  ;;  %v7089_v55 = vrot.slane %v7088_v21, 4 }
 0x42a   :  { %v7116_v52 = vsel %vm6896_vm0, %v7014_v22, 0.0  ;;  %v7090_v56 = vadd.f32 %v7089_v55, %v7088_v21  ;;  %v16349_v21 = vld [vmem:[#allocation133_spill] sm:$0xff] }
 0x42b   :  { %v7117_v13 = vrot.slane %v7116_v52, 4 }
 0x42d   :  { %5597 = vmatmul.mubr.bf16.gmra.mrb[204].mxu0 %v16342_v49  ;;  %v7118_v36 = vadd.f32 %v7117_v13, %v7116_v52  ;;  %v7173_v13 = vrot.slane %v7172_v16, 4 }
 0x42e   :  { %6356 = vmatmul.mubr.bf16.gmra.mrb[152].mxu1 %v16324_v27  ;;  %5606 = vmatprep.mubr.bf16.mxu0 %v16343_v39  ;;  %v7033_v27 = vrot.slane %v7032_v46, 4 }
 0x42f   :  { %6365 = vmatprep.mubr.bf16.mxu1 %v16325_v32  ;;  %v7004_v32 = vmul.f32 %v10241_v51, %v14592_v40  ;;  %v7119_v57 = vrot.slane %v7118_v36, 2  ;;  %v7078_v51 = vadd.f32 %v7077_v59, %v7076_v31 }
 0x430   :  { %v7034_v19 = vadd.f32 %v7033_v27, %v7032_v46  ;;  %v7027_v46 = vadd.f32 %v7026_v35, %v7025_v2  ;;  %v7070_v2 = vrot.slane %v7069_v63, 2 }
 0x431   :  { %v7046_v34 = vsel %vm6896_vm0, %v7004_v32, 0.0  ;;  %v7120_v10 = vadd.f32 %v7119_v57, %v7118_v36 }
 0x432   :  { %v7047_v1 = vrot.slane %v7046_v34, 4  ;;  %v7035_v7 = vrot.slane %v7034_v19, 2  ;;  %v7028_v8 = vrot.slane %v7027_v46, 2  ;;  %v7071_v31 = vadd.f32 %v7070_v2, %v7069_v63 }
 0x433   :  { %v7121_v30 = vrot.slane %v7120_v10, 1 }
 0x434   :  { %v7036_v52 = vadd.f32 %v7035_v7, %v7034_v19  ;;  %v7048_v32 = vadd.f32 %v7047_v1, %v7046_v34  ;;  %v7029_v43 = vadd.f32 %v7028_v8, %v7027_v46  ;;  %v7174_v34 = vadd.f32 %v7173_v13, %v7172_v16  ;;  %v10247_v13 = vld [vmem:[%s15779_s6 + $0x10] sm:$0x1f] }
 0x435   :  { %5607 = vmatmul.mubr.bf16.gmra.mrb[208].mxu0 %v16344_v54  ;;  %v7072_v58 = vrot.slane %v7071_v31, 1 }
 0x436   :  { %6366 = vmatmul.mubr.bf16.gmra.mrb[156].mxu1 %v16326_v28  ;;  %5616 = vmatprep.mubr.bf16.mxu0 %v16345_v61  ;;  %v7016_v28 = vmul.f32 %v10244_v6, %v14600_v45  ;;  %v7037_v6 = vrot.slane %v7036_v52, 1  ;;  %v7049_v35 = vrot.slane %v7048_v32, 2  ;;  %v7030_v59 = vrot.slane %v7029_v43, 1 }
 0x437   :  { %6375 = vmatprep.mubr.bf16.mxu1 %v16327_v14  ;;  %v10245_v14 = vld [vmem:[%s15779_s6 + $0x90] sm:$0x1f] }
 0x438   :  { %v7019_v15 = vmul.f32 %v10245_v14, %v14611_v18  ;;  %v7130_v22 = vsel %vm6896_vm0, %v7016_v28, 0.0  ;;  %v7079_v28 = vrot.slane %v7078_v51, 1  ;;  %v7112_v14 = vrot.slane %v7111_v17, 2 }
 0x439   :  { %v7131_v27 = vrot.slane %v7130_v22, 4  ;;  %v7038_v23 = vadd.f32 %v7037_v6, %v7036_v52  ;;  %v7050_v1 = vadd.f32 %v7049_v35, %v7048_v32  ;;  %v7031_v8 = vadd.f32 %v7030_v59, %v7029_v43 }
 0x43a   :  { %v7151_v50 = vsel %vm6896_vm0, %v7019_v15, 0.0  ;;  %v7080_v37 = vadd.f32 %v7079_v28, %v7078_v51  ;;  %v7113_v55 = vadd.f32 %v7112_v14, %v7111_v17  ;;  %v7073_v51 = vadd.f32 %v7072_v58, %v7071_v31 }
 0x43b   :  { %v7152_v0 = vrot.slane %v7151_v50, 4  ;;  %v7132_v42 = vadd.f32 %v7131_v27, %v7130_v22  ;;  %v7194_v63 = vpack.c.bf16 %v7038_v23, %v7038_v23  ;;  %v7051_v27 = vrot.slane %v7050_v1, 1 }
 0x43c   :  { %v7200_v57 = vpack.c.bf16 %v7080_v37, %v7080_v37  ;;  %v7193_v14 = vpack.c.bf16 %v7031_v8, %v7031_v8  ;;  %v10248_v37 = vld [vmem:[%s15779_s6 + $0x40] sm:$0x1f]  ;;  %v10251_v8 = vld [vmem:[%s15779_s6 + $0x70] sm:$0x1f] }
 0x43d   :  { %5617 = vmatmul.mubr.bf16.gmra.mrb[212].mxu0 %v16346_v33  ;;  %v7153_v15 = vadd.f32 %v7152_v0, %v7151_v50  ;;  %v7133_v36 = vrot.slane %v7132_v42, 2  ;;  %v7175_v50 = vrot.slane %v7174_v34, 2  ;;  %v7052_v28 = vadd.f32 %v7051_v27, %v7050_v1  ;;  %v16353_v27 = vld [vmem:[#allocation138_spill] sm:$0xff] }
 0x43e   :  { %6376 = vmatmul.mubr.bf16.gmra.mrb[160].mxu1 %v16328_v12  ;;  %5626 = vmatprep.mubr.bf16.mxu0 %v16347_v26  ;;  %v7161_v12 = vrot.slane %v7160_v3, 2  ;;  %v7351_v6 = vunpack.c.l.b16 %v7200_v57  ;;  %v7009_v1 = vmul.f32 %v10248_v37, %v14595_v9  ;;  %v16354_v37 = vld [vmem:[#allocation139_spill] sm:$0xff] }
 0x43f   :  { %6385 = vmatprep.mubr.bf16.mxu1 %v16329_v41  ;;  %v7091_v41 = vrot.slane %v7090_v56, 2  ;;  %v7154_v22 = vrot.slane %v7153_v15, 2  ;;  %v7176_v32 = vadd.f32 %v7175_v50, %v7174_v34  ;;  %v16352_v50 = vld [vmem:[#allocation137_spill] sm:$0xff] }
 0x440   :  { %v7162_v19 = vadd.f32 %v7161_v12, %v7160_v3  ;;  %v7134_v3 = vadd.f32 %v7133_v36, %v7132_v42  ;;  %v16350_v12 = vld [vmem:[#allocation134_spill] sm:$0xff]  ;;  %v7345_v42 = vunpack.c.l.b16 %v7194_v63  ;;  %v7196_v36 = vpack.c.bf16 %v7052_v28, %v7052_v28  ;;  %v10253_v28 = vld [vmem:[%s15779_s6 + $0xa0] sm:$0x1f] }
 0x441   :  { %v7092_v7 = vadd.f32 %v7091_v41, %v7090_v56  ;;  %v7155_v0 = vadd.f32 %v7154_v22, %v7153_v15  ;;  %v16351_v56 = vld [vmem:[#allocation135_spill] sm:$0xff]  ;;  %v7199_v15 = vpack.c.bf16 %v7073_v51, %v7073_v51  ;;  %v10252_v51 = vld [vmem:[%s15779_s6 + $0x88] sm:$0x1f] }
 0x442   :  { %v7163_v46 = vrot.slane %v7162_v19, 1  ;;  %v7135_v2 = vrot.slane %v7134_v3, 1 }
 0x443   :  { %v7093_v16 = vrot.slane %v7092_v7, 1  ;;  %v7156_v41 = vrot.slane %v7155_v0, 1  ;;  %v7350_v63 = vunpack.c.l.b16 %v7199_v15 }
 0x444   :  { %v7164_v52 = vadd.f32 %v7163_v46, %v7162_v19  ;;  %v7177_v19 = vrot.slane %v7176_v32, 1  ;;  %v10250_v46 = vld [vmem:[%s15779_s6 + $0x58] sm:$0x1f] }
 0x445   :  { %5627 = vmatmul.mubr.bf16.gmra.mrb[216].mxu0 %v16348_v24  ;;  %v7094_v35 = vadd.f32 %v7093_v16, %v7092_v7  ;;  %v7157_v7 = vadd.f32 %v7156_v41, %v7155_v0  ;;  %v7012_v58 = vmul.f32 %v10250_v46, %v14595_v9  ;;  %v7015_v9 = vmul.f32 %v10251_v8, %v14600_v45 }
 0x446   :  { %6386 = vmatmul.mubr.bf16.gmra.mrb[164].mxu1 %v16330_v62  ;;  %5636 = vmatprep.mubr.bf16.mxu0 %v16349_v21  ;;  %v7122_v62 = vadd.f32 %v7121_v30, %v7120_v10  ;;  %v7003_v10 = vmul.f32 %v10247_v13, %v14592_v40  ;;  %v7212_v43 = vpack.c.bf16 %v7164_v52, %v7164_v52  ;;  %v7347_v0 = vunpack.c.l.b16 %v7196_v36 }
 0x447   :  { %6395 = vmatprep.mubr.bf16.mxu1 %v16331_v4  ;;  %v7114_v4 = vrot.slane %v7113_v55, 1  ;;  %v7374_v30 = vsel %vm7368_vm1, %v7351_v6, %v7345_v42  ;;  %v7202_v23 = vpack.c.bf16 %v7094_v35, %v7094_v35  ;;  %v7178_v57 = vadd.f32 %v7177_v19, %v7176_v32 }
 0x448   :  { %v7206_v17 = vpack.c.bf16 %v7122_v62, %v7122_v62  ;;  %v7039_v34 = vsel %vm6896_vm0, %v7003_v10, 0.0  ;;  %v7363_v62 = vunpack.c.l.b16 %v7212_v43  ;;  %v7081_v52 = vsel %vm6896_vm0, %v7009_v1, 0.0  ;;  %v10254_v43 = vld [vmem:[%s15779_s6 + $0xb8] sm:$0x1f] }
 0x449   :  { %v7211_v32 = vpack.c.bf16 %v7157_v7, %v7157_v7  ;;  %v7102_v13 = vsel %vm6896_vm0, %v7012_v58, 0.0  ;;  %v7214_v6 = vpack.c.bf16 %v7178_v57, %v7178_v57  ;;  %v7021_v35 = vmul.f32 %v10253_v28, %v14611_v18 }
 0x44a   :  { %v7357_v31 = vunpack.c.l.b16 %v7206_v17  ;;  %v7082_v41 = vrot.slane %v7081_v52, 4 }
 0x44b   :  { %v7362_v36 = vunpack.c.l.b16 %v7211_v32  ;;  %v7365_v1 = vunpack.c.l.b16 %v7214_v6  ;;  %v10179_v6 = vld [vmem:[%s15781_s8 + $0xd0] sm:$0xff]  }
 0x44d   :  { %5637 = vmatmul.mubr.bf16.gmra.mrb[220].mxu0 %v16350_v12 }
 0x44e   :  { %6396 = vmatmul.mubr.bf16.gmra.mrb[168].mxu1 %v16332_v25  ;;  %5646 = vmatprep.mubr.bf16.mxu0 %v16351_v56  ;;  %v7115_v25 = vadd.f32 %v7114_v4, %v7113_v55  ;;  %v10249_v55 = vld [vmem:[%s15779_s6 + $0x28] sm:$0x1f]  ;;  %v7040_v4 = vrot.slane %v7039_v34, 4 }
 0x44f   :  { %6405 = vmatprep.mubr.bf16.mxu1 %v16333_v47  ;;  %v7136_v47 = vadd.f32 %v7135_v2, %v7134_v3  ;;  %v7006_v22 = vmul.f32 %v10249_v55, %v14592_v40  ;;  %v7344_v3 = vunpack.c.l.b16 %v7193_v14  ;;  %v7375_v40 = vsel %vm7370_vm2, %v7357_v31, %v7374_v30 }
 0x450   :  { %v7205_v59 = vpack.c.bf16 %v7115_v25, %v7115_v25  ;;  %v7376_v10 = vsel %vm7372_vm3, %v7363_v62, %v7375_v40  ;;  %v7024_v14 = vmul.f32 %v10254_v43, %v14611_v18  ;;  %v7103_v31 = vrot.slane %v7102_v13, 4 }
 0x451   :  { %v7208_v16 = vpack.c.bf16 %v7136_v47, %v7136_v47  ;;  %v7060_v2 = vsel %vm6896_vm0, %v7006_v22, 0.0  ;;  %v7369_v42 = vsel %vm7368_vm1, %v7350_v63, %v7344_v3  ;;  %v7390_v30 = vpack.c.b16 %v7376_v10, %v7376_v10 }
 0x452   :  { %v7356_v17 = vunpack.c.l.b16 %v7205_v59  ;;  %v7061_v19 = vrot.slane %v7060_v2, 4  ;;  %v7041_v7 = vadd.f32 %v7040_v4, %v7039_v34  ;;  %v7165_v55 = vsel %vm6896_vm0, %v7021_v35, 0.0 }
 0x453   :  { %v7359_v25 = vunpack.c.l.b16 %v7208_v16  ;;  %v7083_v22 = vadd.f32 %v7082_v41, %v7081_v52  ;;  %v7186_v58 = vsel %vm6896_vm0, %v7024_v14, 0.0  ;;  %v7104_v3 = vadd.f32 %v7103_v31, %v7102_v13  ;;  %v10176_v16 = vld [vmem:[%s15781_s8 + $0x80] sm:$0xff]  }
 0x454   :  { %v7062_v62 = vadd.f32 %v7061_v19, %v7060_v2  ;;  %v7166_v57 = vrot.slane %v7165_v55, 4  ;;  %v7187_v40 = vrot.slane %v7186_v58, 4  ;;  %v10178_v2 = vld [vmem:[%s15781_s8 + $0x88] sm:$0xff]  }
 0x455   :  { %5647 = vmatmul.mubr.bf16.gmra.mrb[224].mxu0 %v16352_v50  ;;  %v7084_v8 = vrot.slane %v7083_v22, 2  ;;  %v7105_v52 = vrot.slane %v7104_v3, 2 }
 0x456   :  { %6406 = vmatmul.mubr.bf16.gmra.mrb[172].mxu1 %v16334_v11  ;;  %5656 = vmatprep.mubr.bf16.mxu0 %v16353_v27  ;;  %v7353_v11 = vunpack.c.l.b16 %v7202_v23  ;;  %v7371_v23 = vsel %vm7370_vm2, %v7356_v17, %v7369_v42  ;;  %v7188_v17 = vadd.f32 %v7187_v40, %v7186_v58  ;;  %v10183_v58 = vld [vmem:[%s15781_s8 + $0xe0] sm:$0xff]  }
 0x457   :  { %6415 = vmatprep.mubr.bf16.mxu1 %v16335_v38  ;;  %v7018_v38 = vmul.f32 %v10252_v51, %v14600_v45  ;;  %v7123_v45 = vsel %vm6896_vm0, %v7015_v9, 0.0  ;;  %v7373_v63 = vsel %vm7372_vm3, %v7362_v36, %v7371_v23  ;;  %v7085_v10 = vadd.f32 %v7084_v8, %v7083_v22  ;;  %v16355_v36 = vld [vmem:[#allocation47_spill] sm:$0xff] }
 0x458   :  { %v7380_v15 = vsel %vm7368_vm1, %v7353_v11, %v7347_v0  ;;  %v7124_v59 = vrot.slane %v7123_v45, 4  ;;  %v7389_v4 = vpack.c.b16 %v7373_v63, %v7373_v63  ;;  %v10177_v0 = vld [vmem:[%s15781_s8 + $0xc8] sm:$0xff]   ;;  %v7063_v11 = vrot.slane %v7062_v62, 2  ;;  %v10184_v8 = vld [vmem:[%s15781_s8 + $0xa0] sm:$0xff]  }
 0x459   :  { %v7144_v47 = vsel %vm6896_vm0, %v7018_v38, 0.0  ;;  %v7381_v18 = vsel %vm7370_vm2, %v7359_v25, %v7380_v15  ;;  %v7167_v38 = vadd.f32 %v7166_v57, %v7165_v55  ;;  %v7106_v28 = vadd.f32 %v7105_v52, %v7104_v3 }
 0x45a   :  { %v7145_v46 = vrot.slane %v7144_v47, 4  ;;  %v7125_v34 = vadd.f32 %v7124_v59, %v7123_v45  ;;  %v7189_v41 = vrot.slane %v7188_v17, 2  ;;  %v10180_v45 = vld [vmem:[%s15781_s8 + $0x90] sm:$0xff]   ;;  %v7086_v14 = vrot.slane %v7085_v10, 1 }
 0x45b   :  { %v7168_v35 = vrot.slane %v7167_v38, 2  ;;  %v7107_v31 = vrot.slane %v7106_v28, 1  ;;  %v16356_v59 = vld [vmem:[#allocation49_spill] sm:$0xff] }
 0x45c   :  { %v7146_v9 = vadd.f32 %v7145_v46, %v7144_v47  ;;  %v7126_v32 = vrot.slane %v7125_v34, 2  ;;  %v7087_v22 = vadd.f32 %v7086_v14, %v7085_v10 }
 0x45d   :  { %5657 = vmatmul.mubr.bf16.gmra.mrb[228].mxu0 %v16354_v37  ;;  %v7169_v47 = vadd.f32 %v7168_v35, %v7167_v38  ;;  %v7108_v3 = vadd.f32 %v7107_v31, %v7106_v28  ;;  %v10188_v31 = vld [vmem:[%s15781_s8 + $0xb0] sm:$0xff]  }
 0x45e   :  { %6416 = vmatmul.mubr.bf16.gmra.mrb[176].mxu1 %v16336_v48  ;;  %7721 = vmatprep.mubr.bf16.mxu0 %v7390_v30  ;;  %v7382_v48 = vsel %vm7372_vm3, %v7365_v1, %v7381_v18  ;;  %v7147_v42 = vrot.slane %v7146_v9, 2  ;;  %v7127_v25 = vadd.f32 %v7126_v32, %v7125_v34  ;;  %v14831_v30 = vld [vmem:[%s15778_s5] sm:$0x3f] }
 0x45f   :  { %6425 = vmatprep.mubr.bf16.mxu1 %v16337_v5  ;;  %v7042_v5 = vrot.slane %v7041_v7, 2  ;;  %v7392_v51 = vpack.c.b16 %v7382_v48, %v7382_v48  ;;  %v14835_v23 = vrot.slane %v14831_v30, %v16355_v36  ;;  %v14839_v55 = vrot.slane %v14831_v30, %v16356_v59  ;;  %v10189_v59 = vld [vmem:[%s15781_s8 + $0xf8] sm:$0xff]  }
 0x460   :  { %v7148_v15 = vadd.f32 %v7147_v42, %v7146_v9  ;;  %v7128_v1 = vrot.slane %v7127_v25, 1  ;;  %v7170_v57 = vrot.slane %v7169_v47, 1  ;;  %v7204_v32 = vpack.c.bf16 %v7108_v3, %v7108_v3  ;;  %v10186_v42 = vld [vmem:[%s15781_s8 + $0xa8] sm:$0xff]  }
 0x461   :  { %v7043_v13 = vadd.f32 %v7042_v5, %v7041_v7  ;;  %v7190_v7 = vadd.f32 %v7189_v41, %v7188_v17 }
 0x462   :  { %v7149_v46 = vrot.slane %v7148_v15, 1  ;;  %v7129_v40 = vadd.f32 %v7128_v1, %v7127_v25  ;;  %v7355_v25 = vunpack.c.l.b16 %v7204_v32 }
 0x463   :  { %v7044_v43 = vrot.slane %v7043_v13, 1 }
 0x465   :  { %7722 = vmatmul.mubr.bf16.vlgmr.msra.gmra.mrb[232].mxu0 %v7389_v4  ;;  %v7045_v18 = vadd.f32 %v7044_v43, %v7043_v13  ;;  %v7201_v4 = vpack.c.bf16 %v7087_v22, %v7087_v22  ;;  %v7207_v13 = vpack.c.bf16 %v7129_v40, %v7129_v40 }
 0x466   :  { %6426 = vmatmul.mubr.bf16.gmra.mrb[180].mxu1 %v16338_v60  ;;  %8396 = vmatpush3.bf16.msra.mxu0 %v10176_v16  ;;  %v7064_v60 = vadd.f32 %v7063_v11, %v7062_v62  ;;  %v7191_v16 = vrot.slane %v7190_v7, 1 }
 0x467   :  { %7761 = vmatprep.mubr.bf16.mxu0 %v7392_v51  ;;  %8397 = vmatprep.subr.bf16.mxu0 %v10177_v0  ;;  %v7195_v9 = vpack.c.bf16 %v7045_v18, %v7045_v18  ;;  %v7150_v0 = vadd.f32 %v7149_v46, %v7148_v15  ;;  %v10185_v51 = vld [vmem:[%s15781_s8 + $0xe8] sm:$0xff]   ;;  %v7358_v15 = vunpack.c.l.b16 %v7207_v13  ;;  %v10196_v13 = vld [vmem:[%s15781_s8 + $0x110] sm:$0xff]  }
 0x468   :  { %6435 = vmatprep.mubr.bf16.mxu1 %v16339_v20  ;;  %v10181_v20 = vld [vmem:[%s15781_s8 + $0xd8] sm:$0xff]   ;;  %v7065_v19 = vrot.slane %v7064_v60, 1  ;;  %v7192_v10 = vadd.f32 %v7191_v16, %v7190_v7 }
 0x469   :  { %v7210_v28 = vpack.c.bf16 %v7150_v0, %v7150_v0 }
 0x46a   :  { %8398 = vmatpush3.bf16.msra.mxu0 %v10178_v2  ;;  %v7066_v62 = vadd.f32 %v7065_v19, %v7064_v60  ;;  %v7171_v2 = vadd.f32 %v7170_v57, %v7169_v47  ;;  %v7352_v60 = vunpack.c.l.b16 %v7201_v4  ;;  %v10193_v4 = vld [vmem:[%s15781_s8 + $0x148] sm:$0xff]  }
 0x46b   :  { %8399 = vmatprep.subr.bf16.mxu0 %v10179_v6  ;;  %v7346_v6 = vunpack.c.l.b16 %v7195_v9  ;;  %v7361_v36 = vunpack.c.l.b16 %v7210_v28  ;;  %v10199_v28 = vld [vmem:[%s15781_s8 + $0x160] sm:$0xff]  }
 0x46c   :  { %v7198_v38 = vpack.c.bf16 %v7066_v62, %v7066_v62  ;;  %v10190_v62 = vld [vmem:[%s15781_s8 + $0xb8] sm:$0xff]  }
 0x46d   :  { %v7377_v47 = vsel %vm7368_vm1, %v7352_v60, %v7346_v6  ;;  %v10198_v60 = vld [vmem:[%s15781_s8 + $0x118] sm:$0xff]  }
 0x46e   :  { %6436 = vmatmul.mubr.bf16.gmra.mrb[184].mxu1 %v16340_v53  ;;  %8400 = vmatpush3.bf16.msra.mxu0 %v10180_v45  ;;  %v10182_v53 = vld [vmem:[%s15781_s8 + $0x98] sm:$0xff]   ;;  %v7349_v35 = vunpack.c.l.b16 %v7198_v38  ;;  %v7213_v45 = vpack.c.bf16 %v7171_v2, %v7171_v2  ;;  %v7378_v46 = vsel %vm7370_vm2, %v7358_v15, %v7377_v47 }
 0x46f   :  { %6445 = vmatprep.mubr.bf16.mxu1 %v16341_v29  ;;  %8401 = vmatprep.subr.bf16.mxu0 %v10181_v20  ;;  %v7216_v20 = vpack.c.bf16 %v7192_v10, %v7192_v10 }
 0x470   :  { %v5418_v63 = vpop.f32.mrb[132].mxu0  ;;  %v7364_v22 = vunpack.c.l.b16 %v7213_v45  ;;  %v10200_v45 = vld [vmem:[%s15781_s8 + $0x120] sm:$0xff]  }
 0x471   :  { %v8687_v48 = vadd.f32 %v5418_v63, %v14835_v23  ;;  %v5420_v34 = vpop.f32.mrb[133].mxu0 }
 0x472   :  { %v8688_v5 = vadd.f32 %v5420_v34, %v14839_v55  ;;  %8402 = vmatpush3.bf16.msra.mxu0 %v10182_v53  ;;  %v5422_v29 = vpop.f32.mrb[134].mxu0  ;;  %v7386_v53 = vsel %vm7368_vm1, %v7355_v25, %v7349_v35  ;;  %v7379_v57 = vsel %vm7372_vm3, %v7364_v22, %v7378_v46 }
 0x473   :  { %6518 = vst [vmem:[%s15784_s11 + $0x10] sm:$0xff] %v8687_v48  ;;  %v8689_v11 = vadd.f32 %v5422_v29, %v14835_v23  ;;  %v5424_v52 = vpop.f32.mrb[135].mxu0  ;;  %8403 = vmatprep.subr.bf16.mxu0 %v10183_v58  ;;  %v7367_v58 = vunpack.c.l.b16 %v7216_v20  ;;  %v7387_v3 = vsel %vm7370_vm2, %v7361_v36, %v7386_v53  ;;  %v7391_v9 = vpack.c.b16 %v7379_v57, %v7379_v57  ;;  %v10202_v20 = vld [vmem:[%s15781_s8 + $0x128] sm:$0xff]  }
 0x474   :  { %6519 = vst [vmem:[%s15784_s11 + $0x18] sm:$0xff] %v8688_v5  ;;  %v8690_v17 = vadd.f32 %v5424_v52, %v14839_v55  ;;  %v10194_v52 = vld [vmem:[%s15781_s8 + $0x108] sm:$0xff]  }
 0x475   :  { %6524 = vst [vmem:[%s15784_s11 + $0x40] sm:$0xff] %v8689_v11  ;;  %v7388_v40 = vsel %vm7372_vm3, %v7367_v58, %v7387_v3 }
 0x476   :  { %6446 = vmatmul.mubr.bf16.gmra.mrb[188].mxu1 %v16342_v49  ;;  %6525 = vst [vmem:[%s15784_s11 + $0x48] sm:$0xff] %v8690_v17  ;;  %8404 = vmatpush3.bf16.msra.mxu0 %v10184_v8  ;;  %v10187_v49 = vld [vmem:[%s15781_s8 + $0xf0] sm:$0xff]   ;;  %v7394_v11 = vpack.c.b16 %v7388_v40, %v7388_v40 }
 0x477   :  { %6455 = vmatprep.mubr.bf16.mxu1 %v16343_v39  ;;  %8405 = vmatprep.subr.bf16.mxu0 %v10185_v51  ;;  %v10195_v51 = vld [vmem:[%s15781_s8 + $0x150] sm:$0xff]  }
 0x478   :  { %v5428_v41 = vpop.f32.mrb[136].mxu0 }
 0x479   :  { %v8691_v43 = vadd.f32 %v5428_v41, %v14835_v23  ;;  %v5430_v14 = vpop.f32.mrb[137].mxu0 }
 0x47a   :  { %v8692_v19 = vadd.f32 %v5430_v14, %v14839_v55  ;;  %8406 = vmatpush3.bf16.msra.mxu0 %v10186_v42  ;;  %v5432_v39 = vpop.f32.mrb[138].mxu0  ;;  %v10197_v42 = vld [vmem:[%s15781_s8 + $0x158] sm:$0xff]   ;;  %v10201_v14 = vld [vmem:[%s15781_s8 + $0x168] sm:$0xff]  }
 0x47b   :  { %6530 = vst [vmem:[%s15784_s11 + $0x70] sm:$0xff] %v8691_v43  ;;  %v8693_v1 = vadd.f32 %v5432_v39, %v14835_v23  ;;  %v5434_v7 = vpop.f32.mrb[139].mxu0  ;;  %8407 = vmatprep.subr.bf16.mxu0 %v10187_v49 }
 0x47c   :  { %6531 = vst [vmem:[%s15784_s11 + $0x78] sm:$0xff] %v8692_v19  ;;  %v8694_v18 = vadd.f32 %v5434_v7, %v14839_v55  ;;  %v10203_v19 = vld [vmem:[%s15781_s8 + $0x170] sm:$0xff]  }
 0x47d   :  { %6536 = vst [vmem:[%s15784_s11 + $0xa0] sm:$0xff] %v8693_v1  ;;  %v10204_v1 = vld [vmem:[%s15781_s8 + $0x130] sm:$0xff]  }
 0x47e   :  { %6456 = vmatmul.mubr.bf16.gmra.mrb[192].mxu1 %v16344_v54  ;;  %6537 = vst [vmem:[%s15784_s11 + $0xa8] sm:$0xff] %v8694_v18  ;;  %8408 = vmatpush3.bf16.msra.mxu0 %v10188_v31  ;;  %v10191_v54 = vld [vmem:[%s15781_s8 + $0x140] sm:$0xff]   ;;  %v10206_v18 = vld [vmem:[%s15781_s8 + $0x138] sm:$0xff]  }
 0x47f   :  { %6465 = vmatprep.mubr.bf16.mxu1 %v16345_v61  ;;  %8409 = vmatprep.subr.bf16.mxu0 %v10189_v59  ;;  %v10192_v61 = vld [vmem:[%s15781_s8 + $0x100] sm:$0xff]   ;;  %v10205_v59 = vld [vmem:[%s15781_s8 + $0x178] sm:$0xff]   ;;  %s10304_s8 = smov [#allocation2]  }
 0x480   :  { %v5438_v63 = vpop.f32.mrb[140].mxu0  ;;  %s7815_s27 = sshll.u32 %s10304_s8, 4  ;;  %s7816_s27 = int_to_ptr.vmem [resolvable:$true] %s7815_s27 }
 0x481   :  { %v8695_v48 = vadd.f32 %v5438_v63, %v14835_v23  ;;  %v5440_v34 = vpop.f32.mrb[141].mxu0  ;;  %v7393_v63 = vpack.c.b16 %v14641_v44, %v14641_v44  ;;  %s10256_s14 = scalar_lea.vmem %s7816_s27, 6144  ;;  %p10261_p1 = scmp.lt.s32.totalorder %s7816_s27, %s7816_s27 }
 0x482   :  { %v8696_v16 = vadd.f32 %v5440_v34, %v14839_v55  ;;  %8410 = vmatpush3.bf16.msra.mxu0 %v10190_v62  ;;  %v5442_v5 = vpop.f32.mrb[142].mxu0  ;;  %p10257_p0 = scmp.ne.s32.totalorder %s7816_s27, %s10256_s14  ;;  %p10262_p2 = scmp.lt.s32.totalorder %s10256_s14, %s10256_s14 }
 0x483   :  { %6542 = vst [vmem:[%s15784_s11 + $0xd0] sm:$0xff] %v8695_v48  ;;  %v8697_v29 = vadd.f32 %v5442_v5, %v14835_v23  ;;  %v5444_v8 = vpop.f32.mrb[143].mxu0  ;;  %8417 = vmatprep.subr.bf16.mxu0 %v10191_v54 }
 0x484   :  { %6543 = vst [vmem:[%s15784_s11 + $0xd8] sm:$0xff] %v8696_v16  ;;  %v8698_v0 = vadd.f32 %v5444_v8, %v14839_v55  ;;  %p10263_p3 = por %p10262_p2, %p10261_p1 }
 0x485   :  { %6548 = vst [vmem:[%s15784_s11 + $0x100] sm:$0xff] %v8697_v29  ;;  %7762 = vmatmul.mubr.bf16.vlgmr.msra.gmra.mrb[236].mxu0 %v7391_v9 }
 0x486   :  { %6466 = vmatmul.mubr.bf16.gmra.mrb[196].mxu1 %v16346_v33  ;;  %6549 = vst [vmem:[%s15784_s11 + $0x108] sm:$0xff] %v8698_v0  ;;  %8418 = vmatpush3.bf16.msra.mxu0 %v10192_v61  ;;  %p10264_p4 = pnand %p10263_p3, %p10257_p0 }
 0x487   :  { %7801 = vmatprep.mubr.bf16.mxu0 %v7394_v11  ;;  %8419 = vmatprep.subr.bf16.mxu0 %v10193_v4 }
 0x488   :  { %6475 = vmatprep.mubr.bf16.mxu1 %v16347_v26  ;;  %v5448_v38 = vpop.f32.mrb[144].mxu0 }
 0x489   :  { %v8699_v33 = vadd.f32 %v5448_v38, %v14835_v23  ;;  %v5450_v32 = vpop.f32.mrb[145].mxu0 }
 0x48a   :  { %v8700_v17 = vadd.f32 %v5450_v32, %v14839_v55  ;;  %8420 = vmatpush3.bf16.msra.mxu0 %v10194_v52  ;;  %v5452_v2 = vpop.f32.mrb[146].mxu0 }
 0x48b   :  { %6554 = vst [vmem:[%s15784_s11 + $0x130] sm:$0xff] %v8699_v33  ;;  %v8701_v26 = vadd.f32 %v5452_v2, %v14835_v23  ;;  %v5454_v10 = vpop.f32.mrb[147].mxu0  ;;  %8421 = vmatprep.subr.bf16.mxu0 %v10195_v51  ;;  %v16357_v51 = vld [vmem:[#allocation95_spill] sm:$0xff]  ;;  %v16358_v33 = vld [vmem:[#allocation96_spill] sm:$0xff] }
 0x48c   :  { %6555 = vst [vmem:[%s15784_s11 + $0x138] sm:$0xff] %v8700_v17  ;;  %v8702_v6 = vadd.f32 %v5454_v10, %v14839_v55  ;;  %v15081_v38 = vrot.slane %v14831_v30, %v16357_v51  ;;  %v15088_v32 = vrot.slane %v14831_v30, %v16358_v33 }
 0x48d   :  { %6560 = vst [vmem:[%s15784_s11 + $0x160] sm:$0xff] %v8701_v26 }
 0x48e   :  { %6476 = vmatmul.mubr.bf16.gmra.mrb[200].mxu1 %v16348_v24  ;;  %6561 = vst [vmem:[%s15784_s11 + $0x168] sm:$0xff] %v8702_v6  ;;  %8422 = vmatpush3.bf16.msra.mxu0 %v10196_v13 }
 0x48f   :  { %6485 = vmatprep.mubr.bf16.mxu1 %v16349_v21  ;;  %8423 = vmatprep.subr.bf16.mxu0 %v10197_v42 }
 0x490   :  { %v5458_v49 = vpop.f32.mrb[148].mxu0 }
 0x491   :  { %v8703_v35 = vadd.f32 %v5458_v49, %v14835_v23  ;;  %v5460_v24 = vpop.f32.mrb[149].mxu0 }
 0x492   :  { %v8704_v25 = vadd.f32 %v5460_v24, %v14839_v55  ;;  %8424 = vmatpush3.bf16.msra.mxu0 %v10198_v60  ;;  %v5462_v41 = vpop.f32.mrb[150].mxu0 }
 0x493   :  { %6566 = vst [vmem:[%s15784_s11 + $0x190] sm:$0xff] %v8703_v35  ;;  %v8705_v21 = vadd.f32 %v5462_v41, %v14835_v23  ;;  %v5464_v43 = vpop.f32.mrb[151].mxu0  ;;  %8425 = vmatprep.subr.bf16.mxu0 %v10199_v28 }
 0x494   :  { %6567 = vst [vmem:[%s15784_s11 + $0x198] sm:$0xff] %v8704_v25  ;;  %v8706_v15 = vadd.f32 %v5464_v43, %v14839_v55 }
 0x495   :  { %6572 = vst [vmem:[%s15784_s11 + $0x1c0] sm:$0xff] %v8705_v21 }
 0x496   :  { %6486 = vmatmul.mubr.bf16.gmra.mrb[204].mxu1 %v16350_v12  ;;  %6573 = vst [vmem:[%s15784_s11 + $0x1c8] sm:$0xff] %v8706_v15  ;;  %8426 = vmatpush3.bf16.msra.mxu0 %v10200_v45 }
 0x497   :  { %6495 = vmatprep.mubr.bf16.mxu1 %v16351_v56  ;;  %8427 = vmatprep.subr.bf16.mxu0 %v10201_v14 }
 0x498   :  { %v5468_v39 = vpop.f32.mrb[152].mxu0 }
 0x499   :  { %v8707_v31 = vadd.f32 %v5468_v39, %v14835_v23  ;;  %v5470_v12 = vpop.f32.mrb[153].mxu0 }
 0x49a   :  { %v8708_v47 = vadd.f32 %v5470_v12, %v14839_v55  ;;  %8428 = vmatpush3.bf16.msra.mxu0 %v10202_v20  ;;  %v5472_v36 = vpop.f32.mrb[154].mxu0 }
 0x49b   :  { %6578 = vst [vmem:[%s15784_s11 + $0x1f0] sm:$0xff] %v8707_v31  ;;  %v8709_v56 = vadd.f32 %v5472_v36, %v14835_v23  ;;  %v5474_v7 = vpop.f32.mrb[155].mxu0  ;;  %8429 = vmatprep.subr.bf16.mxu0 %v10203_v19 }
 0x49c   :  { %6579 = vst [vmem:[%s15784_s11 + $0x1f8] sm:$0xff] %v8708_v47  ;;  %v8710_v53 = vadd.f32 %v5474_v7, %v14839_v55 }
 0x49d   :  { %6584 = vst [vmem:[%s15784_s11 + $0x220] sm:$0xff] %v8709_v56 }
 0x49e   :  { %6496 = vmatmul.mubr.bf16.gmra.mrb[208].mxu1 %v16352_v50  ;;  %6585 = vst [vmem:[%s15784_s11 + $0x228] sm:$0xff] %v8710_v53  ;;  %8430 = vmatpush3.bf16.msra.mxu0 %v10204_v1 }
 0x49f   :  { %6505 = vmatprep.mubr.bf16.mxu1 %v16353_v27  ;;  %8431 = vmatprep.subr.bf16.mxu0 %v10205_v59 }
 0x4a0   :  { %v5478_v22 = vpop.f32.mrb[156].mxu0 }
 0x4a1   :  { %v8711_v46 = vadd.f32 %v5478_v22, %v14835_v23  ;;  %v5480_v58 = vpop.f32.mrb[157].mxu0 }
 0x4a2   :  { %v8712_v62 = vadd.f32 %v5480_v58, %v14839_v55  ;;  %8432 = vmatpush3.bf16.msra.mxu0 %v10206_v18  ;;  %v5482_v50 = vpop.f32.mrb[158].mxu0 }
 0x4a3   :  { %6590 = vst [vmem:[%s15784_s11 + $0x250] sm:$0xff] %v8711_v46  ;;  %v8713_v3 = vadd.f32 %v5482_v50, %v14835_v23  ;;  %v5484_v54 = vpop.f32.mrb[159].mxu0 }
 0x4a4   :  { %6591 = vst [vmem:[%s15784_s11 + $0x258] sm:$0xff] %v8712_v62  ;;  %v8714_v27 = vadd.f32 %v5484_v54, %v14839_v55 }
 0x4a5   :  { %6596 = vst [vmem:[%s15784_s11 + $0x280] sm:$0xff] %v8713_v3  ;;  %7802 = vmatmul.mubr.bf16.vlgmr.msra.gmra.mrb[240].mxu0 %v7393_v63 }
 0x4a6   :  { %6506 = vmatmul.mubr.bf16.gmra.mrb[212].mxu1 %v16354_v37  ;;  %6597 = vst [vmem:[%s15784_s11 + $0x288] sm:$0xff] %v8714_v27 }
 0x4a8   :  { %v5488_v57 = vpop.f32.mrb[160].mxu0 }
 0x4a9   :  { %v8715_v44 = vadd.f32 %v5488_v57, %v14835_v23  ;;  %v5490_v48 = vpop.f32.mrb[161].mxu0 }
 0x4aa   :  { %v8716_v34 = vadd.f32 %v5490_v48, %v14839_v55  ;;  %v5492_v40 = vpop.f32.mrb[162].mxu0 }
 0x4ab   :  { %6602 = vst [vmem:[%s15784_s11 + $0x2b0] sm:$0xff] %v8715_v44  ;;  %v8717_v16 = vadd.f32 %v5492_v40, %v14835_v23  ;;  %v5494_v5 = vpop.f32.mrb[163].mxu0 }
 0x4ac   :  { %6603 = vst [vmem:[%s15784_s11 + $0x2b8] sm:$0xff] %v8716_v34  ;;  %v8718_v37 = vadd.f32 %v5494_v5, %v14839_v55 }
 0x4ad   :  { %6608 = vst [vmem:[%s15784_s11 + $0x2e0] sm:$0xff] %v8717_v16 }
 0x4ae   :  { %6609 = vst [vmem:[%s15784_s11 + $0x2e8] sm:$0xff] %v8718_v37 }
 0x4b0   :  { %v5498_v61 = vpop.f32.mrb[164].mxu0 }
 0x4b1   :  { %v8719_v29 = vadd.f32 %v5498_v61, %v14835_v23  ;;  %v5500_v8 = vpop.f32.mrb[165].mxu0 }
 0x4b2   :  { %v8720_v9 = vadd.f32 %v5500_v8, %v14839_v55  ;;  %v5502_v4 = vpop.f32.mrb[166].mxu0 }
 0x4b3   :  { %6614 = vst [vmem:[%s15784_s11 + $0x310] sm:$0xff] %v8719_v29  ;;  %v8721_v0 = vadd.f32 %v5502_v4, %v14835_v23  ;;  %v5504_v11 = vpop.f32.mrb[167].mxu0 }
 0x4b4   :  { %6615 = vst [vmem:[%s15784_s11 + $0x318] sm:$0xff] %v8720_v9  ;;  %v8722_v52 = vadd.f32 %v5504_v11, %v14839_v55 }
 0x4b5   :  { %6620 = vst [vmem:[%s15784_s11 + $0x340] sm:$0xff] %v8721_v0 }
 0x4b6   :  { %6621 = vst [vmem:[%s15784_s11 + $0x348] sm:$0xff] %v8722_v52 }
 0x4b8   :  { %v5508_v17 = vpop.f32.mrb[168].mxu0 }
 0x4b9   :  { %v6267_v2 = vpop.f32.mrb[116].mxu1  ;;  %v8723_v13 = vadd.f32 %v5508_v17, %v14835_v23  ;;  %v5510_v10 = vpop.f32.mrb[169].mxu0 }
 0x4ba   :  { %v8787_v26 = vadd.f32 %v6267_v2, %v15081_v38  ;;  %v6269_v42 = vpop.f32.mrb[117].mxu1  ;;  %v8724_v6 = vadd.f32 %v5510_v10, %v14839_v55  ;;  %v5512_v28 = vpop.f32.mrb[170].mxu0 }
 0x4bb   :  { %v8788_v60 = vadd.f32 %v6269_v42, %v15088_v32  ;;  %v6271_v49 = vpop.f32.mrb[118].mxu1  ;;  %6626 = vst [vmem:[%s15784_s11 + $0x370] sm:$0xff] %v8723_v13  ;;  %v8725_v30 = vadd.f32 %v5512_v28, %v14835_v23  ;;  %v5514_v24 = vpop.f32.mrb[171].mxu0 }
 0x4bc   :  { %6520 = vst [vmem:[%s15784_s11 + $0x20] sm:$0xff] %v8787_v26  ;;  %v8789_v35 = vadd.f32 %v6271_v49, %v15081_v38  ;;  %v6273_v25 = vpop.f32.mrb[119].mxu1  ;;  %6627 = vst [vmem:[%s15784_s11 + $0x378] sm:$0xff] %v8724_v6  ;;  %v8726_v41 = vadd.f32 %v5514_v24, %v14839_v55 }
 0x4bd   :  { %6521 = vst [vmem:[%s15784_s11 + $0x28] sm:$0xff] %v8788_v60  ;;  %v8790_v45 = vadd.f32 %v6273_v25, %v15088_v32  ;;  %6632 = vst [vmem:[%s15784_s11 + $0x3a0] sm:$0xff] %v8725_v30 }
 0x4be   :  { %6526 = vst [vmem:[%s15784_s11 + $0x50] sm:$0xff] %v8789_v35  ;;  %6633 = vst [vmem:[%s15784_s11 + $0x3a8] sm:$0xff] %v8726_v41 }
 0x4bf   :  { %6527 = vst [vmem:[%s15784_s11 + $0x58] sm:$0xff] %v8790_v45 }
 0x4c0   :  { %v5518_v21 = vpop.f32.mrb[172].mxu0 }
 0x4c1   :  { %v6277_v43 = vpop.f32.mrb[120].mxu1  ;;  %v8727_v14 = vadd.f32 %v5518_v21, %v14835_v23  ;;  %v5520_v20 = vpop.f32.mrb[173].mxu0 }
 0x4c2   :  { %v8791_v15 = vadd.f32 %v6277_v43, %v15081_v38  ;;  %v6279_v19 = vpop.f32.mrb[121].mxu1  ;;  %v8728_v39 = vadd.f32 %v5520_v20, %v14839_v55  ;;  %v5522_v12 = vpop.f32.mrb[174].mxu0 }
 0x4c3   :  { %v8792_v31 = vadd.f32 %v6279_v19, %v15088_v32  ;;  %v6281_v47 = vpop.f32.mrb[122].mxu1  ;;  %6638 = vst [vmem:[%s15784_s11 + $0x3d0] sm:$0xff] %v8727_v14  ;;  %v8729_v36 = vadd.f32 %v5522_v12, %v14835_v23  ;;  %v5524_v56 = vpop.f32.mrb[175].mxu0 }
 0x4c4   :  { %6532 = vst [vmem:[%s15784_s11 + $0x80] sm:$0xff] %v8791_v15  ;;  %v8793_v1 = vadd.f32 %v6281_v47, %v15081_v38  ;;  %v6283_v7 = vpop.f32.mrb[123].mxu1  ;;  %6639 = vst [vmem:[%s15784_s11 + $0x3d8] sm:$0xff] %v8728_v39  ;;  %v8730_v59 = vadd.f32 %v5524_v56, %v14839_v55 }
 0x4c5   :  { %6533 = vst [vmem:[%s15784_s11 + $0x88] sm:$0xff] %v8792_v31  ;;  %v8794_v53 = vadd.f32 %v6283_v7, %v15088_v32  ;;  %6644 = vst [vmem:[%s15784_s11 + $0x400] sm:$0xff] %v8729_v36 }
 0x4c6   :  { %6538 = vst [vmem:[%s15784_s11 + $0xb0] sm:$0xff] %v8793_v1  ;;  %6645 = vst [vmem:[%s15784_s11 + $0x408] sm:$0xff] %v8730_v59 }
 0x4c7   :  { %6539 = vst [vmem:[%s15784_s11 + $0xb8] sm:$0xff] %v8794_v53 }
 0x4c8   :  { %v5528_v18 = vpop.f32.mrb[176].mxu0 }
 0x4c9   :  { %v6287_v22 = vpop.f32.mrb[124].mxu1  ;;  %v8731_v46 = vadd.f32 %v5528_v18, %v14835_v23  ;;  %v5530_v62 = vpop.f32.mrb[177].mxu0 }
 0x4ca   :  { %v8795_v58 = vadd.f32 %v6287_v22, %v15081_v38  ;;  %v6289_v50 = vpop.f32.mrb[125].mxu1  ;;  %v8732_v3 = vadd.f32 %v5530_v62, %v14839_v55  ;;  %v5532_v63 = vpop.f32.mrb[178].mxu0 }
 0x4cb   :  { %v8796_v54 = vadd.f32 %v6289_v50, %v15088_v32  ;;  %v6291_v27 = vpop.f32.mrb[126].mxu1  ;;  %6650 = vst [vmem:[%s15784_s11 + $0x430] sm:$0xff] %v8731_v46  ;;  %v8733_v57 = vadd.f32 %v5532_v63, %v14835_v23  ;;  %v5534_v48 = vpop.f32.mrb[179].mxu0 }
 0x4cc   :  { %6544 = vst [vmem:[%s15784_s11 + $0xe0] sm:$0xff] %v8795_v58  ;;  %v8797_v44 = vadd.f32 %v6291_v27, %v15081_v38  ;;  %v6293_v34 = vpop.f32.mrb[127].mxu1  ;;  %6651 = vst [vmem:[%s15784_s11 + $0x438] sm:$0xff] %v8732_v3  ;;  %v8734_v40 = vadd.f32 %v5534_v48, %v14839_v55 }
 0x4cd   :  { %6545 = vst [vmem:[%s15784_s11 + $0xe8] sm:$0xff] %v8796_v54  ;;  %v8798_v16 = vadd.f32 %v6293_v34, %v15088_v32  ;;  %6656 = vst [vmem:[%s15784_s11 + $0x460] sm:$0xff] %v8733_v57 }
 0x4ce   :  { %6550 = vst [vmem:[%s15784_s11 + $0x110] sm:$0xff] %v8797_v44  ;;  %6657 = vst [vmem:[%s15784_s11 + $0x468] sm:$0xff] %v8734_v40 }
 0x4cf   :  { %6551 = vst [vmem:[%s15784_s11 + $0x118] sm:$0xff] %v8798_v16 }
 0x4d0   :  { %v5538_v5 = vpop.f32.mrb[180].mxu0 }
 0x4d1   :  { %v6297_v37 = vpop.f32.mrb[128].mxu1  ;;  %v8735_v61 = vadd.f32 %v5538_v5, %v14835_v23  ;;  %v5540_v8 = vpop.f32.mrb[181].mxu0 }
 0x4d2   :  { %v8799_v29 = vadd.f32 %v6297_v37, %v15081_v38  ;;  %v6299_v9 = vpop.f32.mrb[129].mxu1  ;;  %v8736_v4 = vadd.f32 %v5540_v8, %v14839_v55  ;;  %v5542_v11 = vpop.f32.mrb[182].mxu0 }
 0x4d3   :  { %v8800_v0 = vadd.f32 %v6299_v9, %v15088_v32  ;;  %v6301_v52 = vpop.f32.mrb[130].mxu1  ;;  %6662 = vst [vmem:[%s15784_s11 + $0x490] sm:$0xff] %v8735_v61  ;;  %v8737_v51 = vadd.f32 %v5542_v11, %v14835_v23  ;;  %v5544_v17 = vpop.f32.mrb[183].mxu0 }
 0x4d4   :  { %6556 = vst [vmem:[%s15784_s11 + $0x140] sm:$0xff] %v8799_v29  ;;  %v8801_v33 = vadd.f32 %v6301_v52, %v15081_v38  ;;  %v6303_v2 = vpop.f32.mrb[131].mxu1  ;;  %6663 = vst [vmem:[%s15784_s11 + $0x498] sm:$0xff] %v8736_v4  ;;  %v8738_v13 = vadd.f32 %v5544_v17, %v14839_v55 }
 0x4d5   :  { %6557 = vst [vmem:[%s15784_s11 + $0x148] sm:$0xff] %v8800_v0  ;;  %v8802_v26 = vadd.f32 %v6303_v2, %v15088_v32  ;;  %6668 = vst [vmem:[%s15784_s11 + $0x4c0] sm:$0xff] %v8737_v51 }
 0x4d6   :  { %6562 = vst [vmem:[%s15784_s11 + $0x170] sm:$0xff] %v8801_v33  ;;  %6669 = vst [vmem:[%s15784_s11 + $0x4c8] sm:$0xff] %v8738_v13 }
 0x4d7   :  { %6563 = vst [vmem:[%s15784_s11 + $0x178] sm:$0xff] %v8802_v26 }
 0x4d8   :  { %v5548_v10 = vpop.f32.mrb[184].mxu0 }
 0x4d9   :  { %v6307_v42 = vpop.f32.mrb[132].mxu1  ;;  %v8739_v6 = vadd.f32 %v5548_v10, %v14835_v23  ;;  %v5550_v28 = vpop.f32.mrb[185].mxu0 }
 0x4da   :  { %v8803_v60 = vadd.f32 %v6307_v42, %v15081_v38  ;;  %v6309_v49 = vpop.f32.mrb[133].mxu1  ;;  %v8740_v30 = vadd.f32 %v5550_v28, %v14839_v55  ;;  %v5552_v24 = vpop.f32.mrb[186].mxu0 }
 0x4db   :  { %v8804_v35 = vadd.f32 %v6309_v49, %v15088_v32  ;;  %v6311_v25 = vpop.f32.mrb[134].mxu1  ;;  %6674 = vst [vmem:[%s15784_s11 + $0x4f0] sm:$0xff] %v8739_v6  ;;  %v8741_v41 = vadd.f32 %v5552_v24, %v14835_v23  ;;  %v5554_v21 = vpop.f32.mrb[187].mxu0 }
 0x4dc   :  { %6568 = vst [vmem:[%s15784_s11 + $0x1a0] sm:$0xff] %v8803_v60  ;;  %v8805_v45 = vadd.f32 %v6311_v25, %v15081_v38  ;;  %v6313_v43 = vpop.f32.mrb[135].mxu1  ;;  %6675 = vst [vmem:[%s15784_s11 + $0x4f8] sm:$0xff] %v8740_v30  ;;  %v8742_v14 = vadd.f32 %v5554_v21, %v14839_v55 }
 0x4dd   :  { %6569 = vst [vmem:[%s15784_s11 + $0x1a8] sm:$0xff] %v8804_v35  ;;  %v8806_v15 = vadd.f32 %v6313_v43, %v15088_v32  ;;  %6680 = vst [vmem:[%s15784_s11 + $0x520] sm:$0xff] %v8741_v41 }
 0x4de   :  { %6574 = vst [vmem:[%s15784_s11 + $0x1d0] sm:$0xff] %v8805_v45  ;;  %6681 = vst [vmem:[%s15784_s11 + $0x528] sm:$0xff] %v8742_v14 }
 0x4df   :  { %6575 = vst [vmem:[%s15784_s11 + $0x1d8] sm:$0xff] %v8806_v15 }
 0x4e0   :  { %v5558_v20 = vpop.f32.mrb[188].mxu0 }
 0x4e1   :  { %v6317_v19 = vpop.f32.mrb[136].mxu1  ;;  %v8743_v39 = vadd.f32 %v5558_v20, %v14835_v23  ;;  %v5560_v12 = vpop.f32.mrb[189].mxu0 }
 0x4e2   :  { %v8807_v31 = vadd.f32 %v6317_v19, %v15081_v38  ;;  %v6319_v47 = vpop.f32.mrb[137].mxu1  ;;  %v8744_v36 = vadd.f32 %v5560_v12, %v14839_v55  ;;  %v5562_v56 = vpop.f32.mrb[190].mxu0 }
 0x4e3   :  { %v8808_v1 = vadd.f32 %v6319_v47, %v15088_v32  ;;  %v6321_v7 = vpop.f32.mrb[138].mxu1  ;;  %6686 = vst [vmem:[%s15784_s11 + $0x550] sm:$0xff] %v8743_v39  ;;  %v8745_v59 = vadd.f32 %v5562_v56, %v14835_v23  ;;  %v5564_v18 = vpop.f32.mrb[191].mxu0 }
 0x4e4   :  { %6580 = vst [vmem:[%s15784_s11 + $0x200] sm:$0xff] %v8807_v31  ;;  %v8809_v53 = vadd.f32 %v6321_v7, %v15081_v38  ;;  %v6323_v22 = vpop.f32.mrb[139].mxu1  ;;  %6687 = vst [vmem:[%s15784_s11 + $0x558] sm:$0xff] %v8744_v36  ;;  %v8746_v46 = vadd.f32 %v5564_v18, %v14839_v55 }
 0x4e5   :  { %6581 = vst [vmem:[%s15784_s11 + $0x208] sm:$0xff] %v8808_v1  ;;  %v8810_v58 = vadd.f32 %v6323_v22, %v15088_v32  ;;  %6692 = vst [vmem:[%s15784_s11 + $0x580] sm:$0xff] %v8745_v59 }
 0x4e6   :  { %6586 = vst [vmem:[%s15784_s11 + $0x230] sm:$0xff] %v8809_v53  ;;  %6693 = vst [vmem:[%s15784_s11 + $0x588] sm:$0xff] %v8746_v46 }
 0x4e7   :  { %6587 = vst [vmem:[%s15784_s11 + $0x238] sm:$0xff] %v8810_v58 }
 0x4e8   :  { %v5568_v62 = vpop.f32.mrb[192].mxu0 }
 0x4e9   :  { %v6327_v50 = vpop.f32.mrb[140].mxu1  ;;  %v8747_v3 = vadd.f32 %v5568_v62, %v14835_v23  ;;  %v5570_v63 = vpop.f32.mrb[193].mxu0 }
 0x4ea   :  { %v8811_v54 = vadd.f32 %v6327_v50, %v15081_v38  ;;  %v6329_v27 = vpop.f32.mrb[141].mxu1  ;;  %v8748_v57 = vadd.f32 %v5570_v63, %v14839_v55  ;;  %v5572_v48 = vpop.f32.mrb[194].mxu0 }
 0x4eb   :  { %v8812_v44 = vadd.f32 %v6329_v27, %v15088_v32  ;;  %v6331_v34 = vpop.f32.mrb[142].mxu1  ;;  %6698 = vst [vmem:[%s15784_s11 + $0x5b0] sm:$0xff] %v8747_v3  ;;  %v8749_v40 = vadd.f32 %v5572_v48, %v14835_v23  ;;  %v5574_v5 = vpop.f32.mrb[195].mxu0 }
 0x4ec   :  { %6592 = vst [vmem:[%s15784_s11 + $0x260] sm:$0xff] %v8811_v54  ;;  %v8813_v16 = vadd.f32 %v6331_v34, %v15081_v38  ;;  %v6333_v37 = vpop.f32.mrb[143].mxu1  ;;  %6699 = vst [vmem:[%s15784_s11 + $0x5b8] sm:$0xff] %v8748_v57  ;;  %v8750_v61 = vadd.f32 %v5574_v5, %v14839_v55 }
 0x4ed   :  { %6593 = vst [vmem:[%s15784_s11 + $0x268] sm:$0xff] %v8812_v44  ;;  %v8814_v29 = vadd.f32 %v6333_v37, %v15088_v32  ;;  %6704 = vst [vmem:[%s15784_s11 + $0x5e0] sm:$0xff] %v8749_v40 }
 0x4ee   :  { %6598 = vst [vmem:[%s15784_s11 + $0x290] sm:$0xff] %v8813_v16  ;;  %6705 = vst [vmem:[%s15784_s11 + $0x5e8] sm:$0xff] %v8750_v61 }
 0x4ef   :  { %6599 = vst [vmem:[%s15784_s11 + $0x298] sm:$0xff] %v8814_v29 }
 0x4f0   :  { %v5578_v8 = vpop.f32.mrb[196].mxu0 }
 0x4f1   :  { %v6337_v9 = vpop.f32.mrb[144].mxu1  ;;  %v8751_v4 = vadd.f32 %v5578_v8, %v14835_v23  ;;  %v5580_v11 = vpop.f32.mrb[197].mxu0 }
 0x4f2   :  { %v8815_v0 = vadd.f32 %v6337_v9, %v15081_v38  ;;  %v6339_v52 = vpop.f32.mrb[145].mxu1  ;;  %v8752_v51 = vadd.f32 %v5580_v11, %v14839_v55  ;;  %v5582_v17 = vpop.f32.mrb[198].mxu0 }
 0x4f3   :  { %v8816_v33 = vadd.f32 %v6339_v52, %v15088_v32  ;;  %v6341_v2 = vpop.f32.mrb[146].mxu1  ;;  %6710 = vst [vmem:[%s15784_s11 + $0x610] sm:$0xff] %v8751_v4  ;;  %v8753_v13 = vadd.f32 %v5582_v17, %v14835_v23  ;;  %v5584_v10 = vpop.f32.mrb[199].mxu0 }
 0x4f4   :  { %6604 = vst [vmem:[%s15784_s11 + $0x2c0] sm:$0xff] %v8815_v0  ;;  %v8817_v26 = vadd.f32 %v6341_v2, %v15081_v38  ;;  %v6343_v42 = vpop.f32.mrb[147].mxu1  ;;  %6711 = vst [vmem:[%s15784_s11 + $0x618] sm:$0xff] %v8752_v51  ;;  %v8754_v6 = vadd.f32 %v5584_v10, %v14839_v55 }
 0x4f5   :  { %6605 = vst [vmem:[%s15784_s11 + $0x2c8] sm:$0xff] %v8816_v33  ;;  %v8818_v60 = vadd.f32 %v6343_v42, %v15088_v32  ;;  %6716 = vst [vmem:[%s15784_s11 + $0x640] sm:$0xff] %v8753_v13 }
 0x4f6   :  { %6610 = vst [vmem:[%s15784_s11 + $0x2f0] sm:$0xff] %v8817_v26  ;;  %6717 = vst [vmem:[%s15784_s11 + $0x648] sm:$0xff] %v8754_v6 }
 0x4f7   :  { %6611 = vst [vmem:[%s15784_s11 + $0x2f8] sm:$0xff] %v8818_v60 }
 0x4f8   :  { %v5588_v28 = vpop.f32.mrb[200].mxu0 }
 0x4f9   :  { %v6347_v49 = vpop.f32.mrb[148].mxu1  ;;  %v8755_v30 = vadd.f32 %v5588_v28, %v14835_v23  ;;  %v5590_v24 = vpop.f32.mrb[201].mxu0 }
 0x4fa   :  { %v8819_v35 = vadd.f32 %v6347_v49, %v15081_v38  ;;  %v6349_v25 = vpop.f32.mrb[149].mxu1  ;;  %v8756_v41 = vadd.f32 %v5590_v24, %v14839_v55  ;;  %v5592_v21 = vpop.f32.mrb[202].mxu0 }
 0x4fb   :  { %v8820_v45 = vadd.f32 %v6349_v25, %v15088_v32  ;;  %v6351_v43 = vpop.f32.mrb[150].mxu1  ;;  %6722 = vst [vmem:[%s15784_s11 + $0x670] sm:$0xff] %v8755_v30  ;;  %v8757_v14 = vadd.f32 %v5592_v21, %v14835_v23  ;;  %v5594_v20 = vpop.f32.mrb[203].mxu0 }
 0x4fc   :  { %6616 = vst [vmem:[%s15784_s11 + $0x320] sm:$0xff] %v8819_v35  ;;  %v8821_v15 = vadd.f32 %v6351_v43, %v15081_v38  ;;  %v6353_v19 = vpop.f32.mrb[151].mxu1  ;;  %6723 = vst [vmem:[%s15784_s11 + $0x678] sm:$0xff] %v8756_v41  ;;  %v8758_v39 = vadd.f32 %v5594_v20, %v14839_v55 }
 0x4fd   :  { %6617 = vst [vmem:[%s15784_s11 + $0x328] sm:$0xff] %v8820_v45  ;;  %v8822_v31 = vadd.f32 %v6353_v19, %v15088_v32  ;;  %6728 = vst [vmem:[%s15784_s11 + $0x6a0] sm:$0xff] %v8757_v14 }
 0x4fe   :  { %6622 = vst [vmem:[%s15784_s11 + $0x350] sm:$0xff] %v8821_v15  ;;  %6729 = vst [vmem:[%s15784_s11 + $0x6a8] sm:$0xff] %v8758_v39 }
 0x4ff   :  { %6623 = vst [vmem:[%s15784_s11 + $0x358] sm:$0xff] %v8822_v31 }
 0x500   :  { %v5598_v12 = vpop.f32.mrb[204].mxu0 }
 0x501   :  { %v6357_v47 = vpop.f32.mrb[152].mxu1 }
 0x502   :  { %10267 = shalt.err (!%p10264_p4)
}
 0x503   :  { %s10268_s15 = scalar_lea.hbm %s15783_s10, 6144 }
 0x504   :  { %p10269_p5 = scmp.ne.s32.totalorder %s15783_s10, %s10268_s15  ;;  %p10272_p6 = scmp.lt.u32.totalorder %s10268_s15, %s15783_s10 }
 0x506   :  { %p10274_p7 = pnand %p10272_p6, %p10269_p5 }
 0x508   :  { %10277 = shalt.err (!%p10274_p7)
}
 0x509   :  { %s10305_s17 = smov 768   ;;  %s10306_s18 = smov 48   ;;  %v8759_v36 = vadd.f32 %v5598_v12, %v14835_v23  ;;  %v8823_v1 = vadd.f32 %v6357_v47, %v15081_v38  ;;  %v5600_v56 = vpop.f32.mrb[205].mxu0  ;;  %v6359_v7 = vpop.f32.mrb[153].mxu1 }
 0x50a   :  { %7821 = dma.vmem_to_hbm [thread:$0]  %s7816_s27, 6144, %s15783_s10, [#allocation3], %s10305_s17, %s10305_s17, %s10306_s18   ;;  %v8760_v59 = vadd.f32 %v5600_v56, %v14839_v55  ;;  %v8824_v53 = vadd.f32 %v6359_v7, %v15088_v32  ;;  %v5602_v18 = vpop.f32.mrb[206].mxu0  ;;  %v6361_v22 = vpop.f32.mrb[154].mxu1 }
 0x50b   :  { %6734 = vst [vmem:[%s15784_s11 + $0x6d0] sm:$0xff] %v8759_v36  ;;  %6628 = vst [vmem:[%s15784_s11 + $0x380] sm:$0xff] %v8823_v1  ;;  %v8761_v46 = vadd.f32 %v5602_v18, %v14835_v23  ;;  %v8825_v58 = vadd.f32 %v6361_v22, %v15081_v38  ;;  %v5604_v62 = vpop.f32.mrb[207].mxu0  ;;  %v6363_v50 = vpop.f32.mrb[155].mxu1  ;;  %s10307_s25 = smov [#allocation4]  }
 0x50c   :  { %6735 = vst [vmem:[%s15784_s11 + $0x6d8] sm:$0xff] %v8760_v59  ;;  %6629 = vst [vmem:[%s15784_s11 + $0x388] sm:$0xff] %v8824_v53  ;;  %v8762_v3 = vadd.f32 %v5604_v62, %v14839_v55  ;;  %v8826_v54 = vadd.f32 %v6363_v50, %v15088_v32  ;;  %v5608_v63 = vpop.f32.mrb[208].mxu0  ;;  %v6367_v27 = vpop.f32.mrb[156].mxu1  ;;  %s7830_s26 = sshll.u32 %s10307_s25, 4  ;;  %s7831_s26 = int_to_ptr.vmem [resolvable:$true] %s7830_s26 }
 0x50d   :  { %6740 = vst [vmem:[%s15784_s11 + $0x700] sm:$0xff] %v8761_v46  ;;  %6634 = vst [vmem:[%s15784_s11 + $0x3b0] sm:$0xff] %v8825_v58  ;;  %v8763_v57 = vadd.f32 %v5608_v63, %v14835_v23  ;;  %v8827_v44 = vadd.f32 %v6367_v27, %v15081_v38  ;;  %v5610_v48 = vpop.f32.mrb[209].mxu0  ;;  %v6369_v34 = vpop.f32.mrb[157].mxu1  ;;  %s10278_s7 = scalar_lea.vmem %s7831_s26, 64  ;;  %p10283_p9 = scmp.lt.s32.totalorder %s7831_s26, %s7831_s26 }
 0x50e   :  { %6741 = vst [vmem:[%s15784_s11 + $0x708] sm:$0xff] %v8762_v3  ;;  %6635 = vst [vmem:[%s15784_s11 + $0x3b8] sm:$0xff] %v8826_v54  ;;  %v8764_v40 = vadd.f32 %v5610_v48, %v14839_v55  ;;  %v8828_v16 = vadd.f32 %v6369_v34, %v15088_v32  ;;  %v5612_v5 = vpop.f32.mrb[210].mxu0  ;;  %v6371_v37 = vpop.f32.mrb[158].mxu1  ;;  %p10279_p8 = scmp.ne.s32.totalorder %s7831_s26, %s10278_s7  ;;  %p10284_p10 = scmp.lt.s32.totalorder %s10278_s7, %s10278_s7 }
 0x50f   :  { %6746 = vst [vmem:[%s15784_s11 + $0x730] sm:$0xff] %v8763_v57  ;;  %6640 = vst [vmem:[%s15784_s11 + $0x3e0] sm:$0xff] %v8827_v44  ;;  %v8765_v61 = vadd.f32 %v5612_v5, %v14835_v23  ;;  %v8829_v29 = vadd.f32 %v6371_v37, %v15081_v38  ;;  %v5614_v8 = vpop.f32.mrb[211].mxu0  ;;  %v6373_v9 = vpop.f32.mrb[159].mxu1 }
 0x510   :  { %6747 = vst [vmem:[%s15784_s11 + $0x738] sm:$0xff] %v8764_v40  ;;  %6641 = vst [vmem:[%s15784_s11 + $0x3e8] sm:$0xff] %v8828_v16  ;;  %v8766_v4 = vadd.f32 %v5614_v8, %v14839_v55  ;;  %v8830_v0 = vadd.f32 %v6373_v9, %v15088_v32  ;;  %v5618_v11 = vpop.f32.mrb[212].mxu0  ;;  %p10285_p11 = por %p10284_p10, %p10283_p9 }
 0x511   :  { %6752 = vst [vmem:[%s15784_s11 + $0x760] sm:$0xff] %v8765_v61  ;;  %6646 = vst [vmem:[%s15784_s11 + $0x410] sm:$0xff] %v8829_v29  ;;  %v6377_v52 = vpop.f32.mrb[160].mxu1  ;;  %v8767_v51 = vadd.f32 %v5618_v11, %v14835_v23  ;;  %v5620_v17 = vpop.f32.mrb[213].mxu0 }
 0x512   :  { %6753 = vst [vmem:[%s15784_s11 + $0x768] sm:$0xff] %v8766_v4  ;;  %6647 = vst [vmem:[%s15784_s11 + $0x418] sm:$0xff] %v8830_v0  ;;  %v8831_v33 = vadd.f32 %v6377_v52, %v15081_v38  ;;  %v6379_v2 = vpop.f32.mrb[161].mxu1  ;;  %v8768_v13 = vadd.f32 %v5620_v17, %v14839_v55  ;;  %v5622_v10 = vpop.f32.mrb[214].mxu0  ;;  %p10286_p12 = pnand %p10285_p11, %p10279_p8 }
 0x513   :  { %v8832_v26 = vadd.f32 %v6379_v2, %v15088_v32  ;;  %v6381_v42 = vpop.f32.mrb[162].mxu1  ;;  %6758 = vst [vmem:[%s15784_s11 + $0x790] sm:$0xff] %v8767_v51  ;;  %v8769_v6 = vadd.f32 %v5622_v10, %v14835_v23  ;;  %v5624_v28 = vpop.f32.mrb[215].mxu0 }
 0x514   :  { %6652 = vst [vmem:[%s15784_s11 + $0x440] sm:$0xff] %v8831_v33  ;;  %v8833_v60 = vadd.f32 %v6381_v42, %v15081_v38  ;;  %v6383_v49 = vpop.f32.mrb[163].mxu1  ;;  %6759 = vst [vmem:[%s15784_s11 + $0x798] sm:$0xff] %v8768_v13  ;;  %v8770_v30 = vadd.f32 %v5624_v28, %v14839_v55 }
 0x515   :  { %6653 = vst [vmem:[%s15784_s11 + $0x448] sm:$0xff] %v8832_v26  ;;  %v8834_v35 = vadd.f32 %v6383_v49, %v15088_v32  ;;  %6764 = vst [vmem:[%s15784_s11 + $0x7c0] sm:$0xff] %v8769_v6 }
 0x516   :  { %6658 = vst [vmem:[%s15784_s11 + $0x470] sm:$0xff] %v8833_v60  ;;  %6765 = vst [vmem:[%s15784_s11 + $0x7c8] sm:$0xff] %v8770_v30 }
 0x517   :  { %6659 = vst [vmem:[%s15784_s11 + $0x478] sm:$0xff] %v8834_v35 }
 0x518   :  { %v5628_v24 = vpop.f32.mrb[216].mxu0 }
 0x519   :  { %v6387_v25 = vpop.f32.mrb[164].mxu1  ;;  %v8771_v41 = vadd.f32 %v5628_v24, %v14835_v23  ;;  %v5630_v21 = vpop.f32.mrb[217].mxu0 }
 0x51a   :  { %v8835_v45 = vadd.f32 %v6387_v25, %v15081_v38  ;;  %v6389_v43 = vpop.f32.mrb[165].mxu1  ;;  %v8772_v14 = vadd.f32 %v5630_v21, %v14839_v55  ;;  %v5632_v20 = vpop.f32.mrb[218].mxu0 }
 0x51b   :  { %v8836_v15 = vadd.f32 %v6389_v43, %v15088_v32  ;;  %v6391_v19 = vpop.f32.mrb[166].mxu1  ;;  %6770 = vst [vmem:[%s15784_s11 + $0x7f0] sm:$0xff] %v8771_v41  ;;  %v8773_v39 = vadd.f32 %v5632_v20, %v14835_v23  ;;  %v5634_v12 = vpop.f32.mrb[219].mxu0 }
 0x51c   :  { %6664 = vst [vmem:[%s15784_s11 + $0x4a0] sm:$0xff] %v8835_v45  ;;  %v8837_v31 = vadd.f32 %v6391_v19, %v15081_v38  ;;  %v6393_v47 = vpop.f32.mrb[167].mxu1  ;;  %6771 = vst [vmem:[%s15784_s11 + $0x7f8] sm:$0xff] %v8772_v14  ;;  %v8774_v36 = vadd.f32 %v5634_v12, %v14839_v55 }
 0x51d   :  { %6665 = vst [vmem:[%s15784_s11 + $0x4a8] sm:$0xff] %v8836_v15  ;;  %v8838_v1 = vadd.f32 %v6393_v47, %v15088_v32  ;;  %6776 = vst [vmem:[%s15784_s11 + $0x820] sm:$0xff] %v8773_v39 }
 0x51e   :  { %6670 = vst [vmem:[%s15784_s11 + $0x4d0] sm:$0xff] %v8837_v31  ;;  %6777 = vst [vmem:[%s15784_s11 + $0x828] sm:$0xff] %v8774_v36 }
 0x51f   :  { %6671 = vst [vmem:[%s15784_s11 + $0x4d8] sm:$0xff] %v8838_v1 }
 0x520   :  { %v5638_v56 = vpop.f32.mrb[220].mxu0 }
 0x521   :  { %v6397_v7 = vpop.f32.mrb[168].mxu1  ;;  %v8775_v59 = vadd.f32 %v5638_v56, %v14835_v23  ;;  %v5640_v18 = vpop.f32.mrb[221].mxu0 }
 0x522   :  { %v8839_v53 = vadd.f32 %v6397_v7, %v15081_v38  ;;  %v6399_v22 = vpop.f32.mrb[169].mxu1  ;;  %v8776_v46 = vadd.f32 %v5640_v18, %v14839_v55  ;;  %v5642_v62 = vpop.f32.mrb[222].mxu0 }
 0x523   :  { %v8840_v58 = vadd.f32 %v6399_v22, %v15088_v32  ;;  %v6401_v50 = vpop.f32.mrb[170].mxu1  ;;  %6782 = vst [vmem:[%s15784_s11 + $0x850] sm:$0xff] %v8775_v59  ;;  %v8777_v3 = vadd.f32 %v5642_v62, %v14835_v23  ;;  %v5644_v63 = vpop.f32.mrb[223].mxu0 }
 0x524   :  { %6676 = vst [vmem:[%s15784_s11 + $0x500] sm:$0xff] %v8839_v53  ;;  %v8841_v54 = vadd.f32 %v6401_v50, %v15081_v38  ;;  %v6403_v27 = vpop.f32.mrb[171].mxu1  ;;  %6783 = vst [vmem:[%s15784_s11 + $0x858] sm:$0xff] %v8776_v46  ;;  %v8778_v57 = vadd.f32 %v5644_v63, %v14839_v55 }
 0x525   :  { %6677 = vst [vmem:[%s15784_s11 + $0x508] sm:$0xff] %v8840_v58  ;;  %v8842_v44 = vadd.f32 %v6403_v27, %v15088_v32  ;;  %6788 = vst [vmem:[%s15784_s11 + $0x880] sm:$0xff] %v8777_v3 }
 0x526   :  { %6682 = vst [vmem:[%s15784_s11 + $0x530] sm:$0xff] %v8841_v54  ;;  %6789 = vst [vmem:[%s15784_s11 + $0x888] sm:$0xff] %v8778_v57 }
 0x527   :  { %6683 = vst [vmem:[%s15784_s11 + $0x538] sm:$0xff] %v8842_v44 }
 0x528   :  { %v5648_v48 = vpop.f32.mrb[224].mxu0 }
 0x529   :  { %v6407_v34 = vpop.f32.mrb[172].mxu1  ;;  %v8779_v40 = vadd.f32 %v5648_v48, %v14835_v23  ;;  %v5650_v5 = vpop.f32.mrb[225].mxu0 }
 0x52a   :  { %v8843_v16 = vadd.f32 %v6407_v34, %v15081_v38  ;;  %v6409_v37 = vpop.f32.mrb[173].mxu1  ;;  %v8780_v61 = vadd.f32 %v5650_v5, %v14839_v55  ;;  %v5652_v8 = vpop.f32.mrb[226].mxu0 }
 0x52b   :  { %v8844_v29 = vadd.f32 %v6409_v37, %v15088_v32  ;;  %v6411_v9 = vpop.f32.mrb[174].mxu1  ;;  %6794 = vst [vmem:[%s15784_s11 + $0x8b0] sm:$0xff] %v8779_v40  ;;  %v8781_v4 = vadd.f32 %v5652_v8, %v14835_v23  ;;  %v5654_v11 = vpop.f32.mrb[227].mxu0 }
 0x52c   :  { %6688 = vst [vmem:[%s15784_s11 + $0x560] sm:$0xff] %v8843_v16  ;;  %v8845_v0 = vadd.f32 %v6411_v9, %v15081_v38  ;;  %v6413_v52 = vpop.f32.mrb[175].mxu1  ;;  %6795 = vst [vmem:[%s15784_s11 + $0x8b8] sm:$0xff] %v8780_v61  ;;  %v8782_v51 = vadd.f32 %v5654_v11, %v14839_v55 }
 0x52d   :  { %6689 = vst [vmem:[%s15784_s11 + $0x568] sm:$0xff] %v8844_v29  ;;  %v8846_v33 = vadd.f32 %v6413_v52, %v15088_v32  ;;  %6800 = vst [vmem:[%s15784_s11 + $0x8e0] sm:$0xff] %v8781_v4  ;;  %v8324_v29 = vld [vmem:[%s15782_s9] ss:$0 sm:$0xff] }
 0x52e   :  { %6694 = vst [vmem:[%s15784_s11 + $0x590] sm:$0xff] %v8845_v0  ;;  %6801 = vst [vmem:[%s15784_s11 + $0x8e8] sm:$0xff] %v8782_v51 }
 0x52f   :  { %6695 = vst [vmem:[%s15784_s11 + $0x598] sm:$0xff] %v8846_v33 }
 0x530   :  { %v5658_v17 = vpop.f32.mrb[228].mxu0 }
 0x531   :  { %v6417_v2 = vpop.f32.mrb[176].mxu1  ;;  %v8783_v13 = vadd.f32 %v5658_v17, %v14835_v23  ;;  %v5660_v10 = vpop.f32.mrb[229].mxu0 }
 0x532   :  { %v8847_v26 = vadd.f32 %v6417_v2, %v15081_v38  ;;  %v6419_v42 = vpop.f32.mrb[177].mxu1  ;;  %v8784_v6 = vadd.f32 %v5660_v10, %v14839_v55  ;;  %v5662_v28 = vpop.f32.mrb[230].mxu0 }
 0x533   :  { %v8848_v60 = vadd.f32 %v6419_v42, %v15088_v32  ;;  %v6421_v49 = vpop.f32.mrb[178].mxu1  ;;  %6806 = vst [vmem:[%s15784_s11 + $0x910] sm:$0xff] %v8783_v13  ;;  %v8785_v30 = vadd.f32 %v5662_v28, %v14835_v23  ;;  %v5664_v24 = vpop.f32.mrb[231].mxu0 }
 0x534   :  { %6700 = vst [vmem:[%s15784_s11 + $0x5c0] sm:$0xff] %v8847_v26  ;;  %v8849_v35 = vadd.f32 %v6421_v49, %v15081_v38  ;;  %v6423_v25 = vpop.f32.mrb[179].mxu1  ;;  %6807 = vst [vmem:[%s15784_s11 + $0x918] sm:$0xff] %v8784_v6  ;;  %v8786_v41 = vadd.f32 %v5664_v24, %v14839_v55 }
 0x535   :  { %6701 = vst [vmem:[%s15784_s11 + $0x5c8] sm:$0xff] %v8848_v60  ;;  %v8850_v45 = vadd.f32 %v6423_v25, %v15088_v32  ;;  %6812 = vst [vmem:[%s15784_s11 + $0x940] sm:$0xff] %v8785_v30 }
 0x536   :  { %6706 = vst [vmem:[%s15784_s11 + $0x5f0] sm:$0xff] %v8849_v35  ;;  %6813 = vst [vmem:[%s15784_s11 + $0x948] sm:$0xff] %v8786_v41 }
 0x537   :  { %6707 = vst [vmem:[%s15784_s11 + $0x5f8] sm:$0xff] %v8850_v45 }
 0x538   :  { %v8389_v55 = vpop.f32.mrb[232].mxu0 }
 0x539   :  { %v6427_v23 = vpop.f32.mrb[180].mxu1  ;;  %v8390_v14 = vpop.f32.mrb[233].mxu0 }
 0x53a   :  { %v8851_v21 = vadd.f32 %v6427_v23, %v15081_v38  ;;  %v6429_v43 = vpop.f32.mrb[181].mxu1  ;;  %v8391_v20 = vadd.f32 %v8390_v14, %v8389_v55  ;;  %v8392_v39 = vpop.f32.mrb[234].mxu0 }
 0x53b   :  { %v8852_v15 = vadd.f32 %v6429_v43, %v15088_v32  ;;  %v6431_v19 = vpop.f32.mrb[182].mxu1  ;;  %v8393_v47 = vpop.f32.mrb[235].mxu0 }
 0x53c   :  { %6712 = vst [vmem:[%s15784_s11 + $0x620] sm:$0xff] %v8851_v21  ;;  %v8853_v31 = vadd.f32 %v6431_v19, %v15081_v38  ;;  %v6433_v12 = vpop.f32.mrb[183].mxu1  ;;  %v7724_v52 = vadd.f32 %v8391_v20, %v8324_v29 }
 0x53d   :  { %6713 = vst [vmem:[%s15784_s11 + $0x628] sm:$0xff] %v8852_v15  ;;  %v8854_v36 = vadd.f32 %v6433_v12, %v15088_v32 }
 0x53e   :  { %6718 = vst [vmem:[%s15784_s11 + $0x650] sm:$0xff] %v8853_v31 }
 0x53f   :  { %6719 = vst [vmem:[%s15784_s11 + $0x658] sm:$0xff] %v8854_v36 }
 0x541   :  { %v6437_v1 = vpop.f32.mrb[184].mxu1 }
 0x542   :  { %v8855_v56 = vadd.f32 %v6437_v1, %v15081_v38  ;;  %v6439_v7 = vpop.f32.mrb[185].mxu1 }
 0x543   :  { %v8856_v59 = vadd.f32 %v6439_v7, %v15088_v32  ;;  %v6441_v53 = vpop.f32.mrb[186].mxu1 }
 0x544   :  { %6724 = vst [vmem:[%s15784_s11 + $0x680] sm:$0xff] %v8855_v56  ;;  %v8857_v18 = vadd.f32 %v6441_v53, %v15081_v38  ;;  %v6443_v22 = vpop.f32.mrb[187].mxu1 }
 0x545   :  { %6725 = vst [vmem:[%s15784_s11 + $0x688] sm:$0xff] %v8856_v59  ;;  %v8858_v46 = vadd.f32 %v6443_v22, %v15088_v32 }
 0x546   :  { %6730 = vst [vmem:[%s15784_s11 + $0x6b0] sm:$0xff] %v8857_v18 }
 0x547   :  { %6731 = vst [vmem:[%s15784_s11 + $0x6b8] sm:$0xff] %v8858_v46 }
 0x549   :  { %v6447_v58 = vpop.f32.mrb[188].mxu1 }
 0x54a   :  { %v8859_v62 = vadd.f32 %v6447_v58, %v15081_v38  ;;  %v6449_v50 = vpop.f32.mrb[189].mxu1 }
 0x54b   :  { %v8860_v3 = vadd.f32 %v6449_v50, %v15088_v32  ;;  %v6451_v54 = vpop.f32.mrb[190].mxu1 }
 0x54c   :  { %6736 = vst [vmem:[%s15784_s11 + $0x6e0] sm:$0xff] %v8859_v62  ;;  %v8861_v63 = vadd.f32 %v6451_v54, %v15081_v38  ;;  %v6453_v27 = vpop.f32.mrb[191].mxu1 }
 0x54d   :  { %6737 = vst [vmem:[%s15784_s11 + $0x6e8] sm:$0xff] %v8860_v3  ;;  %v8862_v57 = vadd.f32 %v6453_v27, %v15088_v32 }
 0x54e   :  { %6742 = vst [vmem:[%s15784_s11 + $0x710] sm:$0xff] %v8861_v63 }
 0x54f   :  { %6743 = vst [vmem:[%s15784_s11 + $0x718] sm:$0xff] %v8862_v57 }
 0x551   :  { %v6457_v44 = vpop.f32.mrb[192].mxu1 }
 0x552   :  { %v8863_v48 = vadd.f32 %v6457_v44, %v15081_v38  ;;  %v6459_v34 = vpop.f32.mrb[193].mxu1 }
 0x553   :  { %v8864_v40 = vadd.f32 %v6459_v34, %v15088_v32  ;;  %v6461_v16 = vpop.f32.mrb[194].mxu1 }
 0x554   :  { %6748 = vst [vmem:[%s15784_s11 + $0x740] sm:$0xff] %v8863_v48  ;;  %v8865_v5 = vadd.f32 %v6461_v16, %v15081_v38  ;;  %v6463_v37 = vpop.f32.mrb[195].mxu1 }
 0x555   :  { %6749 = vst [vmem:[%s15784_s11 + $0x748] sm:$0xff] %v8864_v40  ;;  %v8866_v61 = vadd.f32 %v6463_v37, %v15088_v32 }
 0x556   :  { %6754 = vst [vmem:[%s15784_s11 + $0x770] sm:$0xff] %v8865_v5 }
 0x557   :  { %6755 = vst [vmem:[%s15784_s11 + $0x778] sm:$0xff] %v8866_v61 }
 0x558   :  { %v8411_v8 = vpop.f32.mrb[236].mxu0 }
 0x559   :  { %v6467_v9 = vpop.f32.mrb[196].mxu1  ;;  %v8412_v0 = vpop.f32.mrb[237].mxu0 }
 0x55a   :  { %v8867_v4 = vadd.f32 %v6467_v9, %v15081_v38  ;;  %v6469_v11 = vpop.f32.mrb[197].mxu1  ;;  %v8413_v51 = vadd.f32 %v8412_v0, %v8411_v8  ;;  %v8414_v17 = vpop.f32.mrb[238].mxu0 }
 0x55b   :  { %v8868_v33 = vadd.f32 %v6469_v11, %v15088_v32  ;;  %v6471_v2 = vpop.f32.mrb[198].mxu1  ;;  %v8415_v26 = vpop.f32.mrb[239].mxu0 }
 0x55c   :  { %6760 = vst [vmem:[%s15784_s11 + $0x7a0] sm:$0xff] %v8867_v4  ;;  %v8869_v13 = vadd.f32 %v6471_v2, %v15081_v38  ;;  %v6473_v10 = vpop.f32.mrb[199].mxu1  ;;  %v7764_v42 = vadd.f32 %v8413_v51, %v7724_v52 }
 0x55d   :  { %6761 = vst [vmem:[%s15784_s11 + $0x7a8] sm:$0xff] %v8868_v33  ;;  %v8870_v6 = vadd.f32 %v6473_v10, %v15088_v32 }
 0x55e   :  { %6766 = vst [vmem:[%s15784_s11 + $0x7d0] sm:$0xff] %v8869_v13 }
 0x55f   :  { %6767 = vst [vmem:[%s15784_s11 + $0x7d8] sm:$0xff] %v8870_v6 }
 0x561   :  { %v6477_v60 = vpop.f32.mrb[200].mxu1 }
 0x562   :  { %v8871_v28 = vadd.f32 %v6477_v60, %v15081_v38  ;;  %v6479_v49 = vpop.f32.mrb[201].mxu1 }
 0x563   :  { %v8872_v30 = vadd.f32 %v6479_v49, %v15088_v32  ;;  %v6481_v35 = vpop.f32.mrb[202].mxu1 }
 0x564   :  { %6772 = vst [vmem:[%s15784_s11 + $0x800] sm:$0xff] %v8871_v28  ;;  %v8873_v24 = vadd.f32 %v6481_v35, %v15081_v38  ;;  %v6483_v25 = vpop.f32.mrb[203].mxu1 }
 0x565   :  { %6773 = vst [vmem:[%s15784_s11 + $0x808] sm:$0xff] %v8872_v30  ;;  %v8874_v41 = vadd.f32 %v6483_v25, %v15088_v32 }
 0x566   :  { %6778 = vst [vmem:[%s15784_s11 + $0x830] sm:$0xff] %v8873_v24 }
 0x567   :  { %6779 = vst [vmem:[%s15784_s11 + $0x838] sm:$0xff] %v8874_v41 }
 0x569   :  { %v6487_v45 = vpop.f32.mrb[204].mxu1 }
 0x56a   :  { %v8875_v23 = vadd.f32 %v6487_v45, %v15081_v38  ;;  %v6489_v55 = vpop.f32.mrb[205].mxu1 }
 0x56b   :  { %v8876_v21 = vadd.f32 %v6489_v55, %v15088_v32  ;;  %v6491_v43 = vpop.f32.mrb[206].mxu1 }
 0x56c   :  { %6784 = vst [vmem:[%s15784_s11 + $0x860] sm:$0xff] %v8875_v23  ;;  %v8877_v14 = vadd.f32 %v6491_v43, %v15081_v38  ;;  %v6493_v15 = vpop.f32.mrb[207].mxu1 }
 0x56d   :  { %6785 = vst [vmem:[%s15784_s11 + $0x868] sm:$0xff] %v8876_v21  ;;  %v8878_v20 = vadd.f32 %v6493_v15, %v15088_v32 }
 0x56e   :  { %6790 = vst [vmem:[%s15784_s11 + $0x890] sm:$0xff] %v8877_v14 }
 0x56f   :  { %6791 = vst [vmem:[%s15784_s11 + $0x898] sm:$0xff] %v8878_v20 }
 0x571   :  { %v6497_v19 = vpop.f32.mrb[208].mxu1 }
 0x572   :  { %v8879_v39 = vadd.f32 %v6497_v19, %v15081_v38  ;;  %v6499_v31 = vpop.f32.mrb[209].mxu1 }
 0x573   :  { %v8880_v12 = vadd.f32 %v6499_v31, %v15088_v32  ;;  %v6501_v47 = vpop.f32.mrb[210].mxu1 }
 0x574   :  { %6796 = vst [vmem:[%s15784_s11 + $0x8c0] sm:$0xff] %v8879_v39  ;;  %v8881_v36 = vadd.f32 %v6501_v47, %v15081_v38  ;;  %v6503_v1 = vpop.f32.mrb[211].mxu1 }
 0x575   :  { %6797 = vst [vmem:[%s15784_s11 + $0x8c8] sm:$0xff] %v8880_v12  ;;  %v8882_v56 = vadd.f32 %v6503_v1, %v15088_v32 }
 0x576   :  { %6802 = vst [vmem:[%s15784_s11 + $0x8f0] sm:$0xff] %v8881_v36 }
 0x577   :  { %6803 = vst [vmem:[%s15784_s11 + $0x8f8] sm:$0xff] %v8882_v56 }
 0x578   :  { %v8433_v7 = vpop.f32.mrb[240].mxu0 }
 0x579   :  { %v6507_v59 = vpop.f32.mrb[212].mxu1  ;;  %v8434_v18 = vpop.f32.mrb[241].mxu0 }
 0x57a   :  { %v8883_v53 = vadd.f32 %v6507_v59, %v15081_v38  ;;  %v6509_v22 = vpop.f32.mrb[213].mxu1  ;;  %v8435_v46 = vadd.f32 %v8434_v18, %v8433_v7  ;;  %v8436_v62 = vpop.f32.mrb[242].mxu0 }
 0x57b   :  { %v8884_v58 = vadd.f32 %v6509_v22, %v15088_v32  ;;  %v6511_v50 = vpop.f32.mrb[214].mxu1  ;;  %v8437_v54 = vpop.f32.mrb[243].mxu0 }
 0x57c   :  { %6808 = vst [vmem:[%s15784_s11 + $0x920] sm:$0xff] %v8883_v53  ;;  %v8885_v3 = vadd.f32 %v6511_v50, %v15081_v38  ;;  %v6513_v63 = vpop.f32.mrb[215].mxu1  ;;  %v7804_v57 = vadd.f32 %v8435_v46, %v7764_v42 }
 0x57d   :  { %6809 = vst [vmem:[%s15784_s11 + $0x928] sm:$0xff] %v8884_v58  ;;  %v8886_v27 = vadd.f32 %v6513_v63, %v15088_v32 }
 0x57e   :  { %6814 = vst [vmem:[%s15784_s11 + $0x950] sm:$0xff] %v8885_v3  ;;  %7809 = vst [vmem:[#allocation4] sm:$0xf] %v7804_v57 }
 0x57f   :  { %6815 = vst [vmem:[%s15784_s11 + $0x958] sm:$0xff] %v8886_v27 }
 0x580   :  { %10289 = shalt.err (!%p10286_p12)
}
 0x581   :  { %s10290_s4 = scalar_lea.hbm %s15785_s12, 64 }
 0x582   :  { %p10291_p13 = scmp.ne.s32.totalorder %s15785_s12, %s10290_s4  ;;  %p10294_p0 = scmp.lt.u32.totalorder %s10290_s4, %s15785_s12 }
 0x584   :  { %p10296_p1 = pnand %p10294_p0, %p10291_p13 }
 0x586   :  { %10299 = shalt.err (!%p10296_p1)
}
 0x587   :  { %7833 = dma.vmem_to_hbm [thread:$0]  %s7831_s26, 64, %s15785_s12, [#allocation5]  }
 0x588   :  { %10300 = dma.done.wait [#allocation3], 6144  }
 0x589   :  { %10301 = vsyncadd [#allocation3], 4294961152 }
 0x58a   :  { %10302 = dma.done.wait [#allocation5], 64  }
 0x58b   :  { %10303 = vsyncadd [#allocation5], 4294967232 }
 0x58c   :  { %7842 = vsyncpa [#allocation3], 1 }
 0x58d   :  { %7843 = vsyncpa [#allocation5], 1 }

</bundles_post_ra>
